<compile_context>
chip_gen: v7x
topology: tpu7x:2x2x1
jax: 0.10.0
libtpu: 0.0.40
codegen_flags: <defaults>
</compile_context>

<pallas_src>
import jax
import jax.numpy as jnp
import numpy as np
from jax.experimental import pallas as pl
from jax.experimental.pallas import tpu as pltpu


def _silu(v):
    # act = SiLU (typical choice for LDM ResNet blocks)
    return v * jax.nn.sigmoid(v)


def resnet_block_kernel(x_ref, shift2_ref,
                        bn1s_ref, bn1b_ref, w1_ref,
                        bn2s_ref, w2_ref, ws_ref, bfin_ref,
                        out_ref,
                        pad1, col1, pad2, col2):
    """One batch image per grid step.  Weights are pre-folded in the wrapper:
         w1_ref    : (9*Cin, Cout)  bf16  im2col layout of conv1 (no bias)
         w2_ref    : (9*Cout, Cout) bf16  im2col layout of conv2 (no bias)
         ws_ref    : (Cin, Cout)    bf16  channel-mixing shortcut (no bias)
         shift2_ref: (1, 1, Cout)   f32   per-image (b1 + Linear_temb(silu(temb)))*bn2s + bn2b
         bfin_ref  : (1, Cout)      f32   b2 + bs (combined final bias)
       Output block is lane-dense NCHW-flat: (1, Cout, H*W).
    """
    _, H, W, Cin = x_ref.shape
    Cout = out_ref.shape[1]
    HW = H * W
    Hp, Wp = H + 2, W + 2

    # Zero ONLY the 1-pixel halo of the padded scratches.  The interior is fully
    # overwritten below every grid step.  (Unconditional -- with a "parallel" batch
    # axis a core may never see program_id==0, so no pl.when(first) init.)
    def _zero_halo(pad, C):
        pad[:, 0:1, :, :] = jnp.zeros((1, 1, Wp, C), pad.dtype)
        pad[:, Hp - 1:Hp, :, :] = jnp.zeros((1, 1, Wp, C), pad.dtype)
        pad[:, :, 0:1, :] = jnp.zeros((1, Hp, 1, C), pad.dtype)
        pad[:, :, Wp - 1:Wp, :] = jnp.zeros((1, Hp, 1, C), pad.dtype)

    _zero_halo(pad1, Cin)
    _zero_halo(pad2, Cout)

    x = x_ref[...]                                               # (1, H, W, Cin) f32

    # ---- block1: folded BatchNorm (inference) -> SiLU -> bf16 padded buffer ----
    h1 = _silu(x * bn1s_ref[...] + bn1b_ref[...])
    pad1[:, 1:H + 1, 1:W + 1, :] = h1.astype(pad1.dtype)         # single bf16 store

    # ---- conv1 as a single im2col matmul (K = 9*Cin) on the MXU, bf16 in / f32 acc ----
    for tap in range(9):
        dy, dx = divmod(tap, 3)
        col1[:, tap * Cin:(tap + 1) * Cin] = (
            pad1[:, dy:dy + H, dx:dx + W, :].reshape(HW, Cin))
    acc1 = jnp.dot(col1[...], w1_ref[...],
                   preferred_element_type=jnp.float32)           # (HW, Cout) f32

    # ---- temb + conv1 bias + BN2 affine: fully folded in the wrapper into shift2 ----
    shift2 = shift2_ref[...].reshape(1, Cout)                    # (1, Cout) f32

    # ---- block2 pre-activation (Dropout(p=0) == identity), written straight into
    #      conv2's padded bf16 buffer -- no intermediate h materialization ----
    h2 = _silu(acc1 * bn2s_ref[...] + shift2)                    # (HW, Cout) f32
    pad2[:, 1:H + 1, 1:W + 1, :] = h2.reshape(1, H, W, Cout).astype(pad2.dtype)

    # ---- conv2 as a single im2col matmul (K = 9*Cout) ----
    for tap in range(9):
        dy, dx = divmod(tap, 3)
        col2[:, tap * Cout:(tap + 1) * Cout] = (
            pad2[:, dy:dy + H, dx:dx + W, :].reshape(HW, Cout))
    acc2 = jnp.dot(col2[...], w2_ref[...],
                   preferred_element_type=jnp.float32)           # (HW, Cout) f32

    # ---- shortcut (channel-mixing linear on the original x) + combined bias ----
    xs = jnp.dot(x.reshape(HW, Cin).astype(jnp.bfloat16), ws_ref[...],
                 preferred_element_type=jnp.float32)
    out = acc2 + xs + bfin_ref[...]                              # (HW, Cout)

    # Lane-dense store: (Cout, HW) with HW=H*W on the 128-lane axis (NCHW-flat).
    # TODO(synk): emit bf16 here if the downstream consumer accepts it (halves writeback).
    out_ref[...] = out.T.reshape(1, Cout, HW).astype(out_ref.dtype)


@jax.jit
def resnet_block(x, temb, bn1_scale, bn1_shift, w1, b1, wt, bt,
                 bn2_scale, bn2_shift, w2, b2, ws, bs):
    """x: (B, H, W, Cin) NHWC; temb: (B, T); w1: (9, Cin, Cout); w2: (9, Cout, Cout);
       bn*_scale/shift: inference-folded BatchNorm per-channel affine.
       Returns NCHW (B, Cout, H, W) (matches the torch caller's layout)."""
    B, H, W, Cin = x.shape
    Cout = w1.shape[-1]
    HW = H * W

    # ---- host-side constant folding (free at runtime for fixed weights) ----
    w1_f = w1.reshape(9 * Cin, Cout).astype(jnp.bfloat16)      # im2col weight layout
    w2_f = w2.reshape(9 * Cout, Cout).astype(jnp.bfloat16)
    ws_f = ws.astype(jnp.bfloat16)
    bfin = (b2 + bs).reshape(1, Cout)                          # conv2 bias + shortcut bias
    bn1s = bn1_scale.reshape(1, Cin)
    bn1b = bn1_shift.reshape(1, Cin)
    bn2s = bn2_scale.reshape(1, Cout)

    # ---- temb path hoisted out of the kernel (one tiny XLA matmul per batch):
    #      shift2 = (b1 + Linear_temb(silu(temb))) * bn2_scale + bn2_shift ----
    t_act = temb * jax.nn.sigmoid(temb)
    shift2 = ((t_act @ wt + bt + b1) * bn2_scale + bn2_shift).reshape(B, 1, Cout)

    out_flat = pl.pallas_call(
        resnet_block_kernel,
        out_shape=jax.ShapeDtypeStruct((B, Cout, HW), jnp.float32),
        grid=(B,),
        in_specs=[
            pl.BlockSpec((1, H, W, Cin), lambda b: (b, 0, 0, 0)),   # x, per image
            pl.BlockSpec((1, 1, Cout), lambda b: (b, 0, 0)),        # shift2, per image
            pl.BlockSpec((1, Cin), lambda b: (0, 0)),               # bn1 scale
            pl.BlockSpec((1, Cin), lambda b: (0, 0)),               # bn1 shift
            pl.BlockSpec((9 * Cin, Cout), lambda b: (0, 0)),        # w1 (im2col, bf16)
            pl.BlockSpec((1, Cout), lambda b: (0, 0)),              # bn2 scale
            pl.BlockSpec((9 * Cout, Cout), lambda b: (0, 0)),       # w2 (im2col, bf16)
            pl.BlockSpec((Cin, Cout), lambda b: (0, 0)),            # ws shortcut (bf16)
            pl.BlockSpec((1, Cout), lambda b: (0, 0)),              # combined final bias
        ],
        out_specs=pl.BlockSpec((1, Cout, HW), lambda b: (b, 0, 0)), # lane-dense NCHW-flat
        scratch_shapes=[
            pltpu.VMEM((1, H + 2, W + 2, Cin), jnp.bfloat16),   # padded act, block1 (bf16)
            pltpu.VMEM((H * W, 9 * Cin), jnp.bfloat16),         # im2col patches, conv1
            pltpu.VMEM((1, H + 2, W + 2, Cout), jnp.bfloat16),  # padded act, block2 (bf16)
            pltpu.VMEM((H * W, 9 * Cout), jnp.bfloat16),        # im2col patches, conv2
        ],
        compiler_params=pltpu.CompilerParams(
            dimension_semantics=("parallel",),                  # megacore sharding on v7x
            # 32 MiB is ample at these shapes; at production LDM shapes tile H and set
            # this per generation (up to ~96 MiB on v6e, < 64 MiB physical on v7x).
            vmem_limit_bytes=32 * 1024 * 1024),
    )(x, shift2, bn1s, bn1b, w1_f, bn2s, w2_f, ws_f, bfin)

    return out_flat.reshape(B, Cout, H, W)                      # free metadata reshape


if __name__ == "__main__":
    B, Cin, Cout, H, W, T = 2, 4, 8, 16, 16, 64   # time_features=64 per forward's default
    key = jax.random.PRNGKey(0)
    keys = jax.random.split(key, 18)

    x = jax.random.normal(keys[0], (B, H, W, Cin), jnp.float32)   # NHWC of NCHW (2,4,16,16)
    temb = jax.random.normal(keys[1], (B, T), jnp.float32)

    eps = 1e-5
    # BatchNorm2d(in_features) — inference mode, folded to per-channel scale/shift.
    g1 = jax.random.uniform(keys[2], (Cin,), jnp.float32, 0.8, 1.2)
    be1 = 0.1 * jax.random.normal(keys[3], (Cin,), jnp.float32)
    rm1 = 0.1 * jax.random.normal(keys[4], (Cin,), jnp.float32)
    rv1 = jax.random.uniform(keys[5], (Cin,), jnp.float32, 0.5, 1.5)
    bn1s = g1 / jnp.sqrt(rv1 + eps)
    bn1b = be1 - rm1 * bn1s

    g2 = jax.random.uniform(keys[6], (Cout,), jnp.float32, 0.8, 1.2)
    be2 = 0.1 * jax.random.normal(keys[7], (Cout,), jnp.float32)
    rm2 = 0.1 * jax.random.normal(keys[8], (Cout,), jnp.float32)
    rv2 = jax.random.uniform(keys[9], (Cout,), jnp.float32, 0.5, 1.5)
    bn2s = g2 / jnp.sqrt(rv2 + eps)
    bn2b = be2 - rm2 * bn2s

    # Conv2d weights, stored (ky*3+kx, Cin, Cout)
    w1 = 0.1 * jax.random.normal(keys[10], (9, Cin, Cout), jnp.float32)
    b1 = 0.1 * jax.random.normal(keys[11], (Cout,), jnp.float32)
    w2 = 0.1 * jax.random.normal(keys[12], (9, Cout, Cout), jnp.float32)
    b2 = 0.1 * jax.random.normal(keys[13], (Cout,), jnp.float32)
    # linear_temb: Linear(time_features, out_features)
    wt = 0.1 * jax.random.normal(keys[14], (T, Cout), jnp.float32)
    bt = 0.1 * jax.random.normal(keys[15], (Cout,), jnp.float32)
    # shortcut Custumnn.Linear(in_features, out_features) — channel mixing
    ws = 0.1 * jax.random.normal(keys[16], (Cin, Cout), jnp.float32)
    bs = 0.1 * jax.random.normal(keys[17], (Cout,), jnp.float32)

    out = resnet_block(x, temb, bn1s, bn1b, w1, b1, wt, bt,
                       bn2s, bn2b, w2, b2, ws, bs)
    out = jax.block_until_ready(out)

    # ---- pure-JAX f32 reference (same semantics), compared in NCHW ----
    def conv3x3(v, w, b):
        w_hwio = w.reshape(3, 3, w.shape[1], w.shape[2])
        y = jax.lax.conv_general_dilated(
            v, w_hwio, window_strides=(1, 1), padding="SAME",
            dimension_numbers=("NHWC", "HWIO", "NHWC"))
        return y + b.reshape(1, 1, 1, -1)

    def silu(v):
        return v * jax.nn.sigmoid(v)

    h = silu(x * bn1s.reshape(1, 1, 1, -1) + bn1b.reshape(1, 1, 1, -1))
    h = conv3x3(h, w1, b1)
    t_ref = silu(temb) @ wt + bt
    h = h + t_ref[:, None, None, :]
    h = silu(h * bn2s.reshape(1, 1, 1, -1) + bn2b.reshape(1, 1, 1, -1))
    h = conv3x3(h, w2, b2)
    ref_nhwc = (x @ ws + bs) + h
    ref = jnp.transpose(ref_nhwc, (0, 3, 1, 2))                 # NCHW (B, Cout, H, W)

    assert out.shape == (B, Cout, H, W)
    np.testing.assert_allclose(np.asarray(out), np.asarray(ref), atol=5e-2, rtol=5e-2)
    print("KERNEL_OK")
</pallas_src>

<mosaic_0001>
module attributes {stable_mosaic.version = 11 : i64} {
  func.func @resnet_block_kernel(%arg0: i32, %arg1: memref<1x16x16x4xf32, #tpu.memory_space<vmem>>, %arg2: memref<1x1x8xf32, #tpu.memory_space<vmem>>, %arg3: memref<1x4xf32, #tpu.memory_space<vmem>>, %arg4: memref<1x4xf32, #tpu.memory_space<vmem>>, %arg5: memref<36x8xbf16, #tpu.memory_space<vmem>>, %arg6: memref<1x8xf32, #tpu.memory_space<vmem>>, %arg7: memref<72x8xbf16, #tpu.memory_space<vmem>>, %arg8: memref<4x8xbf16, #tpu.memory_space<vmem>>, %arg9: memref<1x8xf32, #tpu.memory_space<vmem>>, %arg10: memref<1x8x256xf32, #tpu.memory_space<vmem>>, %arg11: memref<1x18x18x4xbf16, #tpu.memory_space<vmem>>, %arg12: memref<256x36xbf16, #tpu.memory_space<vmem>>, %arg13: memref<1x18x18x8xbf16, #tpu.memory_space<vmem>>, %arg14: memref<256x72xbf16, #tpu.memory_space<vmem>>) attributes {dimension_semantics = [#tpu.dimension_semantics<parallel>], iteration_bounds = array<i64: 2>, scalar_prefetch = 0 : i64, scratch_operands = 4 : i64, tpu.core_type = #tpu.core_type<tc>, window_params = [{transform_indices = @transform_0, window_bounds = array<i64: 1, 16, 16, 4>}, {transform_indices = @transform_1, window_bounds = array<i64: 1, 1, 8>}, {pipeline_mode = #tpu.pipeline_mode<synchronous>, transform_indices = @transform_2, window_bounds = array<i64: 1, 4>}, {pipeline_mode = #tpu.pipeline_mode<synchronous>, transform_indices = @transform_3, window_bounds = array<i64: 1, 4>}, {pipeline_mode = #tpu.pipeline_mode<synchronous>, transform_indices = @transform_4, window_bounds = array<i64: 36, 8>}, {pipeline_mode = #tpu.pipeline_mode<synchronous>, transform_indices = @transform_5, window_bounds = array<i64: 1, 8>}, {pipeline_mode = #tpu.pipeline_mode<synchronous>, transform_indices = @transform_6, window_bounds = array<i64: 72, 8>}, {pipeline_mode = #tpu.pipeline_mode<synchronous>, transform_indices = @transform_7, window_bounds = array<i64: 4, 8>}, {pipeline_mode = #tpu.pipeline_mode<synchronous>, transform_indices = @transform_8, window_bounds = array<i64: 1, 8>}, {transform_indices = @transform_9, window_bounds = array<i64: 1, 8, 256>}]} {
    %cst = arith.constant 0.000000e+00 : bf16
    %0 = vector.broadcast %cst : bf16 to vector<1x1x18x4xbf16>
    %c0 = arith.constant 0 : index
    %c0_0 = arith.constant 0 : index
    %c0_1 = arith.constant 0 : index
    %c0_2 = arith.constant 0 : index
    %1 = vector.load %arg11[%c0, %c0_0, %c0_1, %c0_2] : memref<1x18x18x4xbf16, #tpu.memory_space<vmem>>, vector<1x1x18x4xbf16>
    tpu.vector_store %arg11[%c0, %c0_0, %c0_1, %c0_2], %0 {strides = array<i32>} : memref<1x18x18x4xbf16, #tpu.memory_space<vmem>>, vector<1x1x18x4xbf16>,
    %cst_3 = arith.constant 0.000000e+00 : bf16
    %2 = vector.broadcast %cst_3 : bf16 to vector<1x1x18x4xbf16>
    %c0_4 = arith.constant 0 : index
    %c17 = arith.constant 17 : index
    %c0_5 = arith.constant 0 : index
    %c0_6 = arith.constant 0 : index
    %3 = vector.load %arg11[%c0_4, %c17, %c0_5, %c0_6] : memref<1x18x18x4xbf16, #tpu.memory_space<vmem>>, vector<1x1x18x4xbf16>
    tpu.vector_store %arg11[%c0_4, %c17, %c0_5, %c0_6], %2 {strides = array<i32>} : memref<1x18x18x4xbf16, #tpu.memory_space<vmem>>, vector<1x1x18x4xbf16>,
    %cst_7 = arith.constant 0.000000e+00 : bf16
    %4 = vector.broadcast %cst_7 : bf16 to vector<1x18x1x4xbf16>
    %c0_8 = arith.constant 0 : index
    %c0_9 = arith.constant 0 : index
    %c0_10 = arith.constant 0 : index
    %c0_11 = arith.constant 0 : index
    %5 = vector.load %arg11[%c0_8, %c0_9, %c0_10, %c0_11] : memref<1x18x18x4xbf16, #tpu.memory_space<vmem>>, vector<1x18x1x4xbf16>
    tpu.vector_store %arg11[%c0_8, %c0_9, %c0_10, %c0_11], %4 {strides = array<i32>} : memref<1x18x18x4xbf16, #tpu.memory_space<vmem>>, vector<1x18x1x4xbf16>,
    %cst_12 = arith.constant 0.000000e+00 : bf16
    %6 = vector.broadcast %cst_12 : bf16 to vector<1x18x1x4xbf16>
    %c0_13 = arith.constant 0 : index
    %c0_14 = arith.constant 0 : index
    %c17_15 = arith.constant 17 : index
    %c0_16 = arith.constant 0 : index
    %7 = vector.load %arg11[%c0_13, %c0_14, %c17_15, %c0_16] : memref<1x18x18x4xbf16, #tpu.memory_space<vmem>>, vector<1x18x1x4xbf16>
    tpu.vector_store %arg11[%c0_13, %c0_14, %c17_15, %c0_16], %6 {strides = array<i32>} : memref<1x18x18x4xbf16, #tpu.memory_space<vmem>>, vector<1x18x1x4xbf16>,
    %cst_17 = arith.constant 0.000000e+00 : bf16
    %8 = vector.broadcast %cst_17 : bf16 to vector<1x1x18x8xbf16>
    %c0_18 = arith.constant 0 : index
    %c0_19 = arith.constant 0 : index
    %c0_20 = arith.constant 0 : index
    %c0_21 = arith.constant 0 : index
    %9 = vector.load %arg13[%c0_18, %c0_19, %c0_20, %c0_21] : memref<1x18x18x8xbf16, #tpu.memory_space<vmem>>, vector<1x1x18x8xbf16>
    tpu.vector_store %arg13[%c0_18, %c0_19, %c0_20, %c0_21], %8 {strides = array<i32>} : memref<1x18x18x8xbf16, #tpu.memory_space<vmem>>, vector<1x1x18x8xbf16>,
    %cst_22 = arith.constant 0.000000e+00 : bf16
    %10 = vector.broadcast %cst_22 : bf16 to vector<1x1x18x8xbf16>
    %c0_23 = arith.constant 0 : index
    %c17_24 = arith.constant 17 : index
    %c0_25 = arith.constant 0 : index
    %c0_26 = arith.constant 0 : index
    %11 = vector.load %arg13[%c0_23, %c17_24, %c0_25, %c0_26] : memref<1x18x18x8xbf16, #tpu.memory_space<vmem>>, vector<1x1x18x8xbf16>
    tpu.vector_store %arg13[%c0_23, %c17_24, %c0_25, %c0_26], %10 {strides = array<i32>} : memref<1x18x18x8xbf16, #tpu.memory_space<vmem>>, vector<1x1x18x8xbf16>,
    %cst_27 = arith.constant 0.000000e+00 : bf16
    %12 = vector.broadcast %cst_27 : bf16 to vector<1x18x1x8xbf16>
    %c0_28 = arith.constant 0 : index
    %c0_29 = arith.constant 0 : index
    %c0_30 = arith.constant 0 : index
    %c0_31 = arith.constant 0 : index
    %13 = vector.load %arg13[%c0_28, %c0_29, %c0_30, %c0_31] : memref<1x18x18x8xbf16, #tpu.memory_space<vmem>>, vector<1x18x1x8xbf16>
    tpu.vector_store %arg13[%c0_28, %c0_29, %c0_30, %c0_31], %12 {strides = array<i32>} : memref<1x18x18x8xbf16, #tpu.memory_space<vmem>>, vector<1x18x1x8xbf16>,
    %cst_32 = arith.constant 0.000000e+00 : bf16
    %14 = vector.broadcast %cst_32 : bf16 to vector<1x18x1x8xbf16>
    %c0_33 = arith.constant 0 : index
    %c0_34 = arith.constant 0 : index
    %c17_35 = arith.constant 17 : index
    %c0_36 = arith.constant 0 : index
    %15 = vector.load %arg13[%c0_33, %c0_34, %c17_35, %c0_36] : memref<1x18x18x8xbf16, #tpu.memory_space<vmem>>, vector<1x18x1x8xbf16>
    tpu.vector_store %arg13[%c0_33, %c0_34, %c17_35, %c0_36], %14 {strides = array<i32>} : memref<1x18x18x8xbf16, #tpu.memory_space<vmem>>, vector<1x18x1x8xbf16>,
    %c0_37 = arith.constant 0 : index
    %c0_38 = arith.constant 0 : index
    %c0_39 = arith.constant 0 : index
    %c0_40 = arith.constant 0 : index
    %16 = vector.load %arg1[%c0_37, %c0_38, %c0_39, %c0_40] : memref<1x16x16x4xf32, #tpu.memory_space<vmem>>, vector<1x16x16x4xf32>
    %c0_41 = arith.constant 0 : index
    %c0_42 = arith.constant 0 : index
    %17 = vector.load %arg3[%c0_41, %c0_42] : memref<1x4xf32, #tpu.memory_space<vmem>>, vector<1x4xf32>
    %18 = vector.shape_cast %17 : vector<1x4xf32> to vector<1x1x1x4xf32>
    %19 = vector.broadcast %18 : vector<1x1x1x4xf32> to vector<1x16x16x4xf32>
    %20 = arith.mulf %16, %19 : vector<1x16x16x4xf32>
    %c0_43 = arith.constant 0 : index
    %c0_44 = arith.constant 0 : index
    %21 = vector.load %arg4[%c0_43, %c0_44] : memref<1x4xf32, #tpu.memory_space<vmem>>, vector<1x4xf32>
    %22 = vector.shape_cast %21 : vector<1x4xf32> to vector<1x1x1x4xf32>
    %23 = vector.broadcast %22 : vector<1x1x1x4xf32> to vector<1x16x16x4xf32>
    %24 = arith.addf %20, %23 : vector<1x16x16x4xf32>
    %25 = arith.negf %24 : vector<1x16x16x4xf32>
    %26 = math.exp %25 : vector<1x16x16x4xf32>
    %cst_45 = arith.constant 1.000000e+00 : f32
    %27 = vector.broadcast %cst_45 : f32 to vector<1x16x16x4xf32>
    %28 = arith.addf %27, %26 : vector<1x16x16x4xf32>
    %29 = arith.divf %27, %28 : vector<1x16x16x4xf32>
    %30 = arith.mulf %24, %29 : vector<1x16x16x4xf32>
    %31 = arith.truncf %30 : vector<1x16x16x4xf32> to vector<1x16x16x4xbf16>
    %c0_46 = arith.constant 0 : index
    %c1 = arith.constant 1 : index
    %c1_47 = arith.constant 1 : index
    %c0_48 = arith.constant 0 : index
    %32 = vector.load %arg11[%c0_46, %c1, %c1_47, %c0_48] : memref<1x18x18x4xbf16, #tpu.memory_space<vmem>>, vector<1x16x16x4xbf16>
    tpu.vector_store %arg11[%c0_46, %c1, %c1_47, %c0_48], %31 {strides = array<i32>} : memref<1x18x18x4xbf16, #tpu.memory_space<vmem>>, vector<1x16x16x4xbf16>,
    %c0_49 = arith.constant 0 : index
    %c0_50 = arith.constant 0 : index
    %c0_51 = arith.constant 0 : index
    %c0_52 = arith.constant 0 : index
    %33 = vector.load %arg11[%c0_49, %c0_50, %c0_51, %c0_52] : memref<1x18x18x4xbf16, #tpu.memory_space<vmem>>, vector<1x16x16x4xbf16>
    %34 = vector.shape_cast %33 : vector<1x16x16x4xbf16> to vector<256x4xbf16>
    %c0_53 = arith.constant 0 : index
    %c0_54 = arith.constant 0 : index
    %35 = vector.load %arg12[%c0_53, %c0_54] : memref<256x36xbf16, #tpu.memory_space<vmem>>, vector<256x4xbf16>
    tpu.vector_store %arg12[%c0_53, %c0_54], %34 {strides = array<i32>} : memref<256x36xbf16, #tpu.memory_space<vmem>>, vector<256x4xbf16>,
    %c0_55 = arith.constant 0 : index
    %c0_56 = arith.constant 0 : index
    %c1_57 = arith.constant 1 : index
    %c0_58 = arith.constant 0 : index
    %36 = vector.load %arg11[%c0_55, %c0_56, %c1_57, %c0_58] : memref<1x18x18x4xbf16, #tpu.memory_space<vmem>>, vector<1x16x16x4xbf16>
    %37 = vector.shape_cast %36 : vector<1x16x16x4xbf16> to vector<256x4xbf16>
    %c0_59 = arith.constant 0 : index
    %c4 = arith.constant 4 : index
    %38 = vector.load %arg12[%c0_59, %c4] : memref<256x36xbf16, #tpu.memory_space<vmem>>, vector<256x4xbf16>
    tpu.vector_store %arg12[%c0_59, %c4], %37 {strides = array<i32>} : memref<256x36xbf16, #tpu.memory_space<vmem>>, vector<256x4xbf16>,
    %c0_60 = arith.constant 0 : index
    %c0_61 = arith.constant 0 : index
    %c2 = arith.constant 2 : index
    %c0_62 = arith.constant 0 : index
    %39 = vector.load %arg11[%c0_60, %c0_61, %c2, %c0_62] : memref<1x18x18x4xbf16, #tpu.memory_space<vmem>>, vector<1x16x16x4xbf16>
    %40 = vector.shape_cast %39 : vector<1x16x16x4xbf16> to vector<256x4xbf16>
    %c0_63 = arith.constant 0 : index
    %c8 = arith.constant 8 : index
    %41 = vector.load %arg12[%c0_63, %c8] : memref<256x36xbf16, #tpu.memory_space<vmem>>, vector<256x4xbf16>
    tpu.vector_store %arg12[%c0_63, %c8], %40 {strides = array<i32>} : memref<256x36xbf16, #tpu.memory_space<vmem>>, vector<256x4xbf16>,
    %c0_64 = arith.constant 0 : index
    %c1_65 = arith.constant 1 : index
    %c0_66 = arith.constant 0 : index
    %c0_67 = arith.constant 0 : index
    %42 = vector.load %arg11[%c0_64, %c1_65, %c0_66, %c0_67] : memref<1x18x18x4xbf16, #tpu.memory_space<vmem>>, vector<1x16x16x4xbf16>
    %43 = vector.shape_cast %42 : vector<1x16x16x4xbf16> to vector<256x4xbf16>
    %c0_68 = arith.constant 0 : index
    %c12 = arith.constant 12 : index
    %44 = vector.load %arg12[%c0_68, %c12] : memref<256x36xbf16, #tpu.memory_space<vmem>>, vector<256x4xbf16>
    tpu.vector_store %arg12[%c0_68, %c12], %43 {strides = array<i32>} : memref<256x36xbf16, #tpu.memory_space<vmem>>, vector<256x4xbf16>,
    %c0_69 = arith.constant 0 : index
    %c1_70 = arith.constant 1 : index
    %c1_71 = arith.constant 1 : index
    %c0_72 = arith.constant 0 : index
    %45 = vector.load %arg11[%c0_69, %c1_70, %c1_71, %c0_72] : memref<1x18x18x4xbf16, #tpu.memory_space<vmem>>, vector<1x16x16x4xbf16>
    %46 = vector.shape_cast %45 : vector<1x16x16x4xbf16> to vector<256x4xbf16>
    %c0_73 = arith.constant 0 : index
    %c16 = arith.constant 16 : index
    %47 = vector.load %arg12[%c0_73, %c16] : memref<256x36xbf16, #tpu.memory_space<vmem>>, vector<256x4xbf16>
    tpu.vector_store %arg12[%c0_73, %c16], %46 {strides = array<i32>} : memref<256x36xbf16, #tpu.memory_space<vmem>>, vector<256x4xbf16>,
    %c0_74 = arith.constant 0 : index
    %c1_75 = arith.constant 1 : index
    %c2_76 = arith.constant 2 : index
    %c0_77 = arith.constant 0 : index
    %48 = vector.load %arg11[%c0_74, %c1_75, %c2_76, %c0_77] : memref<1x18x18x4xbf16, #tpu.memory_space<vmem>>, vector<1x16x16x4xbf16>
    %49 = vector.shape_cast %48 : vector<1x16x16x4xbf16> to vector<256x4xbf16>
    %c0_78 = arith.constant 0 : index
    %c20 = arith.constant 20 : index
    %50 = vector.load %arg12[%c0_78, %c20] : memref<256x36xbf16, #tpu.memory_space<vmem>>, vector<256x4xbf16>
    tpu.vector_store %arg12[%c0_78, %c20], %49 {strides = array<i32>} : memref<256x36xbf16, #tpu.memory_space<vmem>>, vector<256x4xbf16>,
    %c0_79 = arith.constant 0 : index
    %c2_80 = arith.constant 2 : index
    %c0_81 = arith.constant 0 : index
    %c0_82 = arith.constant 0 : index
    %51 = vector.load %arg11[%c0_79, %c2_80, %c0_81, %c0_82] : memref<1x18x18x4xbf16, #tpu.memory_space<vmem>>, vector<1x16x16x4xbf16>
    %52 = vector.shape_cast %51 : vector<1x16x16x4xbf16> to vector<256x4xbf16>
    %c0_83 = arith.constant 0 : index
    %c24 = arith.constant 24 : index
    %53 = vector.load %arg12[%c0_83, %c24] : memref<256x36xbf16, #tpu.memory_space<vmem>>, vector<256x4xbf16>
    tpu.vector_store %arg12[%c0_83, %c24], %52 {strides = array<i32>} : memref<256x36xbf16, #tpu.memory_space<vmem>>, vector<256x4xbf16>,
    %c0_84 = arith.constant 0 : index
    %c2_85 = arith.constant 2 : index
    %c1_86 = arith.constant 1 : index
    %c0_87 = arith.constant 0 : index
    %54 = vector.load %arg11[%c0_84, %c2_85, %c1_86, %c0_87] : memref<1x18x18x4xbf16, #tpu.memory_space<vmem>>, vector<1x16x16x4xbf16>
    %55 = vector.shape_cast %54 : vector<1x16x16x4xbf16> to vector<256x4xbf16>
    %c0_88 = arith.constant 0 : index
    %c28 = arith.constant 28 : index
    %56 = vector.load %arg12[%c0_88, %c28] : memref<256x36xbf16, #tpu.memory_space<vmem>>, vector<256x4xbf16>
    tpu.vector_store %arg12[%c0_88, %c28], %55 {strides = array<i32>} : memref<256x36xbf16, #tpu.memory_space<vmem>>, vector<256x4xbf16>,
    %c0_89 = arith.constant 0 : index
    %c2_90 = arith.constant 2 : index
    %c2_91 = arith.constant 2 : index
    %c0_92 = arith.constant 0 : index
    %57 = vector.load %arg11[%c0_89, %c2_90, %c2_91, %c0_92] : memref<1x18x18x4xbf16, #tpu.memory_space<vmem>>, vector<1x16x16x4xbf16>
    %58 = vector.shape_cast %57 : vector<1x16x16x4xbf16> to vector<256x4xbf16>
    %c0_93 = arith.constant 0 : index
    %c32 = arith.constant 32 : index
    %59 = vector.load %arg12[%c0_93, %c32] : memref<256x36xbf16, #tpu.memory_space<vmem>>, vector<256x4xbf16>
    tpu.vector_store %arg12[%c0_93, %c32], %58 {strides = array<i32>} : memref<256x36xbf16, #tpu.memory_space<vmem>>, vector<256x4xbf16>,
    %c0_94 = arith.constant 0 : index
    %c0_95 = arith.constant 0 : index
    %60 = vector.load %arg12[%c0_94, %c0_95] : memref<256x36xbf16, #tpu.memory_space<vmem>>, vector<256x36xbf16>
    %c0_96 = arith.constant 0 : index
    %c0_97 = arith.constant 0 : index
    %61 = vector.load %arg5[%c0_96, %c0_97] : memref<36x8xbf16, #tpu.memory_space<vmem>>, vector<36x8xbf16>
    %cst_98 = arith.constant dense<0.000000e+00> : vector<256x8xf32>
    %62 = tpu.matmul %60, %61, %cst_98 {dimension_numbers = #tpu.dot_dimension_numbers<[1], [0], [0], [1], [0, 0, 1, 1], [], []>} : vector<256x36xbf16>, vector<36x8xbf16>, vector<256x8xf32> -> vector<256x8xf32>
    %c0_99 = arith.constant 0 : index
    %c0_100 = arith.constant 0 : index
    %c0_101 = arith.constant 0 : index
    %63 = vector.load %arg2[%c0_99, %c0_100, %c0_101] : memref<1x1x8xf32, #tpu.memory_space<vmem>>, vector<1x1x8xf32>
    %64 = vector.shape_cast %63 : vector<1x1x8xf32> to vector<1x8xf32>
    %c0_102 = arith.constant 0 : index
    %c0_103 = arith.constant 0 : index
    %65 = vector.load %arg6[%c0_102, %c0_103] : memref<1x8xf32, #tpu.memory_space<vmem>>, vector<1x8xf32>
    %66 = vector.broadcast %65 : vector<1x8xf32> to vector<256x8xf32>
    %67 = arith.mulf %62, %66 : vector<256x8xf32>
    %68 = vector.broadcast %64 : vector<1x8xf32> to vector<256x8xf32>
    %69 = arith.addf %67, %68 : vector<256x8xf32>
    %70 = arith.negf %69 : vector<256x8xf32>
    %71 = math.exp %70 : vector<256x8xf32>
    %cst_104 = arith.constant 1.000000e+00 : f32
    %72 = vector.broadcast %cst_104 : f32 to vector<256x8xf32>
    %73 = arith.addf %72, %71 : vector<256x8xf32>
    %74 = arith.divf %72, %73 : vector<256x8xf32>
    %75 = arith.mulf %69, %74 : vector<256x8xf32>
    %76 = vector.shape_cast %75 : vector<256x8xf32> to vector<1x16x16x8xf32>
    %77 = arith.truncf %76 : vector<1x16x16x8xf32> to vector<1x16x16x8xbf16>
    %c0_105 = arith.constant 0 : index
    %c1_106 = arith.constant 1 : index
    %c1_107 = arith.constant 1 : index
    %c0_108 = arith.constant 0 : index
    %78 = vector.load %arg13[%c0_105, %c1_106, %c1_107, %c0_108] : memref<1x18x18x8xbf16, #tpu.memory_space<vmem>>, vector<1x16x16x8xbf16>
    tpu.vector_store %arg13[%c0_105, %c1_106, %c1_107, %c0_108], %77 {strides = array<i32>} : memref<1x18x18x8xbf16, #tpu.memory_space<vmem>>, vector<1x16x16x8xbf16>,
    %c0_109 = arith.constant 0 : index
    %c0_110 = arith.constant 0 : index
    %c0_111 = arith.constant 0 : index
    %c0_112 = arith.constant 0 : index
    %79 = vector.load %arg13[%c0_109, %c0_110, %c0_111, %c0_112] : memref<1x18x18x8xbf16, #tpu.memory_space<vmem>>, vector<1x16x16x8xbf16>
    %80 = vector.shape_cast %79 : vector<1x16x16x8xbf16> to vector<256x8xbf16>
    %c0_113 = arith.constant 0 : index
    %c0_114 = arith.constant 0 : index
    %81 = vector.load %arg14[%c0_113, %c0_114] : memref<256x72xbf16, #tpu.memory_space<vmem>>, vector<256x8xbf16>
    tpu.vector_store %arg14[%c0_113, %c0_114], %80 {strides = array<i32>} : memref<256x72xbf16, #tpu.memory_space<vmem>>, vector<256x8xbf16>,
    %c0_115 = arith.constant 0 : index
    %c0_116 = arith.constant 0 : index
    %c1_117 = arith.constant 1 : index
    %c0_118 = arith.constant 0 : index
    %82 = vector.load %arg13[%c0_115, %c0_116, %c1_117, %c0_118] : memref<1x18x18x8xbf16, #tpu.memory_space<vmem>>, vector<1x16x16x8xbf16>
    %83 = vector.shape_cast %82 : vector<1x16x16x8xbf16> to vector<256x8xbf16>
    %c0_119 = arith.constant 0 : index
    %c8_120 = arith.constant 8 : index
    %84 = vector.load %arg14[%c0_119, %c8_120] : memref<256x72xbf16, #tpu.memory_space<vmem>>, vector<256x8xbf16>
    tpu.vector_store %arg14[%c0_119, %c8_120], %83 {strides = array<i32>} : memref<256x72xbf16, #tpu.memory_space<vmem>>, vector<256x8xbf16>,
    %c0_121 = arith.constant 0 : index
    %c0_122 = arith.constant 0 : index
    %c2_123 = arith.constant 2 : index
    %c0_124 = arith.constant 0 : index
    %85 = vector.load %arg13[%c0_121, %c0_122, %c2_123, %c0_124] : memref<1x18x18x8xbf16, #tpu.memory_space<vmem>>, vector<1x16x16x8xbf16>
    %86 = vector.shape_cast %85 : vector<1x16x16x8xbf16> to vector<256x8xbf16>
    %c0_125 = arith.constant 0 : index
    %c16_126 = arith.constant 16 : index
    %87 = vector.load %arg14[%c0_125, %c16_126] : memref<256x72xbf16, #tpu.memory_space<vmem>>, vector<256x8xbf16>
    tpu.vector_store %arg14[%c0_125, %c16_126], %86 {strides = array<i32>} : memref<256x72xbf16, #tpu.memory_space<vmem>>, vector<256x8xbf16>,
    %c0_127 = arith.constant 0 : index
    %c1_128 = arith.constant 1 : index
    %c0_129 = arith.constant 0 : index
    %c0_130 = arith.constant 0 : index
    %88 = vector.load %arg13[%c0_127, %c1_128, %c0_129, %c0_130] : memref<1x18x18x8xbf16, #tpu.memory_space<vmem>>, vector<1x16x16x8xbf16>
    %89 = vector.shape_cast %88 : vector<1x16x16x8xbf16> to vector<256x8xbf16>
    %c0_131 = arith.constant 0 : index
    %c24_132 = arith.constant 24 : index
    %90 = vector.load %arg14[%c0_131, %c24_132] : memref<256x72xbf16, #tpu.memory_space<vmem>>, vector<256x8xbf16>
    tpu.vector_store %arg14[%c0_131, %c24_132], %89 {strides = array<i32>} : memref<256x72xbf16, #tpu.memory_space<vmem>>, vector<256x8xbf16>,
    %c0_133 = arith.constant 0 : index
    %c1_134 = arith.constant 1 : index
    %c1_135 = arith.constant 1 : index
    %c0_136 = arith.constant 0 : index
    %91 = vector.load %arg13[%c0_133, %c1_134, %c1_135, %c0_136] : memref<1x18x18x8xbf16, #tpu.memory_space<vmem>>, vector<1x16x16x8xbf16>
    %92 = vector.shape_cast %91 : vector<1x16x16x8xbf16> to vector<256x8xbf16>
    %c0_137 = arith.constant 0 : index
    %c32_138 = arith.constant 32 : index
    %93 = vector.load %arg14[%c0_137, %c32_138] : memref<256x72xbf16, #tpu.memory_space<vmem>>, vector<256x8xbf16>
    tpu.vector_store %arg14[%c0_137, %c32_138], %92 {strides = array<i32>} : memref<256x72xbf16, #tpu.memory_space<vmem>>, vector<256x8xbf16>,
    %c0_139 = arith.constant 0 : index
    %c1_140 = arith.constant 1 : index
    %c2_141 = arith.constant 2 : index
    %c0_142 = arith.constant 0 : index
    %94 = vector.load %arg13[%c0_139, %c1_140, %c2_141, %c0_142] : memref<1x18x18x8xbf16, #tpu.memory_space<vmem>>, vector<1x16x16x8xbf16>
    %95 = vector.shape_cast %94 : vector<1x16x16x8xbf16> to vector<256x8xbf16>
    %c0_143 = arith.constant 0 : index
    %c40 = arith.constant 40 : index
    %96 = vector.load %arg14[%c0_143, %c40] : memref<256x72xbf16, #tpu.memory_space<vmem>>, vector<256x8xbf16>
    tpu.vector_store %arg14[%c0_143, %c40], %95 {strides = array<i32>} : memref<256x72xbf16, #tpu.memory_space<vmem>>, vector<256x8xbf16>,
    %c0_144 = arith.constant 0 : index
    %c2_145 = arith.constant 2 : index
    %c0_146 = arith.constant 0 : index
    %c0_147 = arith.constant 0 : index
    %97 = vector.load %arg13[%c0_144, %c2_145, %c0_146, %c0_147] : memref<1x18x18x8xbf16, #tpu.memory_space<vmem>>, vector<1x16x16x8xbf16>
    %98 = vector.shape_cast %97 : vector<1x16x16x8xbf16> to vector<256x8xbf16>
    %c0_148 = arith.constant 0 : index
    %c48 = arith.constant 48 : index
    %99 = vector.load %arg14[%c0_148, %c48] : memref<256x72xbf16, #tpu.memory_space<vmem>>, vector<256x8xbf16>
    tpu.vector_store %arg14[%c0_148, %c48], %98 {strides = array<i32>} : memref<256x72xbf16, #tpu.memory_space<vmem>>, vector<256x8xbf16>,
    %c0_149 = arith.constant 0 : index
    %c2_150 = arith.constant 2 : index
    %c1_151 = arith.constant 1 : index
    %c0_152 = arith.constant 0 : index
    %100 = vector.load %arg13[%c0_149, %c2_150, %c1_151, %c0_152] : memref<1x18x18x8xbf16, #tpu.memory_space<vmem>>, vector<1x16x16x8xbf16>
    %101 = vector.shape_cast %100 : vector<1x16x16x8xbf16> to vector<256x8xbf16>
    %c0_153 = arith.constant 0 : index
    %c56 = arith.constant 56 : index
    %102 = vector.load %arg14[%c0_153, %c56] : memref<256x72xbf16, #tpu.memory_space<vmem>>, vector<256x8xbf16>
    tpu.vector_store %arg14[%c0_153, %c56], %101 {strides = array<i32>} : memref<256x72xbf16, #tpu.memory_space<vmem>>, vector<256x8xbf16>,
    %c0_154 = arith.constant 0 : index
    %c2_155 = arith.constant 2 : index
    %c2_156 = arith.constant 2 : index
    %c0_157 = arith.constant 0 : index
    %103 = vector.load %arg13[%c0_154, %c2_155, %c2_156, %c0_157] : memref<1x18x18x8xbf16, #tpu.memory_space<vmem>>, vector<1x16x16x8xbf16>
    %104 = vector.shape_cast %103 : vector<1x16x16x8xbf16> to vector<256x8xbf16>
    %c0_158 = arith.constant 0 : index
    %c64 = arith.constant 64 : index
    %105 = vector.load %arg14[%c0_158, %c64] : memref<256x72xbf16, #tpu.memory_space<vmem>>, vector<256x8xbf16>
    tpu.vector_store %arg14[%c0_158, %c64], %104 {strides = array<i32>} : memref<256x72xbf16, #tpu.memory_space<vmem>>, vector<256x8xbf16>,
    %c0_159 = arith.constant 0 : index
    %c0_160 = arith.constant 0 : index
    %106 = vector.load %arg14[%c0_159, %c0_160] : memref<256x72xbf16, #tpu.memory_space<vmem>>, vector<256x72xbf16>
    %c0_161 = arith.constant 0 : index
    %c0_162 = arith.constant 0 : index
    %107 = vector.load %arg7[%c0_161, %c0_162] : memref<72x8xbf16, #tpu.memory_space<vmem>>, vector<72x8xbf16>
    %cst_163 = arith.constant dense<0.000000e+00> : vector<256x8xf32>
    %108 = tpu.matmul %106, %107, %cst_163 {dimension_numbers = #tpu.dot_dimension_numbers<[1], [0], [0], [1], [0, 0, 1, 1], [], []>} : vector<256x72xbf16>, vector<72x8xbf16>, vector<256x8xf32> -> vector<256x8xf32>
    %109 = vector.shape_cast %16 : vector<1x16x16x4xf32> to vector<256x4xf32>
    %110 = arith.truncf %109 : vector<256x4xf32> to vector<256x4xbf16>
    %c0_164 = arith.constant 0 : index
    %c0_165 = arith.constant 0 : index
    %111 = vector.load %arg8[%c0_164, %c0_165] : memref<4x8xbf16, #tpu.memory_space<vmem>>, vector<4x8xbf16>
    %cst_166 = arith.constant dense<0.000000e+00> : vector<256x8xf32>
    %112 = tpu.matmul %110, %111, %cst_166 {dimension_numbers = #tpu.dot_dimension_numbers<[1], [0], [0], [1], [0, 0, 1, 1], [], []>} : vector<256x4xbf16>, vector<4x8xbf16>, vector<256x8xf32> -> vector<256x8xf32>
    %113 = arith.addf %108, %112 : vector<256x8xf32>
    %c0_167 = arith.constant 0 : index
    %c0_168 = arith.constant 0 : index
    %114 = vector.load %arg9[%c0_167, %c0_168] : memref<1x8xf32, #tpu.memory_space<vmem>>, vector<1x8xf32>
    %115 = vector.broadcast %114 : vector<1x8xf32> to vector<256x8xf32>
    %116 = arith.addf %113, %115 : vector<256x8xf32>
    %117 = tpu.transpose %116, [1, 0] : vector<256x8xf32> -> vector<8x256xf32>
    %118 = vector.shape_cast %117 : vector<8x256xf32> to vector<1x8x256xf32>
    %c0_169 = arith.constant 0 : index
    %c0_170 = arith.constant 0 : index
    %c0_171 = arith.constant 0 : index
    %119 = vector.load %arg10[%c0_169, %c0_170, %c0_171] : memref<1x8x256xf32, #tpu.memory_space<vmem>>, vector<1x8x256xf32>
    tpu.vector_store %arg10[%c0_169, %c0_170, %c0_171], %118 {strides = array<i32>} : memref<1x8x256xf32, #tpu.memory_space<vmem>>, vector<1x8x256xf32>,
    return
  }
  func.func @transform_0(%arg0: i32) -> (i32, i32, i32, i32) {
    %c0_i32 = arith.constant 0 : i32
    %c0_i32_0 = arith.constant 0 : i32
    %c0_i32_1 = arith.constant 0 : i32
    %c0_i32_2 = arith.constant 0 : i32
    return %arg0, %c0_i32, %c0_i32_0, %c0_i32_1 : i32, i32, i32, i32
  }
  func.func @transform_1(%arg0: i32) -> (i32, i32, i32) {
    %c0_i32 = arith.constant 0 : i32
    %c0_i32_0 = arith.constant 0 : i32
    %c0_i32_1 = arith.constant 0 : i32
    return %arg0, %c0_i32, %c0_i32_0 : i32, i32, i32
  }
  func.func @transform_2(%arg0: i32) -> (i32, i32) {
    %c0_i32 = arith.constant 0 : i32
    %c0_i32_0 = arith.constant 0 : i32
    %c0_i32_1 = arith.constant 0 : i32
    return %c0_i32, %c0_i32_0 : i32, i32
  }
  func.func @transform_3(%arg0: i32) -> (i32, i32) {
    %c0_i32 = arith.constant 0 : i32
    %c0_i32_0 = arith.constant 0 : i32
    %c0_i32_1 = arith.constant 0 : i32
    return %c0_i32, %c0_i32_0 : i32, i32
  }
  func.func @transform_4(%arg0: i32) -> (i32, i32) {
    %c0_i32 = arith.constant 0 : i32
    %c0_i32_0 = arith.constant 0 : i32
    %c0_i32_1 = arith.constant 0 : i32
    return %c0_i32, %c0_i32_0 : i32, i32
  }
  func.func @transform_5(%arg0: i32) -> (i32, i32) {
    %c0_i32 = arith.constant 0 : i32
    %c0_i32_0 = arith.constant 0 : i32
    %c0_i32_1 = arith.constant 0 : i32
    return %c0_i32, %c0_i32_0 : i32, i32
  }
  func.func @transform_6(%arg0: i32) -> (i32, i32) {
    %c0_i32 = arith.constant 0 : i32
    %c0_i32_0 = arith.constant 0 : i32
    %c0_i32_1 = arith.constant 0 : i32
    return %c0_i32, %c0_i32_0 : i32, i32
  }
  func.func @transform_7(%arg0: i32) -> (i32, i32) {
    %c0_i32 = arith.constant 0 : i32
    %c0_i32_0 = arith.constant 0 : i32
    %c0_i32_1 = arith.constant 0 : i32
    return %c0_i32, %c0_i32_0 : i32, i32
  }
  func.func @transform_8(%arg0: i32) -> (i32, i32) {
    %c0_i32 = arith.constant 0 : i32
    %c0_i32_0 = arith.constant 0 : i32
    %c0_i32_1 = arith.constant 0 : i32
    return %c0_i32, %c0_i32_0 : i32, i32
  }
  func.func @transform_9(%arg0: i32) -> (i32, i32, i32) {
    %c0_i32 = arith.constant 0 : i32
    %c0_i32_0 = arith.constant 0 : i32
    %c0_i32_1 = arith.constant 0 : i32
    return %arg0, %c0_i32, %c0_i32_0 : i32, i32, i32
  }
}

</mosaic_0001>

<bundles_post_ra>
// kernel: resnet_block.1
= control target key start
LH: loop header
LB: loop body
LE: loop exit
PB: predicated region body
PF: predicated region fallthrough
CT: control target
= control target key end

     0   :  { %s10761_s30 = smov 0   ;;  %s13874_s0 = inlined_call_operand.vmem [shape: f32[2,16,16,4], index: 0, kind: input, shape index: {}]   ;;  %s13875_s1 = inlined_call_operand.vmem [shape: f32[2,1,8], index: 1, kind: input, shape index: {}]   ;;  %s13876_s2 = inlined_call_operand.vmem [shape: f32[1,4], index: 2, kind: input, shape index: {}]   ;;  %s13877_s3 = inlined_call_operand.vmem [shape: f32[1,4], index: 3, kind: input, shape index: {}]   ;;  %s13878_s4 = inlined_call_operand.vmem [shape: bf16[36,8], index: 4, kind: input, shape index: {}]   ;;  %s13879_s5 = inlined_call_operand.vmem [shape: f32[1,8], index: 5, kind: input, shape index: {}]   ;;  %s13880_s6 = inlined_call_operand.vmem [shape: bf16[72,8], index: 6, kind: input, shape index: {}]   ;;  %s13881_s7 = inlined_call_operand.vmem [shape: bf16[4,8], index: 7, kind: input, shape index: {}]   ;;  %s13882_s8 = inlined_call_operand.vmem [shape: f32[1,8], index: 8, kind: input, shape index: {}]   ;;  %s13883_s9 = inlined_call_operand.vmem [shape: f32[2,8,256], index: 9, kind: output, shape index: {}]  }
   0x1 LB: > { %s9406_s10 = sadd.s32 4294967295, %s10696_s30   ;;  %p9410_p0 = scmp.ge.s32.totalorder %s10696_s30, 1  ;;  %s10696_s30 = sphi %s10761_s30, %s19_s30  }
   0x2   : > { %p295_p1 = scmp.lt.s32.totalorder %s10696_s30, 3 }
   0x4   : > { %p296_p2 = pnand %p9410_p0, %p295_p1 }
   0x6   : > { %299 = sbr.rel (%p296_p2) target bundleno = 1370 (0x55a), region = 56 }
   0xd   : > { %vm348_vm0 = vcmask 27648   ;;  %vm351_vm1 = vcmask 24576   ;;  %vm13889_vm2 = vsmask.f32 256  ;;  %v13884_v0 = vmov 0   ;;  %p334_p3 = scmp.lt.s32.totalorder %s9406_s10, 1 }
   0xe   : > { %349 = vst.msk [vmem:[#allocation2] sm:$0xf] %vm348_vm0, %v13884_v0  ;;  %350 = vst.msk [vmem:[#allocation2 + $0x4] sm:$0xf] %vm348_vm0, %v13884_v0  ;;  %vm13887_vm3 = vcmask 60416   ;;  %vm2246_vm6 = vcmask 1042432  }
   0xf   : > { %352 = vst.msk [vmem:[#allocation2 + $0x8] sm:$0x1] %vm351_vm1, %v13884_v0  ;;  %356 = vst.msk [vmem:[#allocation2 + $0xd4] sm:$0x1] %vm351_vm1, %v13884_v0  ;;  %vm13888_vm5 = vsmask.f32 7938 }
  0x10   : > { %354 = vst.msk [vmem:[#allocation2 + $0xcc] sm:$0xf] %vm348_vm0, %v13884_v0  ;;  %355 = vst.msk [vmem:[#allocation2 + $0xd0] sm:$0xf] %vm348_vm0, %v13884_v0  ;;  %v366_v2 = vld [vmem:[#allocation2 + $0x18] sm:$0x1] }
  0x11   : > { %471 = vst.msk [vmem:[#allocation4] sm:$0xf] %vm13887_vm3, %v13884_v0  ;;  %472 = vst.msk [vmem:[#allocation4 + $0x4] sm:$0xf] %vm13887_vm3, %v13884_v0  ;;  %vm2247_vm7 = vcmask 1046532   ;;  %s13997_s10 = smov (!%p334_p3, %s9406_s10), 1 }
  0x12   : > { %476 = vst.msk [vmem:[#allocation4 + $0xcc] sm:$0xf] %vm13887_vm3, %v13884_v0  ;;  %477 = vst.msk [vmem:[#allocation4 + $0xd0] sm:$0xf] %vm13887_vm3, %v13884_v0  ;;  %v363_v4 = vld [vmem:[#allocation2 + $0xc] sm:$0x1] }
  0x13   : > { %vm10791_vm4 = vmand %vm351_vm1, %vm13889_vm2  ;;  %v10802_v5 = vld [vmem:[%s13876_s2] ss:$0 sm:$0xff]  ;;  %v369_v7 = vld [vmem:[#allocation2 + $0x24] sm:$0x1]  ;;  %s9990_s13 = sshll.u32 %s13997_s10, 8  ;;  %s10699_s19 = smov 8  }
  0x14   : > { %v367_v3 = vsel %vm10791_vm4, 0, %v366_v2  ;;  %v364_v6 = vsel %vm10791_vm4, 0, %v363_v4  ;;  %v372_v8 = vld [vmem:[#allocation2 + $0x30] sm:$0x1]  ;;  %vm10808_vm8 = vmand %vm351_vm1, %vm13888_vm5  ;;  %v370_v10 = vsel %vm10791_vm4, 0, %v369_v7  ;;  %s10826_s16 = scalar_lea.vmem %s13874_s0, %s9990_s13  ;;  %s10700_s20 = smov 4  }
  0x15   : > { %368 = vst [vmem:[#allocation2 + $0x18] sm:$0x1] %v367_v3  ;;  %365 = vst [vmem:[#allocation2 + $0xc] sm:$0x1] %v364_v6  ;;  %v373_v11 = vsel %vm10791_vm4, 0, %v372_v8  ;;  %v592_v24 = vld [vmem:[%s10826_s16 + $0x10] sm:$0xff] }
  0x16   : > { %v375_v12 = vld [vmem:[#allocation2 + $0x3c] sm:$0x1]  ;;  %vm10819_vm9 = vmor %vm2246_vm6, %vm2247_vm7  ;;  %v10831_v14 = vld [vmem:[%s13877_s3] ss:$0 sm:$0xff]  ;;  %371 = vst [vmem:[#allocation2 + $0x24] sm:$0x1] %v370_v10  ;;  %v631_v28 = vmul.f32 %v10802_v5, %v592_v24 }
  0x17   : > { %374 = vst [vmem:[#allocation2 + $0x30] sm:$0x1] %v373_v11  ;;  %v376_v15 = vsel %vm10791_vm4, 0, %v375_v12  ;;  %v419_v16 = vld [vmem:[#allocation2 + $0x14] sm:$0x1]  ;;  %v593_v27 = vld [vmem:[%s10826_s16 + $0x18] sm:$0xff]  ;;  %vm10992_vm14 = vmand %vm348_vm0, %vm13888_vm5 }
  0x18   : > { %v416_v17 = vld [vmem:[#allocation2 + $0x8] sm:$0x1]  ;;  %v2150_v18 = vld [vmem:[#allocation2] sm:$0xe]  ;;  %v2151_v19 = vld [vmem:[#allocation2 + $0x4] sm:$0xf]  ;;  %v632_v38 = vmul.f32 %v10802_v5, %v593_v27  ;;  %v10854_v39 = vadd.f32 %v10831_v14, %v631_v28 }
  0x19   : > { %vm1650_vm10 = vsmask.f32 3328  ;;  %vm1651_vm11 = vsmask.f32 7440  ;;  %377 = vst [vmem:[#allocation2 + $0x3c] sm:$0x1] %v376_v15 }
  0x1a   : > { %v417_v20 = vsel %vm10808_vm8, 0, %v416_v17  ;;  %v9513_v21 = vrot.slane %v2150_v18, 9  ;;  %v2251_v22 = vrot.slane %v2151_v19, 5  ;;  %v360_v23 = vld [vmem:[#allocation2] sm:$0x1]  ;;  %v420_v30 = vsel %vm10808_vm8, 0, %v419_v16  ;;  %vm10896_vm12 = vmor %vm1650_vm10, %vm1651_vm11 }
  0x1b   : > { %418 = vst [vmem:[#allocation2 + $0x8] sm:$0x1] %v417_v20  ;;  %v361_v25 = vsel %vm10791_vm4, 0, %v360_v23  ;;  %v1603_v26 = vld [vmem:[#allocation2 + $0x4] sm:$0xf]  ;;  %v591_v35 = vld [vmem:[%s10826_s16 + $0x8] sm:$0xff]  ;;  %v10864_v47 = vadd.f32 %v10831_v14, %v632_v38 }
  0x1c   : > { %v590_v29 = vld [vmem:[%s10826_s16] sm:$0xff]  ;;  %v10847_v31 = vsel %vm10819_vm9, %v9513_v21, %v2251_v22  ;;  %v2253_v32 = vrot.slane %v2251_v22, 4  ;;  %362 = vst [vmem:[#allocation2] sm:$0x1] %v361_v25  ;;  %v1663_v33 = vshll.u32 %v1603_v26, 16  ;;  %v1667_v34 = vshrl.u32 %v1603_v26, 16 }
  0x1d   : > { %v594_v36 = vld [vmem:[%s10826_s16 + $0x20] sm:$0xff]  ;;  %v595_v37 = vld [vmem:[%s10826_s16 + $0x28] sm:$0xff]  ;;  %421 = vst [vmem:[#allocation2 + $0x14] sm:$0x1] %v420_v30  ;;  %v629_v40 = vmul.f32 %v10802_v5, %v590_v29  ;;  %v630_v41 = vmul.f32 %v10802_v5, %v591_v35  ;;  %v596_v42 = vld [vmem:[%s10826_s16 + $0x30] sm:$0xff]  ;;  %s10701_s21 = smov 12  }
  0x1e   : > { %v10859_v43 = vrot.slane %v1663_v33, 5  ;;  %v1669_v44 = vrot.slane %v1667_v34, 4  ;;  %v633_v45 = vmul.f32 %v10802_v5, %v594_v36  ;;  %v634_v46 = vmul.f32 %v10802_v5, %v595_v37  ;;  %v597_v51 = vld [vmem:[%s10826_s16 + $0x38] sm:$0xff]  ;;  %v598_v52 = vld [vmem:[%s10826_s16 + $0x40] sm:$0xff]  ;;  %v425_v17 = vld [vmem:[#allocation2 + $0x2c] sm:$0x1] }
  0x1f   : > { %v9419_v48 = vmul.f32 -1.442695, %v10854_v39  ;;  %v10868_v49 = vadd.f32 %v10831_v14, %v629_v40  ;;  %v10871_v50 = vadd.f32 %v10831_v14, %v630_v41  ;;  %v635_v56 = vmul.f32 %v10802_v5, %v596_v42  ;;  %v422_v10 = vld [vmem:[#allocation2 + $0x20] sm:$0x1]  ;;  %v599_v21 = vld [vmem:[%s10826_s16 + $0x48] sm:$0xff]  ;;  %v600_v36 = vld [vmem:[%s10826_s16 + $0x50] sm:$0xff] }
  0x20   : > { %v1670_v53 = vor.u32 %v1669_v44, %v10859_v43  ;;  %v10877_v54 = vadd.f32 %v10831_v14, %v633_v45  ;;  %v10880_v55 = vadd.f32 %v10831_v14, %v634_v46  ;;  %v9420_v57 = vmul.f32 -1.442695, %v10864_v47  ;;  %v428_v22 = vld [vmem:[#allocation2 + $0x38] sm:$0x1]  ;;  %v431_v23 = vld [vmem:[#allocation2 + $0x44] sm:$0x1] }
  0x21   : > { %10390 = vpow2.f32 %v9419_v48  ;;  %v9417_v58 = vmul.f32 -1.442695, %v10868_v49  ;;  %v9418_v59 = vmul.f32 -1.442695, %v10871_v50  ;;  %v636_v63 = vmul.f32 %v10802_v5, %v597_v51  ;;  %v378_v27 = vld [vmem:[#allocation2 + $0x48] sm:$0x1] }
  0x22   : > { %v2152_v60 = vld [vmem:[#allocation2 + $0x8] sm:$0x1]  ;;  %v10886_v62 = vrot.slane %v1670_v53, 4  ;;  %v10890_v2 = vadd.f32 %v10831_v14, %v635_v56  ;;  %v637_v3 = vmul.f32 %v10802_v5, %v598_v52  ;;  %10392 = vpow2.f32 %v9420_v57  ;;  %v434_v28 = vld [vmem:[#allocation2 + $0x50] sm:$0x1]  ;;  %v601_v45 = vld [vmem:[%s10826_s16 + $0x58] sm:$0xff] }
  0x23   : > { %v1604_v61 = vld [vmem:[#allocation2 + $0x8] sm:$0x1]  ;;  %v2254_v4 = vrot.slane %v2152_v60, 5  ;;  %v1602_v6 = vld [vmem:[#allocation2] sm:$0xf]  ;;  %10394 = vpow2.f32 %v9417_v58  ;;  %v10904_v20 = vadd.f32 %v10831_v14, %v636_v63  ;;  %v423_v35 = vsel %vm10808_vm8, 0, %v422_v10 }
  0x24   : > { %v1673_v7 = vshll.u32 %v1604_v61, 16  ;;  %v9421_v8 = vmul.f32 -1.442695, %v10877_v54  ;;  %v1654_v12 = vshrl.u32 %v1602_v6, 16  ;;  %v1657_v15 = vshll.u32 %v1602_v6, 16  ;;  %s10702_s22 = smov 24  }
  0x25   : > { %v9422_v16 = vmul.f32 -1.442695, %v10880_v55  ;;  %v2255_v18 = vsel %vm10819_vm9, %v2253_v32, %v2254_v4  ;;  %10396 = vpow2.f32 %v9418_v59  ;;  %v9423_v30 = vmul.f32 -1.442695, %v10890_v2  ;;  %424 = vst [vmem:[#allocation2 + $0x20] sm:$0x1] %v423_v35 }
  0x26   : > { %v1675_v19 = vrot.slane %v1673_v7, 5  ;;  %v9529_v24 = vcombine.low %v10847_v31, %v2255_v18  ;;  %v1656_v25 = vrot.slane %v1654_v12, 4  ;;  %v1659_v26 = vrot.slane %v1657_v15, 5  ;;  %v381_v58 = vld [vmem:[#allocation2 + $0x54] sm:$0x1]  ;;  %v602_v7 = vld [vmem:[%s10826_s16 + $0x60] sm:$0xff] }
  0x27   : > { %10398 = vpow2.f32 %v9421_v8  ;;  %v9424_v32 = vmul.f32 -1.442695, %v10904_v20  ;;  %v638_v31 = vmul.f32 %v10802_v5, %v599_v21  ;;  %v10916_v34 = vadd.f32 %v10831_v14, %v637_v3  ;;  %v604_v18 = vld [vmem:[%s10826_s16 + $0x70] sm:$0xff]  ;;  %s10703_s23 = smov 20   ;;  %s10704_s24 = smov 32  }
  0x28   : > { %v1676_v29 = vsel %vm10896_vm12, %v10886_v62, %v1675_v19  ;;  %10400 = vpow2.f32 %v9422_v16  ;;  %2409 = vrot.lane.b32.xlu1 %v9529_v24, %s10699_s19  ;;  %v1660_v33 = vor.u32 %v1659_v26, %v1656_v25  ;;  %v426_v37 = vsel %vm10808_vm8, 0, %v425_v17  ;;  %v603_v17 = vld [vmem:[%s10826_s16 + $0x68] sm:$0xff]  ;;  %v605_v24 = vld [vmem:[%s10826_s16 + $0x78] sm:$0xff]  ;;  %s10705_s25 = smov 16   ;;  %s10706_s26 = smov 28  }
  0x29   : > { %10402 = vpow2.f32 %v9423_v30  ;;  %v429_v38 = vsel %vm10808_vm8, 0, %v428_v22  ;;  %v432_v40 = vsel %vm10808_vm8, 0, %v431_v23  ;;  %v10928_v42 = vadd.f32 %v10831_v14, %v638_v31  ;;  %427 = vst [vmem:[#allocation2 + $0x2c] sm:$0x1] %v426_v37  ;;  %s10707_s18 = smov 48   ;;  %s10708_s27 = smov 40  }
  0x2a   : > { %v1661_v41 = vrot.slane %v1660_v33, 4  ;;  %10404 = vpow2.f32 %v9424_v32  ;;  %v9425_v44 = vmul.f32 -1.442695, %v10916_v34  ;;  %430 = vst [vmem:[#allocation2 + $0x38] sm:$0x1] %v429_v38  ;;  %v379_v48 = vsel %vm10791_vm4, 0, %v378_v27 }
  0x2b   : > { %433 = vst [vmem:[#allocation2 + $0x44] sm:$0x1] %v432_v40  ;;  %v10391_v46 = vpop.eup %10390  ;;  %v639_v51 = vmul.f32 %v10802_v5, %v600_v36  ;;  %v435_v52 = vsel %vm10808_vm8, 0, %v434_v28  ;;  %v9426_v57 = vmul.f32 -1.442695, %v10928_v42  ;;  %v640_v61 = vmul.f32 %v10802_v5, %v601_v45  ;;  %s10709_s28 = smov 64  }
  0x2c   : > { %v1666_v53 = vsel %vm10896_vm12, %v1661_v41, %v10859_v43  ;;  %v798_v56 = vadd.f32 1.0, %v10391_v46  ;;  %10406 = vpow2.f32 %v9425_v44  ;;  %380 = vst [vmem:[#allocation2 + $0x48] sm:$0x1] %v379_v48  ;;  %436 = vst [vmem:[#allocation2 + $0x50] sm:$0x1] %v435_v52  ;;  %v10393_v59 = vpop.eup %10392  ;;  %v382_v62 = vsel %vm10791_vm4, 0, %v381_v58 }
  0x2d   : > { %v9497_v60 = vcombine.low %v1666_v53, %v1676_v29  ;;  %v10395_v63 = vpop.eup %10394  ;;  %v799_v3 = vadd.f32 1.0, %v10393_v59  ;;  %383 = vst [vmem:[#allocation2 + $0x54] sm:$0x1] %v382_v62  ;;  %v10946_v6 = vadd.f32 %v10831_v14, %v639_v51  ;;  %v10950_v16 = vadd.f32 %v10831_v14, %v640_v61  ;;  %v437_v38 = vld [vmem:[#allocation2 + $0x5c] sm:$0x1]  ;;  %s10710_s29 = smov 56  }
  0x2e   : > { %10408 = vrcp.f32 %v798_v56  ;;  %v796_v4 = vadd.f32 1.0, %v10395_v63  ;;  %v641_v21 = vmul.f32 %v10802_v5, %v602_v7  ;;  %v642_v27 = vmul.f32 %v10802_v5, %v603_v17 }
  0x2f   : > { %v10397_v43 = vpop.eup %10396  ;;  %2085 = vrot.lane.b32.xlu0 %v9497_v60, %s10700_s20  ;;  %10410 = vpow2.f32 %v9426_v57  ;;  %v9427_v23 = vmul.f32 -1.442695, %v10946_v6  ;;  %v643_v28 = vmul.f32 %v10802_v5, %v604_v18  ;;  %v9428_v30 = vmul.f32 -1.442695, %v10950_v16 }
  0x30   : > { %10412 = vrcp.f32 %v799_v3  ;;  %v797_v10 = vadd.f32 1.0, %v10397_v43  ;;  %v10961_v33 = vadd.f32 %v10831_v14, %v641_v21  ;;  %v644_v31 = vmul.f32 %v10802_v5, %v605_v24 }
  0x31   : > { %v10399_v8 = vpop.eup %10398  ;;  %10414 = vrcp.f32 %v796_v4  ;;  %v10965_v37 = vadd.f32 %v10831_v14, %v642_v27  ;;  %v10968_v40 = vadd.f32 %v10831_v14, %v643_v28  ;;  %v438_v45 = vsel %vm10808_vm8, 0, %v437_v38  ;;  %v1345_v38 = vld [vmem:[#allocation2 + $0xc] sm:$0xf] }
  0x32   : > { %v10401_v12 = vpop.eup %10400  ;;  %v800_v15 = vadd.f32 1.0, %v10399_v8  ;;  %10416 = vrcp.f32 %v797_v10  ;;  %v9429_v48 = vmul.f32 -1.442695, %v10961_v33  ;;  %439 = vst [vmem:[#allocation2 + $0x5c] sm:$0x1] %v438_v45  ;;  %v10975_v51 = vadd.f32 %v10831_v14, %v644_v31 }
  0x33   : > { %v801_v19 = vadd.f32 1.0, %v10401_v12  ;;  %v10403_v22 = vpop.eup %10402  ;;  %vm1020_vm13 = vsmask.f32 4368  ;;  %v10980_v58 = vmul.f32 -1.442695, %v10965_v37  ;;  %vm13892_vm1 = vcmask 31744  }
  0x34   : > { %10418 = vrcp.f32 %v800_v15  ;;  %v10405_v25 = vpop.eup %10404  ;;  %v802_v26 = vadd.f32 1.0, %v10403_v22  ;;  %v10983_v59 = vmul.f32 -1.442695, %v10968_v40  ;;  %v1352_v15 = vld [vmem:[#allocation2 + $0x18] sm:$0xf]  ;;  %vm10999_vm15 = vmor %vm13889_vm2, %vm1020_vm13  ;;  %vm2133_vm6 = vcmask 64544  }
  0x35   : > { %10420 = vrcp.f32 %v801_v19  ;;  %v803_v29 = vadd.f32 1.0, %v10405_v25  ;;  %vm13893_vm7 = vcmask 97344   ;;  %vm13890_vm10 = vcmask 130144  }
  0x36   : > { %v10407_v32 = vpop.eup %10406  ;;  %10422 = vpow2.f32 %v9427_v23  ;;  %vm3179_vm11 = vcmask 162944   ;;  %vm3500_vm13 = vcmask 195744   ;;  %vm3678_vm3 = vcmask 228544  }
  0x37   : > { %v804_v35 = vadd.f32 1.0, %v10407_v32  ;;  %10424 = vrcp.f32 %v802_v26  ;;  %vm4223_vm5 = vcmask 261344   ;;  %vm4544_vm2 = vcmask 294144  }
  0x38   : > { %v10409_v36 = vpop.eup %10408  ;;  %10426 = vrcp.f32 %v803_v29 }
  0x39   : > { %v10411_v41 = vpop.eup %10410  ;;  %v894_v44 = vmul.f32 %v10409_v36, %v10854_v39  ;;  %10428 = vpow2.f32 %v9428_v30 }
  0x3a   : > { %v10413_v46 = vpop.eup %10412  ;;  %v805_v5 = vadd.f32 1.0, %v10411_v41  ;;  %10430 = vrcp.f32 %v804_v35 }
  0x3b   : > { %v10415_v52 = vpop.eup %10414  ;;  %v895_v53 = vmul.f32 %v10413_v46, %v10864_v47  ;;  %v9994_v56 = vpack.c.bf16 %v894_v44, %v894_v44 }
  0x3c   : > { %v10417_v39 = vpop.eup %10416  ;;  %v892_v57 = vmul.f32 %v10415_v52, %v10868_v49  ;;  %10432 = vrcp.f32 %v805_v5  ;;  %v10988_v49 = vmul.f32 -1.442695, %v10975_v51 }
  0x3d   : > { %v9995_v61 = vpack.c.bf16 %v895_v53, %v895_v53  ;;  %v1040_v14 = vshrl.u32 %v9994_v56, 16  ;;  %v1043_v62 = vshll.u32 %v9994_v56, 16  ;;  %v893_v63 = vmul.f32 %v10417_v39, %v10871_v50 }
  0x3e   : > { %v10419_v60 = vpop.eup %10418  ;;  %v9992_v3 = vpack.c.bf16 %v892_v57, %v892_v57  ;;  %10434 = vpow2.f32 %v9429_v48  ;;  %v1359_v57 = vld [vmem:[#allocation2 + $0x24] sm:$0xf] }
  0x3f   : > { %v10421_v47 = vpop.eup %10420  ;;  %v896_v43 = vmul.f32 %v10419_v60, %v10877_v54  ;;  %v1042_v4 = vrot.slane %v1040_v14, 7  ;;  %v1048_v7 = vshrl.u32 %v9995_v61, 16  ;;  %v1051_v8 = vshll.u32 %v9995_v61, 16  ;;  %v1349_v60 = vld [vmem:[#allocation2 + $0x14] sm:$0x1] }
  0x40   : > { %v9993_v10 = vpack.c.bf16 %v893_v63, %v893_v63  ;;  %v1023_v50 = vshrl.u32 %v9992_v3, 16  ;;  %v1026_v17 = vshll.u32 %v9992_v3, 16  ;;  %v897_v18 = vmul.f32 %v10421_v47, %v10880_v55  ;;  %v10423_v19 = vpop.eup %10422 }
  0x41   : > { %v9996_v54 = vpack.c.bf16 %v896_v43, %v896_v43  ;;  %v1045_v21 = vor.u32 %v1043_v62, %v1042_v4  ;;  %v1046_v22 = vrot.slane %v1042_v4, 4  ;;  %v1050_v23 = vrot.slane %v1048_v7, 7  ;;  %v10425_v25 = vpop.eup %10424 }
  0x42   : > { %v1031_v24 = vshrl.u32 %v9993_v10, 16  ;;  %v1025_v27 = vrot.slane %v1023_v50, 7  ;;  %v1034_v28 = vshll.u32 %v9993_v10, 16  ;;  %v9997_v29 = vpack.c.bf16 %v897_v18, %v897_v18  ;;  %v10427_v32 = vpop.eup %10426 }
  0x43   : > { %v1057_v30 = vshrl.u32 %v9996_v54, 16  ;;  %v1053_v31 = vor.u32 %v1051_v8, %v1050_v23  ;;  %v1055_v55 = vrot.slane %v1050_v23, 4  ;;  %v1353_v35 = vsel %vm10992_vm14, %v1045_v21, %v1352_v15  ;;  %v11005_v41 = vpop.eup %10428  ;;  %v1356_v8 = vld [vmem:[#allocation2 + $0x20] sm:$0x1] }
  0x44   : > { %v1033_v36 = vrot.slane %v1031_v24, 7  ;;  %1354 = vst [vmem:[#allocation2 + $0x18] sm:$0xf] %v1353_v35  ;;  %v1028_v44 = vor.u32 %v1026_v17, %v1025_v27  ;;  %v1029_v45 = vrot.slane %v1025_v27, 4  ;;  %v1060_v5 = vshll.u32 %v9996_v54, 16  ;;  %v10431_v48 = vpop.eup %10430 }
  0x45   : > { %v1059_v46 = vrot.slane %v1057_v30, 7  ;;  %v1054_v52 = vsel %vm10999_vm15, %v1046_v22, %v1053_v31  ;;  %v1065_v39 = vshrl.u32 %v9997_v29, 16  ;;  %v1068_v47 = vshll.u32 %v9997_v29, 16  ;;  %v1363_v54 = vld [vmem:[#allocation2 + $0x2c] sm:$0x1] }
  0x46   : > { %v1036_v53 = vor.u32 %v1034_v28, %v1033_v36  ;;  %v1038_v56 = vrot.slane %v1033_v36, 4  ;;  %v10433_v61 = vpop.eup %10432  ;;  %1355 = vst.msk [vmem:[#allocation2 + $0x1c] sm:$0xf] %vm348_vm0, %v1054_v52  ;;  %v1346_v14 = vsel %vm10992_vm14, %v1028_v44, %v1345_v38  ;;  %v898_v4 = vmul.f32 %v10425_v25, %v10890_v2  ;;  %v1366_v31 = vld [vmem:[#allocation2 + $0x30] sm:$0xf] }
  0x47   : > { %v1062_v62 = vor.u32 %v1060_v5, %v1059_v46  ;;  %v1063_v63 = vrot.slane %v1059_v46, 4  ;;  %1347 = vst [vmem:[#allocation2 + $0xc] sm:$0xf] %v1346_v14  ;;  %v1067_v43 = vrot.slane %v1065_v39, 7  ;;  %v899_v7 = vmul.f32 %v10427_v32, %v10904_v20  ;;  %v1373_v44 = vld [vmem:[#allocation2 + $0x3c] sm:$0xf] }
  0x48   : > { %v1037_v3 = vsel %vm10999_vm15, %v1029_v45, %v1036_v53  ;;  %v11016_v10 = vpop.eup %10434  ;;  %v900_v50 = vmul.f32 %v10431_v48, %v10916_v34  ;;  %v901_v17 = vmul.f32 %v10433_v61, %v10928_v42  ;;  %v1350_v18 = vsel %vm10791_vm4, %v1038_v56, %v1349_v60  ;;  %v1370_v48 = vld [vmem:[#allocation2 + $0x38] sm:$0x1] }
  0x49   : > { %1348 = vst.msk [vmem:[#allocation2 + $0x10] sm:$0xf] %vm348_vm0, %v1037_v3  ;;  %v1360_v15 = vsel %vm10992_vm14, %v1062_v62, %v1359_v57  ;;  %v1070_v21 = vor.u32 %v1068_v47, %v1067_v43  ;;  %v1072_v2 = vrot.slane %v1067_v43, 4  ;;  %v9998_v20 = vpack.c.bf16 %v898_v4, %v898_v4  ;;  %1351 = vst [vmem:[#allocation2 + $0x14] sm:$0x1] %v1350_v18 }
  0x4a   : > { %1361 = vst [vmem:[#allocation2 + $0x24] sm:$0xf] %v1360_v15  ;;  %v9999_v22 = vpack.c.bf16 %v899_v7, %v899_v7  ;;  %v10000_v23 = vpack.c.bf16 %v900_v50, %v900_v50  ;;  %v10001_v24 = vpack.c.bf16 %v901_v17, %v901_v17  ;;  %v1357_v25 = vsel %vm10791_vm4, %v1055_v55, %v1356_v8  ;;  %v1377_v47 = vld [vmem:[#allocation2 + $0x44] sm:$0x1] }
  0x4b   : > { %v806_v27 = vadd.f32 1.0, %v10423_v19  ;;  %v1071_v34 = vsel %vm10999_vm15, %v1063_v63, %v1070_v21  ;;  %v1074_v42 = vshrl.u32 %v9998_v20, 16  ;;  %v1077_v28 = vshll.u32 %v9998_v20, 16  ;;  %1358 = vst [vmem:[#allocation2 + $0x20] sm:$0x1] %v1357_v25 }
  0x4c   : > { %v1364_v29 = vsel %vm10791_vm4, %v1072_v2, %v1363_v54  ;;  %1362 = vst.msk [vmem:[#allocation2 + $0x28] sm:$0xf] %vm348_vm0, %v1071_v34  ;;  %v1082_v30 = vshrl.u32 %v9999_v22, 16  ;;  %v1085_v32 = vshll.u32 %v9999_v22, 16  ;;  %v1091_v35 = vshrl.u32 %v10000_v23, 16 }
  0x4d   : > { %v1094_v36 = vshll.u32 %v10000_v23, 16  ;;  %v11032_v38 = vld [vmem:[#allocation2 + $0x18] sm:$0xe]  ;;  %1365 = vst [vmem:[#allocation2 + $0x2c] sm:$0x1] %v1364_v29  ;;  %v1076_v55 = vrot.slane %v1074_v42, 7  ;;  %10436 = vrcp.f32 %v806_v27 }
  0x4e   : > { %v10286_v19 = vld [vmem:[#allocation2 + $0x18] sm:$0xff]   ;;  %v1084_v45 = vrot.slane %v1082_v30, 7  ;;  %v1093_v46 = vrot.slane %v1091_v35, 7  ;;  %v1099_v5 = vshrl.u32 %v10001_v24, 16  ;;  %10438 = vpow2.f32 %v10980_v58  ;;  %v3196_v43 = vld [vmem:[#allocation2 + $0xc] sm:$0xe] }
  0x4f   : > { %2588 = vrot.lane.b32.xlu1 %v10286_v19, %s10701_s21  ;;  %v10289_v53 = vld [vmem:[#allocation2 + $0x18] sm:$0xff]   ;;  %v1079_v56 = vor.u32 %v1077_v28, %v1076_v55  ;;  %v1080_v39 = vrot.slane %v1076_v55, 4  ;;  %v1102_v57 = vshll.u32 %v10001_v24, 16  ;;  %v9641_v60 = vrot.slane %v11032_v38, 9  ;;  %v2153_v54 = vld [vmem:[#allocation2 + $0xc] sm:$0xe] }
  0x50   : > { %v10287_v52 = vld [vmem:[#allocation2 + $0xc] sm:$0xff]   ;;  %v1087_v61 = vor.u32 %v1085_v32, %v1084_v45  ;;  %v1089_v14 = vrot.slane %v1084_v45, 4  ;;  %v1096_v62 = vor.u32 %v1094_v36, %v1093_v46  ;;  %v1097_v63 = vrot.slane %v1093_v46, 4  ;;  %v3198_v50 = vld [vmem:[#allocation2 + $0x14] sm:$0x1] }
  0x51   : > { %2586 = vrot.lane.b32.xlu0 %v10287_v52, %s10701_s21  ;;  %v1367_v58 = vsel %vm10992_vm14, %v1079_v56, %v1366_v31  ;;  %v1101_v3 = vrot.slane %v1099_v5, 7  ;;  %v3197_v4 = vld [vmem:[#allocation2 + $0x10] sm:$0xf]  ;;  %v807_v7 = vadd.f32 1.0, %v11005_v41  ;;  %v9577_v17 = vrot.slane %v3196_v43, 9 }
  0x52   : > { %v1088_v8 = vsel %vm10999_vm15, %v1080_v39, %v1087_v61  ;;  %1368 = vst [vmem:[#allocation2 + $0x30] sm:$0xf] %v1367_v58  ;;  %v1374_v15 = vsel %vm10992_vm14, %v1096_v62, %v1373_v44  ;;  %v3294_v18 = vrot.slane %v3197_v4, 5  ;;  %v1371_v41 = vsel %vm10791_vm4, %v1089_v14, %v1370_v48  ;;  %v2154_v25 = vld [vmem:[#allocation2 + $0x10] sm:$0xf] }
  0x53   : > { %v10288_v21 = vld [vmem:[#allocation2 + $0x24] sm:$0xff]   ;;  %1369 = vst.msk [vmem:[#allocation2 + $0x34] sm:$0xf] %vm348_vm0, %v1088_v8  ;;  %v1104_v2 = vor.u32 %v1102_v57, %v1101_v3  ;;  %v1106_v20 = vrot.slane %v1101_v3, 4  ;;  %1375 = vst [vmem:[#allocation2 + $0x3c] sm:$0xf] %v1374_v15  ;;  %10440 = vrcp.f32 %v807_v7 }
  0x54   : > { %v10291_v22 = vld [vmem:[#allocation2 + $0x24] sm:$0xff]   ;;  %v3296_v23 = vrot.slane %v3294_v18, 4  ;;  %v3297_v24 = vrot.slane %v3198_v50, 5  ;;  %v9514_v27 = vrot.slane %v2153_v54, 9  ;;  %1372 = vst [vmem:[#allocation2 + $0x38] sm:$0x1] %v1371_v41  ;;  %3632 = vrot.lane.b32.xlu1 %v10288_v21, %s10702_s22  ;;  %v11058_v44 = vsel %vm10819_vm9, %v9577_v17, %v3294_v18 }
  0x55   : > { %3630 = vrot.lane.b32.xlu0 %v10289_v53, %s10702_s22  ;;  %v1105_v34 = vsel %vm10999_vm15, %v1097_v63, %v1104_v2  ;;  %v2155_v42 = vld [vmem:[#allocation2 + $0x14] sm:$0x1]  ;;  %v2258_v28 = vrot.slane %v2154_v25, 5  ;;  %v4241_v29 = vld [vmem:[#allocation2 + $0x1c] sm:$0xf]  ;;  %v1378_v30 = vsel %vm10791_vm4, %v1106_v20, %v1377_v47  ;;  %v808_v32 = vadd.f32 1.0, %v11016_v10 }
  0x56   : > { %1376 = vst.msk [vmem:[#allocation2 + $0x40] sm:$0xf] %vm348_vm0, %v1105_v34  ;;  %v2261_v31 = vrot.slane %v2155_v42, 5  ;;  %v4242_v35 = vld [vmem:[#allocation2 + $0x20] sm:$0x1]  ;;  %v4338_v36 = vrot.slane %v4241_v29, 5  ;;  %10442 = vpow2.f32 %v10983_v59  ;;  %v3298_v53 = vsel %vm10819_vm9, %v3296_v23, %v3297_v24 }
  0x57   : > { %v3199_v19 = vld [vmem:[#allocation2 + $0x18] sm:$0xe]  ;;  %1379 = vst [vmem:[#allocation2 + $0x44] sm:$0x1] %v1378_v30  ;;  %v10437_v55 = vpop.eup %10436  ;;  %v2260_v45 = vrot.slane %v2258_v28, 4  ;;  %v4341_v46 = vrot.slane %v4242_v35, 5  ;;  %v11066_v14 = vsel %vm10819_vm9, %v9514_v27, %v2258_v28  ;;  %v9593_v8 = vcombine.low %v11058_v44, %v3298_v53 }
  0x58   : > { %v3200_v5 = vld [vmem:[#allocation2 + $0x1c] sm:$0xf]  ;;  %v3201_v48 = vld [vmem:[#allocation2 + $0x20] sm:$0x1]  ;;  %v10439_v10 = vpop.eup %10438  ;;  %v4340_v56 = vrot.slane %v4338_v36, 4  ;;  %v9578_v39 = vrot.slane %v3199_v19, 9  ;;  %v902_v47 = vmul.f32 %v10437_v55, %v10946_v6  ;;  %v11077_v3 = vsel %vm10819_vm9, %v9641_v60, %v4338_v36 }
  0x59   : > { %v384_v52 = vld [vmem:[#allocation2 + $0x60] sm:$0x1]  ;;  %v3301_v57 = vrot.slane %v3200_v5, 5  ;;  %v4243_v61 = vld [vmem:[#allocation2 + $0x24] sm:$0xe]  ;;  %2590 = vrot.lane.b32.xlu0 %v10291_v22, %s10701_s21  ;;  %v3304_v62 = vrot.slane %v3201_v48, 5  ;;  %v11071_v59 = vsel %vm10819_vm9, %v2260_v45, %v2261_v31  ;;  %10444 = vpow2.f32 %v10988_v49 }
  0x5a   : > { %v9642_v63 = vrot.slane %v4243_v61, 9  ;;  %v10290_v58 = vld [vmem:[#allocation2 + $0x30] sm:$0xff]   ;;  %v11081_v43 = vsel %vm10819_vm9, %v4340_v56, %v4341_v46  ;;  %v4244_v6 = vld [vmem:[#allocation2 + $0x28] sm:$0xf]  ;;  %v11084_v15 = vpack.c.bf16 %v902_v47, %v902_v47  ;;  %v809_v50 = vadd.f32 1.0, %v10439_v10 }
  0x5b   : > { %v3303_v4 = vrot.slane %v3301_v57, 4  ;;  %v10293_v7 = vld [vmem:[#allocation2 + $0x30] sm:$0xff]   ;;  %2592 = vrot.lane.b32.xlu1 %v10290_v58, %s10701_s21  ;;  %v11090_v38 = vsel %vm10819_vm9, %v9578_v39, %v3301_v57  ;;  %v4245_v17 = vld [vmem:[#allocation2 + $0x2c] sm:$0x1]  ;;  %v4345_v18 = vrot.slane %v4244_v6, 5  ;;  %v385_v21 = vsel %vm10791_vm4, 0, %v384_v52 }
  0x5c   : > { %v2159_v54 = vld [vmem:[#allocation2 + $0x24] sm:$0xe]  ;;  %v9530_v49 = vcombine.low %v11066_v14, %v11071_v59  ;;  %v9657_v41 = vcombine.low %v11077_v3, %v11081_v43  ;;  %v4348_v22 = vrot.slane %v4245_v17, 5  ;;  %v2160_v23 = vld [vmem:[#allocation2 + $0x28] sm:$0xf]  ;;  %10446 = vrcp.f32 %v808_v32 }
  0x5d   : > { %v11094_v60 = vsel %vm10819_vm9, %v3303_v4, %v3304_v62  ;;  %v10441_v2 = vpop.eup %10440  ;;  %v10292_v20 = vld [vmem:[#allocation2 + $0x3c] sm:$0xff]   ;;  %3634 = vrot.lane.b32.xlu0 %v10293_v7, %s10702_s22  ;;  %386 = vst [vmem:[#allocation2 + $0x60] sm:$0x1] %v385_v21  ;;  %v11105_v24 = vsel %vm10819_vm9, %v9642_v63, %v4345_v18  ;;  %v4347_v25 = vrot.slane %v4345_v18, 4  ;;  %v2161_v27 = vld [vmem:[#allocation2 + $0x2c] sm:$0x1]  ;;  %10448 = vrcp.f32 %v809_v50 }
  0x5e   : > { %v9516_v34 = vrot.slane %v2159_v54, 9  ;;  %v2272_v42 = vrot.slane %v2160_v23, 5  ;;  %v9594_v28 = vcombine.low %v11090_v38, %v11094_v60  ;;  %v2275_v29 = vrot.slane %v2161_v27, 5  ;;  %v2156_v30 = vld [vmem:[#allocation2 + $0x18] sm:$0xe] }
  0x5f   : > { %v2157_v31 = vld [vmem:[#allocation2 + $0x1c] sm:$0xf]  ;;  %v903_v35 = vmul.f32 %v10441_v2, %v10950_v16  ;;  %v1108_v36 = vshrl.u32 %v11084_v15, 16  ;;  %3636 = vrot.lane.b32.xlu1 %v10292_v20, %s10702_s22  ;;  %v4349_v32 = vsel %vm10819_vm9, %v4347_v25, %v4348_v22  ;;  %v2158_v55 = vld [vmem:[#allocation2 + $0x20] sm:$0x1]  ;;  %v9515_v44 = vrot.slane %v2156_v30, 9 }
  0x60   : > { %v2274_v19 = vrot.slane %v2272_v42, 4  ;;  %v3205_v45 = vld [vmem:[#allocation2 + $0x30] sm:$0xe]  ;;  %v11114_v46 = vpop.eup %10442  ;;  %v9658_v5 = vcombine.low %v11105_v24, %v4349_v32  ;;  %v11120_v16 = vsel %vm10819_vm9, %v9516_v34, %v2272_v42  ;;  %v2265_v48 = vrot.slane %v2157_v31, 5  ;;  %v3206_v10 = vld [vmem:[#allocation2 + $0x34] sm:$0xf] }
  0x61   : > { %3452 = vrot.lane.b32.xlu0 %v9593_v8, %s10703_s23  ;;  %v2268_v52 = vrot.slane %v2158_v55, 5  ;;  %v3207_v53 = vld [vmem:[#allocation2 + $0x38] sm:$0x1]  ;;  %v9580_v39 = vrot.slane %v3205_v45, 9  ;;  %v3315_v57 = vrot.slane %v3206_v10, 5  ;;  %v11126_v3 = vpack.c.bf16 %v903_v35, %v903_v35 }
  0x62   : > { %v2276_v56 = vsel %vm10819_vm9, %v2274_v19, %v2275_v29  ;;  %v3318_v61 = vrot.slane %v3207_v53, 5  ;;  %v3202_v14 = vld [vmem:[#allocation2 + $0x24] sm:$0xe]  ;;  %v2266_v62 = vsel %vm10819_vm9, %v9515_v44, %v2265_v48  ;;  %v2267_v63 = vrot.slane %v2265_v48, 4  ;;  %v3203_v47 = vld [vmem:[#allocation2 + $0x28] sm:$0xf] }
  0x63   : > { %v3204_v58 = vld [vmem:[#allocation2 + $0x2c] sm:$0x1]  ;;  %v9579_v59 = vrot.slane %v3202_v14, 9  ;;  %2411 = vrot.lane.b32.xlu1 %v9530_v49, %s10699_s19  ;;  %v11131_v43 = vsel %vm10819_vm9, %v9580_v39, %v3315_v57  ;;  %v3317_v4 = vrot.slane %v3315_v57, 4  ;;  %v3308_v7 = vrot.slane %v3203_v47, 5  ;;  %v11133_v50 = vpop.eup %10444 }
  0x64   : > { %v3311_v8 = vrot.slane %v3204_v58, 5  ;;  %v2654_v6 = vld [vmem:[#allocation2 + $0x18] sm:$0xf]  ;;  %v9532_v38 = vcombine.low %v11120_v16, %v2276_v56  ;;  %v2269_v60 = vsel %vm10819_vm9, %v2267_v63, %v2268_v52  ;;  %v2655_v17 = vld [vmem:[#allocation2 + $0x1c] sm:$0xf] }
  0x65   : > { %4496 = vrot.lane.b32.xlu0 %v9657_v41, %s10704_s24  ;;  %v2656_v18 = vld [vmem:[#allocation2 + $0x20] sm:$0x1]  ;;  %v2724_v54 = vshrl.u32 %v2654_v6, 16  ;;  %v2727_v21 = vshll.u32 %v2654_v6, 16  ;;  %v9531_v2 = vcombine.low %v2266_v62, %v2269_v60  ;;  %v3319_v20 = vsel %vm10819_vm9, %v3317_v4, %v3318_v61  ;;  %v4246_v23 = vld [vmem:[#allocation2 + $0x30] sm:$0xe] }
  0x66   : > { %v3309_v49 = vsel %vm10819_vm9, %v9579_v59, %v3308_v7  ;;  %v3310_v22 = vrot.slane %v3308_v7, 4  ;;  %v4247_v24 = vld [vmem:[#allocation2 + $0x34] sm:$0xf]  ;;  %v11143_v41 = vpop.eup %10446  ;;  %v9596_v25 = vcombine.low %v11131_v43, %v3319_v20  ;;  %v2733_v42 = vshll.u32 %v2655_v17, 16  ;;  %v4248_v29 = vld [vmem:[#allocation2 + $0x38] sm:$0x1] }
  0x67   : > { %v2726_v27 = vrot.slane %v2724_v54, 4  ;;  %v2729_v34 = vrot.slane %v2727_v21, 5  ;;  %3454 = vrot.lane.b32.xlu1 %v9594_v28, %s10703_s23  ;;  %v2737_v31 = vshrl.u32 %v2655_v17, 16  ;;  %v2743_v35 = vshll.u32 %v2656_v18, 16  ;;  %v3698_v19 = vld [vmem:[#allocation2 + $0x24] sm:$0xf]  ;;  %v11150_v52 = vpop.eup %10448 }
  0x68   : > { %v3312_v30 = vsel %vm10819_vm9, %v3310_v22, %v3311_v8  ;;  %v9643_v32 = vrot.slane %v4246_v23, 9  ;;  %v2735_v45 = vrot.slane %v2733_v42, 5  ;;  %v4352_v16 = vrot.slane %v4247_v24, 5  ;;  %v3699_v48 = vld [vmem:[#allocation2 + $0x28] sm:$0xf] }
  0x69   : > { %4498 = vrot.lane.b32.xlu0 %v9658_v5, %s10704_s24  ;;  %v9595_v55 = vcombine.low %v3309_v49, %v3312_v30  ;;  %v2730_v44 = vor.u32 %v2729_v34, %v2726_v27  ;;  %v2739_v10 = vrot.slane %v2737_v31, 4  ;;  %v2745_v53 = vrot.slane %v2743_v35, 5  ;;  %v3700_v28 = vld [vmem:[#allocation2 + $0x2c] sm:$0x1]  ;;  %v4249_v63 = vld [vmem:[#allocation2 + $0x3c] sm:$0xe] }
  0x6a   : > { %v4355_v56 = vrot.slane %v4248_v29, 5  ;;  %v3768_v39 = vshrl.u32 %v3698_v19, 16  ;;  %v4353_v61 = vsel %vm10819_vm9, %v9643_v32, %v4352_v16  ;;  %v4354_v14 = vrot.slane %v4352_v16, 4  ;;  %v4250_v43 = vld [vmem:[#allocation2 + $0x40] sm:$0xf] }
  0x6b   : > { %v2731_v57 = vrot.slane %v2730_v44, 4  ;;  %v3771_v62 = vshll.u32 %v3698_v19, 16  ;;  %2415 = vrot.lane.b32.xlu1 %v9532_v38, %s10699_s19  ;;  %v2740_v5 = vor.u32 %v2739_v10, %v2735_v45  ;;  %v3777_v58 = vshll.u32 %v3699_v48, 16  ;;  %v4251_v60 = vld [vmem:[#allocation2 + $0x44] sm:$0x1] }
  0x6c   : > { %v3770_v47 = vrot.slane %v3768_v39, 4  ;;  %v3781_v59 = vshrl.u32 %v3699_v48, 16  ;;  %v4356_v7 = vsel %vm10819_vm9, %v4354_v14, %v4355_v56  ;;  %v3787_v6 = vshll.u32 %v3700_v28, 16  ;;  %v1608_v17 = vld [vmem:[#allocation2 + $0x18] sm:$0xf] }
  0x6d   : > { %2413 = vrot.lane.b32.xlu0 %v9531_v2, %s10699_s19  ;;  %v2736_v4 = vsel %vm10896_vm12, %v2731_v57, %v2735_v45  ;;  %v3773_v8 = vrot.slane %v3771_v62, 5  ;;  %v2741_v18 = vrot.slane %v2740_v5, 4  ;;  %v9659_v54 = vcombine.low %v4353_v61, %v4356_v7  ;;  %v1609_v24 = vld [vmem:[#allocation2 + $0x1c] sm:$0xf]  ;;  %v1610_v42 = vld [vmem:[#allocation2 + $0x20] sm:$0x1] }
  0x6e   : > { %v3779_v38 = vrot.slane %v3777_v58, 5  ;;  %v3783_v21 = vrot.slane %v3781_v59, 4  ;;  %v3789_v49 = vrot.slane %v3787_v6, 5  ;;  %v9644_v22 = vrot.slane %v4249_v63, 9  ;;  %v1613_v14 = vld [vmem:[#allocation2 + $0x2c] sm:$0x1] }
  0x6f   : > { %v3774_v20 = vor.u32 %v3773_v8, %v3770_v47  ;;  %v4359_v23 = vrot.slane %v4250_v43, 5  ;;  %3458 = vrot.lane.b32.xlu1 %v9596_v25, %s10703_s23  ;;  %v2746_v2 = vsel %vm10896_vm12, %v2741_v18, %v2745_v53  ;;  %v4362_v34 = vrot.slane %v4251_v60, 5  ;;  %v1611_v25 = vld [vmem:[#allocation2 + $0x24] sm:$0xf]  ;;  %v1605_v62 = vld [vmem:[#allocation2 + $0xc] sm:$0xf] }
  0x70   : > { %v3784_v27 = vor.u32 %v3783_v21, %v3779_v38  ;;  %v1702_v29 = vshrl.u32 %v1608_v17, 16  ;;  %v9562_v30 = vcombine.low %v2736_v4, %v2746_v2  ;;  %v1705_v45 = vshll.u32 %v1608_v17, 16  ;;  %v1606_v17 = vld [vmem:[#allocation2 + $0x10] sm:$0xf] }
  0x71   : > { %3456 = vrot.lane.b32.xlu0 %v9595_v55, %s10703_s23  ;;  %v3775_v31 = vrot.slane %v3774_v20, 4  ;;  %v4360_v35 = vsel %vm10819_vm9, %v9644_v22, %v4359_v23  ;;  %v4361_v32 = vrot.slane %v4359_v23, 4  ;;  %v1711_v16 = vshll.u32 %v1609_v24, 16  ;;  %v1612_v55 = vld [vmem:[#allocation2 + $0x28] sm:$0xf] }
  0x72   : > { %v3785_v19 = vrot.slane %v3784_v27, 4  ;;  %v1704_v44 = vrot.slane %v1702_v29, 4  ;;  %v1715_v53 = vshrl.u32 %v1609_v24, 16  ;;  %v1721_v56 = vshll.u32 %v1610_v42, 16 }
  0x73   : > { %v3780_v48 = vsel %vm10896_vm12, %v3775_v31, %v3779_v38  ;;  %v4363_v10 = vsel %vm10819_vm9, %v4361_v32, %v4362_v34  ;;  %3133 = vrot.lane.b32.xlu1 %v9562_v30, %s10705_s25  ;;  %v1707_v57 = vrot.slane %v1705_v45, 5  ;;  %v1713_v61 = vrot.slane %v1711_v16, 5  ;;  %v2660_v30 = vld [vmem:[#allocation2 + $0x30] sm:$0xf] }
  0x74   : > { %v3790_v28 = vsel %vm10896_vm12, %v3785_v19, %v3789_v49  ;;  %v9660_v39 = vcombine.low %v4360_v35, %v4363_v10  ;;  %v1717_v5 = vrot.slane %v1715_v53, 4  ;;  %v1723_v47 = vrot.slane %v1721_v56, 5  ;;  %v1607_v49 = vld [vmem:[#allocation2 + $0x14] sm:$0x1] }
  0x75   : > { %4500 = vrot.lane.b32.xlu0 %v9659_v54, %s10704_s24  ;;  %v9626_v63 = vcombine.low %v3780_v48, %v3790_v28  ;;  %v1726_v58 = vshrl.u32 %v1611_v25, 16  ;;  %v1708_v59 = vor.u32 %v1707_v57, %v1704_v44  ;;  %v1729_v43 = vshll.u32 %v1611_v25, 16  ;;  %v2661_v44 = vld [vmem:[#allocation2 + $0x34] sm:$0xf] }
  0x76   : > { %v1735_v4 = vshll.u32 %v1612_v55, 16  ;;  %v1739_v7 = vshrl.u32 %v1612_v55, 16  ;;  %v1718_v8 = vor.u32 %v1717_v5, %v1713_v61  ;;  %v1745_v60 = vshll.u32 %v1613_v14, 16  ;;  %v2662_v55 = vld [vmem:[#allocation2 + $0x38] sm:$0x1] }
  0x77   : > { %v1728_v6 = vrot.slane %v1726_v58, 4  ;;  %v1678_v18 = vshrl.u32 %v1605_v62, 16  ;;  %4177 = vrot.lane.b32.xlu1 %v9626_v63, %s10706_s26  ;;  %v1709_v38 = vrot.slane %v1708_v59, 4  ;;  %v1731_v21 = vrot.slane %v1729_v43, 5  ;;  %v2652_v59 = vld [vmem:[#allocation2 + $0x10] sm:$0xf] }
  0x78   : > { %v1737_v20 = vrot.slane %v1735_v4, 5  ;;  %v1741_v54 = vrot.slane %v1739_v7, 4  ;;  %v1719_v22 = vrot.slane %v1718_v8, 4  ;;  %v1747_v23 = vrot.slane %v1745_v60, 5 }
  0x79   : > { %4502 = vrot.lane.b32.xlu0 %v9660_v39, %s10704_s24  ;;  %v1680_v24 = vrot.slane %v1678_v18, 4  ;;  %v1681_v2 = vshll.u32 %v1605_v62, 16  ;;  %v1714_v27 = vsel %vm10896_vm12, %v1709_v38, %v1713_v61  ;;  %v1732_v34 = vor.u32 %v1731_v21, %v1728_v6  ;;  %v2651_v62 = vld [vmem:[#allocation2 + $0xc] sm:$0xf] }
  0x7a   : > { %v1742_v42 = vor.u32 %v1741_v54, %v1737_v20  ;;  %v1687_v29 = vshll.u32 %v1606_v17, 16  ;;  %v1724_v31 = vsel %vm10896_vm12, %v1719_v22, %v1723_v47  ;;  %v1691_v32 = vshrl.u32 %v1606_v17, 16  ;;  %v2653_v17 = vld [vmem:[#allocation2 + $0x14] sm:$0x1]  ;;  %v3704_v22 = vld [vmem:[#allocation2 + $0x3c] sm:$0xf] }
  0x7b   : > { %v1683_v35 = vrot.slane %v1681_v2, 5  ;;  %v1697_v19 = vshll.u32 %v1607_v49, 16  ;;  %v9499_v45 = vcombine.low %v1714_v27, %v1724_v31  ;;  %v1733_v16 = vrot.slane %v1732_v34, 4  ;;  %v3705_v34 = vld [vmem:[#allocation2 + $0x40] sm:$0xf] }
  0x7c   : > { %v1743_v25 = vrot.slane %v1742_v42, 4  ;;  %v1689_v48 = vrot.slane %v1687_v29, 5  ;;  %v1693_v53 = vrot.slane %v1691_v32, 4  ;;  %v2772_v28 = vshrl.u32 %v2660_v30, 16 }
  0x7d   : > { %v1684_v10 = vor.u32 %v1683_v35, %v1680_v24  ;;  %v1699_v56 = vrot.slane %v1697_v19, 5  ;;  %2089 = vrot.lane.b32.xlu1 %v9499_v45, %s10700_s20  ;;  %v1738_v39 = vsel %vm10896_vm12, %v1733_v16, %v1737_v20  ;;  %v2775_v61 = vshll.u32 %v2660_v30, 16 }
  0x7e   : > { %v1748_v57 = vsel %vm10896_vm12, %v1743_v25, %v1747_v23  ;;  %v2781_v14 = vshll.u32 %v2661_v44, 16  ;;  %v1694_v47 = vor.u32 %v1693_v53, %v1689_v48  ;;  %v2774_v58 = vrot.slane %v2772_v28, 4  ;;  %v3706_v25 = vld [vmem:[#allocation2 + $0x44] sm:$0x1] }
  0x7f   : > { %v9500_v63 = vcombine.low %v1738_v39, %v1748_v57  ;;  %v1685_v5 = vrot.slane %v1684_v10, 4  ;;  %v2777_v43 = vrot.slane %v2775_v61, 5  ;;  %v2785_v7 = vshrl.u32 %v2661_v44, 16  ;;  %v3695_v39 = vld [vmem:[#allocation2 + $0x18] sm:$0xf] }
  0x80   : > { %v2783_v4 = vrot.slane %v2781_v14, 5  ;;  %v2791_v8 = vshll.u32 %v2662_v55, 16  ;;  %v1695_v60 = vrot.slane %v1694_v47, 4  ;;  %v2700_v18 = vshrl.u32 %v2651_v62, 16 }
  0x81   : > { %v1690_v6 = vsel %vm10896_vm12, %v1685_v5, %v1689_v48  ;;  %v2703_v38 = vshll.u32 %v2651_v62, 16  ;;  %2091 = vrot.lane.b32.xlu1 %v9500_v63, %s10700_s20  ;;  %v2778_v21 = vor.u32 %v2777_v43, %v2774_v58  ;;  %v2787_v20 = vrot.slane %v2785_v7, 4  ;;  %v3696_v63 = vld [vmem:[#allocation2 + $0x1c] sm:$0xf]  ;;  %v3697_v43 = vld [vmem:[#allocation2 + $0x20] sm:$0x1] }
  0x82   : > { %v2793_v54 = vrot.slane %v2791_v8, 5  ;;  %v2709_v49 = vshll.u32 %v2652_v59, 16  ;;  %v1700_v23 = vsel %vm10896_vm12, %v1695_v60, %v1699_v56  ;;  %v2702_v24 = vrot.slane %v2700_v18, 4 }
  0x83   : > { %v2705_v2 = vrot.slane %v2703_v38, 5  ;;  %v2713_v27 = vshrl.u32 %v2652_v59, 16  ;;  %v9498_v42 = vcombine.low %v1690_v6, %v1700_v23  ;;  %v2779_v29 = vrot.slane %v2778_v21, 4  ;;  %v2658_v23 = vld [vmem:[#allocation2 + $0x28] sm:$0xf] }
  0x84   : > { %v2788_v30 = vor.u32 %v2787_v20, %v2783_v4  ;;  %v2711_v31 = vrot.slane %v2709_v49, 5  ;;  %v2719_v19 = vshll.u32 %v2653_v17, 16  ;;  %v3816_v44 = vshrl.u32 %v3704_v22, 16 }
  0x85   : > { %v2706_v35 = vor.u32 %v2705_v2, %v2702_v24  ;;  %v2715_v32 = vrot.slane %v2713_v27, 4  ;;  %2087 = vrot.lane.b32.xlu0 %v9498_v42, %s10700_s20  ;;  %v2784_v45 = vsel %vm10896_vm12, %v2779_v29, %v2783_v4  ;;  %v3819_v48 = vshll.u32 %v3704_v22, 16  ;;  %v2657_v4 = vld [vmem:[#allocation2 + $0x24] sm:$0xf] }
  0x86   : > { %v2789_v16 = vrot.slane %v2788_v30, 4  ;;  %v3825_v10 = vshll.u32 %v3705_v34, 16  ;;  %v2721_v55 = vrot.slane %v2719_v19, 5  ;;  %v3818_v28 = vrot.slane %v3816_v44, 4  ;;  %v2659_v44 = vld [vmem:[#allocation2 + $0x2c] sm:$0x1] }
  0x87   : > { %v2707_v53 = vrot.slane %v2706_v35, 4  ;;  %v2716_v56 = vor.u32 %v2715_v32, %v2711_v31  ;;  %v3821_v61 = vrot.slane %v3819_v48, 5  ;;  %v3829_v62 = vshrl.u32 %v3705_v34, 16 }
  0x88   : > { %v2794_v57 = vsel %vm10896_vm12, %v2789_v16, %v2793_v54  ;;  %v3827_v14 = vrot.slane %v3825_v10, 5  ;;  %v3835_v59 = vshll.u32 %v3706_v25, 16  ;;  %v3744_v6 = vshrl.u32 %v3695_v39, 16  ;;  %v1614_v16 = vld [vmem:[#allocation2 + $0x30] sm:$0xf] }
  0x89   : > { %v9564_v5 = vcombine.low %v2784_v45, %v2794_v57  ;;  %v2712_v47 = vsel %vm10896_vm12, %v2707_v53, %v2711_v31  ;;  %v2717_v58 = vrot.slane %v2716_v56, 4  ;;  %v3822_v7 = vor.u32 %v3821_v61, %v3818_v28  ;;  %v1615_v56 = vld [vmem:[#allocation2 + $0x34] sm:$0xf] }
  0x8a   : > { %v3831_v8 = vrot.slane %v3829_v62, 4  ;;  %v3747_v60 = vshll.u32 %v3695_v39, 16  ;;  %v3837_v18 = vrot.slane %v3835_v59, 5  ;;  %v3753_v38 = vshll.u32 %v3696_v63, 16 }
  0x8b   : > { %3137 = vrot.lane.b32.xlu1 %v9564_v5, %s10705_s25  ;;  %v2722_v17 = vsel %vm10896_vm12, %v2717_v58, %v2721_v55  ;;  %v3757_v21 = vshrl.u32 %v3696_v63, 16  ;;  %v3823_v54 = vrot.slane %v3822_v7, 4  ;;  %v3746_v22 = vrot.slane %v3744_v6, 4  ;;  %v1616_v63 = vld [vmem:[#allocation2 + $0x38] sm:$0x1] }
  0x8c   : > { %v9561_v20 = vcombine.low %v2712_v47, %v2722_v17  ;;  %v3832_v49 = vor.u32 %v3831_v8, %v3827_v14  ;;  %v3749_v24 = vrot.slane %v3747_v60, 5  ;;  %v3755_v2 = vrot.slane %v3753_v38, 5  ;;  %v3702_v7 = vld [vmem:[#allocation2 + $0x34] sm:$0xf] }
  0x8d   : > { %v3759_v27 = vrot.slane %v3757_v21, 4  ;;  %v3763_v34 = vshll.u32 %v3697_v43, 16  ;;  %v3828_v42 = vsel %vm10896_vm12, %v3823_v54, %v3827_v14  ;;  %v2748_v30 = vshrl.u32 %v2657_v4, 16  ;;  %v3703_v54 = vld [vmem:[#allocation2 + $0x38] sm:$0x1] }
  0x8e   : > { %3131 = vrot.lane.b32.xlu0 %v9561_v20, %s10705_s25  ;;  %v3833_v29 = vrot.slane %v3832_v49, 4  ;;  %v2751_v31 = vshll.u32 %v2657_v4, 16  ;;  %v3750_v35 = vor.u32 %v3749_v24, %v3746_v22  ;;  %v2757_v45 = vshll.u32 %v2658_v23, 16  ;;  %v3701_v4 = vld [vmem:[#allocation2 + $0x30] sm:$0xf] }
  0x8f   : > { %v3760_v32 = vor.u32 %v3759_v27, %v3755_v2  ;;  %v3765_v19 = vrot.slane %v3763_v34, 5  ;;  %v2750_v48 = vrot.slane %v2748_v30, 4  ;;  %v2761_v53 = vshrl.u32 %v2658_v23, 16  ;;  %v1617_v49 = vld [vmem:[#allocation2 + $0x3c] sm:$0xf] }
  0x90   : > { %v3838_v25 = vsel %vm10896_vm12, %v3833_v29, %v3837_v18  ;;  %v2753_v10 = vrot.slane %v2751_v31, 5  ;;  %v3751_v28 = vrot.slane %v3750_v35, 4  ;;  %v2759_v57 = vrot.slane %v2757_v45, 5  ;;  %v1618_v30 = vld [vmem:[#allocation2 + $0x40] sm:$0xf] }
  0x91   : > { %v9628_v55 = vcombine.low %v3828_v42, %v3838_v25  ;;  %v3761_v39 = vrot.slane %v3760_v32, 4  ;;  %v2763_v14 = vrot.slane %v2761_v53, 4  ;;  %v2767_v62 = vshll.u32 %v2659_v44, 16 }
  0x92   : > { %v2754_v61 = vor.u32 %v2753_v10, %v2750_v48  ;;  %v1750_v5 = vshrl.u32 %v1614_v16, 16  ;;  %v3756_v47 = vsel %vm10896_vm12, %v3751_v28, %v3755_v2  ;;  %v1753_v59 = vshll.u32 %v1614_v16, 16  ;;  %v1619_v48 = vld [vmem:[#allocation2 + $0x44] sm:$0x1]  ;;  %v2162_v28 = vld [vmem:[#allocation2 + $0x30] sm:$0xe] }
  0x93   : > { %4181 = vrot.lane.b32.xlu1 %v9628_v55, %s10706_s26  ;;  %v3766_v58 = vsel %vm10896_vm12, %v3761_v39, %v3765_v19  ;;  %v1759_v43 = vshll.u32 %v1615_v56, 16  ;;  %v2764_v60 = vor.u32 %v2763_v14, %v2759_v57  ;;  %v2769_v17 = vrot.slane %v2767_v62, 5  ;;  %v2163_v62 = vld [vmem:[#allocation2 + $0x34] sm:$0xf] }
  0x94   : > { %v9625_v8 = vcombine.low %v3756_v47, %v3766_v58  ;;  %v2755_v6 = vrot.slane %v2754_v61, 4  ;;  %v1752_v18 = vrot.slane %v1750_v5, 4  ;;  %v1755_v38 = vrot.slane %v1753_v59, 5 }
  0x95   : > { %v1761_v21 = vrot.slane %v1759_v43, 5  ;;  %v1763_v20 = vshrl.u32 %v1615_v56, 16  ;;  %v2765_v23 = vrot.slane %v2764_v60, 4  ;;  %v1769_v24 = vshll.u32 %v1616_v63, 16 }
  0x96   : > { %4175 = vrot.lane.b32.xlu0 %v9625_v8, %s10706_s26  ;;  %v2760_v22 = vsel %vm10896_vm12, %v2755_v6, %v2759_v57  ;;  %v3792_v2 = vshrl.u32 %v3701_v4, 16  ;;  %v1756_v27 = vor.u32 %v1755_v38, %v1752_v18  ;;  %v3795_v42 = vshll.u32 %v3701_v4, 16  ;;  %v2164_v8 = vld [vmem:[#allocation2 + $0x38] sm:$0x1]  ;;  %v2165_v38 = vld [vmem:[#allocation2 + $0x3c] sm:$0xe] }
  0x97   : > { %v1765_v34 = vrot.slane %v1763_v20, 4  ;;  %v3801_v29 = vshll.u32 %v3702_v7, 16  ;;  %v2770_v31 = vsel %vm10896_vm12, %v2765_v23, %v2769_v17  ;;  %v1771_v35 = vrot.slane %v1769_v24, 5  ;;  %v2167_v23 = vld [vmem:[#allocation2 + $0x44] sm:$0x1] }
  0x98   : > { %v3794_v32 = vrot.slane %v3792_v2, 4  ;;  %v3805_v19 = vshrl.u32 %v3702_v7, 16  ;;  %v9563_v44 = vcombine.low %v2760_v22, %v2770_v31  ;;  %v1757_v45 = vrot.slane %v1756_v27, 4  ;;  %v2166_v22 = vld [vmem:[#allocation2 + $0x40] sm:$0xf] }
  0x99   : > { %v1766_v16 = vor.u32 %v1765_v34, %v1761_v21  ;;  %v3797_v25 = vrot.slane %v3795_v42, 5  ;;  %v3803_v10 = vrot.slane %v3801_v29, 5  ;;  %v3811_v56 = vshll.u32 %v3703_v54, 16 }
  0x9a   : > { %v3807_v53 = vrot.slane %v3805_v19, 4  ;;  %v1774_v55 = vshrl.u32 %v1617_v49, 16  ;;  %3135 = vrot.lane.b32.xlu0 %v9563_v44, %s10705_s25  ;;  %v1762_v39 = vsel %vm10896_vm12, %v1757_v45, %v1761_v21  ;;  %v1777_v14 = vshll.u32 %v1617_v49, 16 }
  0x9b   : > { %v1767_v57 = vrot.slane %v1766_v16, 4  ;;  %v3798_v61 = vor.u32 %v3797_v25, %v3794_v32  ;;  %v3813_v5 = vrot.slane %v3811_v56, 5  ;;  %v1783_v58 = vshll.u32 %v1618_v30, 16 }
  0x9c   : > { %v3808_v63 = vor.u32 %v3807_v53, %v3803_v10  ;;  %v1776_v47 = vrot.slane %v1774_v55, 4  ;;  %v1779_v4 = vrot.slane %v1777_v14, 5  ;;  %v1787_v7 = vshrl.u32 %v1618_v30, 16 }
  0x9d   : > { %v1772_v59 = vsel %vm10896_vm12, %v1767_v57, %v1771_v35  ;;  %v3799_v43 = vrot.slane %v3798_v61, 4  ;;  %v1785_v17 = vrot.slane %v1783_v58, 5  ;;  %v1793_v18 = vshll.u32 %v1619_v48, 16 }
  0x9e   : > { %v9501_v6 = vcombine.low %v1762_v39, %v1772_v59  ;;  %v3809_v60 = vrot.slane %v3808_v63, 4  ;;  %v1780_v20 = vor.u32 %v1779_v4, %v1776_v47  ;;  %v1789_v54 = vrot.slane %v1787_v7, 4  ;;  %v2663_v39 = vld [vmem:[#allocation2 + $0x3c] sm:$0xf]  ;;  %v1384_v63 = vld [vmem:[#allocation2 + $0x50] sm:$0x1] }
  0x9f   : > { %v3804_v21 = vsel %vm10896_vm12, %v3799_v43, %v3803_v10  ;;  %v9517_v49 = vrot.slane %v2162_v28, 9  ;;  %v1795_v2 = vrot.slane %v1793_v18, 5  ;;  %v2279_v27 = vrot.slane %v2163_v62, 5  ;;  %v1380_v28 = vld [vmem:[#allocation2 + $0x48] sm:$0xf]  ;;  %v10294_v47 = vld [vmem:[#allocation2 + $0x3c] sm:$0xff]  }
  0xa0   : > { %2093 = vrot.lane.b32.xlu1 %v9501_v6, %s10700_s20  ;;  %v3814_v24 = vsel %vm10896_vm12, %v3809_v60, %v3813_v5  ;;  %v2282_v34 = vrot.slane %v2164_v8, 5  ;;  %v1781_v29 = vrot.slane %v1780_v20, 4  ;;  %v1790_v30 = vor.u32 %v1789_v54, %v1785_v17  ;;  %v2665_v43 = vld [vmem:[#allocation2 + $0x44] sm:$0x1]  ;;  %v3208_v60 = vld [vmem:[#allocation2 + $0x3c] sm:$0xe] }
  0xa1   : > { %v9627_v42 = vcombine.low %v3804_v21, %v3814_v24  ;;  %v9518_v31 = vrot.slane %v2165_v38, 9  ;;  %v2280_v35 = vsel %vm10819_vm9, %v9517_v49, %v2279_v27  ;;  %v2281_v32 = vrot.slane %v2279_v27, 4  ;;  %v3210_v54 = vld [vmem:[#allocation2 + $0x44] sm:$0x1] }
  0xa2   : > { %v2286_v19 = vrot.slane %v2166_v22, 5  ;;  %v2289_v44 = vrot.slane %v2167_v23, 5  ;;  %v1786_v45 = vsel %vm10896_vm12, %v1781_v29, %v1785_v17  ;;  %v1791_v16 = vrot.slane %v1790_v30, 4  ;;  %v3209_v17 = vld [vmem:[#allocation2 + $0x40] sm:$0xf] }
  0xa3   : > { %4179 = vrot.lane.b32.xlu0 %v9627_v42, %s10706_s26  ;;  %v1110_v25 = vrot.slane %v1108_v36, 7  ;;  %v1111_v48 = vshll.u32 %v11084_v15, 16  ;;  %v2283_v10 = vsel %vm10819_vm9, %v2281_v32, %v2282_v34  ;;  %v1116_v55 = vshrl.u32 %v11126_v3, 16  ;;  %v2664_v36 = vld [vmem:[#allocation2 + $0x40] sm:$0xf] }
  0xa4   : > { %v2287_v53 = vsel %vm10819_vm9, %v9518_v31, %v2286_v19  ;;  %v2288_v56 = vrot.slane %v2286_v19, 4  ;;  %v1796_v57 = vsel %vm10896_vm12, %v1791_v16, %v1795_v2  ;;  %v9533_v61 = vcombine.low %v2280_v35, %v2283_v10 }
  0xa5   : > { %v1113_v14 = vor.u32 %v1111_v48, %v1110_v25  ;;  %v1114_v62 = vrot.slane %v1110_v25, 4  ;;  %v9502_v15 = vcombine.low %v1786_v45, %v1796_v57  ;;  %v1118_v58 = vrot.slane %v1116_v55, 7 }
  0xa6   : > { %v2290_v5 = vsel %vm10819_vm9, %v2288_v56, %v2289_v44  ;;  %v1119_v59 = vshll.u32 %v11126_v3, 16  ;;  %v2796_v8 = vshrl.u32 %v2663_v39, 16  ;;  %v2799_v6 = vshll.u32 %v2663_v39, 16 }
  0xa7   : > { %2417 = vrot.lane.b32.xlu0 %v9533_v61, %s10699_s19  ;;  %v9534_v4 = vcombine.low %v2287_v53, %v2290_v5  ;;  %v1381_v7 = vsel %vm10992_vm14, %v1113_v14, %v1380_v28  ;;  %2095 = vrot.lane.b32.xlu1 %v9502_v15, %s10700_s20  ;;  %v1123_v38 = vrot.slane %v1118_v58, 4  ;;  %v2805_v21 = vshll.u32 %v2664_v36, 16  ;;  %v606_v28 = vld [vmem:[%s10826_s16 + $0x80] sm:$0xff] }
  0xa8   : > { %v1121_v18 = vor.u32 %v1119_v59, %v1118_v58  ;;  %1382 = vst [vmem:[#allocation2 + $0x48] sm:$0xf] %v1381_v7  ;;  %v2809_v20 = vshrl.u32 %v2664_v36, 16  ;;  %v2798_v3 = vrot.slane %v2796_v8, 4  ;;  %v2801_v49 = vrot.slane %v2799_v6, 5 }
  0xa9   : > { %v2815_v22 = vshll.u32 %v2665_v43, 16  ;;  %v2807_v24 = vrot.slane %v2805_v21, 5  ;;  %v1385_v27 = vsel %vm10791_vm4, %v1123_v38, %v1384_v63  ;;  %v9581_v42 = vrot.slane %v3208_v60, 9 }
  0xaa   : > { %v1122_v23 = vsel %vm10999_vm15, %v1114_v62, %v1121_v18  ;;  %v2811_v2 = vrot.slane %v2809_v20, 4  ;;  %v2802_v34 = vor.u32 %v2801_v49, %v2798_v3  ;;  %1386 = vst [vmem:[#allocation2 + $0x50] sm:$0x1] %v1385_v27  ;;  %v3322_v29 = vrot.slane %v3209_v17, 5 }
  0xab   : > { %2594 = vrot.lane.b32.xlu0 %v10294_v47, %s10701_s21  ;;  %1383 = vst.msk [vmem:[#allocation2 + $0x4c] sm:$0xf] %vm348_vm0, %v1122_v23  ;;  %v3325_v30 = vrot.slane %v3210_v54, 5  ;;  %2419 = vrot.lane.b32.xlu1 %v9534_v4, %s10699_s19  ;;  %v2817_v35 = vrot.slane %v2815_v22, 5  ;;  %v904_v32 = vmul.f32 %v11143_v41, %v10961_v33  ;;  %v810_v25 = vadd.f32 1.0, %v11114_v46 }
  0xac   : > { %v2812_v31 = vor.u32 %v2811_v2, %v2807_v24  ;;  %v2803_v19 = vrot.slane %v2802_v34, 4  ;;  %v3324_v44 = vrot.slane %v3322_v29, 4  ;;  %v3323_v53 = vsel %vm10819_vm9, %v9581_v42, %v3322_v29  ;;  %v1387_v4 = vld [vmem:[#allocation2 + $0x54] sm:$0xf] }
  0xad   : > { %v10004_v16 = vpack.c.bf16 %v904_v32, %v904_v32  ;;  %v811_v55 = vadd.f32 1.0, %v11133_v50  ;;  %v905_v46 = vmul.f32 %v11150_v52, %v10965_v37  ;;  %10450 = vrcp.f32 %v810_v25  ;;  %v11272_v50 = vld [vmem:[%s13876_s2] ss:$0 sm:$0xff] }
  0xae   : > { %v2813_v45 = vrot.slane %v2812_v31, 4  ;;  %v2808_v48 = vsel %vm10896_vm12, %v2803_v19, %v2807_v24  ;;  %v3326_v56 = vsel %vm10819_vm9, %v3324_v44, %v3325_v30  ;;  %v11275_v47 = vmul.f32 %v11272_v50, %v606_v28 }
  0xaf   : > { %v2666_v10 = vld [vmem:[#allocation2 + $0x48] sm:$0xf]  ;;  %v1125_v14 = vshrl.u32 %v10004_v16, 16  ;;  %v1128_v62 = vshll.u32 %v10004_v16, 16  ;;  %v9597_v5 = vcombine.low %v3323_v53, %v3326_v56  ;;  %v10005_v17 = vpack.c.bf16 %v905_v46, %v905_v46 }
  0xb0   : > { %v2818_v33 = vsel %vm10896_vm12, %v2813_v45, %v2817_v35  ;;  %v2820_v41 = vshrl.u32 %v2666_v10, 16  ;;  %v2823_v39 = vshll.u32 %v2666_v10, 16  ;;  %v3211_v57 = vld [vmem:[#allocation2 + $0x48] sm:$0xe]  ;;  %10452 = vrcp.f32 %v811_v55 }
  0xb1   : > { %v9565_v61 = vcombine.low %v2808_v48, %v2818_v33  ;;  %v2668_v58 = vld [vmem:[#allocation2 + $0x50] sm:$0x1]  ;;  %v9582_v43 = vrot.slane %v3211_v57, 9  ;;  %v3707_v7 = vld [vmem:[#allocation2 + $0x48] sm:$0xf]  ;;  %v1127_v18 = vrot.slane %v1125_v14, 7 }
  0xb2   : > { %v10295_v36 = vld [vmem:[#allocation2 + $0x48] sm:$0xff]   ;;  %v2822_v15 = vrot.slane %v2820_v41, 4  ;;  %v2825_v37 = vrot.slane %v2823_v39, 5  ;;  %v2839_v8 = vshll.u32 %v2668_v58, 16  ;;  %v3213_v60 = vld [vmem:[#allocation2 + $0x50] sm:$0x1]  ;;  %v11294_v58 = vpop.permute.xlu1 %2409 }
  0xb3   : > { %v2667_v63 = vld [vmem:[#allocation2 + $0x4c] sm:$0xf]  ;;  %3139 = vrot.lane.b32.xlu0 %v9565_v61, %s10705_s25  ;;  %2596 = vrot.lane.b32.xlu1 %v10295_v36, %s10701_s21  ;;  %v3332_v49 = vrot.slane %v3213_v60, 5  ;;  %v1130_v22 = vor.u32 %v1128_v62, %v1127_v18  ;;  %v1131_v23 = vrot.slane %v1127_v18, 4  ;;  %v1133_v30 = vshrl.u32 %v10005_v17, 16 }
  0xb4   : > { %v2829_v52 = vshll.u32 %v2667_v63, 16  ;;  %v2833_v59 = vshrl.u32 %v2667_v63, 16  ;;  %v3212_v6 = vld [vmem:[#allocation2 + $0x4c] sm:$0xf]  ;;  %v2826_v38 = vor.u32 %v2825_v37, %v2822_v15  ;;  %v2841_v3 = vrot.slane %v2839_v8, 5 }
  0xb5   : > { %v3329_v54 = vrot.slane %v3212_v6, 5  ;;  %v10296_v42 = vld [vmem:[#allocation2 + $0x48] sm:$0xff]   ;;  %v1136_v31 = vshll.u32 %v10005_v17, 16  ;;  %v1388_v35 = vsel %vm10992_vm14, %v1130_v22, %v1387_v4  ;;  %v3709_v32 = vld [vmem:[#allocation2 + $0x50] sm:$0x1]  ;;  %v3840_v19 = vshrl.u32 %v3707_v7, 16 }
  0xb6   : > { %v2831_v21 = vrot.slane %v2829_v52, 5  ;;  %v2835_v20 = vrot.slane %v2833_v59, 4  ;;  %v2827_v24 = vrot.slane %v2826_v38, 4  ;;  %v3708_v29 = vld [vmem:[#allocation2 + $0x4c] sm:$0xf]  ;;  %v3843_v25 = vshll.u32 %v3707_v7, 16  ;;  %v11296_v7 = vpop.permute.xlu0 %2085 }
  0xb7   : > { %3460 = vrot.lane.b32.xlu0 %v9597_v5, %s10703_s23  ;;  %v11282_v27 = vsel %vm10819_vm9, %v9582_v43, %v3329_v54  ;;  %v3331_v34 = vrot.slane %v3329_v54, 4  ;;  %1389 = vst [vmem:[#allocation2 + $0x54] sm:$0xf] %v1388_v35  ;;  %v1391_v48 = vld [vmem:[#allocation2 + $0x5c] sm:$0x1]  ;;  %v1135_v56 = vrot.slane %v1133_v30, 7  ;;  %v10451_v14 = vpop.eup %10450 }
  0xb8   : > { %v2836_v2 = vor.u32 %v2835_v20, %v2831_v21  ;;  %v2832_v44 = vsel %vm10896_vm12, %v2827_v24, %v2831_v21  ;;  %v4252_v10 = vld [vmem:[#allocation2 + $0x48] sm:$0xe]  ;;  %v3842_v55 = vrot.slane %v3840_v19, 4  ;;  %v3849_v28 = vshll.u32 %v3708_v29, 16  ;;  %v4253_v33 = vld [vmem:[#allocation2 + $0x4c] sm:$0xf] }
  0xb9   : > { %v3333_v16 = vsel %vm10819_vm9, %v3331_v34, %v3332_v49  ;;  %v3845_v39 = vrot.slane %v3843_v25, 5  ;;  %v3853_v57 = vshrl.u32 %v3708_v29, 16  ;;  %v3859_v46 = vshll.u32 %v3709_v32, 16  ;;  %v4254_v61 = vld [vmem:[#allocation2 + $0x50] sm:$0x1]  ;;  %v607_v8 = vld [vmem:[%s10826_s16 + $0x88] sm:$0xff] }
  0xba   : > { %v2837_v45 = vrot.slane %v2836_v2, 4  ;;  %v9598_v53 = vcombine.low %v11282_v27, %v3333_v16  ;;  %v1138_v36 = vor.u32 %v1136_v31, %v1135_v56  ;;  %v1140_v63 = vrot.slane %v1135_v56, 4  ;;  %v1620_v5 = vld [vmem:[#allocation2 + $0x48] sm:$0xf]  ;;  %v1621_v4 = vld [vmem:[#allocation2 + $0x4c] sm:$0xf]  ;;  %v10453_v6 = vpop.eup %10452 }
  0xbb   : > { %3638 = vrot.lane.b32.xlu0 %v10296_v42, %s10702_s22  ;;  %v3851_v15 = vrot.slane %v3849_v28, 5  ;;  %v3846_v37 = vor.u32 %v3845_v39, %v3842_v55  ;;  %v3855_v52 = vrot.slane %v3853_v57, 4  ;;  %v3861_v59 = vrot.slane %v3859_v46, 5  ;;  %v1622_v30 = vld [vmem:[#allocation2 + $0x50] sm:$0x1] }
  0xbc   : > { %v2842_v41 = vsel %vm10896_vm12, %v2837_v45, %v2841_v3  ;;  %v9645_v43 = vrot.slane %v4252_v10, 9  ;;  %v1139_v60 = vsel %vm10999_vm15, %v1131_v23, %v1138_v36  ;;  %v1392_v17 = vsel %vm10791_vm4, %v1140_v63, %v1391_v48 }
  0xbd   : > { %v9566_v62 = vcombine.low %v2832_v44, %v2842_v41  ;;  %v4366_v18 = vrot.slane %v4253_v33, 5  ;;  %v4369_v38 = vrot.slane %v4254_v61, 5  ;;  %1390 = vst.msk [vmem:[#allocation2 + $0x58] sm:$0xf] %vm348_vm0, %v1139_v60  ;;  %v3847_v21 = vrot.slane %v3846_v37, 4 }
  0xbe   : > { %v3856_v20 = vor.u32 %v3855_v52, %v3851_v15  ;;  %1393 = vst [vmem:[#allocation2 + $0x5c] sm:$0x1] %v1392_v17  ;;  %v1798_v54 = vshrl.u32 %v1620_v5, 16  ;;  %v1801_v3 = vshll.u32 %v1620_v5, 16  ;;  %v3710_v49 = vld [vmem:[#allocation2 + $0x54] sm:$0xf]  ;;  %v11308_v23 = vmul.f32 %v11272_v50, %v607_v8 }
  0xbf   : > { %3141 = vrot.lane.b32.xlu1 %v9566_v62, %s10705_s25  ;;  %v4367_v22 = vsel %vm10819_vm9, %v9645_v43, %v4366_v18  ;;  %v4368_v24 = vrot.slane %v4366_v18, 4  ;;  %v1807_v2 = vshll.u32 %v1621_v4, 16  ;;  %v3852_v27 = vsel %vm10896_vm12, %v3847_v21, %v3851_v15  ;;  %v4255_v19 = vld [vmem:[#allocation2 + $0x54] sm:$0xe]  ;;  %v11327_v15 = vld [vmem:[%s13877_s3] ss:$0 sm:$0xff] }
  0xc0   : > { %v3857_v34 = vrot.slane %v3856_v20, 4  ;;  %v3864_v42 = vshrl.u32 %v3710_v49, 16  ;;  %v3867_v29 = vshll.u32 %v3710_v49, 16  ;;  %v1800_v35 = vrot.slane %v1798_v54, 4  ;;  %v1623_v44 = vld [vmem:[#allocation2 + $0x54] sm:$0xf] }
  0xc1   : > { %v4370_v31 = vsel %vm10819_vm9, %v4368_v24, %v4369_v38  ;;  %v1803_v32 = vrot.slane %v1801_v3, 5  ;;  %v906_v45 = vmul.f32 %v10451_v14, %v10968_v40  ;;  %v11316_v16 = vpop.permute.xlu1 %2588  ;;  %v1809_v56 = vrot.slane %v1807_v2, 5 }
  0xc2   : > { %v3862_v25 = vsel %vm10896_vm12, %v3857_v34, %v3861_v59  ;;  %v3866_v48 = vrot.slane %v3864_v42, 4  ;;  %v3869_v10 = vrot.slane %v3867_v29, 5  ;;  %v1811_v33 = vshrl.u32 %v1621_v4, 16 }
  0xc3   : > { %3462 = vrot.lane.b32.xlu1 %v9598_v53, %s10703_s23  ;;  %v11320_v55 = vpop.permute.xlu0 %2586  ;;  %v9629_v53 = vcombine.low %v3852_v27, %v3862_v25  ;;  %v1804_v28 = vor.u32 %v1803_v32, %v1800_v35  ;;  %v1817_v41 = vshll.u32 %v1622_v30, 16  ;;  %v9646_v57 = vrot.slane %v4255_v19, 9  ;;  %v2168_v35 = vld [vmem:[#allocation2 + $0x48] sm:$0xe]  ;;  %v2169_v32 = vld [vmem:[#allocation2 + $0x4c] sm:$0xf] }
  0xc4   : > { %v3870_v39 = vor.u32 %v3869_v10, %v3866_v48  ;;  %v1822_v46 = vshrl.u32 %v1623_v44, 16  ;;  %v1825_v61 = vshll.u32 %v1623_v44, 16  ;;  %v10297_v62 = vld [vmem:[#allocation2 + $0x54] sm:$0xff]   ;;  %v9661_v14 = vcombine.low %v4367_v22, %v4370_v31 }
  0xc5   : > { %4183 = vrot.lane.b32.xlu0 %v9629_v53, %s10706_s26  ;;  %v3711_v40 = vld [vmem:[#allocation2 + $0x58] sm:$0xf]  ;;  %v1805_v36 = vrot.slane %v1804_v28, 4  ;;  %v907_v63 = vmul.f32 %v10453_v6, %v10975_v51  ;;  %v11331_v5 = vadd.f32 %v11327_v15, %v11275_v47  ;;  %v3712_v37 = vld [vmem:[#allocation2 + $0x5c] sm:$0x1]  ;;  %v1813_v4 = vrot.slane %v1811_v33, 4 }
  0xc6   : > { %v3871_v52 = vrot.slane %v3870_v39, 4  ;;  %v3873_v59 = vshll.u32 %v3711_v40, 16  ;;  %v3877_v43 = vshrl.u32 %v3711_v40, 16  ;;  %v3883_v60 = vshll.u32 %v3712_v37, 16  ;;  %v4256_v17 = vld [vmem:[#allocation2 + $0x58] sm:$0xf]  ;;  %v11340_v47 = vpop.permute.xlu1 %3632 }
  0xc7   : > { %v11333_v8 = vpop.permute.xlu0 %3630  ;;  %3640 = vrot.lane.b32.xlu1 %v10297_v62, %s10702_s22  ;;  %v1810_v51 = vsel %vm10896_vm12, %v1805_v36, %v1809_v56  ;;  %v1819_v6 = vrot.slane %v1817_v41, 5  ;;  %v4257_v18 = vld [vmem:[#allocation2 + $0x5c] sm:$0x1]  ;;  %v11338_v38 = vpack.c.bf16 %v906_v45, %v906_v45  ;;  %v1814_v54 = vor.u32 %v1813_v4, %v1809_v56  ;;  %v1624_v49 = vld [vmem:[#allocation2 + $0x58] sm:$0xf] }
  0xc8   : > { %v3875_v21 = vrot.slane %v3873_v59, 5  ;;  %v3879_v20 = vrot.slane %v3877_v43, 4  ;;  %v4373_v3 = vrot.slane %v4256_v17, 5  ;;  %v4376_v22 = vrot.slane %v4257_v18, 5  ;;  %v1625_v24 = vld [vmem:[#allocation2 + $0x5c] sm:$0x1] }
  0xc9   : > { %4504 = vrot.lane.b32.xlu0 %v9661_v14, %s10704_s24  ;;  %v1824_v2 = vrot.slane %v1822_v46, 4  ;;  %v1827_v27 = vrot.slane %v1825_v61, 5  ;;  %v11343_v34 = vpack.c.bf16 %v907_v63, %v907_v63  ;;  %v3885_v29 = vrot.slane %v3883_v60, 5  ;;  %v2170_v33 = vld [vmem:[#allocation2 + $0x50] sm:$0x1]  ;;  %v10311_v43 = vld [vmem:[%s13878_s4] sm:$0xff]  }
  0xca   : > { %v3880_v42 = vor.u32 %v3879_v20, %v3875_v21  ;;  %v1815_v30 = vrot.slane %v1814_v54, 4  ;;  %v4374_v31 = vsel %vm10819_vm9, %v9646_v57, %v4373_v3  ;;  %v4375_v44 = vrot.slane %v4373_v3, 4  ;;  %v2171_v41 = vld [vmem:[#allocation2 + $0x54] sm:$0xe]  ;;  %v2172_v62 = vld [vmem:[#allocation2 + $0x58] sm:$0xf]  ;;  %10113 = vmatprep.subr.bf16.mxu0 %v10311_v43 }
  0xcb   : > { %v11347_v19 = vpop.permute.xlu0 %2590  ;;  %v1828_v45 = vor.u32 %v1827_v27, %v1824_v2  ;;  %v1831_v25 = vshll.u32 %v1624_v49, 16  ;;  %v1835_v48 = vshrl.u32 %v1624_v49, 16  ;;  %v3876_v10 = vsel %vm10896_vm12, %v3871_v52, %v3875_v21  ;;  %v2173_v40 = vld [vmem:[#allocation2 + $0x5c] sm:$0x1]  ;;  %v2669_v54 = vld [vmem:[#allocation2 + $0x54] sm:$0xf]  ;;  %10114 = vmatpush3.bf16.msra.mxu0 %v10311_v43 }
  0xcc   : > { %v3881_v56 = vrot.slane %v3880_v42, 4  ;;  %v1820_v53 = vsel %vm10896_vm12, %v1815_v30, %v1819_v6  ;;  %v1841_v28 = vshll.u32 %v1625_v24, 16  ;;  %v4377_v57 = vsel %vm10819_vm9, %v4375_v44, %v4376_v22  ;;  %v387_v43 = vld [vmem:[#allocation2 + $0x6c] sm:$0x1] }
  0xcd   : > { %v9503_v39 = vcombine.low %v1810_v51, %v1820_v53  ;;  %v1833_v46 = vrot.slane %v1831_v25, 5  ;;  %v9519_v61 = vrot.slane %v2168_v35, 9  ;;  %v11355_v14 = vpop.permute.xlu1 %2592  ;;  %v9662_v63 = vcombine.low %v4374_v31, %v4377_v57  ;;  %v2670_v53 = vld [vmem:[#allocation2 + $0x58] sm:$0xf] }
  0xce   : > { %v3886_v36 = vsel %vm10896_vm12, %v3881_v56, %v3885_v29  ;;  %v1829_v37 = vrot.slane %v1828_v45, 4  ;;  %v1837_v52 = vrot.slane %v1835_v48, 4  ;;  %v1843_v60 = vrot.slane %v1841_v28, 5  ;;  %v1394_v45 = vld [vmem:[#allocation2 + $0x60] sm:$0xf] }
  0xcf   : > { %v11359_v59 = vpop.permute.xlu0 %3634  ;;  %v9630_v4 = vcombine.low %v3876_v10, %v3886_v36  ;;  %v2293_v51 = vrot.slane %v2169_v32, 5  ;;  %v2296_v6 = vrot.slane %v2170_v33, 5  ;;  %4506 = vrot.lane.b32.xlu0 %v9662_v63, %s10704_s24  ;;  %v9520_v18 = vrot.slane %v2171_v41, 9  ;;  %v2671_v28 = vld [vmem:[#allocation2 + $0x5c] sm:$0x1] }
  0xd0   : > { %13909 = vst [vmem:[#allocation6_spill] sm:$0xff] %v11359_v59  ;;  %v1838_v17 = vor.u32 %v1837_v52, %v1833_v46  ;;  %v2300_v21 = vrot.slane %v2172_v62, 5  ;;  %v2303_v20 = vrot.slane %v2173_v40, 5  ;;  %v1142_v22 = vshrl.u32 %v11338_v38, 16  ;;  %v10298_v40 = vld [vmem:[#allocation2 + $0x54] sm:$0xff]   ;;  %v10300_v52 = vld [vmem:[#allocation2] sm:$0xff]  }
  0xd1   : > { %4185 = vrot.lane.b32.xlu1 %v9630_v4, %s10706_s26  ;;  %v2294_v3 = vsel %vm10819_vm9, %v9519_v61, %v2293_v51  ;;  %v2295_v49 = vrot.slane %v2293_v51, 4  ;;  %v1145_v24 = vshll.u32 %v11338_v38, 16  ;;  %v11370_v2 = vpop.permute.xlu1 %3636  ;;  %v1834_v27 = vsel %vm10896_vm12, %v1829_v37, %v1833_v46  ;;  %v440_v46 = vld [vmem:[#allocation2 + $0x68] sm:$0x1]  ;;  %v11393_v61 = vld [vmem:[#allocation2 + $0x54] sm:$0xe] }
  0xd2   : > { %v1839_v42 = vrot.slane %v1838_v17, 4  ;;  %v2302_v29 = vrot.slane %v2300_v21, 4  ;;  %v1150_v30 = vshrl.u32 %v11343_v34, 16  ;;  %v1144_v32 = vrot.slane %v1142_v22, 7  ;;  %1586 = vst.msk [vmem:[#allocation3] sm:$0xff] %vm13892_vm1, %v10300_v52 }
  0xd3   : > { %v11375_v31 = vpop.permute.xlu0 %3452  ;;  %v2297_v35 = vsel %vm10819_vm9, %v2295_v49, %v2296_v6  ;;  %v1153_v44 = vshll.u32 %v11343_v34, 16  ;;  %v2844_v38 = vshrl.u32 %v2669_v54, 16  ;;  %v11384_v10 = vsel %vm10819_vm9, %v9520_v18, %v2300_v21  ;;  %v10307_v21 = vld [vmem:[#allocation2 + $0x18] sm:$0xff]   ;;  %2134 = vst.msk [vmem:[#allocation3] sm:$0xff] %vm2133_vm6, %v11296_v7 }
  0xd4   : > { %v1844_v25 = vsel %vm10896_vm12, %v1839_v42, %v1843_v60  ;;  %v9535_v48 = vcombine.low %v2294_v3, %v2297_v35  ;;  %v11386_v56 = vrot.slane %v1150_v30, 7  ;;  %v11391_v34 = vsel %vm10819_vm9, %v2302_v29, %v2303_v20  ;;  %v10308_v20 = vld [vmem:[#allocation2 + $0x24] sm:$0xff]   ;;  %v10309_v3 = vld [vmem:[#allocation2 + $0xc] sm:$0xff]   ;;  %1588 = vst.msk [vmem:[#allocation3 + $0x10] sm:$0xff] %vm13892_vm1, %v10307_v21  ;;  %v609_v7 = vld [vmem:[%s10826_s16 + $0x98] sm:$0xff] }
  0xd5   : > { %2097 = vrot.lane.b32.xlu1 %v9503_v39, %s10700_s20  ;;  %v9504_v33 = vcombine.low %v1834_v27, %v1844_v25  ;;  %v1147_v41 = vor.u32 %v1145_v24, %v1144_v32  ;;  %v1148_v57 = vrot.slane %v1144_v32, 4  ;;  %v11395_v62 = vpop.permute.xlu1 %2411  ;;  %v2846_v63 = vrot.slane %v2844_v38, 4  ;;  %v11399_v39 = vld [vmem:[#allocation2 + $0x58] sm:$0xf]  ;;  %v3216_v24 = vld [vmem:[#allocation2 + $0x5c] sm:$0x1] }
  0xd6   : > { %2421 = vrot.lane.b32.xlu0 %v9535_v48, %s10699_s19  ;;  %v1155_v36 = vor.u32 %v1153_v44, %v11386_v56  ;;  %v2847_v37 = vshll.u32 %v2669_v54, 16  ;;  %v11403_v4 = vadd.f32 %v11327_v15, %v11308_v23  ;;  %v2853_v6 = vshll.u32 %v2670_v53, 16  ;;  %v10313_v27 = vld [vmem:[%s13878_s4 + $0x8] sm:$0xff]   ;;  %v443_v38 = vld [vmem:[#allocation2 + $0x74] sm:$0x1]  ;;  %1589 = vst.msk [vmem:[#allocation3 + $0x18] sm:$0xff] %vm13892_vm1, %v10308_v20 }
  0xd7   : > { %v11405_v60 = vpop.permute.xlu0 %4496  ;;  %v1395_v51 = vsel %vm10992_vm14, %v1147_v41, %v1394_v45  ;;  %v2857_v17 = vshrl.u32 %v2670_v53, 16  ;;  %v2863_v18 = vshll.u32 %v2671_v28, 16  ;;  %v9536_v54 = vcombine.low %v11384_v10, %v11391_v34  ;;  %10115 = vmatprep.subr.bf16.mxu0 %v10313_v27  ;;  %v608_v34 = vld [vmem:[%s10826_s16 + $0x90] sm:$0xff]  ;;  %1587 = vst.msk [vmem:[#allocation3 + $0x8] sm:$0xff] %vm13892_vm1, %v10309_v3 }
  0xd8   : > { %13910 = vst [vmem:[#allocation7_spill] sm:$0xff] %v11405_v60  ;;  %v1156_v49 = vsel %vm10999_vm15, %v1148_v57, %v1155_v36  ;;  %1396 = vst [vmem:[#allocation2 + $0x60] sm:$0xf] %v1395_v51  ;;  %v2849_v23 = vrot.slane %v2847_v37, 5  ;;  %v441_v22 = vsel %vm10808_vm8, 0, %v440_v46  ;;  %v2855_v42 = vrot.slane %v2853_v6, 5  ;;  %10116 = vmatpush3.bf16.msra.mxu0 %v10313_v27 }
  0xd9   : > { %2099 = vrot.lane.b32.xlu1 %v9504_v33, %s10700_s20  ;;  %1397 = vst.msk [vmem:[#allocation2 + $0x64] sm:$0xf] %vm348_vm0, %v1156_v49  ;;  %v2859_v29 = vrot.slane %v2857_v17, 4  ;;  %442 = vst [vmem:[#allocation2 + $0x68] sm:$0x1] %v441_v22  ;;  %v9583_v30 = vrot.slane %v11393_v61, 9  ;;  %v11422_v32 = vpop.permute.xlu1 %3454 }
  0xda   : > { %v3336_v35 = vrot.slane %v11399_v39, 5  ;;  %2598 = vrot.lane.b32.xlu0 %v10298_v40, %s10701_s21  ;;  %v2850_v44 = vor.u32 %v2849_v23, %v2846_v63  ;;  %v2865_v45 = vrot.slane %v2863_v18, 5  ;;  %v3339_v53 = vrot.slane %v3216_v24, 5  ;;  %v390_v33 = vld [vmem:[#allocation2 + $0x78] sm:$0x1]  ;;  %2458 = vst.msk [vmem:[#allocation3] sm:$0xff] %vm13893_vm7, %v11294_v58 }
  0xdb   : > { %v11425_v25 = vpop.permute.xlu0 %4498  ;;  %v2860_v48 = vor.u32 %v2859_v29, %v2855_v42  ;;  %v388_v28 = vsel %vm10791_vm4, 0, %v387_v43  ;;  %v9433_v57 = vmul.f32 -1.442695, %v11331_v5  ;;  %v9434_v46 = vmul.f32 -1.442695, %v11403_v4  ;;  %2635 = vst.msk [vmem:[#allocation3] sm:$0xff] %vm13890_vm10, %v11320_v55 }
  0xdc   : > { %v3338_v10 = vrot.slane %v3336_v35, 4  ;;  %v2851_v41 = vrot.slane %v2850_v44, 4  ;;  %389 = vst [vmem:[#allocation2 + $0x6c] sm:$0x1] %v388_v28  ;;  %v1157_v61 = vrot.slane %v11386_v56, 4  ;;  %v444_v36 = vsel %vm10808_vm8, 0, %v443_v38 }
  0xdd   : > { %2423 = vrot.lane.b32.xlu1 %v9536_v54, %s10699_s19  ;;  %v2861_v40 = vrot.slane %v2860_v48, 4  ;;  %v11445_v63 = vpop.permute.xlu1 %2415  ;;  %10454 = vpow2.f32 %v9433_v57  ;;  %445 = vst [vmem:[#allocation2 + $0x74] sm:$0x1] %v444_v36  ;;  %v391_v56 = vsel %vm10791_vm4, 0, %v390_v33  ;;  %v647_v58 = vmul.f32 %v11272_v50, %v608_v34  ;;  %v610_v39 = vld [vmem:[%s10826_s16 + $0xa0] sm:$0xff]  ;;  %v611_v17 = vld [vmem:[%s10826_s16 + $0xa8] sm:$0xff] }
  0xde   : > { %v2856_v37 = vsel %vm10896_vm12, %v2851_v41, %v2855_v42  ;;  %v3337_v51 = vsel %vm10819_vm9, %v9583_v30, %v3336_v35  ;;  %v3340_v6 = vsel %vm10819_vm9, %v3338_v10, %v3339_v53  ;;  %10456 = vpow2.f32 %v9434_v46  ;;  %392 = vst [vmem:[#allocation2 + $0x78] sm:$0x1] %v391_v56  ;;  %v612_v42 = vld [vmem:[%s10826_s16 + $0xb0] sm:$0xff] }
  0xdf   : > { %v2866_v52 = vsel %vm10896_vm12, %v2861_v40, %v2865_v45  ;;  %v2672_v43 = vld [vmem:[#allocation2 + $0x60] sm:$0xf]  ;;  %v11461_v55 = vpop.permute.xlu0 %2413  ;;  %v648_v54 = vmul.f32 %v11272_v50, %v609_v7  ;;  %v9599_v44 = vcombine.low %v3337_v51, %v3340_v6  ;;  %v613_v45 = vld [vmem:[%s10826_s16 + $0xb8] sm:$0xff]  ;;  %v11479_v53 = vadd.f32 %v11327_v15, %v647_v58 }
  0xe0   : > { %v10299_v18 = vld [vmem:[#allocation2 + $0x60] sm:$0xff]   ;;  %v9567_v21 = vcombine.low %v2856_v37, %v2866_v52  ;;  %v1398_v20 = vld [vmem:[#allocation2 + $0x68] sm:$0x1]  ;;  %v2868_v3 = vshrl.u32 %v2672_v43, 16  ;;  %v2871_v22 = vshll.u32 %v2672_v43, 16  ;;  %v11482_v28 = vmul.f32 %v11272_v50, %v610_v39 }
  0xe1   : > { %v1399_v49 = vsel %vm10791_vm4, %v1157_v61, %v1398_v20  ;;  %v2673_v23 = vld [vmem:[#allocation2 + $0x64] sm:$0xf]  ;;  %v11469_v27 = vpop.permute.xlu1 %3458  ;;  %2600 = vrot.lane.b32.xlu1 %v10299_v18, %s10701_s21  ;;  %v11475_v48 = vld [vmem:[#allocation2 + $0x60] sm:$0xe]  ;;  %v11487_v57 = vadd.f32 %v11327_v15, %v648_v54  ;;  %v11490_v46 = vmul.f32 %v11272_v50, %v611_v17  ;;  %v10314_v61 = vld [vmem:[#allocation2 + $0x30] sm:$0xff]   ;;  %v11497_v39 = vmul.f32 %v11272_v50, %v612_v42 }
  0xe2   : > { %v11467_v24 = vld [vmem:[#allocation2 + $0x64] sm:$0xf]  ;;  %3143 = vrot.lane.b32.xlu0 %v9567_v21, %s10705_s25  ;;  %1400 = vst [vmem:[#allocation2 + $0x68] sm:$0x1] %v1399_v49  ;;  %v2870_v29 = vrot.slane %v2868_v3, 4  ;;  %v2877_v30 = vshll.u32 %v2673_v23, 16  ;;  %v11502_v18 = vmul.f32 %v11272_v50, %v613_v45 }
  0xe3   : > { %v2881_v35 = vshrl.u32 %v2673_v23, 16  ;;  %v2873_v38 = vrot.slane %v2871_v22, 5  ;;  %v13886_v10 = vrot.slane %v11467_v24, 5  ;;  %v3713_v41 = vld [vmem:[#allocation2 + $0x60] sm:$0xf]  ;;  %v11492_v56 = vpop.permute.xlu0 %3456  ;;  %1590 = vst.msk [vmem:[#allocation3 + $0x20] sm:$0xff] %vm13892_vm1, %v10314_v61 }
  0xe4   : > { %v11484_v33 = vrot.slane %v2877_v30, 5  ;;  %v3714_v36 = vld [vmem:[#allocation2 + $0x64] sm:$0xf]  ;;  %v3888_v7 = vshrl.u32 %v3713_v41, 16  ;;  %v3891_v37 = vshll.u32 %v3713_v41, 16  ;;  %13911 = vst [vmem:[#allocation8_spill] sm:$0xff] %v11492_v56 }
  0xe5   : > { %v2883_v34 = vrot.slane %v2881_v35, 4  ;;  %v2874_v40 = vor.u32 %v2873_v38, %v2870_v29  ;;  %v11494_v58 = vpop.permute.xlu1 %3133  ;;  %v10301_v43 = vld [vmem:[#allocation2 + $0x60] sm:$0xff]   ;;  %v3897_v51 = vshll.u32 %v3714_v36, 16  ;;  %v3901_v6 = vshrl.u32 %v3714_v36, 16 }
  0xe6   : > { %3464 = vrot.lane.b32.xlu0 %v9599_v44, %s10703_s23  ;;  %v4259_v17 = vld [vmem:[#allocation2 + $0x64] sm:$0xf]  ;;  %v9584_v20 = vrot.slane %v11475_v48, 9  ;;  %v3345_v3 = vrot.slane %v13886_v10, 4  ;;  %v3890_v54 = vrot.slane %v3888_v7, 4  ;;  %v3893_v49 = vrot.slane %v3891_v37, 5 }
  0xe7   : > { %v2884_v52 = vor.u32 %v2883_v34, %v11484_v33  ;;  %v614_v21 = vld [vmem:[%s10826_s16 + $0xc0] sm:$0xff]  ;;  %v10455_v23 = vpop.eup %10454  ;;  %v2875_v22 = vrot.slane %v2874_v40, 4  ;;  %v3899_v29 = vrot.slane %v3897_v51, 5  ;;  %v3903_v30 = vrot.slane %v3901_v6, 4  ;;  %v615_v44 = vld [vmem:[%s10826_s16 + $0xc8] sm:$0xff] }
  0xe8   : > { %v4258_v35 = vld [vmem:[#allocation2 + $0x60] sm:$0xe]  ;;  %v10457_v38 = vpop.eup %10456  ;;  %v812_v41 = vadd.f32 1.0, %v10455_v23  ;;  %v3894_v61 = vor.u32 %v3893_v49, %v3890_v54  ;;  %v4380_v36 = vrot.slane %v4259_v17, 5  ;;  %v653_v48 = vmul.f32 %v11272_v50, %v614_v21  ;;  %v11514_v23 = vpop.permute.xlu0 %4500 }
  0xe9   : > { %v2885_v42 = vrot.slane %v2884_v52, 4  ;;  %v2674_v45 = vld [vmem:[#allocation2 + $0x68] sm:$0x1]  ;;  %v11510_v0 = vpop.permute.xlu1 %4177  ;;  %v813_v40 = vadd.f32 1.0, %v10457_v38  ;;  %v3904_v52 = vor.u32 %v3903_v30, %v3899_v29  ;;  %v10316_v51 = vld [vmem:[#allocation2 + $0x3c] sm:$0xff]   ;;  %v9647_v60 = vrot.slane %v4258_v35, 9 }
  0xea   : > { %v3219_v34 = vld [vmem:[#allocation2 + $0x68] sm:$0x1]  ;;  %v2887_v10 = vshll.u32 %v2674_v45, 16  ;;  %3642 = vrot.lane.b32.xlu0 %v10301_v43, %s10702_s22  ;;  %10458 = vrcp.f32 %v812_v41  ;;  %v3895_v6 = vrot.slane %v3894_v61, 4  ;;  %v2880_v17 = vsel %vm10896_vm12, %v2875_v22, %v11484_v33  ;;  %1591 = vst.msk [vmem:[#allocation3 + $0x28] sm:$0xff] %vm13892_vm1, %v10316_v51  ;;  %v616_v51 = vld [vmem:[%s10826_s16 + $0xd0] sm:$0xff] }
  0xeb   : > { %v3346_v7 = vrot.slane %v3219_v34, 5  ;;  %v3715_v37 = vld [vmem:[#allocation2 + $0x68] sm:$0x1]  ;;  %10460 = vrcp.f32 %v813_v40  ;;  %v3905_v54 = vrot.slane %v3904_v52, 4  ;;  %v4382_v30 = vrot.slane %v4380_v36, 4 }
  0xec   : > { %v3907_v59 = vshll.u32 %v3715_v37, 16  ;;  %v4260_v56 = vld [vmem:[#allocation2 + $0x68] sm:$0x1]  ;;  %v2889_v21 = vrot.slane %v2887_v10, 5  ;;  %v3900_v43 = vsel %vm10896_vm12, %v3895_v6, %v3899_v29  ;;  %v1626_v38 = vld [vmem:[#allocation2 + $0x60] sm:$0xf]  ;;  %v654_v45 = vmul.f32 %v11272_v50, %v615_v44 }
  0xed   : > { %v13912_v34 = vrot.slane %v11467_v24, 5  ;;  %v3347_v33 = vsel %vm10819_vm9, %v3345_v3, %v3346_v7  ;;  %v4383_v22 = vrot.slane %v4260_v56, 5  ;;  %v4381_v29 = vsel %vm10819_vm9, %v9647_v60, %v4380_v36  ;;  %v1627_v44 = vld [vmem:[#allocation2 + $0x64] sm:$0xf]  ;;  %v446_v61 = vld [vmem:[#allocation2 + $0x80] sm:$0x1] }
  0xee   : > { %v3909_v49 = vrot.slane %v3907_v59, 5  ;;  %v2890_v35 = vsel %vm10896_vm12, %v2885_v42, %v2889_v21  ;;  %v11537_v24 = vadd.f32 %v11327_v15, %v11482_v28  ;;  %v1846_v56 = vshrl.u32 %v1626_v38, 16  ;;  %v393_v36 = vld [vmem:[#allocation2 + $0x84] sm:$0x1]  ;;  %v11547_v28 = vpop.permute.xlu0 %4502  ;;  %v617_v21 = vld [vmem:[%s10826_s16 + $0xd8] sm:$0xff] }
  0xef   : > { %v3344_v10 = vsel %vm10819_vm9, %v9584_v20, %v13912_v34  ;;  %v9568_v41 = vcombine.low %v2880_v17, %v2890_v35  ;;  %v2090_v42 = vpop.permute.xlu1 %2089  ;;  %v4384_v3 = vsel %vm10819_vm9, %v4382_v30, %v4383_v22  ;;  %v1849_v7 = vshll.u32 %v1626_v38, 16  ;;  %v11561_v17 = vld [vmem:[#allocation2 + $0x68] sm:$0x1]  ;;  %v449_v22 = vld [vmem:[#allocation2 + $0x8c] sm:$0x1] }
  0xf0   : > { %v3910_v59 = vsel %vm10896_vm12, %v3905_v54, %v3909_v49  ;;  %2136 = vst.msk [vmem:[#allocation3 + $0x10] sm:$0xff] %vm2133_vm6, %v2090_v42  ;;  %v9600_v60 = vcombine.low %v3344_v10, %v3347_v33  ;;  %v11545_v40 = vadd.f32 %v11327_v15, %v11490_v46  ;;  %v11553_v37 = vadd.f32 %v11327_v15, %v11497_v39  ;;  %v11601_v42 = vld [vmem:[#allocation2 + $0x64] sm:$0xf] }
  0xf1   : > { %v9631_v20 = vcombine.low %v3900_v43, %v3910_v59  ;;  %3145 = vrot.lane.b32.xlu1 %v9568_v41, %s10705_s25  ;;  %2460 = vst.msk [vmem:[#allocation3 + $0x10] sm:$0xff] %vm13893_vm7, %v11461_v55  ;;  %v11557_v52 = vadd.f32 %v11327_v15, %v11502_v18  ;;  %v9663_v6 = vcombine.low %v4381_v29, %v4384_v3  ;;  %v1855_v46 = vshll.u32 %v1627_v44, 16 }
  0xf2   : > { %2637 = vst.msk [vmem:[#allocation3 + $0x10] sm:$0xff] %vm13890_vm10, %v11347_v19  ;;  %v11566_v55 = vadd.f32 %v11327_v15, %v653_v48  ;;  %v11569_v39 = vadd.f32 %v11327_v15, %v654_v45  ;;  %v1859_v54 = vshrl.u32 %v1627_v44, 16  ;;  %v9435_v18 = vmul.f32 -1.442695, %v11479_v53  ;;  %v11580_v19 = vld [vmem:[#allocation2 + $0x60] sm:$0xe] }
  0xf3   : > { %4187 = vrot.lane.b32.xlu0 %v9631_v20, %s10706_s26  ;;  %v9436_v43 = vmul.f32 -1.442695, %v11487_v57  ;;  %v447_v49 = vsel %vm10808_vm8, 0, %v446_v61  ;;  %v2092_v30 = vpop.permute.xlu1 %2091  ;;  %v11576_v38 = vrot.slane %v1846_v56, 4  ;;  %v11578_v35 = vrot.slane %v1849_v7, 5 }
  0xf4   : > { %448 = vst [vmem:[#allocation2 + $0x80] sm:$0x1] %v447_v49  ;;  %v394_v48 = vsel %vm10791_vm4, 0, %v393_v36  ;;  %2137 = vst.msk [vmem:[#allocation3 + $0x18] sm:$0xff] %vm2133_vm6, %v2092_v30  ;;  %v11586_v45 = vmul.f32 %v11272_v50, %v616_v51  ;;  %v10459_v34 = vpop.eup %10458  ;;  %10462 = vpow2.f32 %v9435_v18  ;;  %v9437_v10 = vmul.f32 -1.442695, %v11537_v24 }
  0xf5   : > { %3466 = vrot.lane.b32.xlu1 %v9600_v60, %s10703_s23  ;;  %395 = vst [vmem:[#allocation2 + $0x84] sm:$0x1] %v394_v48  ;;  %v9438_v33 = vmul.f32 -1.442695, %v11545_v40  ;;  %2461 = vst.msk [vmem:[#allocation3 + $0x18] sm:$0xff] %vm13893_vm7, %v11445_v63  ;;  %v11594_v41 = vmul.f32 %v11272_v50, %v617_v21  ;;  %v10461_v59 = vpop.eup %10460  ;;  %v908_v29 = vmul.f32 %v10459_v34, %v11331_v5  ;;  %v11598_v44 = vrot.slane %v1855_v46, 5 }
  0xf6   : > { %v1865_v61 = vshll.u32 %v11561_v17, 16  ;;  %10464 = vpow2.f32 %v9436_v43  ;;  %2638 = vst.msk [vmem:[#allocation3 + $0x18] sm:$0xff] %vm13890_vm10, %v11355_v14  ;;  %v909_v63 = vmul.f32 %v10461_v59, %v11403_v4  ;;  %v11606_v20 = vrot.slane %v1859_v54, 4  ;;  %v396_v60 = vld [vmem:[#allocation2 + $0x90] sm:$0x1] }
  0xf7   : > { %4508 = vrot.lane.b32.xlu0 %v9663_v6, %s10704_s24  ;;  %v9521_v50 = vrot.slane %v11580_v19, 9  ;;  %10466 = vpow2.f32 %v9437_v10  ;;  %v2088_v5 = vpop.permute.xlu0 %2087  ;;  %v10008_v3 = vpack.c.bf16 %v908_v29, %v908_v29  ;;  %v1852_v56 = vor.u32 %v11578_v35, %v11576_v38  ;;  %v452_v14 = vld [vmem:[#allocation2 + $0x98] sm:$0x1]  ;;  %v10315_v51 = vld [vmem:[%s13878_s4 + $0x10] ss:$0 sps:$4 sm:$0x33]  }
  0xf8   : > { %10468 = vpow2.f32 %v9438_v33  ;;  %v450_v7 = vsel %vm10808_vm8, 0, %v449_v22  ;;  %2135 = vst.msk [vmem:[#allocation3 + $0x8] sm:$0xff] %vm2133_vm6, %v2088_v5  ;;  %v10009_v36 = vpack.c.bf16 %v909_v63, %v909_v63  ;;  %v2307_v4 = vrot.slane %v11601_v42, 5  ;;  %v399_v6 = vld [vmem:[#allocation2 + $0x9c] sm:$0x1] }
  0xf9   : > { %451 = vst [vmem:[#allocation2 + $0x8c] sm:$0x1] %v450_v7  ;;  %2459 = vst.msk [vmem:[#allocation3 + $0x8] sm:$0xff] %vm13893_vm7, %v11395_v62  ;;  %v1159_v17 = vshrl.u32 %v10008_v3, 16  ;;  %v1162_v46 = vshll.u32 %v10008_v3, 16  ;;  %v397_v62 = vsel %vm10791_vm4, 0, %v396_v60  ;;  %v1862_v59 = vor.u32 %v11606_v20, %v11598_v44 }
  0xfa   : > { %v11620_v21 = vld [vmem:[#allocation2 + $0x68] sm:$0x1]  ;;  %2636 = vst.msk [vmem:[#allocation3 + $0x8] sm:$0xff] %vm13890_vm10, %v11316_v16  ;;  %v1167_v54 = vshrl.u32 %v10009_v36, 16  ;;  %v1170_v18 = vshll.u32 %v10009_v36, 16  ;;  %v453_v43 = vsel %vm10808_vm8, 0, %v452_v14 }
  0xfb   : > { %3181 = vst.msk [vmem:[#allocation3 + $0x8] sm:$0xff] %vm3179_vm11, %v11494_v58  ;;  %v455_v49 = vld [vmem:[#allocation2 + $0xa4] sm:$0x1]  ;;  %v1161_v30 = vrot.slane %v1159_v17, 7  ;;  %v1401_v38 = vld [vmem:[#allocation2 + $0x6c] sm:$0xf] }
  0xfc   : > { %v11630_v35 = vrot.slane %v1865_v61, 5  ;;  %3502 = vst.msk [vmem:[#allocation3 + $0x8] sm:$0xff] %vm3500_vm13, %v11422_v32  ;;  %398 = vst [vmem:[#allocation2 + $0x90] sm:$0x1] %v397_v62  ;;  %vm13891_vm10 = vcmask 1041408   ;;  %v1169_v58 = vrot.slane %v1167_v54, 7 }
  0xfd   : > { %v3138_v16 = vpop.permute.xlu1 %3137  ;;  %454 = vst [vmem:[#allocation2 + $0x98] sm:$0x1] %v453_v43  ;;  %v2310_v48 = vrot.slane %v11620_v21, 5  ;;  %3680 = vst.msk [vmem:[#allocation3 + $0x8] sm:$0xff] %vm3678_vm3, %v11340_v47  ;;  %v9439_v34 = vmul.f32 -1.442695, %v11553_v37  ;;  %10261 = vmatprep.subr.msk.bf16.mxu0 %vm13891_vm10, %v10315_v51  ;;  %v1164_v33 = vor.u32 %v1162_v46, %v1161_v30 }
  0xfe   : > { %3183 = vst.msk [vmem:[#allocation3 + $0x18] sm:$0xff] %vm3179_vm11, %v3138_v16  ;;  %v4648_v10 = vsel %vm13891_vm10, %v10315_v51, 0  ;;  %v1165_v32 = vrot.slane %v1161_v30, 4  ;;  %v1405_v22 = vld [vmem:[#allocation2 + $0x74] sm:$0x1]  ;;  %v400_v47 = vsel %vm10791_vm4, 0, %v399_v6  ;;  %v10463_v29 = vpop.eup %10462  ;;  %v1172_v61 = vor.u32 %v1170_v18, %v1169_v58 }
  0xff   : > { %4225 = vst.msk [vmem:[#allocation3 + $0x8] sm:$0xff] %vm4223_vm5, %v11510_v0  ;;  %10118 = vmatpush3.bf16.msra.mxu0 %v4648_v10  ;;  %v1174_v63 = vrot.slane %v1169_v58, 4  ;;  %v11649_v5 = vrot.slane %v1852_v56, 4  ;;  %v2309_v3 = vrot.slane %v2307_v4, 4  ;;  %401 = vst [vmem:[#allocation2 + $0x9c] sm:$0x1] %v400_v47  ;;  %v1402_v60 = vsel %vm10992_vm14, %v1164_v33, %v1401_v38 }
 0x100   : > { %3504 = vst.msk [vmem:[#allocation3 + $0x18] sm:$0xff] %vm3500_vm13, %v11469_v27  ;;  %v3132_v0 = vpop.permute.xlu0 %3131  ;;  %v402_v27 = vld [vmem:[#allocation2 + $0xa8] sm:$0x1]  ;;  %v618_v20 = vld [vmem:[%s10826_s16 + $0xe0] sm:$0xff]  ;;  %v10465_v7 = vpop.eup %10464  ;;  %v814_v14 = vadd.f32 1.0, %v10463_v29  ;;  %v456_v36 = vsel %vm10808_vm8, 0, %v455_v49  ;;  %10470 = vpow2.f32 %v9439_v34  ;;  %v11682_v49 = vadd.f32 %v11327_v15, %v11594_v41 }
 0x101   : > { %4546 = vst.msk [vmem:[#allocation3 + $0x8] sm:$0xff] %vm4544_vm2, %v11425_v25  ;;  %v9440_v56 = vmul.f32 -1.442695, %v11557_v52  ;;  %v458_v25 = vld [vmem:[#allocation2 + $0xb0] sm:$0x1]  ;;  %v10467_v51 = vpop.eup %10466  ;;  %v1406_v6 = vsel %vm10791_vm4, %v1174_v63, %v1405_v22  ;;  %v815_v18 = vadd.f32 1.0, %v10465_v7  ;;  %v11705_v33 = vsel %vm10819_vm9, %v9521_v50, %v2307_v4 }
 0x102   : > { %3682 = vst.msk [vmem:[#allocation3 + $0x18] sm:$0xff] %vm3678_vm3, %v11370_v2  ;;  %v1173_v2 = vsel %vm10999_vm15, %v1165_v32, %v1172_v61  ;;  %1403 = vst [vmem:[#allocation2 + $0x6c] sm:$0xf] %v1402_v60  ;;  %v9441_v17 = vmul.f32 -1.442695, %v11566_v55  ;;  %v10469_v54 = vpop.eup %10468  ;;  %10472 = vrcp.f32 %v814_v14  ;;  %v403_v62 = vsel %vm10791_vm4, 0, %v402_v27 }
 0x103   : > { %3180 = vst.msk [vmem:[#allocation3] sm:$0xff] %vm3179_vm11, %v3132_v0  ;;  %457 = vst [vmem:[#allocation2 + $0xa4] sm:$0x1] %v456_v36  ;;  %v405_v46 = vld [vmem:[#allocation2 + $0xb4] sm:$0x1]  ;;  %v816_v43 = vadd.f32 1.0, %v10467_v51  ;;  %10474 = vpow2.f32 %v9440_v56  ;;  %v11711_v32 = vsel %vm10819_vm9, %v2309_v3, %v2310_v48  ;;  %v1858_v21 = vsel %vm10896_vm12, %v11649_v5, %v11598_v44 }
 0x104   : > { %3501 = vst.msk [vmem:[#allocation3] sm:$0xff] %vm3500_vm13, %v11375_v31  ;;  %1407 = vst [vmem:[#allocation2 + $0x74] sm:$0x1] %v1406_v6  ;;  %v11678_v31 = vadd.f32 %v11327_v15, %v11586_v45  ;;  %v459_v30 = vsel %vm10808_vm8, 0, %v458_v25  ;;  %v1863_v16 = vrot.slane %v1862_v59, 4  ;;  %v817_v58 = vadd.f32 1.0, %v10469_v54 }
 0x105   : > { %1404 = vst.msk [vmem:[#allocation2 + $0x70] sm:$0xf] %vm348_vm0, %v1173_v2  ;;  %404 = vst [vmem:[#allocation2 + $0xa8] sm:$0x1] %v403_v62  ;;  %v4182_v45 = vpop.permute.xlu1 %4181  ;;  %v406_v34 = vsel %vm10791_vm4, 0, %v405_v46  ;;  %10476 = vpow2.f32 %v9441_v17  ;;  %vm4597_vm10 = vcmask 293888   ;;  %v9537_v29 = vcombine.low %v11705_v33, %v11711_v32 }
 0x106   : > { %3679 = vst.msk [vmem:[#allocation3] sm:$0xff] %vm3678_vm3, %v11333_v8  ;;  %v11689_v8 = vld [vmem:[%s13876_s2] ss:$0 sm:$0xff]  ;;  %460 = vst [vmem:[#allocation2 + $0xb0] sm:$0x1] %v459_v30  ;;  %10478 = vrcp.f32 %v815_v18  ;;  %v13913_v61 = vld [vmem:[#allocation7_spill] sm:$0xff] }
 0x107   : > { %v657_v38 = vmul.f32 %v11689_v8, %v618_v20  ;;  %4227 = vst.msk [vmem:[#allocation3 + $0x18] sm:$0xff] %vm4223_vm5, %v4182_v45  ;;  %v9442_v41 = vmul.f32 -1.442695, %v11569_v39  ;;  %407 = vst [vmem:[#allocation2 + $0xb4] sm:$0x1] %v406_v34  ;;  %10480 = vrcp.f32 %v816_v43 }
 0x108   : > { %4548 = vst.msk [vmem:[#allocation3 + $0x18] sm:$0xff] %vm4544_vm2, %v11547_v28  ;;  %v9443_v42 = vmul.f32 -1.442695, %v11678_v31  ;;  %v9444_v19 = vmul.f32 -1.442695, %v11682_v49  ;;  %v1868_v28 = vsel %vm10896_vm12, %v1863_v16, %v11630_v35  ;;  %10482 = vrcp.f32 %v817_v58 }
 0x109   : > { %v11697_v10 = vadd.f32 %v11327_v15, %v657_v38  ;;  %v4176_v15 = vpop.permute.xlu0 %4175  ;;  %v3716_v4 = vld [vmem:[#allocation2 + $0x6c] sm:$0xf]  ;;  %10484 = vpow2.f32 %v9442_v41  ;;  %v11735_v7 = vcombine.low %v1858_v21, %v1868_v28 }
 0x10a   : > { %v4261_v48 = vld [vmem:[#allocation2 + $0x6c] sm:$0xe]  ;;  %4224 = vst.msk [vmem:[#allocation3] sm:$0xff] %vm4223_vm5, %v4176_v15  ;;  %v3912_v47 = vshrl.u32 %v3716_v4, 16  ;;  %v3915_v44 = vshll.u32 %v3716_v4, 16  ;;  %v11732_v35 = vpop.eup %10470  ;;  %10486 = vpow2.f32 %v9443_v42  ;;  %v13914_v15 = vld [vmem:[#allocation8_spill] sm:$0xff] }
 0x10b   : > { %v11718_v50 = vmul.f32 -1.442695, %v11697_v10  ;;  %4545 = vst.msk [vmem:[#allocation3] sm:$0xff] %vm4544_vm2, %v13913_v61  ;;  %v3718_v63 = vld [vmem:[#allocation2 + $0x74] sm:$0x1]  ;;  %v9648_v0 = vrot.slane %v4261_v48, 9  ;;  %10488 = vpow2.f32 %v9444_v19 }
 0x10c   : > { %v10302_v22 = vld [vmem:[#allocation2 + $0x6c] sm:$0xff]   ;;  %v3914_v27 = vrot.slane %v3912_v47, 4  ;;  %v3931_v20 = vshll.u32 %v3718_v63, 16  ;;  %v4263_v14 = vld [vmem:[#allocation2 + $0x74] sm:$0x1]  ;;  %v10473_v56 = vpop.eup %10472  ;;  %v3917_v36 = vrot.slane %v3915_v44, 5 }
 0x10d   : > { %v3717_v59 = vld [vmem:[#allocation2 + $0x70] sm:$0xf]  ;;  %3644 = vrot.lane.b32.xlu1 %v10302_v22, %s10702_s22  ;;  %v1629_v6 = vld [vmem:[#allocation2 + $0x6c] sm:$0xf]  ;;  %v3136_v17 = vpop.permute.xlu0 %3135  ;;  %v4390_v54 = vrot.slane %v4263_v14, 5  ;;  %v910_v43 = vmul.f32 %v10473_v56, %v11479_v53  ;;  %v11739_v30 = vpop.eup %10474  ;;  %v4562_v14 = vld [vmem:[#allocation3 + $0x8] sm:$0xff]  ;;  %10490 = vpow2.f32 %v11718_v50 }
 0x10e   : > { %v3921_v5 = vshll.u32 %v3717_v59, 16  ;;  %v3925_v3 = vshrl.u32 %v3717_v59, 16  ;;  %v4262_v60 = vld [vmem:[#allocation2 + $0x70] sm:$0xf]  ;;  %v3933_v46 = vrot.slane %v3931_v20, 5  ;;  %3182 = vst.msk [vmem:[#allocation3 + $0x10] sm:$0xff] %vm3179_vm11, %v3136_v17  ;;  %v3918_v38 = vor.u32 %v3917_v36, %v3914_v27 }
 0x10f   : > { %v4387_v2 = vrot.slane %v4262_v60, 5  ;;  %v1630_v18 = vld [vmem:[#allocation2 + $0x70] sm:$0xf]  ;;  %v1631_v62 = vld [vmem:[#allocation2 + $0x74] sm:$0x1]  ;;  %3503 = vst.msk [vmem:[#allocation3 + $0x10] sm:$0xff] %vm3500_vm13, %v13914_v15  ;;  %v11745_v42 = vpop.eup %10476 }
 0x110   : > { %v3923_v25 = vrot.slane %v3921_v5, 5  ;;  %v3927_v51 = vrot.slane %v3925_v3, 4  ;;  %v2177_v34 = vld [vmem:[#allocation2 + $0x6c] sm:$0xe]  ;;  %v2178_v41 = vld [vmem:[#allocation2 + $0x70] sm:$0xf]  ;;  %v10479_v22 = vpop.eup %10478 }
 0x111   : > { %v4388_v58 = vsel %vm10819_vm9, %v9648_v0, %v4387_v2  ;;  %v4389_v45 = vrot.slane %v4387_v2, 4  ;;  %v1870_v4 = vshrl.u32 %v1629_v6, 16  ;;  %v1873_v53 = vshll.u32 %v1629_v6, 16  ;;  %v2179_v19 = vld [vmem:[#allocation2 + $0x74] sm:$0x1]  ;;  %v11751_v5 = vpop.eup %10480 }
 0x112   : > { %v3928_v16 = vor.u32 %v3927_v51, %v3923_v25  ;;  %v1879_v21 = vshll.u32 %v1630_v18, 16  ;;  %v1883_v28 = vshrl.u32 %v1630_v18, 16  ;;  %v13915_v48 = vld [vmem:[#allocation6_spill] sm:$0xff]  ;;  %v3919_v59 = vrot.slane %v3918_v38, 4  ;;  %v4561_v44 = vld [vmem:[#allocation3] sm:$0xff]  ;;  %v2094_v60 = vpop.permute.xlu1 %2093  ;;  %v11754_v56 = vpop.eup %10482 }
 0x113   : > { %3681 = vst.msk [vmem:[#allocation3 + $0x10] sm:$0xff] %vm3678_vm3, %v13915_v48  ;;  %v4391_v61 = vsel %vm10819_vm9, %v4389_v45, %v4390_v54  ;;  %v1889_v63 = vshll.u32 %v1631_v62, 16  ;;  %v1872_v0 = vrot.slane %v1870_v4, 4  ;;  %v1875_v27 = vrot.slane %v1873_v53, 5  ;;  %10119 = vmatprep.mubr.msk.bf16.mxu0 %vm4597_vm10, %v4561_v44  ;;  %v2675_v17 = vld [vmem:[#allocation2 + $0x6c] sm:$0xf]  ;;  %v11762_v54 = vpop.eup %10484 }
 0x114   : > { %v3929_v47 = vrot.slane %v3928_v16, 4  ;;  %v9664_v3 = vcombine.low %v4388_v58, %v4391_v61  ;;  %v1881_v20 = vrot.slane %v1879_v21, 5  ;;  %v3924_v36 = vsel %vm10896_vm12, %v3919_v59, %v3923_v25  ;;  %2138 = vst.msk [vmem:[#allocation3 + $0x20] sm:$0xff] %vm2133_vm6, %v2094_v60  ;;  %10120 = vmatmul.mubr.msk.bf16.vlgmr.msra.gmra.mrb[0].mxu0 %vm4597_vm10, %v4562_v14  ;;  %v10321_v4 = vld [vmem:[#allocation2 + $0x48] sm:$0xff]   ;;  %v11766_v53 = vpop.eup %10486  ;;  %v3221_v33 = vld [vmem:[#allocation2 + $0x70] sm:$0xf] }
 0x115   : > { %v1885_v2 = vrot.slane %v1883_v28, 4  ;;  %v1891_v6 = vrot.slane %v1889_v63, 5  ;;  %v1876_v62 = vor.u32 %v1875_v27, %v1872_v0  ;;  %v9522_v38 = vrot.slane %v2177_v34, 9  ;;  %v4180_v15 = vpop.permute.xlu0 %4179  ;;  %v10303_v59 = vld [vmem:[#allocation2 + $0x6c] sm:$0xff]   ;;  %1592 = vst.msk [vmem:[#allocation3 + $0x30] sm:$0xff] %vm13892_vm1, %v10321_v4  ;;  %v11777_v61 = vpop.eup %10488 }
 0x116   : > { %v3934_v51 = vsel %vm10896_vm12, %v3929_v47, %v3933_v46  ;;  %4510 = vrot.lane.b32.xlu0 %v9664_v3, %s10704_s24  ;;  %v2314_v16 = vrot.slane %v2178_v41, 5  ;;  %v2317_v25 = vrot.slane %v2179_v19, 5  ;;  %v911_v45 = vmul.f32 %v10479_v22, %v11487_v57  ;;  %4226 = vst.msk [vmem:[#allocation3 + $0x10] sm:$0xff] %vm4223_vm5, %v4180_v15  ;;  %v2676_v22 = vld [vmem:[#allocation2 + $0x70] sm:$0xf]  ;;  %v10322_v47 = vld [vmem:[#allocation2 + $0x54] sm:$0xff]  }
 0x117   : > { %v9632_v18 = vcombine.low %v3924_v36, %v3934_v51  ;;  %v1886_v58 = vor.u32 %v1885_v2, %v1881_v20  ;;  %v10010_v46 = vpack.c.bf16 %v910_v43, %v910_v43  ;;  %v1877_v21 = vrot.slane %v1876_v62, 4  ;;  %4547 = vst.msk [vmem:[#allocation3 + $0x10] sm:$0xff] %vm4544_vm2, %v11514_v23  ;;  %v1408_v3 = vld [vmem:[#allocation2 + $0x78] sm:$0xf]  ;;  %v2677_v0 = vld [vmem:[#allocation2 + $0x74] sm:$0x1] }
 0x118   : > { %v11771_v28 = vsel %vm10819_vm9, %v9522_v38, %v2314_v16  ;;  %v2316_v48 = vrot.slane %v2314_v16, 4  ;;  %v2892_v34 = vshrl.u32 %v2675_v17, 16  ;;  %v10011_v19 = vpack.c.bf16 %v911_v45, %v911_v45  ;;  %v11789_v60 = vld [vmem:[#allocation2 + $0x6c] sm:$0xe]  ;;  %1593 = vst.msk [vmem:[#allocation3 + $0x38] sm:$0xff] %vm13892_vm1, %v10322_v47 }
 0x119   : > { %4189 = vrot.lane.b32.xlu1 %v9632_v18, %s10706_s26  ;;  %v1887_v41 = vrot.slane %v1886_v58, 4  ;;  %v1176_v57 = vshrl.u32 %v10010_v46, 16  ;;  %v1179_v43 = vshll.u32 %v10010_v46, 16  ;;  %v1882_v63 = vsel %vm10896_vm12, %v1877_v21, %v1881_v20  ;;  %v2418_v32 = vpop.permute.xlu0 %2417  ;;  %v2096_v62 = vpop.permute.xlu1 %2095  ;;  %v1412_v15 = vld [vmem:[#allocation2 + $0x80] sm:$0x1] }
 0x11a   : > { %2425 = vrot.lane.b32.xlu0 %v9537_v29, %s10699_s19  ;;  %v11787_v44 = vsel %vm10819_vm9, %v2316_v48, %v2317_v25  ;;  %v2894_v23 = vrot.slane %v2892_v34, 4  ;;  %v2895_v27 = vshll.u32 %v2675_v17, 16  ;;  %v1184_v51 = vshrl.u32 %v10011_v19, 16  ;;  %2462 = vst.msk [vmem:[#allocation3 + $0x20] sm:$0xff] %vm13893_vm7, %v2418_v32  ;;  %v3222_v25 = vld [vmem:[#allocation2 + $0x74] sm:$0x1] }
 0x11b   : > { %v1892_v14 = vsel %vm10896_vm12, %v1887_v41, %v1891_v6  ;;  %v9538_v20 = vcombine.low %v11771_v28, %v11787_v44  ;;  %v1178_v36 = vrot.slane %v1176_v57, 7  ;;  %v1187_v2 = vshll.u32 %v10011_v19, 16  ;;  %2139 = vst.msk [vmem:[#allocation3 + $0x28] sm:$0xff] %vm2133_vm6, %v2096_v62  ;;  %v619_v19 = vld [vmem:[%s10826_s16 + $0xe8] sm:$0xff] }
 0x11c   : > { %v9506_v29 = vcombine.low %v1882_v63, %v1892_v14  ;;  %v2897_v17 = vrot.slane %v2895_v27, 5  ;;  %v2901_v18 = vshll.u32 %v2676_v22, 16  ;;  %v1186_v16 = vrot.slane %v1184_v51, 7  ;;  %v4564_v27 = vld [vmem:[#allocation3 + $0x18] sm:$0xff] }
 0x11d   : > { %2101 = vrot.lane.b32.xlu1 %v11735_v7, %s10700_s20  ;;  %v1181_v6 = vor.u32 %v1179_v43, %v1178_v36  ;;  %v1182_v38 = vrot.slane %v1178_v36, 4  ;;  %v2905_v58 = vshrl.u32 %v2676_v22, 16  ;;  %v2911_v7 = vshll.u32 %v2677_v0, 16  ;;  %v2595_v41 = vpop.permute.xlu0 %2594  ;;  %v2420_v47 = vpop.permute.xlu1 %2419 }
 0x11e   : > { %2602 = vrot.lane.b32.xlu0 %v10303_v59, %s10701_s21  ;;  %v2898_v45 = vor.u32 %v2897_v17, %v2894_v23  ;;  %v2903_v46 = vrot.slane %v2901_v18, 5  ;;  %v9585_v4 = vrot.slane %v11789_v60, 9  ;;  %v1189_v21 = vor.u32 %v1187_v2, %v1186_v16  ;;  %v4563_v63 = vld [vmem:[#allocation3 + $0x10] sm:$0xff]  ;;  %2463 = vst.msk [vmem:[#allocation3 + $0x28] sm:$0xff] %vm13893_vm7, %v2420_v47 }
 0x11f   : > { %v1191_v28 = vrot.slane %v1186_v16, 4  ;;  %v1409_v48 = vsel %vm10992_vm14, %v1181_v6, %v1408_v3  ;;  %v2907_v34 = vrot.slane %v2905_v58, 4  ;;  %v2913_v43 = vrot.slane %v2911_v7, 5  ;;  %10123 = vmatprep.mubr.msk.bf16.mxu0 %vm4597_vm10, %v4563_v63 }
 0x120   : > { %1410 = vst [vmem:[#allocation2 + $0x78] sm:$0xf] %v1409_v48  ;;  %v2899_v57 = vrot.slane %v2898_v45, 4  ;;  %v3350_v59 = vrot.slane %v3221_v33, 5  ;;  %v3353_v22 = vrot.slane %v3222_v25, 5  ;;  %vm13916_vm1 = vcmask 130144   ;;  %10124 = vmatmul.mubr.msk.bf16.gmra.mrb[4].mxu0 %vm4597_vm10, %v4564_v27  ;;  %v11855_v27 = vpop.eup %10490 }
 0x121   : > { %2103 = vrot.lane.b32.xlu1 %v9506_v29, %s10700_s20  ;;  %2639 = vst.msk [vmem:[#allocation3 + $0x20] sm:$0xff] %vm13916_vm1, %v2595_v41  ;;  %v1190_v44 = vsel %vm10999_vm15, %v1182_v38, %v1189_v21  ;;  %v2908_v0 = vor.u32 %v2907_v34, %v2903_v46  ;;  %v1413_v3 = vsel %vm10791_vm4, %v1191_v28, %v1412_v15  ;;  %v818_v33 = vadd.f32 1.0, %v11732_v35  ;;  %v620_v38 = vld [vmem:[%s10826_s16 + $0xf0] sm:$0xff]  ;;  %v11845_v28 = vld [vmem:[%s13877_s3] ss:$0 sm:$0xff] }
 0x122   : > { %v912_v23 = vmul.f32 %v11751_v5, %v11537_v24  ;;  %1411 = vst.msk [vmem:[#allocation2 + $0x7c] sm:$0xf] %vm348_vm0, %v1190_v44  ;;  %1414 = vst [vmem:[#allocation2 + $0x80] sm:$0x1] %v1413_v3  ;;  %v3352_v60 = vrot.slane %v3350_v59, 4  ;;  %v913_v14 = vmul.f32 %v11754_v56, %v11545_v40  ;;  %v658_v36 = vmul.f32 %v11689_v8, %v619_v19 }
 0x123   : > { %v2904_v24 = vsel %vm10896_vm12, %v2899_v57, %v2903_v46  ;;  %v2909_v5 = vrot.slane %v2908_v0, 4  ;;  %v3351_v32 = vsel %vm10819_vm9, %v9585_v4, %v3350_v59  ;;  %v819_v29 = vadd.f32 1.0, %v11739_v30 }
 0x124   : > { %v10012_v51 = vpack.c.bf16 %v912_v23, %v912_v23  ;;  %v3354_v40 = vsel %vm10819_vm9, %v3352_v60, %v3353_v22  ;;  %v10013_v56 = vpack.c.bf16 %v913_v14, %v913_v14  ;;  %v820_v17 = vadd.f32 1.0, %v11745_v42  ;;  %v1415_v22 = vld [vmem:[#allocation2 + $0x84] sm:$0xf] }
 0x125   : > { %2427 = vrot.lane.b32.xlu1 %v9538_v20, %s10699_s19  ;;  %v2914_v50 = vsel %vm10896_vm12, %v2909_v5, %v2913_v43  ;;  %v11834_v18 = vadd.f32 1.0, %v11762_v54  ;;  %v9601_v58 = vcombine.low %v3351_v32, %v3354_v40  ;;  %10492 = vrcp.f32 %v818_v33  ;;  %v3140_v45 = vpop.permute.xlu0 %3139  ;;  %v2597_v42 = vpop.permute.xlu1 %2596 }
 0x126   : > { %v1193_v2 = vshrl.u32 %v10012_v51, 16  ;;  %v9569_v35 = vcombine.low %v2904_v24, %v2914_v50  ;;  %v1196_v20 = vshll.u32 %v10012_v51, 16  ;;  %v1201_v62 = vshrl.u32 %v10013_v56, 16  ;;  %3184 = vst.msk [vmem:[#allocation3 + $0x20] sm:$0xff] %vm3179_vm11, %v3140_v45 }
 0x127   : > { %v1204_v6 = vshll.u32 %v10013_v56, 16  ;;  %v2678_v16 = vld [vmem:[#allocation2 + $0x78] sm:$0xf]  ;;  %10494 = vrcp.f32 %v819_v29  ;;  %2640 = vst.msk [vmem:[#allocation3 + $0x28] sm:$0xff] %vm13916_vm1, %v2597_v42  ;;  %v11848_v48 = vadd.f32 %v11845_v28, %v658_v36  ;;  %v11851_v34 = vmul.f32 %v11689_v8, %v620_v38 }
 0x128   : > { %v3223_v25 = vld [vmem:[#allocation2 + $0x78] sm:$0xe]  ;;  %3147 = vrot.lane.b32.xlu0 %v9569_v35, %s10705_s25  ;;  %v2916_v30 = vshrl.u32 %v2678_v16, 16  ;;  %v2919_v46 = vshll.u32 %v2678_v16, 16  ;;  %v1195_v15 = vrot.slane %v1193_v2, 7  ;;  %v11839_v21 = vrot.slane %v1201_v62, 7 }
 0x129   : > { %v9586_v7 = vrot.slane %v3223_v25, 9  ;;  %v10304_v54 = vld [vmem:[#allocation2 + $0x78] sm:$0xff]   ;;  %v2680_v41 = vld [vmem:[#allocation2 + $0x80] sm:$0x1]  ;;  %10496 = vrcp.f32 %v820_v17  ;;  %v3461_v23 = vpop.permute.xlu0 %3460  ;;  %v1419_v35 = vld [vmem:[#allocation2 + $0x8c] sm:$0x1] }
 0x12a   : > { %v2679_v4 = vld [vmem:[#allocation2 + $0x7c] sm:$0xf]  ;;  %v2918_v19 = vrot.slane %v2916_v30, 4  ;;  %v2921_v57 = vrot.slane %v2919_v46, 5  ;;  %2604 = vrot.lane.b32.xlu1 %v10304_v54, %s10701_s21  ;;  %v2935_v47 = vshll.u32 %v2680_v41, 16  ;;  %v1198_v0 = vor.u32 %v1196_v20, %v1195_v15  ;;  %3505 = vst.msk [vmem:[#allocation3 + $0x20] sm:$0xff] %vm3500_vm13, %v3461_v23 }
 0x12b   : > { %v2925_v43 = vshll.u32 %v2679_v4, 16  ;;  %v2929_v59 = vshrl.u32 %v2679_v4, 16  ;;  %v3224_v63 = vld [vmem:[#allocation2 + $0x7c] sm:$0xf]  ;;  %v3225_v44 = vld [vmem:[#allocation2 + $0x80] sm:$0x1]  ;;  %v1206_v3 = vor.u32 %v1204_v6, %v11839_v21  ;;  %10498 = vrcp.f32 %v11834_v18 }
 0x12c   : > { %v2922_v8 = vor.u32 %v2921_v57, %v2918_v19  ;;  %3468 = vrot.lane.b32.xlu0 %v9601_v58, %s10703_s23  ;;  %v3357_v36 = vrot.slane %v3224_v63, 5  ;;  %v10305_v24 = vld [vmem:[#allocation2 + $0x78] sm:$0xff]   ;;  %v2937_v5 = vrot.slane %v2935_v47, 5  ;;  %v3360_v51 = vrot.slane %v3225_v44, 5  ;;  %v3721_v6 = vld [vmem:[#allocation2 + $0x80] sm:$0x1] }
 0x12d   : > { %v2927_v60 = vrot.slane %v2925_v43, 5  ;;  %v2931_v14 = vrot.slane %v2929_v59, 4  ;;  %v1199_v33 = vrot.slane %v1195_v15, 4  ;;  %v1208_v32 = vrot.slane %v11839_v21, 4  ;;  %v3719_v40 = vld [vmem:[#allocation2 + $0x78] sm:$0xf]  ;;  %v3639_v25 = vpop.permute.xlu0 %3638 }
 0x12e   : > { %v2923_v56 = vrot.slane %v2922_v8, 4  ;;  %v11862_v50 = vsel %vm10819_vm9, %v9586_v7, %v3357_v36  ;;  %v3359_v2 = vrot.slane %v3357_v36, 4  ;;  %v3720_v17 = vld [vmem:[#allocation2 + $0x7c] sm:$0xf]  ;;  %v1416_v62 = vsel %vm10992_vm14, %v1198_v0, %v1415_v22  ;;  %v4264_v58 = vld [vmem:[#allocation2 + $0x78] sm:$0xe] }
 0x12f   : > { %v2932_v29 = vor.u32 %v2931_v14, %v2927_v60  ;;  %v1207_v20 = vsel %vm10999_vm15, %v1199_v33, %v1206_v3  ;;  %v3936_v38 = vshrl.u32 %v3719_v40, 16  ;;  %v3939_v16 = vshll.u32 %v3719_v40, 16  ;;  %1417 = vst [vmem:[#allocation2 + $0x84] sm:$0xf] %v1416_v62  ;;  %v4265_v15 = vld [vmem:[#allocation2 + $0x7c] sm:$0xf]  ;;  %v10493_v54 = vpop.eup %10492 }
 0x130   : > { %v2928_v45 = vsel %vm10896_vm12, %v2923_v56, %v2927_v60  ;;  %v3361_v46 = vsel %vm10819_vm9, %v3359_v2, %v3360_v51  ;;  %3646 = vrot.lane.b32.xlu0 %v10305_v24, %s10702_s22  ;;  %1418 = vst.msk [vmem:[#allocation2 + $0x88] sm:$0xf] %vm348_vm0, %v1207_v20  ;;  %v3945_v7 = vshll.u32 %v3720_v17, 16  ;;  %v4266_v42 = vld [vmem:[#allocation2 + $0x80] sm:$0x1]  ;;  %v3949_v19 = vshrl.u32 %v3720_v17, 16 }
 0x131   : > { %v2933_v30 = vrot.slane %v2932_v29, 4  ;;  %3683 = vst.msk [vmem:[#allocation3 + $0x20] sm:$0xff] %vm3678_vm3, %v3639_v25  ;;  %v9602_v4 = vcombine.low %v11862_v50, %v3361_v46  ;;  %v3938_v21 = vrot.slane %v3936_v38, 4  ;;  %v3941_v41 = vrot.slane %v3939_v16, 5  ;;  %v1632_v57 = vld [vmem:[#allocation2 + $0x78] sm:$0xf]  ;;  %v3142_v44 = vpop.permute.xlu1 %3141  ;;  %v10495_v0 = vpop.eup %10494 }
 0x132   : > { %v3947_v59 = vrot.slane %v3945_v7, 5  ;;  %v3955_v22 = vshll.u32 %v3721_v6, 16  ;;  %v1420_v47 = vsel %vm10791_vm4, %v1208_v32, %v1419_v35  ;;  %v1633_v63 = vld [vmem:[#allocation2 + $0x7c] sm:$0xf]  ;;  %v3951_v8 = vrot.slane %v3949_v19, 4  ;;  %3185 = vst.msk [vmem:[#allocation3 + $0x28] sm:$0xff] %vm3179_vm11, %v3142_v44 }
 0x133   : > { %v2938_v43 = vsel %vm10896_vm12, %v2933_v30, %v2937_v5  ;;  %v3942_v23 = vor.u32 %v3941_v41, %v3938_v21  ;;  %1421 = vst [vmem:[#allocation2 + $0x8c] sm:$0x1] %v1420_v47  ;;  %v9649_v60 = vrot.slane %v4264_v58, 9  ;;  %v4394_v36 = vrot.slane %v4265_v15, 5  ;;  %v11881_v5 = vpop.eup %10496  ;;  %v1634_v62 = vld [vmem:[#allocation2 + $0x80] sm:$0x1] }
 0x134   : > { %v9570_v3 = vcombine.low %v2928_v45, %v2938_v43  ;;  %v3957_v14 = vrot.slane %v3955_v22, 5  ;;  %v4397_v24 = vrot.slane %v4266_v42, 5  ;;  %v1894_v51 = vshrl.u32 %v1632_v57, 16 }
 0x135   : > { %v3943_v33 = vrot.slane %v3942_v23, 4  ;;  %v3952_v32 = vor.u32 %v3951_v8, %v3947_v59  ;;  %v1897_v40 = vshll.u32 %v1632_v57, 16  ;;  %v1903_v56 = vshll.u32 %v1633_v63, 16  ;;  %v3463_v17 = vpop.permute.xlu1 %3462 }
 0x136   : > { %3149 = vrot.lane.b32.xlu1 %v9570_v3, %s10705_s25  ;;  %v11886_v29 = vsel %vm10819_vm9, %v9649_v60, %v4394_v36  ;;  %v4396_v50 = vrot.slane %v4394_v36, 4  ;;  %v1896_v2 = vrot.slane %v1894_v51, 4  ;;  %v1907_v6 = vshrl.u32 %v1633_v63, 16  ;;  %3506 = vst.msk [vmem:[#allocation3 + $0x28] sm:$0xff] %vm3500_vm13, %v3463_v17  ;;  %v3722_v16 = vld [vmem:[#allocation2 + $0x84] sm:$0xf] }
 0x137   : > { %v3948_v35 = vsel %vm10896_vm12, %v3943_v33, %v3947_v59  ;;  %v3953_v20 = vrot.slane %v3952_v32, 4  ;;  %v11892_v38 = vmul.f32 %v10493_v54, %v11553_v37  ;;  %v3723_v58 = vld [vmem:[#allocation2 + $0x88] sm:$0xf]  ;;  %v1899_v45 = vrot.slane %v1897_v40, 5  ;;  %v4267_v54 = vld [vmem:[#allocation2 + $0x84] sm:$0xe]  ;;  %v4184_v22 = vpop.permute.xlu0 %4183 }
 0x138   : > { %v4398_v25 = vsel %vm10819_vm9, %v4396_v50, %v4397_v24  ;;  %v11897_v30 = vrot.slane %v1903_v56, 5  ;;  %v11900_v18 = vmul.f32 %v10495_v0, %v11557_v52  ;;  %v10306_v46 = vld [vmem:[#allocation2 + $0x84] sm:$0xff]   ;;  %v3960_v7 = vshrl.u32 %v3722_v16, 16  ;;  %4228 = vst.msk [vmem:[#allocation3 + $0x20] sm:$0xff] %vm4223_vm5, %v4184_v22 }
 0x139   : > { %v3958_v37 = vsel %vm10896_vm12, %v3953_v20, %v3957_v14  ;;  %v3963_v15 = vshll.u32 %v3722_v16, 16  ;;  %v3969_v42 = vshll.u32 %v3723_v58, 16  ;;  %v3973_v19 = vshrl.u32 %v3723_v58, 16  ;;  %v4268_v59 = vld [vmem:[#allocation2 + $0x88] sm:$0xf]  ;;  %v3641_v60 = vpop.permute.xlu1 %3640  ;;  %v11917_v58 = vpop.eup %10498 }
 0x13a   : > { %3470 = vrot.lane.b32.xlu1 %v9602_v4, %s10703_s23  ;;  %v9633_v21 = vcombine.low %v3948_v35, %v3958_v37  ;;  %v3724_v41 = vld [vmem:[#allocation2 + $0x8c] sm:$0x1]  ;;  %v9665_v57 = vcombine.low %v11886_v29, %v4398_v25  ;;  %v1900_v43 = vor.u32 %v1899_v45, %v1896_v2  ;;  %v3962_v52 = vrot.slane %v3960_v7, 4  ;;  %v1635_v33 = vld [vmem:[#allocation2 + $0x84] sm:$0xf]  ;;  %3684 = vst.msk [vmem:[#allocation3 + $0x28] sm:$0xff] %vm3678_vm3, %v3641_v60 }
 0x13b   : > { %v3965_v47 = vrot.slane %v3963_v15, 5  ;;  %v3971_v63 = vrot.slane %v3969_v42, 5  ;;  %v3979_v4 = vshll.u32 %v3724_v41, 16  ;;  %v3975_v44 = vrot.slane %v3973_v19, 4  ;;  %v4269_v8 = vld [vmem:[#allocation2 + $0x8c] sm:$0x1]  ;;  %v4505_v2 = vpop.permute.xlu0 %4504 }
 0x13c   : > { %4191 = vrot.lane.b32.xlu0 %v9633_v21, %s10706_s26  ;;  %v1901_v0 = vrot.slane %v1900_v43, 4  ;;  %v1909_v3 = vrot.slane %v1907_v6, 4  ;;  %v1913_v23 = vshll.u32 %v1634_v62, 16  ;;  %v9650_v24 = vrot.slane %v4267_v54, 9  ;;  %v1636_v50 = vld [vmem:[#allocation2 + $0x88] sm:$0xf] }
 0x13d   : > { %v3966_v14 = vor.u32 %v3965_v47, %v3962_v52  ;;  %v3981_v36 = vrot.slane %v3979_v4, 5  ;;  %v4401_v51 = vrot.slane %v4268_v59, 5  ;;  %v3976_v32 = vor.u32 %v3975_v44, %v3971_v63  ;;  %v2180_v6 = vld [vmem:[#allocation2 + $0x78] sm:$0xe]  ;;  %v2181_v16 = vld [vmem:[#allocation2 + $0x7c] sm:$0xf] }
 0x13e   : > { %3648 = vrot.lane.b32.xlu1 %v10306_v46, %s10702_s22  ;;  %v1906_v40 = vsel %vm10896_vm12, %v1901_v0, %v11897_v30  ;;  %v1910_v56 = vor.u32 %v1909_v3, %v11897_v30  ;;  %v1915_v29 = vrot.slane %v1913_v23, 5  ;;  %v4404_v62 = vrot.slane %v4269_v8, 5  ;;  %4549 = vst.msk [vmem:[#allocation3 + $0x20] sm:$0xff] %vm4544_vm2, %v4505_v2  ;;  %v1637_v30 = vld [vmem:[#allocation2 + $0x8c] sm:$0x1] }
 0x13f   : > { %v3967_v17 = vrot.slane %v3966_v14, 4  ;;  %v4402_v35 = vsel %vm10819_vm9, %v9650_v24, %v4401_v51  ;;  %v4403_v20 = vrot.slane %v4401_v51, 4  ;;  %v3977_v25 = vrot.slane %v3976_v32, 4  ;;  %v2182_v7 = vld [vmem:[#allocation2 + $0x80] sm:$0x1] }
 0x140   : > { %4512 = vrot.lane.b32.xlu0 %v9665_v57, %s10704_s24  ;;  %v1911_v45 = vrot.slane %v1910_v56, 4  ;;  %v1918_v46 = vshrl.u32 %v1635_v33, 16  ;;  %v1921_v37 = vshll.u32 %v1635_v33, 16  ;;  %v1927_v54 = vshll.u32 %v1636_v50, 16  ;;  %v2183_v59 = vld [vmem:[#allocation2 + $0x84] sm:$0xe] }
 0x141   : > { %v3972_v15 = vsel %vm10896_vm12, %v3967_v17, %v3971_v63  ;;  %v4405_v42 = vsel %vm10819_vm9, %v4403_v20, %v4404_v62  ;;  %v1931_v21 = vshrl.u32 %v1636_v50, 16  ;;  %v3982_v41 = vsel %vm10896_vm12, %v3977_v25, %v3981_v36  ;;  %v2184_v22 = vld [vmem:[#allocation2 + $0x88] sm:$0xf]  ;;  %v2185_v8 = vld [vmem:[#allocation2 + $0x8c] sm:$0x1]  ;;  %v4507_v51 = vpop.permute.xlu0 %4506 }
 0x142   : > { %v1916_v19 = vsel %vm10896_vm12, %v1911_v45, %v1915_v29  ;;  %v9666_v57 = vcombine.low %v4402_v35, %v4405_v42  ;;  %v1920_v43 = vrot.slane %v1918_v46, 4  ;;  %v9634_v52 = vcombine.low %v3972_v15, %v3982_v41  ;;  %v2681_v29 = vld [vmem:[#allocation2 + $0x84] sm:$0xf]  ;;  %v2682_v46 = vld [vmem:[#allocation2 + $0x88] sm:$0xf] }
 0x143   : > { %v9507_v47 = vcombine.low %v1906_v40, %v1916_v19  ;;  %v1923_v4 = vrot.slane %v1921_v37, 5  ;;  %v1929_v44 = vrot.slane %v1927_v54, 5  ;;  %v1933_v63 = vrot.slane %v1931_v21, 4  ;;  %v4186_v50 = vpop.permute.xlu1 %4185  ;;  %v2683_v42 = vld [vmem:[#allocation2 + $0x8c] sm:$0x1]  ;;  %v10310_v19 = vld [vmem:[#allocation2 + $0x84] sm:$0xff]  }
 0x144   : > { %4514 = vrot.lane.b32.xlu0 %v9666_v57, %s10704_s24  ;;  %v1937_v0 = vshll.u32 %v1637_v30, 16  ;;  %v9523_v3 = vrot.slane %v2180_v6, 9  ;;  %v2321_v23 = vrot.slane %v2181_v16, 5  ;;  %4193 = vrot.lane.b32.xlu1 %v9634_v52, %s10706_s26  ;;  %v2324_v14 = vrot.slane %v2182_v7, 5  ;;  %4229 = vst.msk [vmem:[#allocation3 + $0x28] sm:$0xff] %vm4223_vm5, %v4186_v50 }
 0x145   : > { %v1924_v60 = vor.u32 %v1923_v4, %v1920_v43  ;;  %v9524_v36 = vrot.slane %v2183_v59, 9  ;;  %v2328_v24 = vrot.slane %v2184_v22, 5  ;;  %v1934_v33 = vor.u32 %v1933_v63, %v1929_v44  ;;  %v4565_v2 = vld [vmem:[#allocation3 + $0x20] sm:$0xff]  ;;  %4550 = vst.msk [vmem:[#allocation3 + $0x28] sm:$0xff] %vm4544_vm2, %v4507_v51  ;;  %v3227_v54 = vld [vmem:[#allocation2 + $0x88] sm:$0xf] }
 0x146   : > { %v1939_v32 = vrot.slane %v1937_v0, 5  ;;  %v2322_v40 = vsel %vm10819_vm9, %v9523_v3, %v2321_v23  ;;  %v2323_v56 = vrot.slane %v2321_v23, 4  ;;  %v2331_v20 = vrot.slane %v2185_v8, 5  ;;  %10127 = vmatprep.mubr.msk.bf16.mxu0 %vm4597_vm10, %v4565_v2  ;;  %v1422_v59 = vld [vmem:[#allocation2 + $0x90] sm:$0xf] }
 0x147   : > { %v1925_v17 = vrot.slane %v1924_v60, 4  ;;  %v2330_v35 = vrot.slane %v2328_v24, 4  ;;  %v11934_v62 = vmul.f32 %v11881_v5, %v11566_v55  ;;  %v1935_v6 = vrot.slane %v1934_v33, 4  ;;  %v2098_v21 = vpop.permute.xlu1 %2097  ;;  %v3226_v0 = vld [vmem:[#allocation2 + $0x84] sm:$0xe] }
 0x148   : > { %v2325_v16 = vsel %vm10819_vm9, %v2323_v56, %v2324_v14  ;;  %v10014_v25 = vpack.c.bf16 %v11892_v38, %v11892_v38  ;;  %v10015_v45 = vpack.c.bf16 %v11900_v18, %v11900_v18  ;;  %2105 = vrot.lane.b32.xlu1 %v9507_v47, %s10700_s20  ;;  %v2329_v30 = vsel %vm10819_vm9, %v9524_v36, %v2328_v24  ;;  %v2422_v52 = vpop.permute.xlu0 %2421  ;;  %v1426_v60 = vld [vmem:[#allocation2 + $0x98] sm:$0x1] }
 0x149   : > { %v1930_v55 = vsel %vm10896_vm12, %v1925_v17, %v1929_v44  ;;  %v9539_v5 = vcombine.low %v2322_v40, %v2325_v16  ;;  %v2940_v37 = vshrl.u32 %v2681_v29, 16  ;;  %v1940_v7 = vsel %vm10896_vm12, %v1935_v6, %v1939_v32  ;;  %2140 = vst.msk [vmem:[#allocation3 + $0x30] sm:$0xff] %vm2133_vm6, %v2098_v21  ;;  %v3228_v32 = vld [vmem:[#allocation2 + $0x8c] sm:$0x1] }
 0x14a   : > { %v2332_v38 = vsel %vm10819_vm9, %v2330_v35, %v2331_v20  ;;  %v1210_v18 = vshrl.u32 %v10014_v25, 16  ;;  %v1213_v15 = vshll.u32 %v10014_v25, 16  ;;  %v9508_v41 = vcombine.low %v1930_v55, %v1940_v7  ;;  %2464 = vst.msk [vmem:[#allocation3 + $0x30] sm:$0xff] %vm13893_vm7, %v2422_v52 }
 0x14b   : > { %2429 = vrot.lane.b32.xlu0 %v9539_v5, %s10699_s19  ;;  %v1218_v57 = vshrl.u32 %v10015_v45, 16  ;;  %v1221_v43 = vshll.u32 %v10015_v45, 16  ;;  %v2942_v22 = vrot.slane %v2940_v37, 4  ;;  %v2943_v4 = vshll.u32 %v2681_v29, 16  ;;  %v2100_v40 = vpop.permute.xlu1 %2099 }
 0x14c   : > { %v1212_v47 = vrot.slane %v1210_v18, 7  ;;  %v2949_v44 = vshll.u32 %v2682_v46, 16  ;;  %v2953_v63 = vshrl.u32 %v2682_v46, 16  ;;  %2107 = vrot.lane.b32.xlu1 %v9508_v41, %s10700_s20  ;;  %v9540_v3 = vcombine.low %v2329_v30, %v2332_v38  ;;  %2141 = vst.msk [vmem:[#allocation3 + $0x38] sm:$0xff] %vm2133_vm6, %v2100_v40  ;;  %v2599_v17 = vpop.permute.xlu0 %2598  ;;  %v4566_v35 = vld [vmem:[#allocation3 + $0x28] sm:$0xff] }
 0x14d   : > { %v1220_v23 = vrot.slane %v1218_v57, 7  ;;  %v2959_v8 = vshll.u32 %v2683_v42, 16  ;;  %v3364_v14 = vrot.slane %v3227_v54, 5  ;;  %v2945_v51 = vrot.slane %v2943_v4, 5  ;;  %2641 = vst.msk [vmem:[#allocation3 + $0x30] sm:$0xff] %vm13916_vm1, %v2599_v17  ;;  %10128 = vmatmul.mubr.msk.bf16.gmra.mrb[8].mxu0 %vm4597_vm10, %v4566_v35  ;;  %v10327_v18 = vld [vmem:[#allocation2 + $0x60] sm:$0xff]  }
 0x14e   : > { %v1215_v36 = vor.u32 %v1213_v15, %v1212_v47  ;;  %v1216_v24 = vrot.slane %v1212_v47, 4  ;;  %v2951_v33 = vrot.slane %v2949_v44, 5  ;;  %v2955_v50 = vrot.slane %v2953_v63, 4  ;;  %v408_v57 = vld [vmem:[#allocation2 + $0xc0] sm:$0x1]  ;;  %v10328_v63 = vld [vmem:[#allocation2 + $0x6c] sm:$0xff]  }
 0x14f   : > { %2606 = vrot.lane.b32.xlu0 %v10310_v19, %s10701_s21  ;;  %v1223_v56 = vor.u32 %v1221_v43, %v1220_v23  ;;  %v1225_v29 = vrot.slane %v1220_v23, 4  ;;  %v9587_v2 = vrot.slane %v3226_v0, 9  ;;  %v2946_v6 = vor.u32 %v2945_v51, %v2942_v22  ;;  %v2424_v38 = vpop.permute.xlu1 %2423  ;;  %v461_v19 = vld [vmem:[#allocation2 + $0xbc] sm:$0x1]  ;;  %v10650_v40 = vld [vmem:[%s13876_s2] ss:$0 sm:$0xff] }
 0x150   : > { %v1423_v20 = vsel %vm10992_vm14, %v1215_v36, %v1422_v59  ;;  %v2961_v16 = vrot.slane %v2959_v8, 5  ;;  %v3366_v25 = vrot.slane %v3364_v14, 4  ;;  %2431 = vrot.lane.b32.xlu1 %v9540_v3, %s10699_s19  ;;  %v2956_v55 = vor.u32 %v2955_v50, %v2951_v33  ;;  %2465 = vst.msk [vmem:[#allocation3 + $0x38] sm:$0xff] %vm13893_vm7, %v2424_v38  ;;  %v621_v59 = vld [vmem:[%s10826_s16 + $0xf8] sm:$0xff] }
 0x151   : > { %v1224_v45 = vsel %vm10999_vm15, %v1216_v24, %v1223_v56  ;;  %1424 = vst [vmem:[#allocation2 + $0x90] sm:$0xf] %v1423_v20  ;;  %v1427_v5 = vsel %vm10791_vm4, %v1225_v29, %v1426_v60  ;;  %v3367_v30 = vrot.slane %v3228_v32, 5  ;;  %v2947_v46 = vrot.slane %v2946_v6, 4  ;;  %v1429_v4 = vld [vmem:[#allocation2 + $0x9c] sm:$0xf] }
 0x152   : > { %1425 = vst.msk [vmem:[#allocation2 + $0x94] sm:$0xf] %vm348_vm0, %v1224_v45  ;;  %1428 = vst [vmem:[#allocation2 + $0x98] sm:$0x1] %v1427_v5  ;;  %v917_v37 = vmul.f32 %v11917_v58, %v11569_v39  ;;  %v10016_v7 = vpack.c.bf16 %v11934_v62, %v11934_v62  ;;  %v2957_v15 = vrot.slane %v2956_v55, 4  ;;  %v3365_v42 = vsel %vm10819_vm9, %v9587_v2, %v3364_v14 }
 0x153   : > { %v822_v54 = vadd.f32 1.0, %v11766_v53  ;;  %v11980_v21 = vadd.f32 %v11845_v28, %v11851_v34  ;;  %v2952_v39 = vsel %vm10896_vm12, %v2947_v46, %v2951_v33  ;;  %v3368_v58 = vsel %vm10819_vm9, %v3366_v25, %v3367_v30  ;;  %v2601_v23 = vpop.permute.xlu1 %2600 }
 0x154   : > { %v11986_v62 = vpack.c.bf16 %v917_v37, %v917_v37  ;;  %v1227_v41 = vshrl.u32 %v10016_v7, 16  ;;  %vm13917_vm1 = vcmask 31744   ;;  %v2962_v53 = vsel %vm10896_vm12, %v2957_v15, %v2961_v16  ;;  %v3144_v8 = vpop.permute.xlu0 %3143 }
 0x155   : > { %1594 = vst.msk [vmem:[#allocation3 + $0x40] sm:$0xff] %vm13917_vm1, %v10327_v18  ;;  %v1230_v43 = vshll.u32 %v10016_v7, 16  ;;  %v823_v28 = vadd.f32 1.0, %v11777_v61  ;;  %v9446_v34 = vmul.f32 -1.442695, %v11848_v48  ;;  %v9571_v22 = vcombine.low %v2952_v39, %v2962_v53 }
 0x156   : > { %v11994_v52 = vrot.slane %v1227_v41, 7  ;;  %v1235_v47 = vshrl.u32 %v11986_v62, 16  ;;  %v824_v44 = vadd.f32 1.0, %v11855_v27  ;;  %v1238_v0 = vshll.u32 %v11986_v62, 16  ;;  %3186 = vst.msk [vmem:[#allocation3 + $0x30] sm:$0xff] %vm3179_vm11, %v3144_v8 }
 0x157   : > { %v462_v3 = vsel %vm10808_vm8, 0, %v461_v19  ;;  %v409_v61 = vsel %vm10791_vm4, 0, %v408_v57  ;;  %v12004_v60 = vmul.f32 -1.442695, %v11980_v21  ;;  %3151 = vrot.lane.b32.xlu0 %v9571_v22, %s10705_s25  ;;  %v9603_v36 = vcombine.low %v3365_v42, %v3368_v58  ;;  %v1433_v8 = vld [vmem:[#allocation2 + $0xa4] sm:$0x1] }
 0x158   : > { %v2684_v14 = vld [vmem:[#allocation2 + $0x90] sm:$0xf]  ;;  %v1232_v27 = vor.u32 %v1230_v43, %v11994_v52  ;;  %10500 = vrcp.f32 %v822_v54  ;;  %463 = vst [vmem:[#allocation2 + $0xbc] sm:$0x1] %v462_v3  ;;  %vm13918_vm1 = vcmask 130144   ;;  %vm13919_vm7 = vcmask 31744   ;;  %v3465_v55 = vpop.permute.xlu0 %3464 }
 0x159   : > { %v3229_v24 = vld [vmem:[#allocation2 + $0x90] sm:$0xe]  ;;  %2642 = vst.msk [vmem:[#allocation3 + $0x38] sm:$0xff] %vm13918_vm1, %v2601_v23  ;;  %410 = vst [vmem:[#allocation2 + $0xc0] sm:$0x1] %v409_v61  ;;  %v2964_v32 = vshrl.u32 %v2684_v14, 16  ;;  %10502 = vrcp.f32 %v823_v28  ;;  %v12014_v56 = vmul.f32 %v10650_v40, %v621_v59 }
 0x15a   : > { %1595 = vst.msk [vmem:[#allocation3 + $0x48] sm:$0xff] %vm13919_vm7, %v10328_v63  ;;  %v10312_v51 = vld [vmem:[#allocation2 + $0x90] sm:$0xff]   ;;  %v2686_v29 = vld [vmem:[#allocation2 + $0x98] sm:$0x1]  ;;  %v2967_v50 = vshll.u32 %v2684_v14, 16  ;;  %v9588_v35 = vrot.slane %v3229_v24, 9  ;;  %v1430_v45 = vsel %vm10992_vm14, %v1232_v27, %v1429_v4  ;;  %10504 = vpow2.f32 %v9446_v34  ;;  %vm13920_vm1 = vmmov %vm13919_vm7 }
 0x15b   : > { %v2685_v33 = vld [vmem:[#allocation2 + $0x94] sm:$0xf]  ;;  %2608 = vrot.lane.b32.xlu1 %v10312_v51, %s10701_s21  ;;  %v2966_v20 = vrot.slane %v2964_v32, 4  ;;  %v2983_v6 = vshll.u32 %v2686_v29, 16  ;;  %v3231_v25 = vld [vmem:[#allocation2 + $0x98] sm:$0x1]  ;;  %3472 = vrot.lane.b32.xlu0 %v9603_v36, %s10703_s23  ;;  %10506 = vrcp.f32 %v824_v44 }
 0x15c   : > { %v2973_v2 = vshll.u32 %v2685_v33, 16  ;;  %v2977_v17 = vshrl.u32 %v2685_v33, 16  ;;  %v3230_v16 = vld [vmem:[#allocation2 + $0x94] sm:$0xf]  ;;  %v2969_v5 = vrot.slane %v2967_v50, 5  ;;  %3507 = vst.msk [vmem:[#allocation3 + $0x30] sm:$0xff] %vm3500_vm13, %v3465_v55  ;;  %v3643_v34 = vpop.permute.xlu0 %3642  ;;  %10508 = vpow2.f32 %v12004_v60 }
 0x15d   : > { %v3371_v37 = vrot.slane %v3230_v16, 5  ;;  %1431 = vst [vmem:[#allocation2 + $0x9c] sm:$0xf] %v1430_v45  ;;  %v2985_v7 = vrot.slane %v2983_v6, 5  ;;  %v3374_v38 = vrot.slane %v3231_v25, 5  ;;  %v10317_v18 = vld [vmem:[#allocation2 + $0x90] sm:$0xff]  }
 0x15e   : > { %v2975_v30 = vrot.slane %v2973_v2, 5  ;;  %v2979_v46 = vrot.slane %v2977_v17, 4  ;;  %v1233_v15 = vrot.slane %v11994_v52, 4  ;;  %v2970_v42 = vor.u32 %v2969_v5, %v2966_v20  ;;  %v3725_v41 = vld [vmem:[#allocation2 + $0x90] sm:$0xf]  ;;  %3685 = vst.msk [vmem:[#allocation3 + $0x30] sm:$0xff] %vm3678_vm3, %v3643_v34 }
 0x15f   : > { %v12024_v39 = vsel %vm10819_vm9, %v9588_v35, %v3371_v37  ;;  %v3373_v58 = vrot.slane %v3371_v37, 4  ;;  %v3726_v19 = vld [vmem:[#allocation2 + $0x94] sm:$0xf]  ;;  %v1237_v57 = vrot.slane %v1235_v47, 7  ;;  %v3984_v53 = vshrl.u32 %v3725_v41, 16  ;;  %3650 = vrot.lane.b32.xlu0 %v10317_v18, %s10702_s22  ;;  %v10331_v37 = vld [vmem:[#allocation2 + $0x78] sm:$0xff]  }
 0x160   : > { %v2980_v54 = vor.u32 %v2979_v46, %v2975_v30  ;;  %v3987_v43 = vshll.u32 %v3725_v41, 16  ;;  %v3993_v28 = vshll.u32 %v3726_v19, 16  ;;  %v2971_v59 = vrot.slane %v2970_v42, 4  ;;  %v3727_v4 = vld [vmem:[#allocation2 + $0x98] sm:$0x1]  ;;  %1596 = vst.msk [vmem:[#allocation3 + $0x50] sm:$0xff] %vm13919_vm7, %v10331_v37  ;;  %vm13921_vm7 = vmmov %vm13920_vm1 }
 0x161   : > { %v3375_v52 = vsel %vm10819_vm9, %v3373_v58, %v3374_v38  ;;  %v3997_v44 = vshrl.u32 %v3726_v19, 16  ;;  %v1240_v47 = vor.u32 %v1238_v0, %v1237_v57  ;;  %v1242_v3 = vrot.slane %v1237_v57, 4  ;;  %v4270_v61 = vld [vmem:[#allocation2 + $0x90] sm:$0xe]  ;;  %v4271_v33 = vld [vmem:[#allocation2 + $0x94] sm:$0xf] }
 0x162   : > { %v2981_v22 = vrot.slane %v2980_v54, 4  ;;  %v9604_v63 = vcombine.low %v12024_v39, %v3375_v52  ;;  %v3986_v23 = vrot.slane %v3984_v53, 4  ;;  %v12033_v14 = vpop.eup %10500  ;;  %v2976_v36 = vsel %vm10896_vm12, %v2971_v59, %v2975_v30  ;;  %v4272_v32 = vld [vmem:[#allocation2 + $0x98] sm:$0x1]  ;;  %v1638_v16 = vld [vmem:[#allocation2 + $0x90] sm:$0xf] }
 0x163   : > { %v3989_v27 = vrot.slane %v3987_v43, 5  ;;  %v3995_v51 = vrot.slane %v3993_v28, 5  ;;  %v10503_v40 = vpop.eup %10502  ;;  %v1241_v62 = vsel %vm10999_vm15, %v1233_v15, %v1240_v47  ;;  %v3999_v0 = vrot.slane %v3997_v44, 4  ;;  %v1639_v46 = vld [vmem:[#allocation2 + $0x94] sm:$0xf]  ;;  %v3146_v42 = vpop.permute.xlu1 %3145  ;;  %v10332_v53 = vld [vmem:[#allocation2 + $0x84] sm:$0xff]  }
 0x164   : > { %v2986_v24 = vsel %vm10896_vm12, %v2981_v22, %v2985_v7  ;;  %v4003_v50 = vshll.u32 %v3727_v4, 16  ;;  %v3728_v2 = vld [vmem:[#allocation2 + $0x9c] sm:$0xf]  ;;  %1432 = vst.msk [vmem:[#allocation2 + $0xa0] sm:$0xf] %vm348_vm0, %v1241_v62  ;;  %v1434_v35 = vsel %vm10791_vm4, %v1242_v3, %v1433_v8  ;;  %v12044_v25 = vpop.eup %10504  ;;  %v9651_v5 = vrot.slane %v4270_v61, 9 }
 0x165   : > { %v9572_v29 = vcombine.low %v2976_v36, %v2986_v24  ;;  %v3990_v17 = vor.u32 %v3989_v27, %v3986_v23  ;;  %v4008_v20 = vshrl.u32 %v3728_v2, 16  ;;  %v4011_v6 = vshll.u32 %v3728_v2, 16  ;;  %1435 = vst [vmem:[#allocation2 + $0xa4] sm:$0x1] %v1434_v35  ;;  %v12047_v54 = vpop.eup %10506  ;;  %3187 = vst.msk [vmem:[#allocation3 + $0x38] sm:$0xff] %vm3179_vm11, %v3146_v42  ;;  %v4188_v57 = vpop.permute.xlu0 %4187 }
 0x166   : > { %v4000_v45 = vor.u32 %v3999_v0, %v3995_v51  ;;  %v4005_v55 = vrot.slane %v4003_v50, 5  ;;  %v4408_v30 = vrot.slane %v4271_v33, 5  ;;  %v4411_v15 = vrot.slane %v4272_v32, 5  ;;  %4230 = vst.msk [vmem:[#allocation3 + $0x30] sm:$0xff] %vm4223_vm5, %v4188_v57  ;;  %v1640_v23 = vld [vmem:[#allocation2 + $0x98] sm:$0x1] }
 0x167   : > { %3153 = vrot.lane.b32.xlu1 %v9572_v29, %s10705_s25  ;;  %v3991_v7 = vrot.slane %v3990_v17, 4  ;;  %v4010_v38 = vrot.slane %v4008_v20, 4  ;;  %v4013_v18 = vrot.slane %v4011_v6, 5  ;;  %v1942_v19 = vshrl.u32 %v1638_v16, 16  ;;  %1597 = vst.msk [vmem:[#allocation3 + $0x58] sm:$0xff] %vm13920_vm1, %v10332_v53  ;;  %v3467_v36 = vpop.permute.xlu1 %3466 }
 0x168   : > { %v4001_v39 = vrot.slane %v4000_v45, 4  ;;  %v4409_v58 = vsel %vm10819_vm9, %v9651_v5, %v4408_v30  ;;  %v4410_v41 = vrot.slane %v4408_v30, 4  ;;  %v1945_v34 = vshll.u32 %v1638_v16, 16  ;;  %v4273_v61 = vld [vmem:[#allocation2 + $0x9c] sm:$0xe]  ;;  %3508 = vst.msk [vmem:[#allocation3 + $0x38] sm:$0xff] %vm3500_vm13, %v3467_v36  ;;  %v12090_v36 = vpop.eup %10508 }
 0x169   : > { %v3996_v43 = vsel %vm10896_vm12, %v3991_v7, %v3995_v51  ;;  %v4014_v28 = vor.u32 %v4013_v18, %v4010_v38  ;;  %v1951_v59 = vshll.u32 %v1639_v46, 16  ;;  %v1944_v4 = vrot.slane %v1942_v19, 4  ;;  %v4509_v29 = vpop.permute.xlu0 %4508  ;;  %v10333_v5 = vld [vmem:[#allocation2 + $0x90] sm:$0xff]  }
 0x16a   : > { %v4006_v22 = vsel %vm10896_vm12, %v4001_v39, %v4005_v55  ;;  %v4412_v52 = vsel %vm10819_vm9, %v4410_v41, %v4411_v15  ;;  %v1955_v44 = vshrl.u32 %v1639_v46, 16  ;;  %v1947_v8 = vrot.slane %v1945_v34, 5  ;;  %4551 = vst.msk [vmem:[#allocation3 + $0x30] sm:$0xff] %vm4544_vm2, %v4509_v29 }
 0x16b   : > { %3474 = vrot.lane.b32.xlu1 %v9604_v63, %s10703_s23  ;;  %v9635_v47 = vcombine.low %v3996_v43, %v4006_v22  ;;  %v12062_v3 = vrot.slane %v4014_v28, 4  ;;  %v10318_v63 = vld [vmem:[#allocation2 + $0x9c] sm:$0xff]   ;;  %v9667_v27 = vcombine.low %v4409_v58, %v4412_v52  ;;  %v1953_v51 = vrot.slane %v1951_v59, 5  ;;  %v2186_v58 = vld [vmem:[#allocation2 + $0x90] sm:$0xe]  ;;  %1598 = vst.msk [vmem:[#allocation3 + $0x60] sm:$0xff] %vm13921_vm7, %v10333_v5 }
 0x16c   : > { %v3729_v24 = vld [vmem:[#allocation2 + $0xa0] sm:$0xf]  ;;  %v918_v33 = vmul.f32 %v12033_v14, %v11678_v31  ;;  %v919_v32 = vmul.f32 %v10503_v40, %v11682_v49  ;;  %v3730_v62 = vld [vmem:[#allocation2 + $0xa4] sm:$0x1]  ;;  %v1948_v2 = vor.u32 %v1947_v8, %v1944_v4  ;;  %v1957_v17 = vrot.slane %v1955_v44, 4 }
 0x16d   : > { %4195 = vrot.lane.b32.xlu0 %v9635_v47, %s10706_s26  ;;  %v4017_v0 = vshll.u32 %v3729_v24, 16  ;;  %v4021_v50 = vshrl.u32 %v3729_v24, 16  ;;  %v4027_v60 = vshll.u32 %v3730_v62, 16  ;;  %v1961_v35 = vshll.u32 %v1640_v23, 16  ;;  %v4274_v20 = vld [vmem:[#allocation2 + $0xa0] sm:$0xf] }
 0x16e   : > { %v1641_v31 = vld [vmem:[#allocation2 + $0x9c] sm:$0xf]  ;;  %v12072_v14 = vpack.c.bf16 %v918_v33, %v918_v33  ;;  %v12074_v49 = vpack.c.bf16 %v919_v32, %v919_v32  ;;  %v1949_v16 = vrot.slane %v1948_v2, 4  ;;  %v1958_v45 = vor.u32 %v1957_v17, %v1953_v51  ;;  %v4275_v55 = vld [vmem:[#allocation2 + $0xa4] sm:$0x1] }
 0x16f   : > { %3652 = vrot.lane.b32.xlu1 %v10318_v63, %s10702_s22  ;;  %v4019_v40 = vrot.slane %v4017_v0, 5  ;;  %v4023_v6 = vrot.slane %v4021_v50, 4  ;;  %v4029_v30 = vrot.slane %v4027_v60, 5  ;;  %v1963_v46 = vrot.slane %v1961_v35, 5  ;;  %v1642_v38 = vld [vmem:[#allocation2 + $0xa0] sm:$0xf] }
 0x170   : > { %v9652_v37 = vrot.slane %v4273_v61, 9  ;;  %v4415_v7 = vrot.slane %v4274_v20, 5  ;;  %v1954_v42 = vsel %vm10896_vm12, %v1949_v16, %v1953_v51  ;;  %v1959_v39 = vrot.slane %v1958_v45, 4  ;;  %v10334_v41 = vld [vmem:[#allocation2 + $0x9c] sm:$0xff]   ;;  %v2187_v28 = vld [vmem:[#allocation2 + $0x94] sm:$0xf] }
 0x171   : > { %v4020_v18 = vsel %vm10896_vm12, %v12062_v3, %v4019_v40  ;;  %v4024_v15 = vor.u32 %v4023_v6, %v4019_v40  ;;  %4516 = vrot.lane.b32.xlu0 %v9667_v27, %s10704_s24  ;;  %v4418_v53 = vrot.slane %v4275_v55, 5  ;;  %v1966_v43 = vshrl.u32 %v1641_v31, 16  ;;  %v1643_v22 = vld [vmem:[#allocation2 + $0xa4] sm:$0x1]  ;;  %1599 = vst.msk [vmem:[#allocation3 + $0x68] sm:$0xff] %vm13920_vm1, %v10334_v41  ;;  %v4567_v2 = vld [vmem:[#allocation3 + $0x30] sm:$0xff] }
 0x172   : > { %v4416_v19 = vsel %vm10819_vm9, %v9652_v37, %v4415_v7  ;;  %v4417_v57 = vrot.slane %v4415_v7, 4  ;;  %v1964_v59 = vsel %vm10896_vm12, %v1959_v39, %v1963_v46  ;;  %v1969_v52 = vshll.u32 %v1641_v31, 16  ;;  %v2188_v8 = vld [vmem:[#allocation2 + $0x98] sm:$0x1]  ;;  %v2189_v61 = vld [vmem:[#allocation2 + $0x9c] sm:$0xe]  ;;  %10131 = vmatprep.mubr.msk.bf16.mxu0 %vm4597_vm10, %v4567_v2 }
 0x173   : > { %v4025_v34 = vrot.slane %v4024_v15, 4  ;;  %v1975_v4 = vshll.u32 %v1642_v38, 16  ;;  %v9509_v44 = vcombine.low %v1954_v42, %v1964_v59  ;;  %v1968_v3 = vrot.slane %v1966_v43, 4  ;;  %v2190_v33 = vld [vmem:[#allocation2 + $0xa0] sm:$0xf] }
 0x174   : > { %v4419_v47 = vsel %vm10819_vm9, %v4417_v57, %v4418_v53  ;;  %v1979_v23 = vshrl.u32 %v1642_v38, 16  ;;  %v1971_v27 = vrot.slane %v1969_v52, 5  ;;  %v2191_v32 = vld [vmem:[#allocation2 + $0xa4] sm:$0x1]  ;;  %v1985_v0 = vshll.u32 %v1643_v22, 16  ;;  %v10319_v59 = vld [vmem:[#allocation2 + $0x9c] sm:$0xff]  }
 0x175   : > { %v4030_v63 = vsel %vm10896_vm12, %v4025_v34, %v4029_v30  ;;  %v9668_v24 = vcombine.low %v4416_v19, %v4419_v47  ;;  %v1977_v51 = vrot.slane %v1975_v4, 5  ;;  %v9525_v50 = vrot.slane %v2186_v58, 9  ;;  %v2687_v46 = vld [vmem:[#allocation2 + $0x9c] sm:$0xf]  ;;  %v2688_v41 = vld [vmem:[#allocation2 + $0xa0] sm:$0xf] }
 0x176   : > { %v9636_v29 = vcombine.low %v4020_v18, %v4030_v63  ;;  %v1981_v62 = vrot.slane %v1979_v23, 4  ;;  %v1972_v17 = vor.u32 %v1971_v27, %v1968_v3  ;;  %v2335_v60 = vrot.slane %v2187_v28, 5  ;;  %v1436_v43 = vld [vmem:[#allocation2 + $0xa8] sm:$0xf]  ;;  %v2689_v28 = vld [vmem:[#allocation2 + $0xa4] sm:$0x1] }
 0x177   : > { %4518 = vrot.lane.b32.xlu0 %v9668_v24, %s10704_s24  ;;  %v2338_v35 = vrot.slane %v2188_v8, 5  ;;  %v9526_v20 = vrot.slane %v2189_v61, 9  ;;  %v1987_v40 = vrot.slane %v1985_v0, 5  ;;  %v2342_v6 = vrot.slane %v2190_v33, 5  ;;  %v3232_v4 = vld [vmem:[#allocation2 + $0x9c] sm:$0xe] }
 0x178   : > { %4197 = vrot.lane.b32.xlu1 %v9636_v29, %s10706_s26  ;;  %v1982_v31 = vor.u32 %v1981_v62, %v1977_v51  ;;  %v2345_v16 = vrot.slane %v2191_v32, 5  ;;  %v1973_v45 = vrot.slane %v1972_v17, 4  ;;  %v2336_v55 = vsel %vm10819_vm9, %v9525_v50, %v2335_v60  ;;  %v3233_v61 = vld [vmem:[#allocation2 + $0xa0] sm:$0xf]  ;;  %v3234_v29 = vld [vmem:[#allocation2 + $0xa4] sm:$0x1] }
 0x179   : > { %v2337_v5 = vrot.slane %v2335_v60, 4  ;;  %v1244_v30 = vshrl.u32 %v12072_v14, 16  ;;  %v2343_v7 = vsel %vm10819_vm9, %v9526_v20, %v2342_v6  ;;  %v2344_v38 = vrot.slane %v2342_v6, 4 }
 0x17a   : > { %v1983_v37 = vrot.slane %v1982_v31, 4  ;;  %v1247_v18 = vshll.u32 %v12072_v14, 16  ;;  %v1978_v15 = vsel %vm10896_vm12, %v1973_v45, %v1977_v51  ;;  %v1252_v58 = vshrl.u32 %v12074_v49, 16  ;;  %v1440_v51 = vld [vmem:[#allocation2 + $0xb0] sm:$0x1] }
 0x17b   : > { %v2339_v42 = vsel %vm10819_vm9, %v2337_v5, %v2338_v35  ;;  %v1246_v39 = vrot.slane %v1244_v30, 7  ;;  %v2346_v53 = vsel %vm10819_vm9, %v2344_v38, %v2345_v16  ;;  %v1255_v14 = vshll.u32 %v12074_v49, 16 }
 0x17c   : > { %2109 = vrot.lane.b32.xlu1 %v9509_v44, %s10700_s20  ;;  %v1988_v19 = vsel %vm10896_vm12, %v1983_v37, %v1987_v40  ;;  %v9541_v57 = vcombine.low %v2336_v55, %v2339_v42  ;;  %v920_v47 = vmul.f32 %v12047_v54, %v11697_v10  ;;  %v1254_v44 = vrot.slane %v1252_v58, 7  ;;  %v464_v40 = vld [vmem:[#allocation2 + $0xc8] sm:$0x1] }
 0x17d   : > { %v9510_v34 = vcombine.low %v1978_v15, %v1988_v19  ;;  %v1249_v22 = vor.u32 %v1247_v18, %v1246_v39  ;;  %v1250_v52 = vrot.slane %v1246_v39, 4  ;;  %v2988_v3 = vshrl.u32 %v2687_v46, 16  ;;  %v411_v15 = vld [vmem:[#allocation2 + $0xcc] sm:$0x1] }
 0x17e   : > { %2433 = vrot.lane.b32.xlu0 %v9541_v57, %s10699_s19  ;;  %v2991_v23 = vshll.u32 %v2687_v46, 16  ;;  %v2997_v8 = vshll.u32 %v2688_v41, 16  ;;  %v9542_v63 = vcombine.low %v2343_v7, %v2346_v53  ;;  %v3001_v24 = vshrl.u32 %v2688_v41, 16  ;;  %v10651_v46 = vld [vmem:[%s13877_s3] ss:$0 sm:$0xff] }
 0x17f   : > { %v1437_v49 = vsel %vm10992_vm14, %v1249_v22, %v1436_v43  ;;  %v3007_v27 = vshll.u32 %v2689_v28, 16  ;;  %v1257_v33 = vor.u32 %v1255_v14, %v1254_v44  ;;  %v1259_v32 = vrot.slane %v1254_v44, 4  ;;  %v3645_v17 = vpop.permute.xlu1 %3644 }
 0x180   : > { %2111 = vrot.lane.b32.xlu1 %v9510_v34, %s10700_s20  ;;  %1438 = vst [vmem:[#allocation2 + $0xa8] sm:$0xf] %v1437_v49  ;;  %v2990_v10 = vrot.slane %v2988_v3, 4  ;;  %v2993_v54 = vrot.slane %v2991_v23, 5  ;;  %v2999_v62 = vrot.slane %v2997_v8, 5  ;;  %v3003_v0 = vrot.slane %v3001_v24, 4 }
 0x181   : > { %v9589_v50 = vrot.slane %v3232_v4, 9  ;;  %v3378_v2 = vrot.slane %v3233_v61, 5  ;;  %v1258_v60 = vsel %vm10999_vm15, %v1250_v52, %v1257_v33  ;;  %v3009_v20 = vrot.slane %v3007_v27, 5  ;;  %3686 = vst.msk [vmem:[#allocation3 + $0x38] sm:$0xff] %vm3678_vm3, %v3645_v17  ;;  %v1443_v34 = vld [vmem:[#allocation2 + $0xb4] sm:$0xf] }
 0x182   : > { %2610 = vrot.lane.b32.xlu0 %v10319_v59, %s10701_s21  ;;  %v2994_v35 = vor.u32 %v2993_v54, %v2990_v10  ;;  %v1441_v31 = vsel %vm10791_vm4, %v1259_v32, %v1440_v51  ;;  %1439 = vst.msk [vmem:[#allocation2 + $0xac] sm:$0xf] %vm348_vm0, %v1258_v60  ;;  %v3004_v6 = vor.u32 %v3003_v0, %v2999_v62  ;;  %v3381_v45 = vrot.slane %v3234_v29, 5 }
 0x183   : > { %1442 = vst [vmem:[#allocation2 + $0xb0] sm:$0x1] %v1441_v31  ;;  %v3380_v16 = vrot.slane %v3378_v2, 4  ;;  %v825_v55 = vadd.f32 1.0, %v12044_v25  ;;  %v10020_v30 = vpack.c.bf16 %v920_v47, %v920_v47  ;;  %v12133_v37 = vadd.f32 %v10651_v46, %v12014_v56 }
 0x184   : > { %2435 = vrot.lane.b32.xlu1 %v9542_v63, %s10699_s19  ;;  %v2995_v5 = vrot.slane %v2994_v35, 4  ;;  %v3005_v7 = vrot.slane %v3004_v6, 4  ;;  %v465_v38 = vsel %vm10808_vm8, 0, %v464_v40  ;;  %v3379_v58 = vsel %vm10819_vm9, %v9589_v50, %v3378_v2 }
 0x185   : > { %10510 = vrcp.f32 %v825_v55  ;;  %v1261_v25 = vshrl.u32 %v10020_v30, 16  ;;  %466 = vst [vmem:[#allocation2 + $0xc8] sm:$0x1] %v465_v38  ;;  %v3382_v56 = vsel %vm10819_vm9, %v3380_v16, %v3381_v45  ;;  %v1264_v41 = vshll.u32 %v10020_v30, 16 }
 0x186   : > { %v3000_v18 = vsel %vm10896_vm12, %v2995_v5, %v2999_v62  ;;  %v3010_v42 = vsel %vm10896_vm12, %v3005_v7, %v3009_v20  ;;  %v9448_v14 = vmul.f32 -1.442695, %v12133_v37  ;;  %v826_v59 = vadd.f32 1.0, %v12090_v36 }
 0x187   : > { %v2690_v39 = vld [vmem:[#allocation2 + $0xa8] sm:$0xf]  ;;  %v9573_v19 = vcombine.low %v3000_v18, %v3010_v42  ;;  %v12146_v28 = vrot.slane %v1261_v25, 7  ;;  %v412_v52 = vsel %vm10791_vm4, 0, %v411_v15  ;;  %v9605_v3 = vcombine.low %v3379_v58, %v3382_v56 }
 0x188   : > { %v3012_v57 = vshrl.u32 %v2690_v39, 16  ;;  %v3015_v53 = vshll.u32 %v2690_v39, 16  ;;  %v3235_v43 = vld [vmem:[#allocation2 + $0xa8] sm:$0xe]  ;;  %v4511_v22 = vpop.permute.xlu0 %4510  ;;  %413 = vst [vmem:[#allocation2 + $0xcc] sm:$0x1] %v412_v52  ;;  %10512 = vpow2.f32 %v9448_v14 }
 0x189   : > { %v10320_v4 = vld [vmem:[#allocation2 + $0xa8] sm:$0xff]   ;;  %3155 = vrot.lane.b32.xlu0 %v9573_v19, %s10705_s25  ;;  %v1266_v49 = vor.u32 %v1264_v41, %v12146_v28  ;;  %v9590_v32 = vrot.slane %v3235_v43, 9  ;;  %v1267_v17 = vrot.slane %v12146_v28, 4  ;;  %10514 = vrcp.f32 %v826_v59 }
 0x18a   : > { %v2691_v47 = vld [vmem:[#allocation2 + $0xac] sm:$0xf]  ;;  %v3014_v44 = vrot.slane %v3012_v57, 4  ;;  %v2692_v23 = vld [vmem:[#allocation2 + $0xb0] sm:$0x1]  ;;  %v3017_v8 = vrot.slane %v3015_v53, 5  ;;  %2612 = vrot.lane.b32.xlu1 %v10320_v4, %s10701_s21 }
 0x18b   : > { %v3021_v61 = vshll.u32 %v2691_v47, 16  ;;  %v3025_v63 = vshrl.u32 %v2691_v47, 16  ;;  %v3731_v24 = vld [vmem:[#allocation2 + $0xa8] sm:$0xf]  ;;  %v4190_v27 = vpop.permute.xlu1 %4189  ;;  %v3031_v36 = vshll.u32 %v2692_v23, 16  ;;  %v1444_v60 = vsel %vm10992_vm14, %v1266_v49, %v1443_v34 }
 0x18c   : > { %v3236_v51 = vld [vmem:[#allocation2 + $0xac] sm:$0xf]  ;;  %v3237_v33 = vld [vmem:[#allocation2 + $0xb0] sm:$0x1]  ;;  %4231 = vst.msk [vmem:[#allocation3 + $0x38] sm:$0xff] %vm4223_vm5, %v4190_v27  ;;  %v3018_v10 = vor.u32 %v3017_v8, %v3014_v44  ;;  %v2426_v0 = vpop.permute.xlu0 %2425  ;;  %v4032_v30 = vshrl.u32 %v3731_v24, 16 }
 0x18d   : > { %v3023_v54 = vrot.slane %v3021_v61, 5  ;;  %v3027_v29 = vrot.slane %v3025_v63, 4  ;;  %v3385_v62 = vrot.slane %v3236_v51, 5  ;;  %4552 = vst.msk [vmem:[#allocation3 + $0x38] sm:$0xff] %vm4544_vm2, %v4511_v22  ;;  %3476 = vrot.lane.b32.xlu0 %v9605_v3, %s10703_s23  ;;  %v3388_v50 = vrot.slane %v3237_v33, 5  ;;  %v10323_v2 = vld [vmem:[#allocation2 + $0xa8] sm:$0xff]  }
 0x18e   : > { %v3732_v35 = vld [vmem:[#allocation2 + $0xac] sm:$0xf]  ;;  %v3019_v31 = vrot.slane %v3018_v10, 4  ;;  %v3033_v6 = vrot.slane %v3031_v36, 5  ;;  %1445 = vst [vmem:[#allocation2 + $0xb4] sm:$0xf] %v1444_v60 }
 0x18f   : > { %v10511_v20 = vpop.eup %10510  ;;  %v3028_v40 = vor.u32 %v3027_v29, %v3023_v54  ;;  %v3387_v16 = vrot.slane %v3385_v62, 4  ;;  %v2102_v45 = vpop.permute.xlu1 %2101  ;;  %v3733_v5 = vld [vmem:[#allocation2 + $0xb0] sm:$0x1]  ;;  %v4035_v46 = vshll.u32 %v3731_v24, 16  ;;  %v4041_v7 = vshll.u32 %v3732_v35, 16 }
 0x190   : > { %v921_v55 = vmul.f32 %v10511_v20, %v11848_v48  ;;  %2142 = vst.msk [vmem:[#allocation3 + $0x40] sm:$0xff] %vm2133_vm6, %v2102_v45  ;;  %v3024_v38 = vsel %vm10896_vm12, %v3019_v31, %v3023_v54  ;;  %v3386_v25 = vsel %vm10819_vm9, %v9590_v32, %v3385_v62  ;;  %v4045_v15 = vshrl.u32 %v3732_v35, 16  ;;  %v2603_v42 = vpop.permute.xlu0 %2602  ;;  %v4276_v41 = vld [vmem:[#allocation2 + $0xa8] sm:$0xe]  ;;  %v4277_v19 = vld [vmem:[#allocation2 + $0xac] sm:$0xf] }
 0x191   : > { %v3029_v18 = vrot.slane %v3028_v40, 4  ;;  %vm13922_vm7 = vcmask 97344   ;;  %v3389_v48 = vsel %vm10819_vm9, %v3387_v16, %v3388_v50  ;;  %3654 = vrot.lane.b32.xlu0 %v10323_v2, %s10702_s22  ;;  %v4034_v58 = vrot.slane %v4032_v30, 4  ;;  %v1447_v3 = vld [vmem:[#allocation2 + $0xbc] sm:$0x1] }
 0x192   : > { %2466 = vst.msk [vmem:[#allocation3 + $0x40] sm:$0xff] %vm13922_vm7, %v2426_v0  ;;  %v10021_v39 = vpack.c.bf16 %v921_v55, %v921_v55  ;;  %v4037_v56 = vrot.slane %v4035_v46, 5  ;;  %vm13923_vm1 = vcmask 130144   ;;  %v4043_v53 = vrot.slane %v4041_v7, 5  ;;  %v4278_v23 = vld [vmem:[#allocation2 + $0xb0] sm:$0x1]  ;;  %v12174_v49 = vpop.eup %10512 }
 0x193   : > { %2643 = vst.msk [vmem:[#allocation3 + $0x40] sm:$0xff] %vm13923_vm1, %v2603_v42  ;;  %v3034_v57 = vsel %vm10896_vm12, %v3029_v18, %v3033_v6  ;;  %v4047_v14 = vrot.slane %v4045_v15, 4  ;;  %v4051_v43 = vshll.u32 %v3733_v5, 16  ;;  %v2104_v34 = vpop.permute.xlu1 %2103  ;;  %v9653_v8 = vrot.slane %v4276_v41, 9  ;;  %v1644_v29 = vld [vmem:[#allocation2 + $0xa8] sm:$0xf]  ;;  %v10515_v0 = vpop.eup %10514 }
 0x194   : > { %v9574_v59 = vcombine.low %v3024_v38, %v3034_v57  ;;  %v1269_v22 = vshrl.u32 %v10021_v39, 16  ;;  %v1272_v52 = vshll.u32 %v10021_v39, 16  ;;  %v4038_v4 = vor.u32 %v4037_v56, %v4034_v58  ;;  %2143 = vst.msk [vmem:[#allocation3 + $0x48] sm:$0xff] %vm2133_vm6, %v2104_v34  ;;  %v4568_v63 = vld [vmem:[#allocation3 + $0x38] sm:$0xff]  ;;  %v1645_v20 = vld [vmem:[#allocation2 + $0xac] sm:$0xf] }
 0x195   : > { %v4048_v47 = vor.u32 %v4047_v14, %v4043_v53  ;;  %v4053_v44 = vrot.slane %v4051_v43, 5  ;;  %v4422_v61 = vrot.slane %v4277_v19, 5  ;;  %v9606_v24 = vcombine.low %v3386_v25, %v3389_v48  ;;  %v3734_v51 = vld [vmem:[#allocation2 + $0xb4] sm:$0xf]  ;;  %10132 = vmatmul.mubr.msk.bf16.gmra.mrb[12].mxu0 %vm4597_vm10, %v4568_v63  ;;  %v1646_v31 = vld [vmem:[#allocation2 + $0xb0] sm:$0x1] }
 0x196   : > { %3157 = vrot.lane.b32.xlu1 %v9574_v59, %s10705_s25  ;;  %v1271_v27 = vrot.slane %v1269_v22, 7  ;;  %v4039_v36 = vrot.slane %v4038_v4, 4  ;;  %v4056_v32 = vshrl.u32 %v3734_v51, 16  ;;  %v4059_v10 = vshll.u32 %v3734_v51, 16  ;;  %v12192_v7 = vld [vmem:[#allocation2 + $0xb4] sm:$0xe] }
 0x197   : > { %v4049_v33 = vrot.slane %v4048_v47, 4  ;;  %v4423_v54 = vsel %vm10819_vm9, %v9653_v8, %v4422_v61  ;;  %v2428_v62 = vpop.permute.xlu1 %2427  ;;  %v4424_v35 = vrot.slane %v4422_v61, 4  ;;  %v4425_v45 = vrot.slane %v4278_v23, 5  ;;  %v1647_v38 = vld [vmem:[#allocation2 + $0xb4] sm:$0xf] }
 0x198   : > { %v1274_v50 = vor.u32 %v1272_v52, %v1271_v27  ;;  %v1276_v2 = vrot.slane %v1271_v27, 4  ;;  %v4044_v60 = vsel %vm10896_vm12, %v4039_v36, %v4043_v53  ;;  %2467 = vst.msk [vmem:[#allocation3 + $0x48] sm:$0xff] %vm13922_vm7, %v2428_v62  ;;  %v4058_v6 = vrot.slane %v4056_v32, 4  ;;  %v2192_v18 = vld [vmem:[#allocation2 + $0xa8] sm:$0xe] }
 0x199   : > { %v4054_v40 = vsel %vm10896_vm12, %v4049_v33, %v4053_v44  ;;  %v4061_v16 = vrot.slane %v4059_v10, 5  ;;  %v1990_v46 = vshrl.u32 %v1644_v29, 16  ;;  %v2193_v25 = vld [vmem:[#allocation2 + $0xac] sm:$0xf]  ;;  %v4426_v28 = vsel %vm10819_vm9, %v4424_v35, %v4425_v45  ;;  %v2194_v14 = vld [vmem:[#allocation2 + $0xb0] sm:$0x1] }
 0x19a   : > { %3478 = vrot.lane.b32.xlu1 %v9606_v24, %s10703_s23  ;;  %v1275_v55 = vsel %vm10999_vm15, %v1267_v17, %v1274_v50  ;;  %v9637_v5 = vcombine.low %v4044_v60, %v4054_v40  ;;  %v1448_v30 = vsel %vm10791_vm4, %v1276_v2, %v1447_v3  ;;  %v1993_v42 = vshll.u32 %v1644_v29, 16  ;;  %v3148_v17 = vpop.permute.xlu0 %3147  ;;  %v12205_v4 = vld [vmem:[#allocation2 + $0xb4] sm:$0xe]  ;;  %v10335_v10 = vld [vmem:[#allocation2 + $0xa8] sm:$0xff]  }
 0x19b   : > { %1446 = vst.msk [vmem:[#allocation2 + $0xb8] sm:$0xf] %vm348_vm0, %v1275_v55  ;;  %1449 = vst [vmem:[#allocation2 + $0xbc] sm:$0x1] %v1448_v30  ;;  %v4062_v15 = vor.u32 %v4061_v16, %v4058_v6  ;;  %v1999_v48 = vshll.u32 %v1645_v20, 16  ;;  %v9669_v39 = vcombine.low %v4423_v54, %v4426_v28  ;;  %v1992_v58 = vrot.slane %v1990_v46, 4 }
 0x19c   : > { %4199 = vrot.lane.b32.xlu0 %v9637_v5, %s10706_s26  ;;  %v2003_v56 = vshrl.u32 %v1645_v20, 16  ;;  %v2009_v41 = vshll.u32 %v1646_v31, 16  ;;  %3188 = vst.msk [vmem:[#allocation3 + $0x40] sm:$0xff] %vm3179_vm11, %v3148_v17  ;;  %v1995_v57 = vrot.slane %v1993_v42, 5  ;;  %v922_v43 = vmul.f32 %v10515_v0, %v11980_v21  ;;  %v2605_v47 = vpop.permute.xlu1 %2604 }
 0x19d   : > { %v12199_v19 = vrot.slane %v4062_v15, 4  ;;  %v12201_v53 = vrot.slane %v1999_v48, 5  ;;  %v9654_v59 = vrot.slane %v12192_v7, 9  ;;  %v2014_v22 = vshrl.u32 %v1647_v38, 16  ;;  %2644 = vst.msk [vmem:[#allocation3 + $0x48] sm:$0xff] %vm13923_vm1, %v2605_v47 }
 0x19e   : > { %v2005_v34 = vrot.slane %v2003_v56, 4  ;;  %v2017_v52 = vshll.u32 %v1647_v38, 16  ;;  %v1996_v44 = vor.u32 %v1995_v57, %v1992_v58  ;;  %v12207_v3 = vrot.slane %v2009_v41, 5  ;;  %v3469_v61 = vpop.permute.xlu0 %3468 }
 0x19f   : > { %v9527_v23 = vrot.slane %v2192_v18, 9  ;;  %v2349_v8 = vrot.slane %v2193_v25, 5  ;;  %v2016_v63 = vrot.slane %v2014_v22, 4  ;;  %v2352_v27 = vrot.slane %v2194_v14, 5  ;;  %3509 = vst.msk [vmem:[#allocation3 + $0x40] sm:$0xff] %vm3500_vm13, %v3469_v61 }
 0x1a0   : > { %4520 = vrot.lane.b32.xlu0 %v9669_v39, %s10704_s24  ;;  %v2006_v21 = vor.u32 %v2005_v34, %v12201_v53  ;;  %v2019_v24 = vrot.slane %v2017_v52, 5  ;;  %v1997_v36 = vrot.slane %v1996_v44, 4  ;;  %v9528_v33 = vrot.slane %v12205_v4, 9  ;;  %v2693_v14 = vld [vmem:[#allocation2 + $0xb4] sm:$0xf] }
 0x1a1   : > { %v2351_v51 = vrot.slane %v2349_v8, 4  ;;  %v827_v32 = vadd.f32 1.0, %v12174_v49  ;;  %v12217_v35 = vsel %vm10819_vm9, %v9527_v23, %v2349_v8  ;;  %vm13924_vm7 = vcmask 31744  }
 0x1a2   : > { %v10324_v54 = vld [vmem:[#allocation2 + $0xb4] sm:$0xff]   ;;  %v2007_v62 = vrot.slane %v2006_v21, 4  ;;  %v3736_v0 = vld [vmem:[#allocation2 + $0xbc] sm:$0x1]  ;;  %v3647_v20 = vpop.permute.xlu0 %3646  ;;  %1600 = vst.msk [vmem:[#allocation3 + $0x70] sm:$0xff] %vm13924_vm7, %v10335_v10  ;;  %v2020_v16 = vor.u32 %v2019_v24, %v2016_v63  ;;  %v12221_v45 = vpack.c.bf16 %v922_v43, %v922_v43  ;;  %v2002_v30 = vsel %vm10896_vm12, %v1997_v36, %v12201_v53  ;;  %vm13925_vm1 = vmmov %vm13924_vm7 }
 0x1a3   : > { %v3735_v29 = vld [vmem:[#allocation2 + $0xb8] sm:$0xf]  ;;  %3656 = vrot.lane.b32.xlu1 %v10324_v54, %s10702_s22  ;;  %v4075_v31 = vshll.u32 %v3736_v0, 16  ;;  %v4281_v40 = vld [vmem:[#allocation2 + $0xbc] sm:$0x1]  ;;  %3687 = vst.msk [vmem:[#allocation3 + $0x40] sm:$0xff] %vm3678_vm3, %v3647_v20  ;;  %v2353_v15 = vsel %vm10819_vm9, %v2351_v51, %v2352_v27  ;;  %10516 = vrcp.f32 %v827_v32 }
 0x1a4   : > { %v4065_v50 = vshll.u32 %v3735_v29, 16  ;;  %v4069_v2 = vshrl.u32 %v3735_v29, 16  ;;  %v4280_v60 = vld [vmem:[#allocation2 + $0xb8] sm:$0xf]  ;;  %v4432_v46 = vrot.slane %v4281_v40, 5  ;;  %v2012_v48 = vsel %vm10896_vm12, %v2007_v62, %v12207_v3 }
 0x1a5   : > { %v4429_v49 = vrot.slane %v4280_v60, 5  ;;  %v1648_v6 = vld [vmem:[#allocation2 + $0xb8] sm:$0xf]  ;;  %v1649_v7 = vld [vmem:[#allocation2 + $0xbc] sm:$0x1]  ;;  %v4077_v38 = vrot.slane %v4075_v31, 5  ;;  %v9511_v44 = vcombine.low %v2002_v30, %v2012_v48  ;;  %v9543_v3 = vcombine.low %v12217_v35, %v2353_v15 }
 0x1a6   : > { %v4067_v55 = vrot.slane %v4065_v50, 5  ;;  %v4071_v5 = vrot.slane %v4069_v2, 4  ;;  %v10336_v28 = vld [vmem:[#allocation2 + $0xb4] sm:$0xff]   ;;  %v2023_v17 = vshll.u32 %v1648_v6, 16  ;;  %v2027_v39 = vshrl.u32 %v1648_v6, 16 }
 0x1a7   : > { %v4430_v18 = vsel %vm10819_vm9, %v9654_v59, %v4429_v49  ;;  %v4431_v25 = vrot.slane %v4429_v49, 4  ;;  %v12234_v58 = vld [vmem:[#allocation2 + $0xb8] sm:$0xf]  ;;  %v2021_v57 = vrot.slane %v2020_v16, 4  ;;  %v2033_v53 = vshll.u32 %v1649_v7, 16  ;;  %1601 = vst.msk [vmem:[#allocation3 + $0x78] sm:$0xff] %vm13925_vm1, %v10336_v28 }
 0x1a8   : > { %v4072_v42 = vor.u32 %v4071_v5, %v4067_v55  ;;  %v4068_v56 = vsel %vm10896_vm12, %v12199_v19, %v4067_v55  ;;  %v3150_v43 = vpop.permute.xlu1 %3149  ;;  %v2025_v22 = vrot.slane %v2023_v17, 5  ;;  %v2029_v52 = vrot.slane %v2027_v39, 4  ;;  %v2197_v47 = vld [vmem:[#allocation2 + $0xbc] sm:$0x1]  ;;  %v2694_v23 = vld [vmem:[#allocation2 + $0xb8] sm:$0xf] }
 0x1a9   : > { %v4433_v41 = vsel %vm10819_vm9, %v4431_v25, %v4432_v46  ;;  %3189 = vst.msk [vmem:[#allocation3 + $0x48] sm:$0xff] %vm3179_vm11, %v3150_v43  ;;  %v2356_v19 = vrot.slane %v12234_v58, 5  ;;  %v2035_v21 = vrot.slane %v2033_v53, 5  ;;  %v1278_v63 = vshrl.u32 %v12221_v45, 16  ;;  %v2695_v24 = vld [vmem:[#allocation2 + $0xbc] sm:$0x1] }
 0x1aa   : > { %v4073_v34 = vrot.slane %v4072_v42, 4  ;;  %v9670_v59 = vcombine.low %v4430_v18, %v4433_v41  ;;  %v2030_v61 = vor.u32 %v2029_v52, %v2025_v22  ;;  %v2359_v36 = vrot.slane %v2197_v47, 5  ;;  %v1450_v10 = vld [vmem:[#allocation2 + $0xc0] sm:$0xf]  ;;  %v3238_v2 = vld [vmem:[#allocation2 + $0xb4] sm:$0xe] }
 0x1ab   : > { %v1281_v51 = vshll.u32 %v12221_v45, 16  ;;  %v3036_v54 = vshrl.u32 %v2693_v14, 16  ;;  %v2026_v32 = vsel %vm10896_vm12, %v2021_v57, %v2025_v22  ;;  %v12252_v0 = vrot.slane %v1278_v63, 7  ;;  %v467_v60 = vld [vmem:[#allocation2 + $0xd4] sm:$0x1] }
 0x1ac   : > { %v4078_v8 = vsel %vm10896_vm12, %v4073_v34, %v4077_v38  ;;  %4522 = vrot.lane.b32.xlu0 %v9670_v59, %s10704_s24  ;;  %v3471_v29 = vpop.permute.xlu1 %3470  ;;  %v2031_v62 = vrot.slane %v2030_v61, 4  ;;  %v3039_v50 = vshll.u32 %v2693_v14, 16  ;;  %v3045_v20 = vshll.u32 %v2694_v23, 16  ;;  %v3239_v49 = vld [vmem:[#allocation2 + $0xb8] sm:$0xf] }
 0x1ad   : > { %v9638_v27 = vcombine.low %v4068_v56, %v4078_v8  ;;  %3510 = vst.msk [vmem:[#allocation3 + $0x48] sm:$0xff] %vm3500_vm13, %v3471_v29  ;;  %v3038_v35 = vrot.slane %v3036_v54, 4  ;;  %v3049_v31 = vshrl.u32 %v2694_v23, 16  ;;  %v3055_v40 = vshll.u32 %v2695_v24, 16  ;;  %v10325_v45 = vld [vmem:[#allocation2 + $0xb4] sm:$0xff]   ;;  %v10517_v43 = vpop.eup %10516 }
 0x1ae   : > { %v2036_v6 = vsel %vm10896_vm12, %v2031_v62, %v2035_v21  ;;  %v2358_v16 = vrot.slane %v2356_v19, 4  ;;  %v1283_v55 = vor.u32 %v1281_v51, %v12252_v0  ;;  %v3041_v5 = vrot.slane %v3039_v50, 5  ;;  %v3240_v30 = vld [vmem:[#allocation2 + $0xbc] sm:$0x1]  ;;  %v4192_v46 = vpop.permute.xlu0 %4191  ;;  %v1454_v24 = vld [vmem:[#allocation2 + $0xc8] sm:$0x1] }
 0x1af   : > { %4201 = vrot.lane.b32.xlu1 %v9638_v27, %s10706_s26  ;;  %v9512_v7 = vcombine.low %v2026_v32, %v2036_v6  ;;  %v3047_v38 = vrot.slane %v3045_v20, 5  ;;  %v3051_v18 = vrot.slane %v3049_v31, 4  ;;  %4232 = vst.msk [vmem:[#allocation3 + $0x40] sm:$0xff] %vm4223_vm5, %v4192_v46  ;;  %v3057_v42 = vrot.slane %v3055_v40, 5  ;;  %v3740_v32 = vld [vmem:[#allocation2 + $0xcc] sm:$0xf] }
 0x1b0   : > { %2437 = vrot.lane.b32.xlu0 %v9543_v3, %s10699_s19  ;;  %v3649_v25 = vpop.permute.xlu1 %3648  ;;  %v1451_v15 = vsel %vm10992_vm14, %v1283_v55, %v1450_v10  ;;  %v3042_v28 = vor.u32 %v3041_v5, %v3038_v35  ;;  %v3392_v48 = vrot.slane %v3239_v49, 5  ;;  %v9591_v39 = vrot.slane %v3238_v2, 9  ;;  %v3741_v62 = vld [vmem:[#allocation2 + $0xd0] sm:$0xf] }
 0x1b1   : > { %3688 = vst.msk [vmem:[#allocation3 + $0x48] sm:$0xff] %vm3678_vm3, %v3649_v25  ;;  %1452 = vst [vmem:[#allocation2 + $0xc0] sm:$0xf] %v1451_v15  ;;  %v3052_v17 = vor.u32 %v3051_v18, %v3047_v38  ;;  %v3395_v58 = vrot.slane %v3240_v30, 5  ;;  %v468_v56 = vsel %vm10808_vm8, 0, %v467_v60  ;;  %v2357_v12 = vsel %vm10819_vm9, %v9528_v33, %v2356_v19 }
 0x1b2   : > { %v2360_v41 = vsel %vm10819_vm9, %v2358_v16, %v2359_v36  ;;  %v3043_v57 = vrot.slane %v3042_v28, 4  ;;  %v3394_v53 = vrot.slane %v3392_v48, 4  ;;  %469 = vst [vmem:[#allocation2 + $0xd4] sm:$0x1] %v468_v56  ;;  %v4513_v14 = vpop.permute.xlu0 %4512  ;;  %v923_v9 = vmul.f32 %v10517_v43, %v12133_v37 }
 0x1b3   : > { %2113 = vrot.lane.b32.xlu1 %v9511_v44, %s10700_s20  ;;  %v3053_v34 = vrot.slane %v3052_v17, 4  ;;  %4553 = vst.msk [vmem:[#allocation3 + $0x40] sm:$0xff] %vm4544_vm2, %v4513_v14  ;;  %v9544_v33 = vcombine.low %v2357_v12, %v2360_v41  ;;  %v3393_v22 = vsel %vm10819_vm9, %v9591_v39, %v3392_v48  ;;  %v1284_v61 = vrot.slane %v12252_v0, 4 }
 0x1b4   : > { %2614 = vrot.lane.b32.xlu0 %v10325_v45, %s10701_s21  ;;  %v3048_v4 = vsel %vm10896_vm12, %v3043_v57, %v3047_v38  ;;  %v3396_v52 = vsel %vm10819_vm9, %v3394_v53, %v3395_v58  ;;  %v10023_v47 = vpack.c.bf16 %v923_v9, %v923_v9  ;;  %vm13926_vm8 = vcmask 97344  }
 0x1b5   : > { %v3058_v59 = vsel %vm10896_vm12, %v3053_v34, %v3057_v42  ;;  %v9607_v8 = vcombine.low %v3393_v22, %v3396_v52  ;;  %v4104_v20 = vshrl.u32 %v3740_v32, 16  ;;  %v4107_v31 = vshll.u32 %v3740_v32, 16 }
 0x1b6   : > { %v9575_v44 = vcombine.low %v3048_v4, %v3058_v59  ;;  %v4515_v3 = vpop.permute.xlu0 %4514  ;;  %v4194_v19 = vpop.permute.xlu1 %4193  ;;  %v1286_v37 = vshrl.u32 %v10023_v47, 16  ;;  %v1289_v23 = vshll.u32 %v10023_v47, 16  ;;  %v4113_v40 = vshll.u32 %v3741_v62, 16 }
 0x1b7   : > { %2115 = vrot.lane.b32.xlu1 %v9512_v7, %s10700_s20  ;;  %4233 = vst.msk [vmem:[#allocation3 + $0x48] sm:$0xff] %vm4223_vm5, %v4194_v19  ;;  %v4117_v49 = vshrl.u32 %v3741_v62, 16  ;;  %v12302_v7 = vrot.slane %v4104_v20, 4  ;;  %v12304_v38 = vrot.slane %v4107_v31, 5  ;;  %vm473_vm7 = vcmask 57344  }
 0x1b8   : > { %3159 = vrot.lane.b32.xlu0 %v9575_v44, %s10705_s25  ;;  %4554 = vst.msk [vmem:[#allocation3 + $0x48] sm:$0xff] %vm4544_vm2, %v4515_v3  ;;  %v1288_v21 = vrot.slane %v1286_v37, 7  ;;  %v2696_v63 = vld [vmem:[#allocation2 + $0xc0] sm:$0xf]  ;;  %v12306_v18 = vrot.slane %v4113_v40, 5 }
 0x1b9   : > { %v3060_v54 = vshrl.u32 %v2696_v63, 16  ;;  %v3063_v29 = vshll.u32 %v2696_v63, 16  ;;  %v3737_v60 = vld [vmem:[#allocation2 + $0xc0] sm:$0xf]  ;;  %v4119_v42 = vrot.slane %v4117_v49, 4  ;;  %v4110_v63 = vor.u32 %v12304_v38, %v12302_v7 }
 0x1ba   : > { %v2106_v27 = vpop.permute.xlu1 %2105  ;;  %v1291_v36 = vor.u32 %v1289_v23, %v1288_v21  ;;  %v1293_v51 = vrot.slane %v1288_v21, 4  ;;  %v4569_v10 = vld [vmem:[#allocation3 + $0x40] sm:$0xff]  ;;  %v4080_v55 = vshrl.u32 %v3737_v60, 16  ;;  %v4083_v5 = vshll.u32 %v3737_v60, 16  ;;  %v3241_v30 = vld [vmem:[#allocation2 + $0xc0] sm:$0xe] }
 0x1bb   : > { %2439 = vrot.lane.b32.xlu1 %v9544_v33, %s10699_s19  ;;  %2144 = vst.msk [vmem:[#allocation3 + $0x50] sm:$0xff] %vm2133_vm6, %v2106_v27  ;;  %10135 = vmatprep.mubr.msk.bf16.mxu0 %vm4597_vm10, %v4569_v10  ;;  %v3062_v16 = vrot.slane %v3060_v54, 4  ;;  %v3065_v45 = vrot.slane %v3063_v29, 5  ;;  %v9592_v39 = vrot.slane %v3241_v30, 9  ;;  %v3742_v57 = vld [vmem:[#allocation2 + $0xd4] sm:$0x1] }
 0x1bc   : > { %3480 = vrot.lane.b32.xlu0 %v9607_v8, %s10703_s23  ;;  %v1292_v0 = vsel %vm10999_vm15, %v1284_v61, %v1291_v36  ;;  %v1455_v2 = vsel %vm10791_vm4, %v1293_v51, %v1454_v24  ;;  %vm13927_vm4 = vcmask 130144   ;;  %v4082_v15 = vrot.slane %v4080_v55, 4  ;;  %v4282_v52 = vld [vmem:[#allocation2 + $0xc0] sm:$0xe] }
 0x1bd   : > { %v2430_v50 = vpop.permute.xlu0 %2429  ;;  %1453 = vst.msk [vmem:[#allocation2 + $0xc4] sm:$0xf] %vm348_vm0, %v1292_v0  ;;  %1456 = vst [vmem:[#allocation2 + $0xc8] sm:$0x1] %v1455_v2  ;;  %v3066_v25 = vor.u32 %v3065_v45, %v3062_v16  ;;  %v4085_v28 = vrot.slane %v4083_v5, 5  ;;  %v4120_v51 = vor.u32 %v4119_v42, %v12306_v18  ;;  %v4123_v10 = vshll.u32 %v3742_v57, 16 }
 0x1be   : > { %2468 = vst.msk [vmem:[#allocation3 + $0x50] sm:$0xff] %vm13926_vm8, %v2430_v50  ;;  %v2108_v35 = vpop.permute.xlu1 %2107  ;;  %vm13928_vm0 = vmmov %vm13926_vm8  ;;  %v4286_v45 = vld [vmem:[#allocation2 + $0xd0] sm:$0xf]  ;;  %vm13930_vm1 = vsmask.f32 256 }
 0x1bf   : > { %2145 = vst.msk [vmem:[#allocation3 + $0x58] sm:$0xff] %vm2133_vm6, %v2108_v35  ;;  %v4570_v6 = vld [vmem:[#allocation3 + $0x48] sm:$0xff]  ;;  %v3067_v34 = vrot.slane %v3066_v25, 4  ;;  %v4086_v22 = vor.u32 %v4085_v28, %v4082_v15  ;;  %v9655_v35 = vrot.slane %v4282_v52, 9  ;;  %vm13929_vm14 = vmmov %vm13927_vm4  ;;  %v4121_v7 = vrot.slane %v4120_v51, 4 }
 0x1c0   : > { %10136 = vmatmul.mubr.msk.bf16.gmra.mrb[16].mxu0 %vm4597_vm10, %v4570_v6  ;;  %v4443_v38 = vrot.slane %v4286_v45, 5  ;;  %v4125_v28 = vrot.slane %v4123_v10, 5  ;;  %vm12352_vm8 = vmand %vm473_vm7, %vm13930_vm1 }
 0x1c1   : > { %v2607_v1 = vpop.permute.xlu0 %2606  ;;  %v4087_v62 = vrot.slane %v4086_v22, 4 }
 0x1c2   : > { %2645 = vst.msk [vmem:[#allocation3 + $0x50] sm:$0xff] %vm13927_vm4, %v2607_v1  ;;  %v2432_v46 = vpop.permute.xlu1 %2431  ;;  %vm13934_vm4 = vsmask.f32 7938 }
 0x1c3   : > { %2469 = vst.msk [vmem:[#allocation3 + $0x58] sm:$0xff] %vm13928_vm0, %v2432_v46  ;;  %v4111_v46 = vrot.slane %v4110_v63, 4  ;;  %vm12364_vm0 = vmand %vm473_vm7, %vm13934_vm4 }
 0x1c4   : > { %v10326_v48 = vld [vmem:[#allocation2 + $0xc0] sm:$0xff]   ;;  %v2698_v58 = vld [vmem:[#allocation2 + $0xc8] sm:$0x1] }
 0x1c5   : > { %v2697_v17 = vld [vmem:[#allocation2 + $0xc4] sm:$0xf]  ;;  %2616 = vrot.lane.b32.xlu1 %v10326_v48, %s10701_s21  ;;  %v3079_v53 = vshll.u32 %v2698_v58, 16  ;;  %v3243_v14 = vld [vmem:[#allocation2 + $0xc8] sm:$0x1]  ;;  %v4116_v57 = vsel %vm10896_vm12, %v4111_v46, %v12306_v18 }
 0x1c6   : > { %v3069_v56 = vshll.u32 %v2697_v17, 16  ;;  %v3073_v12 = vshrl.u32 %v2697_v17, 16  ;;  %v3242_v41 = vld [vmem:[#allocation2 + $0xc4] sm:$0xf]  ;;  %v3402_v3 = vrot.slane %v3243_v14, 5  ;;  %v4445_v14 = vrot.slane %v4443_v38, 4 }
 0x1c7   : > { %v3399_v43 = vrot.slane %v3242_v41, 5  ;;  %v10329_v33 = vld [vmem:[#allocation2 + $0xc0] sm:$0xff]   ;;  %v3081_v47 = vrot.slane %v3079_v53, 5  ;;  %v3739_v19 = vld [vmem:[#allocation2 + $0xc8] sm:$0x1]  ;;  %v4126_v53 = vsel %vm10896_vm12, %v4121_v7, %v4125_v28 }
 0x1c8   : > { %v3071_v9 = vrot.slane %v3069_v56, 5  ;;  %v3075_v4 = vrot.slane %v3073_v12, 4  ;;  %v3738_v59 = vld [vmem:[#allocation2 + $0xc4] sm:$0xf]  ;;  %3658 = vrot.lane.b32.xlu0 %v10329_v33, %s10702_s22  ;;  %v4099_v21 = vshll.u32 %v3739_v19, 16  ;;  %v10330_v56 = vld [vmem:[#allocation2 + $0xcc] sm:$0xff]  }
 0x1c9   : > { %v3401_v44 = vrot.slane %v3399_v43, 4  ;;  %v4089_v37 = vshll.u32 %v3738_v59, 16  ;;  %v3152_v23 = vpop.permute.xlu0 %3151  ;;  %v4093_v61 = vshrl.u32 %v3738_v59, 16  ;;  %v4283_v24 = vld [vmem:[#allocation2 + $0xc4] sm:$0xf]  ;;  %v3400_v2 = vsel %vm10819_vm9, %v9592_v39, %v3399_v43 }
 0x1ca   : > { %v3076_v8 = vor.u32 %v3075_v4, %v3071_v9  ;;  %v4284_v27 = vld [vmem:[#allocation2 + $0xc8] sm:$0x1]  ;;  %3190 = vst.msk [vmem:[#allocation3 + $0x50] sm:$0xff] %vm3179_vm11, %v3152_v23  ;;  %v4436_v54 = vrot.slane %v4283_v24, 5  ;;  %v3072_v29 = vsel %vm10896_vm12, %v3067_v34, %v3071_v9  ;;  %v4101_v6 = vrot.slane %v4099_v21, 5 }
 0x1cb   : > { %v4091_v36 = vrot.slane %v4089_v37, 5  ;;  %v4095_v50 = vrot.slane %v4093_v61, 4  ;;  %v3403_v60 = vsel %vm10819_vm9, %v3401_v44, %v3402_v3  ;;  %v4439_v20 = vrot.slane %v4284_v27, 5  ;;  %v4285_v17 = vld [vmem:[#allocation2 + $0xcc] sm:$0xe] }
 0x1cc   : > { %v3077_v32 = vrot.slane %v3076_v8, 4  ;;  %v4438_v16 = vrot.slane %v4436_v54, 4  ;;  %v9608_v30 = vcombine.low %v3400_v2, %v3403_v60  ;;  %v4437_v42 = vsel %vm10819_vm9, %v9655_v35, %v4436_v54  ;;  %v4287_v58 = vld [vmem:[#allocation2 + $0xd4] sm:$0x1]  ;;  %v487_v59 = vld [vmem:[#allocation4 + $0x18] sm:$0x1] }
 0x1cd   : > { %v2609_v0 = vpop.permute.xlu1 %2608  ;;  %v3473_v31 = vpop.permute.xlu0 %3472  ;;  %v4096_v49 = vor.u32 %v4095_v50, %v4091_v36  ;;  %v4092_v5 = vsel %vm10896_vm12, %v4087_v62, %v4091_v36  ;;  %v9656_v41 = vrot.slane %v4285_v17, 9  ;;  %v4446_v43 = vrot.slane %v4287_v58, 5  ;;  %v484_v3 = vld [vmem:[#allocation4 + $0xc] sm:$0x1]  ;;  %v542_v61 = vld [vmem:[#allocation4 + $0x20] sm:$0x1] }
 0x1ce   : > { %2646 = vst.msk [vmem:[#allocation3 + $0x58] sm:$0xff] %vm13929_vm14, %v2609_v0  ;;  %v3082_v40 = vsel %vm10896_vm12, %v3077_v32, %v3081_v47  ;;  %v4440_v48 = vsel %vm10819_vm9, %v4438_v16, %v4439_v20  ;;  %v9640_v9 = vcombine.low %v4116_v57, %v4126_v53  ;;  %v13933_v44 = vmov 0   ;;  %v539_v21 = vld [vmem:[#allocation4 + $0x14] sm:$0x1]  ;;  %v493_v27 = vld [vmem:[#allocation4 + $0x30] sm:$0x1] }
 0x1cf   : > { %3511 = vst.msk [vmem:[#allocation3 + $0x50] sm:$0xff] %vm3500_vm13, %v3473_v31  ;;  %v9576_v55 = vcombine.low %v3072_v29, %v3082_v40  ;;  %v4097_v1 = vrot.slane %v4096_v49, 4  ;;  %v9671_v12 = vcombine.low %v4437_v42, %v4440_v48  ;;  %v4444_v4 = vsel %vm10819_vm9, %v9656_v41, %v4443_v38  ;;  %v490_v36 = vld [vmem:[#allocation4 + $0x24] sm:$0x1]  ;;  %v548_v54 = vld [vmem:[#allocation4 + $0x38] sm:$0x1] }
 0x1d0   : > { %v4447_v33 = vsel %vm10819_vm9, %v4445_v14, %v4446_v43  ;;  %474 = vst.msk [vmem:[#allocation4 + $0x8] sm:$0x1] %vm473_vm7, %v13933_v44  ;;  %478 = vst.msk [vmem:[#allocation4 + $0xd4] sm:$0x1] %vm473_vm7, %v13933_v44  ;;  %v488_v37 = vsel %vm12352_vm8, 0, %v487_v59  ;;  %v485_v23 = vsel %vm12352_vm8, 0, %v484_v3 }
 0x1d1   : > { %3161 = vrot.lane.b32.xlu1 %v9576_v55, %s10705_s25  ;;  %v3651_v25 = vpop.permute.xlu0 %3650  ;;  %v4102_v15 = vsel %vm10896_vm12, %v4097_v1, %v4101_v6  ;;  %v9672_v22 = vcombine.low %v4444_v4, %v4447_v33  ;;  %489 = vst [vmem:[#allocation4 + $0x18] sm:$0x1] %v488_v37  ;;  %486 = vst [vmem:[#allocation4 + $0xc] sm:$0x1] %v485_v23  ;;  %v543_v63 = vsel %vm12364_vm0, 0, %v542_v61  ;;  %v540_v24 = vsel %vm12364_vm0, 0, %v539_v21 }
 0x1d2   : > { %3689 = vst.msk [vmem:[#allocation3 + $0x50] sm:$0xff] %vm3678_vm3, %v3651_v25  ;;  %v9639_v39 = vcombine.low %v4092_v5, %v4102_v15  ;;  %544 = vst [vmem:[#allocation4 + $0x20] sm:$0x1] %v543_v63  ;;  %v494_v51 = vsel %vm12352_vm8, 0, %v493_v27  ;;  %v491_v10 = vsel %vm12352_vm8, 0, %v490_v36  ;;  %v549_v62 = vsel %vm12364_vm0, 0, %v548_v54 }
 0x1d3   : > { %541 = vst [vmem:[#allocation4 + $0x14] sm:$0x1] %v540_v24  ;;  %v545_v29 = vld [vmem:[#allocation4 + $0x2c] sm:$0x1]  ;;  %495 = vst [vmem:[#allocation4 + $0x30] sm:$0x1] %v494_v51 }
 0x1d4   : > { %4203 = vrot.lane.b32.xlu0 %v9639_v39, %s10706_s26  ;;  %492 = vst [vmem:[#allocation4 + $0x24] sm:$0x1] %v491_v10  ;;  %v546_v50 = vsel %vm12364_vm0, 0, %v545_v29  ;;  %v499_v0 = vld [vmem:[#allocation4 + $0x48] sm:$0x1]  ;;  %vm13937_vm14 = vcmask 97344  }
 0x1d5   : > { %3482 = vrot.lane.b32.xlu1 %v9608_v30, %s10703_s23  ;;  %v496_v2 = vld [vmem:[#allocation4 + $0x3c] sm:$0x1]  ;;  %550 = vst [vmem:[#allocation4 + $0x38] sm:$0x1] %v549_v62  ;;  %547 = vst [vmem:[#allocation4 + $0x2c] sm:$0x1] %v546_v50  ;;  %s12395_s23 = scalar_lea.vmem %s13875_s1, %s13997_s10 }
 0x1d6   : > { %v500_v60 = vsel %vm12352_vm8, 0, %v499_v0  ;;  %v497_v35 = vsel %vm12352_vm8, 0, %v496_v2  ;;  %v554_v20 = vld [vmem:[#allocation4 + $0x50] sm:$0x1]  ;;  %v551_v31 = vld [vmem:[#allocation4 + $0x44] sm:$0x1]  ;;  %vm13939_vm1 = vmmov %vm13937_vm14 }
 0x1d7   : > { %501 = vst [vmem:[#allocation4 + $0x48] sm:$0x1] %v500_v60  ;;  %498 = vst [vmem:[#allocation4 + $0x3c] sm:$0x1] %v497_v35  ;;  %v555_v40 = vsel %vm12364_vm0, 0, %v554_v20  ;;  %v552_v49 = vsel %vm12364_vm0, 0, %v551_v31 }
 0x1d8   : > { %4524 = vrot.lane.b32.xlu0 %v9671_v12, %s10704_s24  ;;  %v481_v6 = vld [vmem:[#allocation4] sm:$0x1]  ;;  %v5790_v16 = vld [vmem:[#allocation4 + $0x4] sm:$0xf]  ;;  %556 = vst [vmem:[#allocation4 + $0x50] sm:$0x1] %v555_v40 }
 0x1d9   : > { %v3154_v34 = vpop.permute.xlu1 %3153  ;;  %3660 = vrot.lane.b32.xlu1 %v10330_v56, %s10702_s22  ;;  %553 = vst [vmem:[#allocation4 + $0x44] sm:$0x1] %v552_v49  ;;  %v482_v45 = vsel %vm12352_vm8, 0, %v481_v6  ;;  %v536_v55 = vld [vmem:[#allocation4 + $0x8] sm:$0x1]  ;;  %v5847_v5 = vshll.u32 %v5790_v16, 16 }
 0x1da   : > { %3191 = vst.msk [vmem:[#allocation3 + $0x58] sm:$0xff] %vm3179_vm11, %v3154_v34  ;;  %v5851_v1 = vshrl.u32 %v5790_v16, 16  ;;  %v12402_v30 = vld [vmem:[%s13879_s5] ss:$0 sm:$0xff]  ;;  %483 = vst [vmem:[#allocation4] sm:$0x1] %v482_v45 }
 0x1db   : > { %v537_v46 = vsel %vm12364_vm0, 0, %v536_v55  ;;  %v532_v7 = vld [vmem:[#allocation4 + $0xcc] sm:$0x1]  ;;  %v12406_v38 = vrot.slane %v5847_v5, 5  ;;  %v12409_v42 = vld [vmem:[%s12395_s23] ss:$0 sm:$0xff] }
 0x1dc   : > { %538 = vst [vmem:[#allocation4 + $0x8] sm:$0x1] %v537_v46  ;;  %v5853_v25 = vrot.slane %v5851_v1, 4  ;;  %v533_v48 = vsel %vm12352_vm8, 0, %v532_v7  ;;  %v6334_v4 = vld [vmem:[#allocation4] sm:$0xe] }
 0x1dd   : > { %v3475_v18 = vpop.permute.xlu1 %3474  ;;  %4205 = vrot.lane.b32.xlu1 %v9640_v9, %s10706_s26  ;;  %534 = vst [vmem:[#allocation4 + $0xcc] sm:$0x1] %v533_v48  ;;  %v6335_v33 = vld [vmem:[#allocation4 + $0x4] sm:$0xf]  ;;  %v9790_v50 = vrot.slane %v6334_v4, 9  ;;  %vm13938_vm7 = vcmask 130144  }
 0x1de   : > { %3512 = vst.msk [vmem:[#allocation3 + $0x58] sm:$0xff] %vm3500_vm13, %v3475_v18  ;;  %v5854_v43 = vor.u32 %v5853_v25, %v12406_v38  ;;  %v6432_v44 = vrot.slane %v6335_v33, 5  ;;  %v505_v2 = vld [vmem:[#allocation4 + $0x60] sm:$0x1]  ;;  %vm13940_vm4 = vmmov %vm13938_vm7 }
 0x1df   : > { %v4196_v52 = vpop.permute.xlu0 %4195  ;;  %v506_v31 = vsel %vm12352_vm8, 0, %v505_v2 }
 0x1e0   : > { %4234 = vst.msk [vmem:[#allocation3 + $0x50] sm:$0xff] %vm4223_vm5, %v4196_v52  ;;  %v5855_v24 = vrot.slane %v5854_v43, 4  ;;  %v6434_v0 = vrot.slane %v6432_v44, 4  ;;  %507 = vst [vmem:[#allocation4 + $0x60] sm:$0x1] %v506_v31  ;;  %v6433_v46 = vsel %vm10819_vm9, %v9790_v50, %v6432_v44 }
 0x1e1   : > { %v3653_v19 = vpop.permute.xlu1 %3652  ;;  %4526 = vrot.lane.b32.xlu1 %v9672_v22, %s10704_s24  ;;  %v5789_v52 = vld [vmem:[#allocation4] sm:$0xf] }
 0x1e2   : > { %3690 = vst.msk [vmem:[#allocation3 + $0x58] sm:$0xff] %vm3678_vm3, %v3653_v19  ;;  %v5838_v23 = vshrl.u32 %v5789_v52, 16  ;;  %v5841_v61 = vshll.u32 %v5789_v52, 16 }
 0x1e3   : > { %v4517_v32 = vpop.permute.xlu0 %4516  ;;  %v5791_v37 = vld [vmem:[#allocation4 + $0x8] sm:$0x1] }
 0x1e4   : > { %4555 = vst.msk [vmem:[#allocation3 + $0x50] sm:$0xff] %vm4544_vm2, %v4517_v32  ;;  %v5857_v27 = vshll.u32 %v5791_v37, 16  ;;  %v6336_v36 = vld [vmem:[#allocation4 + $0x8] sm:$0x1]  ;;  %v5840_v10 = vrot.slane %v5838_v23, 4  ;;  %v5843_v54 = vrot.slane %v5841_v61, 5 }
 0x1e5   : > { %v10337_v62 = vld [vmem:[#allocation4 + $0xcc] sm:$0xff]   ;;  %v6435_v20 = vrot.slane %v6336_v36, 5 }
 0x1e6   : > { %v5859_v32 = vrot.slane %v5857_v27, 5  ;;  %v5844_v35 = vor.u32 %v5843_v54, %v5840_v10  ;;  %7841 = vrot.lane.b32.xlu1 %v10337_v62, %s10707_s18 }
 0x1e7   : > { %v10121_v28 = vpop.f32.mrb[0].mxu0  ;;  %v6436_v7 = vsel %vm10819_vm9, %v6434_v0, %v6435_v20 }
 0x1e8   : > { %v4821_v39 = vmul.f32 %v10121_v28, %v12402_v30  ;;  %v4684_v58 = vpop.f32.mrb[1].mxu0  ;;  %v5845_v49 = vrot.slane %v5844_v35, 4  ;;  %v5860_v6 = vsel %vm10896_vm12, %v5855_v24, %v5859_v32 }
 0x1e9   : > { %v4519_v15 = vpop.permute.xlu0 %4518  ;;  %v4819_v12 = vmul.f32 %v12402_v30, %v4684_v58  ;;  %v10122_v41 = vpop.f32.mrb[2].mxu0 }
 0x1ea   : > { %v4198_v17 = vpop.permute.xlu1 %4197  ;;  %v12419_v57 = vadd.f32 %v12409_v42, %v4821_v39  ;;  %v4822_v53 = vmul.f32 %v10122_v41, %v12402_v30  ;;  %v4687_v14 = vpop.f32.mrb[3].mxu0  ;;  %v5850_v1 = vsel %vm10896_vm12, %v5845_v49, %v12406_v38 }
 0x1eb   : > { %4235 = vst.msk [vmem:[#allocation3 + $0x58] sm:$0xff] %vm4223_vm5, %v4198_v17  ;;  %v4571_v56 = vld [vmem:[#allocation3 + $0x50] sm:$0xff]  ;;  %v12424_v34 = vadd.f32 %v12409_v42, %v4819_v12  ;;  %v4820_v9 = vmul.f32 %v12402_v30, %v4687_v14  ;;  %v9774_v28 = vcombine.low %v5850_v1, %v5860_v6  ;;  %v9806_v12 = vcombine.low %v6433_v46, %v6436_v7  ;;  %v5539_v7 = vld [vmem:[#allocation4 + $0x18] sm:$0xf] }
 0x1ec   : > { %4556 = vst.msk [vmem:[#allocation3 + $0x58] sm:$0xff] %vm4544_vm2, %v4519_v15  ;;  %10139 = vmatprep.mubr.msk.bf16.mxu0 %vm4597_vm10, %v4571_v56  ;;  %v9696_v59 = vmul.f32 -1.442695, %v12419_v57  ;;  %v12429_v22 = vadd.f32 %v12409_v42, %v4822_v53 }
 0x1ed   : > { %v9694_v3 = vmul.f32 -1.442695, %v12424_v34  ;;  %v12434_v19 = vadd.f32 %v12409_v42, %v4820_v9  ;;  %6269 = vrot.lane.b32.xlu0 %v9774_v28, %s10699_s19 }
 0x1ee   : > { %v2110_v18 = vpop.permute.xlu1 %2109  ;;  %10518 = vpow2.f32 %v9696_v59  ;;  %v9697_v63 = vmul.f32 -1.442695, %v12429_v22 }
 0x1ef   : > { %2146 = vst.msk [vmem:[#allocation3 + $0x60] sm:$0xff] %vm2133_vm6, %v2110_v18  ;;  %10520 = vpow2.f32 %v9694_v3  ;;  %v9695_v51 = vmul.f32 -1.442695, %v12434_v19 }
 0x1f0   : > { %v2434_v21 = vpop.permute.xlu0 %2433  ;;  %10522 = vpow2.f32 %v9697_v63 }
 0x1f1   : > { %2470 = vst.msk [vmem:[#allocation3 + $0x60] sm:$0xff] %vm13937_vm14, %v2434_v21  ;;  %10524 = vpow2.f32 %v9695_v51  ;;  %6590 = vrot.lane.b32.xlu0 %v9806_v12, %s10705_s25  ;;  %vm13941_vm14 = vsmask.f32 7938 }
 0x1f2   : > { %v2112_v29 = vpop.permute.xlu1 %2111 }
 0x1f3   : > { %2147 = vst.msk [vmem:[#allocation3 + $0x68] sm:$0xff] %vm2133_vm6, %v2112_v29  ;;  %v4572_v60 = vld [vmem:[#allocation3 + $0x58] sm:$0xff]  ;;  %v10125_v45 = vpop.f32.mrb[4].mxu0 }
 0x1f4   : > { %v2611_v40 = vpop.permute.xlu0 %2610  ;;  %10140 = vmatmul.mubr.msk.bf16.gmra.mrb[20].mxu0 %vm4597_vm10, %v4572_v60  ;;  %v4825_v55 = vmul.f32 %v10125_v45, %v12402_v30  ;;  %v4700_v5 = vpop.f32.mrb[5].mxu0 }
 0x1f5   : > { %2647 = vst.msk [vmem:[#allocation3 + $0x60] sm:$0xff] %vm13938_vm7, %v2611_v40  ;;  %v4823_v25 = vmul.f32 %v12402_v30, %v4700_v5  ;;  %v10126_v15 = vpop.f32.mrb[6].mxu0  ;;  %vm13942_vm7 = vcmask 60416  }
 0x1f6   : > { %v2436_v16 = vpop.permute.xlu1 %2435  ;;  %v12458_v48 = vadd.f32 %v12409_v42, %v4825_v55  ;;  %v4826_v17 = vmul.f32 %v10126_v15, %v12402_v30  ;;  %v4703_v39 = vpop.f32.mrb[7].mxu0 }
 0x1f7   : > { %2471 = vst.msk [vmem:[#allocation3 + $0x68] sm:$0xff] %vm13939_vm1, %v2436_v16  ;;  %v12462_v56 = vadd.f32 %v12409_v42, %v4823_v25  ;;  %v4824_v38 = vmul.f32 %v12402_v30, %v4703_v39  ;;  %vm12489_vm1 = vmand %vm13942_vm7, %vm13941_vm14 }
 0x1f8   : > { %v10519_v58 = vpop.eup %10518  ;;  %v12467_v14 = vadd.f32 %v12409_v42, %v4826_v17  ;;  %v9700_v52 = vmul.f32 -1.442695, %v12458_v48 }
 0x1f9   : > { %v10521_v41 = vpop.eup %10520  ;;  %v4987_v53 = vadd.f32 1.0, %v10519_v58  ;;  %v12470_v33 = vadd.f32 %v12409_v42, %v4824_v38  ;;  %v9698_v37 = vmul.f32 -1.442695, %v12462_v56  ;;  %v5532_v58 = vld [vmem:[#allocation4 + $0xc] sm:$0xf] }
 0x1fa   : > { %v10523_v43 = vpop.eup %10522  ;;  %v4985_v4 = vadd.f32 1.0, %v10521_v41  ;;  %v9701_v23 = vmul.f32 -1.442695, %v12467_v14 }
 0x1fb   : > { %v3156_v9 = vpop.permute.xlu0 %3155  ;;  %v10525_v18 = vpop.eup %10524  ;;  %10526 = vrcp.f32 %v4987_v53  ;;  %v4988_v59 = vadd.f32 1.0, %v10523_v43  ;;  %v9699_v21 = vmul.f32 -1.442695, %v12470_v33  ;;  %v5543_v43 = vld [vmem:[#allocation4 + $0x20] sm:$0x1] }
 0x1fc   : > { %3192 = vst.msk [vmem:[#allocation3 + $0x60] sm:$0xff] %vm3179_vm11, %v3156_v9  ;;  %v2613_v44 = vpop.permute.xlu1 %2612  ;;  %10528 = vrcp.f32 %v4985_v4  ;;  %v4986_v3 = vadd.f32 1.0, %v10525_v18 }
 0x1fd   : > { %2648 = vst.msk [vmem:[#allocation3 + $0x68] sm:$0xff] %vm13940_vm4, %v2613_v44  ;;  %10530 = vrcp.f32 %v4988_v59  ;;  %vm13945_vm4 = vmmov %vm13942_vm7  ;;  %vm13947_vm7 = vcmask 97344  }
 0x1fe   : > { %10532 = vrcp.f32 %v4986_v3  ;;  %v5536_v3 = vld [vmem:[#allocation4 + $0x14] sm:$0x1]  ;;  %vm13946_vm14 = vmmov %vm13945_vm4 }
 0x1ff   : > { %v3477_v61 = vpop.permute.xlu0 %3476  ;;  %10534 = vpow2.f32 %v9700_v52 }
 0x200   : > { %3513 = vst.msk [vmem:[#allocation3 + $0x60] sm:$0xff] %vm3500_vm13, %v3477_v61  ;;  %10536 = vpow2.f32 %v9698_v37 }
 0x201   : > { %10538 = vpow2.f32 %v9701_v23 }
 0x202   : > { %10540 = vpow2.f32 %v9699_v21  ;;  %v502_v21 = vld [vmem:[#allocation4 + $0x54] sm:$0x1] }
 0x203   : > { %v3655_v63 = vpop.permute.xlu0 %3654 }
 0x204   : > { %3691 = vst.msk [vmem:[#allocation3 + $0x60] sm:$0xff] %vm3678_vm3, %v3655_v63 }
 0x205   : > { %v10527_v24 = vpop.eup %10526 }
 0x206   : > { %v10529_v27 = vpop.eup %10528  ;;  %v5083_v51 = vmul.f32 %v10527_v24, %v12419_v57 }
 0x207   : > { %v10531_v10 = vpop.eup %10530  ;;  %v5081_v54 = vmul.f32 %v10529_v27, %v12424_v34  ;;  %v503_v27 = vsel %vm12352_vm8, 0, %v502_v21 }
 0x208   : > { %v3158_v36 = vpop.permute.xlu1 %3157  ;;  %v10533_v29 = vpop.eup %10532  ;;  %v10026_v32 = vpack.c.bf16 %v5083_v51, %v5083_v51  ;;  %v5084_v62 = vmul.f32 %v10531_v10, %v12429_v22  ;;  %504 = vst [vmem:[#allocation4 + $0x54] sm:$0x1] %v503_v27 }
 0x209   : > { %3193 = vst.msk [vmem:[#allocation3 + $0x68] sm:$0xff] %vm3179_vm11, %v3158_v36  ;;  %v10535_v50 = vpop.eup %10534  ;;  %v10024_v0 = vpack.c.bf16 %v5081_v54, %v5081_v54  ;;  %v5082_v2 = vmul.f32 %v10533_v29, %v12434_v19  ;;  %v560_v36 = vld [vmem:[#allocation4 + $0x68] sm:$0x1]  ;;  %v557_v29 = vld [vmem:[#allocation4 + $0x5c] sm:$0x1] }
 0x20a   : > { %v10537_v60 = vpop.eup %10536  ;;  %v5227_v20 = vshrl.u32 %v10026_v32, 16  ;;  %v5230_v31 = vshll.u32 %v10026_v32, 16  ;;  %v10027_v40 = vpack.c.bf16 %v5084_v62, %v5084_v62  ;;  %v4991_v49 = vadd.f32 1.0, %v10535_v50  ;;  %v511_v50 = vld [vmem:[#allocation4 + $0x78] sm:$0x1] }
 0x20b   : > { %v10539_v57 = vpop.eup %10538  ;;  %v5210_v6 = vshrl.u32 %v10024_v0, 16  ;;  %v5213_v16 = vshll.u32 %v10024_v0, 16  ;;  %v10025_v34 = vpack.c.bf16 %v5082_v2, %v5082_v2  ;;  %v4989_v45 = vadd.f32 1.0, %v10537_v60 }
 0x20c   : > { %v3479_v35 = vpop.permute.xlu1 %3478  ;;  %v10541_v55 = vpop.eup %10540  ;;  %v5229_v22 = vrot.slane %v5227_v20, 7  ;;  %v5235_v1 = vshrl.u32 %v10027_v40, 16  ;;  %v5238_v46 = vshll.u32 %v10027_v40, 16  ;;  %10542 = vrcp.f32 %v4991_v49 }
 0x20d   : > { %3514 = vst.msk [vmem:[#allocation3 + $0x68] sm:$0xff] %vm3500_vm13, %v3479_v35  ;;  %v5212_v25 = vrot.slane %v5210_v6, 7  ;;  %v5218_v15 = vshrl.u32 %v10025_v34, 16  ;;  %v5221_v28 = vshll.u32 %v10025_v34, 16  ;;  %10544 = vrcp.f32 %v4989_v45 }
 0x20e   : > { %v4200_v5 = vpop.permute.xlu0 %4199  ;;  %v5232_v17 = vor.u32 %v5230_v31, %v5229_v22  ;;  %v5233_v39 = vrot.slane %v5229_v22, 4  ;;  %v5237_v38 = vrot.slane %v5235_v1, 7  ;;  %v4992_v12 = vadd.f32 1.0, %v10539_v57 }
 0x20f   : > { %4236 = vst.msk [vmem:[#allocation3 + $0x60] sm:$0xff] %vm4223_vm5, %v4200_v5  ;;  %v5215_v41 = vor.u32 %v5213_v16, %v5212_v25  ;;  %v5216_v53 = vrot.slane %v5212_v25, 4  ;;  %v5220_v9 = vrot.slane %v5218_v15, 7  ;;  %v4990_v4 = vadd.f32 1.0, %v10541_v55 }
 0x210   : > { %v5540_v59 = vsel %vm12489_vm1, %v5232_v17, %v5539_v7  ;;  %v5240_v52 = vor.u32 %v5238_v46, %v5237_v38  ;;  %v5242_v44 = vrot.slane %v5237_v38, 4  ;;  %10546 = vrcp.f32 %v4992_v12 }
 0x211   : > { %5541 = vst [vmem:[#allocation4 + $0x18] sm:$0xf] %v5540_v59  ;;  %v5533_v37 = vsel %vm12489_vm1, %v5215_v41, %v5532_v58  ;;  %v5223_v23 = vor.u32 %v5221_v28, %v5220_v9  ;;  %v5225_v61 = vrot.slane %v5220_v9, 4  ;;  %10548 = vrcp.f32 %v4990_v4 }
 0x212   : > { %v4521_v18 = vpop.permute.xlu0 %4520  ;;  %5534 = vst [vmem:[#allocation4 + $0xc] sm:$0xf] %v5533_v37  ;;  %v5241_v63 = vsel %vm10999_vm15, %v5233_v39, %v5240_v52  ;;  %v5544_v24 = vsel %vm12352_vm8, %v5242_v44, %v5543_v43  ;;  %v561_v54 = vsel %vm12364_vm0, 0, %v560_v36  ;;  %v558_v62 = vsel %vm12364_vm0, 0, %v557_v29  ;;  %v5546_v44 = vld [vmem:[#allocation4 + $0x24] sm:$0xf] }
 0x213   : > { %4557 = vst.msk [vmem:[#allocation3 + $0x60] sm:$0xff] %vm4544_vm2, %v4521_v18  ;;  %5545 = vst [vmem:[#allocation4 + $0x20] sm:$0x1] %v5544_v24  ;;  %v5224_v51 = vsel %vm10999_vm15, %v5216_v53, %v5223_v23  ;;  %v5537_v10 = vsel %vm12352_vm8, %v5225_v61, %v5536_v3  ;;  %v512_v0 = vsel %vm12352_vm8, 0, %v511_v50  ;;  %v5553_v53 = vld [vmem:[#allocation4 + $0x30] sm:$0xf] }
 0x214   : > { %5542 = vst.msk [vmem:[#allocation4 + $0x1c] sm:$0xf] %vm13945_vm4, %v5241_v63  ;;  %5538 = vst [vmem:[#allocation4 + $0x14] sm:$0x1] %v5537_v10  ;;  %v5557_v29 = vld [vmem:[#allocation4 + $0x38] sm:$0x1] }
 0x215   : > { %v3657_v32 = vpop.permute.xlu1 %3656  ;;  %5535 = vst.msk [vmem:[#allocation4 + $0x10] sm:$0xf] %vm13946_vm14, %v5224_v51  ;;  %562 = vst [vmem:[#allocation4 + $0x68] sm:$0x1] %v561_v54  ;;  %vm13948_vm4 = vcmask 130144  }
 0x216   : > { %3692 = vst.msk [vmem:[#allocation3 + $0x68] sm:$0xff] %vm3678_vm3, %v3657_v32  ;;  %559 = vst [vmem:[#allocation4 + $0x5c] sm:$0x1] %v558_v62  ;;  %v10543_v2 = vpop.eup %10542 }
 0x217   : > { %513 = vst [vmem:[#allocation4 + $0x78] sm:$0x1] %v512_v0  ;;  %v10545_v60 = vpop.eup %10544  ;;  %v5087_v35 = vmul.f32 %v10543_v2, %v12458_v48 }
 0x218   : > { %v5085_v31 = vmul.f32 %v10545_v60, %v12462_v56  ;;  %v7380_v49 = vld [vmem:[#allocation4 + $0x18] sm:$0xe] }
 0x219   : > { %v10030_v40 = vpack.c.bf16 %v5087_v35, %v5087_v35  ;;  %v8421_v57 = vld [vmem:[#allocation4 + $0x18] sm:$0xe]  ;;  %v9855_v7 = vrot.slane %v7380_v49, 9 }
 0x21a   : > { %v4573_v20 = vld [vmem:[#allocation3 + $0x60] sm:$0xff]  ;;  %v10547_v6 = vpop.eup %10546  ;;  %v10028_v16 = vpack.c.bf16 %v5085_v31, %v5085_v31  ;;  %v9918_v4 = vrot.slane %v8421_v57, 9 }
 0x21b   : > { %10143 = vmatprep.mubr.msk.bf16.mxu0 %vm4597_vm10, %v4573_v20  ;;  %v10338_v34 = vld [vmem:[#allocation4 + $0x18] sm:$0xff]   ;;  %v10549_v45 = vpop.eup %10548  ;;  %v5261_v5 = vshrl.u32 %v10030_v40, 16  ;;  %v5264_v22 = vshll.u32 %v10030_v40, 16  ;;  %v5088_v1 = vmul.f32 %v10547_v6, %v12467_v14  ;;  %v7382_v28 = vld [vmem:[#allocation4 + $0x20] sm:$0x1] }
 0x21c   : > { %v10339_v46 = vld [vmem:[#allocation4 + $0x18] sm:$0xff]   ;;  %v5244_v48 = vshrl.u32 %v10028_v16, 16  ;;  %v5247_v25 = vshll.u32 %v10028_v16, 16  ;;  %v5086_v56 = vmul.f32 %v10549_v45, %v12470_v33  ;;  %7811 = vrot.lane.b32.xlu0 %v10338_v34, %s10707_s18  ;;  %v7485_v38 = vrot.slane %v7382_v28, 5  ;;  %v10340_v9 = vld [vmem:[#allocation4 + $0xc] sm:$0xff]  }
 0x21d   : > { %v7381_v15 = vld [vmem:[#allocation4 + $0x1c] sm:$0xf]  ;;  %v5263_v17 = vrot.slane %v5261_v5, 7  ;;  %v10031_v39 = vpack.c.bf16 %v5088_v1, %v5088_v1  ;;  %6769 = vrot.lane.b32.xlu1 %v10339_v46, %s10702_s22  ;;  %v5550_v20 = vld [vmem:[#allocation4 + $0x2c] sm:$0x1] }
 0x21e   : > { %v4523_v55 = vpop.permute.xlu0 %4522  ;;  %v7482_v58 = vrot.slane %v7381_v15, 5  ;;  %v8422_v12 = vld [vmem:[#allocation4 + $0x1c] sm:$0xf]  ;;  %v5246_v14 = vrot.slane %v5244_v48, 7  ;;  %v10029_v43 = vpack.c.bf16 %v5086_v56, %v5086_v56  ;;  %v6337_v5 = vld [vmem:[#allocation4 + $0xc] sm:$0xe] }
 0x21f   : > { %v8519_v18 = vrot.slane %v8422_v12, 5  ;;  %v5266_v59 = vor.u32 %v5264_v22, %v5263_v17  ;;  %v5267_v52 = vrot.slane %v5263_v17, 4  ;;  %v5269_v3 = vshrl.u32 %v10031_v39, 16  ;;  %v6339_v56 = vld [vmem:[#allocation4 + $0x14] sm:$0x1] }
 0x220   : > { %v5272_v37 = vshll.u32 %v10031_v39, 16  ;;  %v5249_v23 = vor.u32 %v5247_v25, %v5246_v14  ;;  %v5250_v61 = vrot.slane %v5246_v14, 4  ;;  %v5252_v21 = vshrl.u32 %v10029_v43, 16  ;;  %6767 = vrot.lane.b32.xlu0 %v10340_v9, %s10702_s22  ;;  %v10129_v62 = vpop.f32.mrb[8].mxu0  ;;  %v6338_v25 = vld [vmem:[#allocation4 + $0x10] sm:$0xf] }
 0x221   : > { %v4202_v41 = vpop.permute.xlu1 %4201  ;;  %v5255_v63 = vshll.u32 %v10029_v43, 16  ;;  %v5554_v24 = vsel %vm12489_vm1, %v5266_v59, %v5553_v53  ;;  %v5271_v27 = vrot.slane %v5269_v3, 7  ;;  %v7483_v36 = vsel %vm10819_vm9, %v9855_v7, %v7482_v58  ;;  %v4716_v40 = vpop.f32.mrb[9].mxu0  ;;  %v6341_v12 = vld [vmem:[#allocation4 + $0x1c] sm:$0xf] }
 0x222   : > { %4237 = vst.msk [vmem:[#allocation3 + $0x68] sm:$0xff] %vm4223_vm5, %v4202_v41  ;;  %v2438_v33 = vpop.permute.xlu0 %2437  ;;  %v7484_v51 = vrot.slane %v7482_v58, 4  ;;  %5555 = vst [vmem:[#allocation4 + $0x30] sm:$0xf] %v5554_v24  ;;  %v5547_v54 = vsel %vm12489_vm1, %v5249_v23, %v5546_v44  ;;  %v5254_v32 = vrot.slane %v5252_v21, 7  ;;  %v12536_v50 = vsel %vm10819_vm9, %v9918_v4, %v8519_v18  ;;  %v10130_v34 = vpop.f32.mrb[10].mxu0 }
 0x223   : > { %4558 = vst.msk [vmem:[#allocation3 + $0x68] sm:$0xff] %vm4544_vm2, %v4523_v55  ;;  %v8521_v0 = vrot.slane %v8519_v18, 4  ;;  %5548 = vst [vmem:[#allocation4 + $0x24] sm:$0xf] %v5547_v54  ;;  %v5274_v60 = vor.u32 %v5272_v37, %v5271_v27  ;;  %v5276_v35 = vrot.slane %v5271_v27, 4  ;;  %v4829_v31 = vmul.f32 %v10129_v62, %v12402_v30  ;;  %v4719_v48 = vpop.f32.mrb[11].mxu0 }
 0x224   : > { %v7486_v49 = vsel %vm10819_vm9, %v7484_v51, %v7485_v38  ;;  %v5257_v57 = vor.u32 %v5255_v63, %v5254_v32  ;;  %v5259_v6 = vrot.slane %v5254_v32, 4  ;;  %v4827_v16 = vmul.f32 %v12402_v30, %v4716_v40  ;;  %v8423_v55 = vld [vmem:[#allocation4 + $0x20] sm:$0x1]  ;;  %v6340_v38 = vld [vmem:[#allocation4 + $0x18] sm:$0xe] }
 0x225   : > { %v2114_v10 = vpop.permute.xlu1 %2113  ;;  %v9871_v45 = vcombine.low %v7483_v36, %v7486_v49  ;;  %v5275_v22 = vsel %vm10999_vm15, %v5267_v52, %v5274_v60  ;;  %v5558_v1 = vsel %vm12352_vm8, %v5276_v35, %v5557_v29  ;;  %v12550_v46 = vadd.f32 %v12409_v42, %v4829_v31  ;;  %v6342_v41 = vld [vmem:[#allocation4 + $0x20] sm:$0x1]  ;;  %v7378_v18 = vld [vmem:[#allocation4 + $0x10] sm:$0xf]  ;;  %v6835_v37 = vld [vmem:[#allocation4 + $0x18] sm:$0xf] }
 0x226   : > { %2148 = vst.msk [vmem:[#allocation3 + $0x70] sm:$0xff] %vm2133_vm6, %v2114_v10  ;;  %v2615_v2 = vpop.permute.xlu0 %2614  ;;  %v4830_v7 = vmul.f32 %v10130_v34, %v12402_v30  ;;  %5559 = vst [vmem:[#allocation4 + $0x38] sm:$0x1] %v5558_v1  ;;  %v5258_v28 = vsel %vm10999_vm15, %v5250_v61, %v5257_v57  ;;  %v5551_v17 = vsel %vm12352_vm8, %v5259_v6, %v5550_v20  ;;  %v8522_v9 = vrot.slane %v8423_v55, 5  ;;  %v6836_v29 = vld [vmem:[#allocation4 + $0x1c] sm:$0xf] }
 0x227   : > { %2472 = vst.msk [vmem:[#allocation3 + $0x70] sm:$0xff] %vm13947_vm7, %v2438_v33  ;;  %v12559_v39 = vadd.f32 %v12409_v42, %v4827_v16  ;;  %v4828_v58 = vmul.f32 %v12402_v30, %v4719_v48  ;;  %7635 = vrot.lane.b32.xlu1 %v9871_v45, %s10708_s27  ;;  %vm13949_vm7 = vmmov %vm13946_vm14  ;;  %v9704_v14 = vmul.f32 -1.442695, %v12550_v46  ;;  %v9791_v4 = vrot.slane %v6337_v5, 9  ;;  %v7377_v30 = vld [vmem:[#allocation4 + $0xc] sm:$0xe] }
 0x228   : > { %2649 = vst.msk [vmem:[#allocation3 + $0x70] sm:$0xff] %vm13948_vm4, %v2615_v2  ;;  %5552 = vst [vmem:[#allocation4 + $0x2c] sm:$0x1] %v5551_v17  ;;  %v12567_v43 = vadd.f32 %v12409_v42, %v4830_v7  ;;  %v7379_v33 = vld [vmem:[#allocation4 + $0x14] sm:$0x1]  ;;  %v6439_v44 = vrot.slane %v6338_v25, 5  ;;  %v8523_v21 = vsel %vm10819_vm9, %v8521_v0, %v8522_v9 }
 0x229   : > { %v2116_v15 = vpop.permute.xlu1 %2115  ;;  %5556 = vst.msk [vmem:[#allocation4 + $0x34] sm:$0xf] %vm13946_vm14, %v5275_v22  ;;  %v9702_v59 = vmul.f32 -1.442695, %v12559_v39  ;;  %v12572_v52 = vadd.f32 %v12409_v42, %v4828_v58  ;;  %v6442_v3 = vrot.slane %v6339_v56, 5  ;;  %10550 = vpow2.f32 %v9704_v14 }
 0x22a   : > { %2149 = vst.msk [vmem:[#allocation3 + $0x78] sm:$0xff] %vm2133_vm6, %v2116_v15  ;;  %v4574_v53 = vld [vmem:[#allocation3 + $0x68] sm:$0xff]  ;;  %v3160_v23 = vpop.permute.xlu0 %3159  ;;  %v9705_v61 = vmul.f32 -1.442695, %v12567_v43  ;;  %v9792_v63 = vrot.slane %v6340_v38, 9  ;;  %v9934_v42 = vcombine.low %v12536_v50, %v8523_v21  ;;  %v6440_v36 = vsel %vm10819_vm9, %v9791_v4, %v6439_v44 }
 0x22b   : > { %5549 = vst.msk [vmem:[#allocation4 + $0x28] sm:$0xf] %vm13949_vm7, %v5258_v28  ;;  %10144 = vmatmul.mubr.msk.bf16.gmra.mrb[24].mxu0 %vm4597_vm10, %v4574_v53  ;;  %10552 = vpow2.f32 %v9702_v59  ;;  %v9703_v27 = vmul.f32 -1.442695, %v12572_v52  ;;  %vm13950_vm6 = vcmask 97344   ;;  %v6441_v51 = vrot.slane %v6439_v44, 4 }
 0x22c   : > { %3194 = vst.msk [vmem:[#allocation3 + $0x70] sm:$0xff] %vm3179_vm11, %v3160_v23  ;;  %10554 = vpow2.f32 %v9705_v61  ;;  %v6446_v10 = vrot.slane %v6341_v12, 5  ;;  %v6449_v54 = vrot.slane %v6342_v41, 5  ;;  %8677 = vrot.lane.b32.xlu0 %v9934_v42, %s10709_s28  ;;  %v9854_v32 = vrot.slane %v7377_v30, 9  ;;  %v6837_v2 = vld [vmem:[#allocation4 + $0x20] sm:$0x1] }
 0x22d   : > { %v2440_v24 = vpop.permute.xlu1 %2439  ;;  %10556 = vpow2.f32 %v9703_v27  ;;  %v7475_v62 = vrot.slane %v7378_v18, 5  ;;  %v7478_v0 = vrot.slane %v7379_v33, 5  ;;  %v6443_v50 = vsel %vm10819_vm9, %v6441_v51, %v6442_v3  ;;  %v7876_v40 = vld [vmem:[#allocation4 + $0x18] sm:$0xf]  ;;  %v7877_v22 = vld [vmem:[#allocation4 + $0x1c] sm:$0xf] }
 0x22e   : > { %2473 = vst.msk [vmem:[#allocation3 + $0x78] sm:$0xff] %vm13950_vm6, %v2440_v24  ;;  %v3481_v60 = vpop.permute.xlu0 %3480  ;;  %v6447_v35 = vsel %vm10819_vm9, %v9792_v63, %v6446_v10  ;;  %v6448_v20 = vrot.slane %v6446_v10, 4  ;;  %v6905_v31 = vshrl.u32 %v6835_v37, 16  ;;  %v9807_v49 = vcombine.low %v6440_v36, %v6443_v50  ;;  %v7878_v56 = vld [vmem:[#allocation4 + $0x20] sm:$0x1] }
 0x22f   : > { %3515 = vst.msk [vmem:[#allocation3 + $0x70] sm:$0xff] %vm3500_vm13, %v3481_v60  ;;  %v7476_v57 = vsel %vm10819_vm9, %v9854_v32, %v7475_v62  ;;  %v7477_v6 = vrot.slane %v7475_v62, 4  ;;  %v6908_v16 = vshll.u32 %v6835_v37, 16  ;;  %v6914_v55 = vshll.u32 %v6836_v29, 16  ;;  %v5795_v42 = vld [vmem:[#allocation4 + $0x18] sm:$0xf] }
 0x230   : > { %v6450_v34 = vsel %vm10819_vm9, %v6448_v20, %v6449_v54  ;;  %v6907_v45 = vrot.slane %v6905_v31, 4  ;;  %v6918_v5 = vshrl.u32 %v6836_v29, 16  ;;  %6592 = vrot.lane.b32.xlu1 %v9807_v49, %s10705_s25  ;;  %v6924_v25 = vshll.u32 %v6837_v2, 16  ;;  %v10341_v38 = vld [vmem:[#allocation4 + $0x30] sm:$0xff]   ;;  %v5796_v29 = vld [vmem:[#allocation4 + $0x1c] sm:$0xf] }
 0x231   : > { %v9808_v1 = vcombine.low %v6447_v35, %v6450_v34  ;;  %v7479_v7 = vsel %vm10819_vm9, %v7477_v6, %v7478_v0  ;;  %v6910_v48 = vrot.slane %v6908_v16, 5  ;;  %v6916_v28 = vrot.slane %v6914_v55, 5  ;;  %v10342_v60 = vld [vmem:[#allocation4 + $0x30] sm:$0xff]   ;;  %v5792_v20 = vld [vmem:[#allocation4 + $0xc] sm:$0xf] }
 0x232   : > { %v9870_v15 = vcombine.low %v7476_v57, %v7479_v7  ;;  %v6920_v17 = vrot.slane %v6918_v5, 4  ;;  %v7925_v58 = vshrl.u32 %v7876_v40, 16  ;;  %v6926_v41 = vrot.slane %v6924_v25, 5  ;;  %v5797_v49 = vld [vmem:[#allocation4 + $0x20] sm:$0x1] }
 0x233   : > { %6594 = vrot.lane.b32.xlu0 %v9808_v1, %s10705_s25  ;;  %v6911_v12 = vor.u32 %v6910_v48, %v6907_v45  ;;  %v7928_v53 = vshll.u32 %v7876_v40, 16  ;;  %v7934_v14 = vshll.u32 %v7877_v22, 16  ;;  %v10551_v9 = vpop.eup %10550  ;;  %v7938_v18 = vshrl.u32 %v7877_v22, 16  ;;  %v5793_v55 = vld [vmem:[#allocation4 + $0x10] sm:$0xf] }
 0x234   : > { %v6921_v4 = vor.u32 %v6920_v17, %v6916_v28  ;;  %v7927_v30 = vrot.slane %v7925_v58, 4  ;;  %v7944_v33 = vshll.u32 %v7878_v56, 16  ;;  %v4995_v44 = vadd.f32 1.0, %v10551_v9  ;;  %6773 = vrot.lane.b32.xlu1 %v10341_v38, %s10702_s22  ;;  %v5794_v5 = vld [vmem:[#allocation4 + $0x14] sm:$0x1] }
 0x235   : > { %v10553_v59 = vpop.eup %10552  ;;  %v6912_v3 = vrot.slane %v6911_v12, 4  ;;  %v7930_v37 = vrot.slane %v7928_v53, 5  ;;  %v7936_v23 = vrot.slane %v7934_v14, 5  ;;  %v7940_v24 = vrot.slane %v7938_v18, 4  ;;  %v6832_v25 = vld [vmem:[#allocation4 + $0xc] sm:$0xf] }
 0x236   : > { %v10555_v61 = vpop.eup %10554  ;;  %v4993_v21 = vadd.f32 1.0, %v10553_v59  ;;  %v6922_v63 = vrot.slane %v6921_v4, 4  ;;  %v7946_v27 = vrot.slane %v7944_v33, 5  ;;  %10558 = vrcp.f32 %v4995_v44 }
 0x237   : > { %v10557_v36 = vpop.eup %10556  ;;  %v4996_v51 = vadd.f32 1.0, %v10555_v61  ;;  %7633 = vrot.lane.b32.xlu0 %v9870_v15, %s10708_s27  ;;  %v6917_v10 = vsel %vm10896_vm12, %v6912_v3, %v6916_v28  ;;  %v7931_v54 = vor.u32 %v7930_v37, %v7927_v30  ;;  %v7941_v0 = vor.u32 %v7940_v24, %v7936_v23  ;;  %v2617_v31 = vpop.permute.xlu1 %2616  ;;  %v10343_v15 = vld [vmem:[#allocation4 + $0x24] sm:$0xff]  }
 0x238   : > { %10560 = vrcp.f32 %v4993_v21  ;;  %v4994_v32 = vadd.f32 1.0, %v10557_v36  ;;  %v6927_v62 = vsel %vm10896_vm12, %v6922_v63, %v6926_v41  ;;  %v5886_v35 = vshrl.u32 %v5795_v42, 16  ;;  %2650 = vst.msk [vmem:[#allocation3 + $0x78] sm:$0xff] %vm13948_vm4, %v2617_v31  ;;  %v10344_v21 = vld [vmem:[#allocation4 + $0x24] sm:$0xff]  }
 0x239   : > { %10562 = vrcp.f32 %v4996_v51  ;;  %v9839_v2 = vcombine.low %v6917_v10, %v6927_v62  ;;  %v7932_v50 = vrot.slane %v7931_v54, 4  ;;  %v7942_v40 = vrot.slane %v7941_v0, 4  ;;  %v6833_v10 = vld [vmem:[#allocation4 + $0x10] sm:$0xf] }
 0x23a   : > { %10564 = vrcp.f32 %v4994_v32  ;;  %v5889_v57 = vshll.u32 %v5795_v42, 16  ;;  %v5895_v6 = vshll.u32 %v5796_v29, 16  ;;  %v5888_v34 = vrot.slane %v5886_v35, 4  ;;  %v3659_v56 = vpop.permute.xlu0 %3658 }
 0x23b   : > { %7314 = vrot.lane.b32.xlu1 %v9839_v2, %s10704_s24  ;;  %7815 = vrot.lane.b32.xlu0 %v10342_v60, %s10707_s18  ;;  %v7937_v16 = vsel %vm10896_vm12, %v7932_v50, %v7936_v23  ;;  %v5899_v45 = vshrl.u32 %v5796_v29, 16  ;;  %v7947_v22 = vsel %vm10896_vm12, %v7942_v40, %v7946_v27  ;;  %v5862_v48 = vshrl.u32 %v5792_v20, 16  ;;  %3693 = vst.msk [vmem:[#allocation3 + $0x70] sm:$0xff] %vm3678_vm3, %v3659_v56 }
 0x23c   : > { %v5891_v1 = vrot.slane %v5889_v57, 5  ;;  %v5897_v7 = vrot.slane %v5895_v6, 5  ;;  %v9902_v28 = vcombine.low %v7937_v16, %v7947_v22  ;;  %v5905_v58 = vshll.u32 %v5797_v49, 16 }
 0x23d   : > { %v5901_v17 = vrot.slane %v5899_v45, 4  ;;  %v5865_v38 = vshll.u32 %v5792_v20, 16  ;;  %v5864_v41 = vrot.slane %v5862_v48, 4  ;;  %v5871_v53 = vshll.u32 %v5793_v55, 16 }
 0x23e   : > { %v5892_v12 = vor.u32 %v5891_v1, %v5888_v34  ;;  %v5875_v14 = vshrl.u32 %v5793_v55, 16  ;;  %v5881_v30 = vshll.u32 %v5794_v5, 16  ;;  %v6881_v18 = vshrl.u32 %v6832_v25, 16  ;;  %v5567_v55 = vld [vmem:[#allocation4 + $0x48] sm:$0xf] }
 0x23f   : > { %7813 = vrot.lane.b32.xlu1 %v10343_v15, %s10707_s18  ;;  %8356 = vrot.lane.b32.xlu0 %v9902_v28, %s10710_s29  ;;  %v5902_v9 = vor.u32 %v5901_v17, %v5897_v7  ;;  %v5867_v4 = vrot.slane %v5865_v38, 5  ;;  %v5873_v59 = vrot.slane %v5871_v53, 5  ;;  %v6884_v3 = vshll.u32 %v6832_v25, 16  ;;  %v5560_v25 = vld [vmem:[#allocation4 + $0x3c] sm:$0xf] }
 0x240   : > { %v5893_v33 = vrot.slane %v5892_v12, 4  ;;  %v5877_v44 = vrot.slane %v5875_v14, 4  ;;  %v10559_v37 = vpop.eup %10558  ;;  %v5907_v61 = vrot.slane %v5905_v58, 5  ;;  %v6883_v24 = vrot.slane %v6881_v18, 4  ;;  %v5571_v58 = vld [vmem:[#allocation4 + $0x50] sm:$0x1] }
 0x241   : > { %v5903_v23 = vrot.slane %v5902_v9, 4  ;;  %v5868_v63 = vor.u32 %v5867_v4, %v5864_v41  ;;  %v5091_v42 = vmul.f32 %v10559_v37, %v12550_v46  ;;  %v5883_v51 = vrot.slane %v5881_v30, 5  ;;  %v5564_v9 = vld [vmem:[#allocation4 + $0x44] sm:$0x1]  ;;  %v6834_v4 = vld [vmem:[#allocation4 + $0x14] sm:$0x1] }
 0x242   : > { %v10561_v27 = vpop.eup %10560  ;;  %v5878_v36 = vor.u32 %v5877_v44, %v5873_v59  ;;  %v6886_v54 = vrot.slane %v6884_v3, 5  ;;  %v5898_v62 = vsel %vm10896_vm12, %v5893_v33, %v5897_v7  ;;  %v6890_v57 = vshll.u32 %v6833_v10, 16  ;;  %v7386_v37 = vld [vmem:[#allocation4 + $0x30] sm:$0xe] }
 0x243   : > { %v10563_v29 = vpop.eup %10562  ;;  %v5089_v32 = vmul.f32 %v10561_v27, %v12559_v39  ;;  %v5908_v0 = vsel %vm10896_vm12, %v5903_v23, %v5907_v61  ;;  %6771 = vrot.lane.b32.xlu0 %v10344_v21, %s10702_s22  ;;  %v5869_v2 = vrot.slane %v5868_v63, 4  ;;  %v3162_v50 = vpop.permute.xlu1 %3161  ;;  %v10034_v35 = vpack.c.bf16 %v5091_v42, %v5091_v42  ;;  %v7387_v42 = vld [vmem:[#allocation4 + $0x34] sm:$0xf] }
 0x244   : > { %v10565_v60 = vpop.eup %10564  ;;  %v5092_v46 = vmul.f32 %v10563_v29, %v12567_v43  ;;  %v9776_v20 = vcombine.low %v5898_v62, %v5908_v0  ;;  %v5879_v31 = vrot.slane %v5878_v36, 4  ;;  %3195 = vst.msk [vmem:[#allocation3 + $0x78] sm:$0xff] %vm3179_vm11, %v3162_v50  ;;  %v6887_v49 = vor.u32 %v6886_v54, %v6883_v24  ;;  %v7388_v36 = vld [vmem:[#allocation4 + $0x38] sm:$0x1]  ;;  %v8428_v62 = vld [vmem:[#allocation4 + $0x34] sm:$0xf] }
 0x245   : > { %v10032_v40 = vpack.c.bf16 %v5089_v32, %v5089_v32  ;;  %v5090_v39 = vmul.f32 %v10565_v60, %v12572_v52  ;;  %v5295_v6 = vshrl.u32 %v10034_v35, 16  ;;  %v5874_v34 = vsel %vm10896_vm12, %v5869_v2, %v5873_v59  ;;  %v8427_v32 = vld [vmem:[#allocation4 + $0x30] sm:$0xe] }
 0x246   : > { %v10035_v16 = vpack.c.bf16 %v5092_v46, %v5092_v46  ;;  %6273 = vrot.lane.b32.xlu1 %v9776_v20, %s10699_s19  ;;  %v5884_v45 = vsel %vm10896_vm12, %v5879_v31, %v5883_v51  ;;  %v5298_v43 = vshll.u32 %v10034_v35, 16  ;;  %v4204_v48 = vpop.permute.xlu0 %4203  ;;  %v12630_v41 = vrot.slane %v6887_v49, 4  ;;  %v8429_v35 = vld [vmem:[#allocation4 + $0x38] sm:$0x1]  ;;  %v6343_v46 = vld [vmem:[#allocation4 + $0x24] sm:$0xe] }
 0x247   : > { %v5278_v5 = vshrl.u32 %v10032_v40, 16  ;;  %v5281_v22 = vshll.u32 %v10032_v40, 16  ;;  %v10033_v1 = vpack.c.bf16 %v5090_v39, %v5090_v39  ;;  %v3483_v7 = vpop.permute.xlu1 %3482  ;;  %v5297_v52 = vrot.slane %v5295_v6, 7  ;;  %4238 = vst.msk [vmem:[#allocation3 + $0x70] sm:$0xff] %vm4223_vm5, %v4204_v48  ;;  %v6344_v20 = vld [vmem:[#allocation4 + $0x28] sm:$0xf] }
 0x248   : > { %v5303_v56 = vshrl.u32 %v10035_v16, 16  ;;  %v5306_v15 = vshll.u32 %v10035_v16, 16  ;;  %v9775_v28 = vcombine.low %v5874_v34, %v5884_v45  ;;  %3516 = vst.msk [vmem:[#allocation3 + $0x78] sm:$0xff] %vm3500_vm13, %v3483_v7  ;;  %v12633_v30 = vrot.slane %v6890_v57, 5  ;;  %v6345_v57 = vld [vmem:[#allocation4 + $0x2c] sm:$0x1] }
 0x249   : > { %v5280_v17 = vrot.slane %v5278_v5, 7  ;;  %v5286_v38 = vshrl.u32 %v10033_v1, 16  ;;  %v5289_v12 = vshll.u32 %v10033_v1, 16  ;;  %v5300_v53 = vor.u32 %v5298_v43, %v5297_v52  ;;  %v6346_v6 = vld [vmem:[#allocation4 + $0x30] sm:$0xe] }
 0x24a   : > { %v5305_v14 = vrot.slane %v5303_v56, 7  ;;  %6271 = vrot.lane.b32.xlu1 %v9775_v28, %s10699_s19  ;;  %v6894_v18 = vshrl.u32 %v6833_v10, 16  ;;  %v5301_v33 = vrot.slane %v5297_v52, 4  ;;  %v4525_v61 = vpop.permute.xlu0 %4524  ;;  %v6900_v29 = vshll.u32 %v6834_v4, 16  ;;  %v6347_v5 = vld [vmem:[#allocation4 + $0x34] sm:$0xf] }
 0x24b   : > { %v5283_v59 = vor.u32 %v5281_v22, %v5280_v17  ;;  %v5284_v44 = vrot.slane %v5280_v17, 4  ;;  %v5288_v3 = vrot.slane %v5286_v38, 7  ;;  %v3661_v23 = vpop.permute.xlu1 %3660  ;;  %v5568_v21 = vsel %vm12489_vm1, %v5300_v53, %v5567_v55  ;;  %4559 = vst.msk [vmem:[#allocation3 + $0x70] sm:$0xff] %vm4544_vm2, %v4525_v61  ;;  %v6348_v22 = vld [vmem:[#allocation4 + $0x38] sm:$0x1] }
 0x24c   : > { %v5308_v63 = vor.u32 %v5306_v15, %v5305_v14  ;;  %v5310_v24 = vrot.slane %v5305_v14, 4  ;;  %v6896_v27 = vrot.slane %v6894_v18, 4  ;;  %3694 = vst.msk [vmem:[#allocation3 + $0x78] sm:$0xff] %vm3678_vm3, %v3661_v23  ;;  %5569 = vst [vmem:[#allocation4 + $0x48] sm:$0xf] %v5568_v21  ;;  %v6893_v60 = vsel %vm10896_vm12, %v12630_v41, %v12633_v30 }
 0x24d   : > { %v5561_v51 = vsel %vm12489_vm1, %v5283_v59, %v5560_v25  ;;  %v5291_v10 = vor.u32 %v5289_v12, %v5288_v3  ;;  %v5293_v54 = vrot.slane %v5288_v3, 4  ;;  %vm13951_vm3 = vmmov %vm13949_vm7  ;;  %v9857_v39 = vrot.slane %v7386_v37, 9  ;;  %v8424_v25 = vld [vmem:[#allocation4 + $0x24] sm:$0xe]  ;;  %v8425_v56 = vld [vmem:[#allocation4 + $0x28] sm:$0xf] }
 0x24e   : > { %5562 = vst [vmem:[#allocation4 + $0x3c] sm:$0xf] %v5561_v51  ;;  %v5309_v0 = vsel %vm10999_vm15, %v5301_v33, %v5308_v63  ;;  %v5572_v2 = vsel %vm12352_vm8, %v5310_v24, %v5571_v58  ;;  %v6897_v50 = vor.u32 %v6896_v27, %v12633_v30  ;;  %v7496_v49 = vrot.slane %v7387_v42, 5  ;;  %vm13952_vm11 = vmmov %vm13951_vm3  ;;  %v8426_v38 = vld [vmem:[#allocation4 + $0x2c] sm:$0x1] }
 0x24f   : > { %5570 = vst.msk [vmem:[#allocation4 + $0x4c] sm:$0xf] %vm13951_vm3, %v5309_v0  ;;  %5573 = vst [vmem:[#allocation4 + $0x50] sm:$0x1] %v5572_v2  ;;  %v5292_v31 = vsel %vm10999_vm15, %v5284_v44, %v5291_v10  ;;  %v5565_v40 = vsel %vm12352_vm8, %v5293_v54, %v5564_v9  ;;  %v4206_v16 = vpop.permute.xlu1 %4205  ;;  %v6902_v45 = vrot.slane %v6900_v29, 5  ;;  %v7499_v43 = vrot.slane %v7388_v36, 5 }
 0x250   : > { %5563 = vst.msk [vmem:[#allocation4 + $0x40] sm:$0xf] %vm13952_vm11, %v5292_v31  ;;  %5566 = vst [vmem:[#allocation4 + $0x44] sm:$0x1] %v5565_v40  ;;  %v6898_v34 = vrot.slane %v6897_v50, 4  ;;  %v8533_v55 = vrot.slane %v8428_v62, 5  ;;  %v7497_v1 = vsel %vm10819_vm9, %v9857_v39, %v7496_v49 }
 0x251   : > { %4239 = vst.msk [vmem:[#allocation3 + $0x78] sm:$0xff] %vm4223_vm5, %v4206_v16  ;;  %v7498_v7 = vrot.slane %v7496_v49, 4  ;;  %v9920_v48 = vrot.slane %v8427_v32, 9  ;;  %v8536_v52 = vrot.slane %v8429_v35, 5  ;;  %v9793_v17 = vrot.slane %v6343_v46, 9 }
 0x252   : > { %v6903_v15 = vsel %vm10896_vm12, %v6898_v34, %v6902_v45  ;;  %v8535_v28 = vrot.slane %v8533_v55, 4  ;;  %v6453_v58 = vrot.slane %v6344_v20, 5  ;;  %v6841_v12 = vld [vmem:[#allocation4 + $0x30] sm:$0xf]  ;;  %v6456_v14 = vrot.slane %v6345_v57, 5 }
 0x253   : > { %v9838_v41 = vcombine.low %v6893_v60, %v6903_v15  ;;  %v7500_v53 = vsel %vm10819_vm9, %v7498_v7, %v7499_v43  ;;  %v9794_v9 = vrot.slane %v6346_v6, 9  ;;  %v6842_v4 = vld [vmem:[#allocation4 + $0x34] sm:$0xf]  ;;  %v4527_v30 = vpop.permute.xlu1 %4526  ;;  %v8534_v59 = vsel %vm10819_vm9, %v9920_v48, %v8533_v55  ;;  %v6843_v63 = vld [vmem:[#allocation4 + $0x38] sm:$0x1] }
 0x254   : > { %v4575_v18 = vld [vmem:[#allocation3 + $0x70] sm:$0xff]  ;;  %v9873_v33 = vcombine.low %v7497_v1, %v7500_v53  ;;  %v8537_v44 = vsel %vm10819_vm9, %v8535_v28, %v8536_v52  ;;  %v6455_v3 = vrot.slane %v6453_v58, 4  ;;  %4560 = vst.msk [vmem:[#allocation3 + $0x78] sm:$0xff] %vm4544_vm2, %v4527_v30  ;;  %v6454_v23 = vsel %vm10819_vm9, %v9793_v17, %v6453_v58  ;;  %v7383_v51 = vld [vmem:[#allocation4 + $0x24] sm:$0xe]  ;;  %vm13953_vm2 = vmmov %vm13951_vm3 }
 0x255   : > { %10147 = vmatprep.mubr.msk.bf16.mxu0 %vm4597_vm10, %v4575_v18  ;;  %7312 = vrot.lane.b32.xlu0 %v9838_v41, %s10704_s24  ;;  %v9936_v37 = vcombine.low %v8534_v59, %v8537_v44  ;;  %v6460_v61 = vrot.slane %v6347_v5, 5  ;;  %v6463_v21 = vrot.slane %v6348_v22, 5  ;;  %v9919_v27 = vrot.slane %v8424_v25, 9  ;;  %v7384_v62 = vld [vmem:[#allocation4 + $0x28] sm:$0xf]  ;;  %vm13954_vm5 = vmmov %vm13953_vm2 }
 0x256   : > { %7639 = vrot.lane.b32.xlu1 %v9873_v33, %s10708_s27  ;;  %v6457_v24 = vsel %vm10819_vm9, %v6455_v3, %v6456_v14  ;;  %v8526_v42 = vrot.slane %v8425_v56, 5  ;;  %v6953_v36 = vshrl.u32 %v6841_v12, 16  ;;  %v8529_v29 = vrot.slane %v8426_v38, 5  ;;  %v508_v0 = vld [vmem:[#allocation4 + $0x6c] sm:$0x1]  ;;  %vm13957_vm6 = vmmov %vm13953_vm2 }
 0x257   : > { %v9809_v10 = vcombine.low %v6454_v23, %v6457_v24  ;;  %v6462_v54 = vrot.slane %v6460_v61, 4  ;;  %v6956_v32 = vshll.u32 %v6841_v12, 16  ;;  %v566_v2 = vld [vmem:[#allocation4 + $0x80] sm:$0x1]  ;;  %v6461_v60 = vsel %vm10819_vm9, %v9794_v9, %v6460_v61  ;;  %v563_v20 = vld [vmem:[#allocation4 + $0x74] sm:$0x1]  ;;  %vm13958_vm4 = vmmov %vm13953_vm2 }
 0x258   : > { %v8528_v50 = vrot.slane %v8526_v42, 4  ;;  %v6955_v35 = vrot.slane %v6953_v36, 4  ;;  %v6962_v46 = vshll.u32 %v6842_v4, 16  ;;  %v6966_v39 = vshrl.u32 %v6842_v4, 16  ;;  %v5801_v45 = vld [vmem:[#allocation4 + $0x30] sm:$0xf] }
 0x259   : > { %8681 = vrot.lane.b32.xlu0 %v9936_v37, %s10709_s28  ;;  %v6464_v31 = vsel %vm10819_vm9, %v6462_v54, %v6463_v21  ;;  %v6958_v40 = vrot.slane %v6956_v32, 5  ;;  %v6972_v49 = vshll.u32 %v6843_v63, 16  ;;  %v8527_v6 = vsel %vm10819_vm9, %v9919_v27, %v8526_v42  ;;  %v7385_v22 = vld [vmem:[#allocation4 + $0x2c] sm:$0x1]  ;;  %v5802_v7 = vld [vmem:[#allocation4 + $0x34] sm:$0xf] }
 0x25a   : > { %6596 = vrot.lane.b32.xlu1 %v9809_v10, %s10705_s25  ;;  %v9810_v57 = vcombine.low %v6461_v60, %v6464_v31  ;;  %v8530_v16 = vsel %vm10819_vm9, %v8528_v50, %v8529_v29  ;;  %v6964_v34 = vrot.slane %v6962_v46, 5  ;;  %v6968_v5 = vrot.slane %v6966_v39, 4  ;;  %v10345_v52 = vld [vmem:[#allocation4 + $0x48] sm:$0xff]   ;;  %v5803_v12 = vld [vmem:[#allocation4 + $0x38] sm:$0x1] }
 0x25b   : > { %v9935_v43 = vcombine.low %v8527_v6, %v8530_v16  ;;  %v6959_v55 = vor.u32 %v6958_v40, %v6955_v35  ;;  %v9856_v1 = vrot.slane %v7383_v51, 9  ;;  %v4576_v48 = vld [vmem:[#allocation3 + $0x78] sm:$0xff]  ;;  %v6974_v25 = vrot.slane %v6972_v49, 5  ;;  %v7882_v30 = vld [vmem:[#allocation4 + $0x30] sm:$0xf] }
 0x25c   : > { %v7489_v56 = vrot.slane %v7384_v62, 5  ;;  %v509_v15 = vsel %vm12352_vm8, 0, %v508_v0  ;;  %v567_v28 = vsel %vm12364_vm0, 0, %v566_v2  ;;  %10148 = vmatmul.mubr.msk.bf16.gmra.mrb[28].mxu0 %vm4597_vm10, %v4576_v48  ;;  %v6969_v58 = vor.u32 %v6968_v5, %v6964_v34  ;;  %v7883_v21 = vld [vmem:[#allocation4 + $0x34] sm:$0xf] }
 0x25d   : > { %6598 = vrot.lane.b32.xlu0 %v9810_v57, %s10705_s25  ;;  %v6960_v17 = vrot.slane %v6959_v55, 4  ;;  %510 = vst [vmem:[#allocation4 + $0x6c] sm:$0x1] %v509_v15  ;;  %568 = vst [vmem:[#allocation4 + $0x80] sm:$0x1] %v567_v28  ;;  %v564_v38 = vsel %vm12364_vm0, 0, %v563_v20 }
 0x25e   : > { %v5934_v41 = vshrl.u32 %v5801_v45, 16  ;;  %6777 = vrot.lane.b32.xlu1 %v10345_v52, %s10702_s22  ;;  %v7491_v53 = vrot.slane %v7489_v56, 4  ;;  %v7492_v14 = vrot.slane %v7385_v22, 5  ;;  %565 = vst [vmem:[#allocation4 + $0x74] sm:$0x1] %v564_v38  ;;  %v5937_v9 = vshll.u32 %v5801_v45, 16 }
 0x25f   : > { %v5943_v4 = vshll.u32 %v5802_v7, 16  ;;  %v6970_v18 = vrot.slane %v6969_v58, 4  ;;  %v7490_v33 = vsel %vm10819_vm9, %v9856_v1, %v7489_v56  ;;  %v5947_v44 = vshrl.u32 %v5802_v7, 16  ;;  %v7884_v54 = vld [vmem:[#allocation4 + $0x38] sm:$0x1]  ;;  %v10346_v57 = vld [vmem:[#allocation4 + $0x3c] sm:$0xff]  }
 0x260   : > { %v5936_v59 = vrot.slane %v5934_v41, 4  ;;  %v7493_v3 = vsel %vm10819_vm9, %v7491_v53, %v7492_v14  ;;  %v5939_v37 = vrot.slane %v5937_v9, 5  ;;  %v5953_v61 = vshll.u32 %v5803_v12, 16  ;;  %v7879_v60 = vld [vmem:[#allocation4 + $0x24] sm:$0xf] }
 0x261   : > { %v5945_v23 = vrot.slane %v5943_v4, 5  ;;  %8679 = vrot.lane.b32.xlu0 %v9935_v43, %s10709_s28  ;;  %v6965_v63 = vsel %vm10896_vm12, %v6960_v17, %v6964_v34  ;;  %v6975_v24 = vsel %vm10896_vm12, %v6970_v18, %v6974_v25  ;;  %v5949_v27 = vrot.slane %v5947_v44, 4  ;;  %v7880_v20 = vld [vmem:[#allocation4 + $0x28] sm:$0xf]  ;;  %v7881_v1 = vld [vmem:[#allocation4 + $0x2c] sm:$0x1] }
 0x262   : > { %v7973_v42 = vshrl.u32 %v7882_v30, 16  ;;  %v9841_v36 = vcombine.low %v6965_v63, %v6975_v24  ;;  %v9872_v51 = vcombine.low %v7490_v33, %v7493_v3  ;;  %v5940_v10 = vor.u32 %v5939_v37, %v5936_v59  ;;  %v10347_v43 = vld [vmem:[#allocation4 + $0x48] sm:$0xff]  }
 0x263   : > { %v7976_v29 = vshll.u32 %v7882_v30, 16  ;;  %v5950_v32 = vor.u32 %v5949_v27, %v5945_v23  ;;  %v7982_v0 = vshll.u32 %v7883_v21, 16  ;;  %v7986_v2 = vshrl.u32 %v7883_v21, 16  ;;  %v12713_v28 = vld [vmem:[%s13879_s5] ss:$0 sm:$0xff] }
 0x264   : > { %v7975_v62 = vrot.slane %v7973_v42, 4  ;;  %7318 = vrot.lane.b32.xlu1 %v9841_v36, %s10704_s24  ;;  %v5941_v50 = vrot.slane %v5940_v10, 4  ;;  %v5955_v35 = vrot.slane %v5953_v61, 5  ;;  %v7992_v49 = vshll.u32 %v7884_v54, 16  ;;  %v12721_v18 = vld [vmem:[%s12395_s23] ss:$0 sm:$0xff] }
 0x265   : > { %v7978_v46 = vrot.slane %v7976_v29, 5  ;;  %7637 = vrot.lane.b32.xlu0 %v9872_v51, %s10708_s27  ;;  %v5951_v31 = vrot.slane %v5950_v32, 4  ;;  %v7984_v40 = vrot.slane %v7982_v0, 5  ;;  %v7988_v39 = vrot.slane %v7986_v2, 4  ;;  %v5799_v10 = vld [vmem:[#allocation4 + $0x28] sm:$0xf] }
 0x266   : > { %v5946_v6 = vsel %vm10896_vm12, %v5941_v50, %v5945_v23  ;;  %v7949_v34 = vshrl.u32 %v7879_v60, 16  ;;  %v7952_v45 = vshll.u32 %v7879_v60, 16  ;;  %v7994_v22 = vrot.slane %v7992_v49, 5  ;;  %v5798_v23 = vld [vmem:[#allocation4 + $0x24] sm:$0xf] }
 0x267   : > { %v7979_v16 = vor.u32 %v7978_v46, %v7975_v62  ;;  %v5956_v55 = vsel %vm10896_vm12, %v5951_v31, %v5955_v35  ;;  %v7989_v5 = vor.u32 %v7988_v39, %v7984_v40  ;;  %v7958_v7 = vshll.u32 %v7880_v20, 16  ;;  %v5800_v62 = vld [vmem:[#allocation4 + $0x2c] sm:$0x1]  ;;  %v6838_v35 = vld [vmem:[#allocation4 + $0x24] sm:$0xf] }
 0x268   : > { %v10133_v48 = vpop.f32.mrb[12].mxu0  ;;  %7817 = vrot.lane.b32.xlu1 %v10346_v57, %s10707_s18  ;;  %v9778_v52 = vcombine.low %v5946_v6, %v5956_v55  ;;  %v7951_v56 = vrot.slane %v7949_v34, 4  ;;  %v7954_v15 = vrot.slane %v7952_v45, 5  ;;  %v7962_v41 = vshrl.u32 %v7880_v20, 16  ;;  %v10348_v20 = vld [vmem:[#allocation4 + $0x3c] sm:$0xff]  }
 0x269   : > { %v7980_v25 = vrot.slane %v7979_v16, 4  ;;  %v4833_v17 = vmul.f32 %v12713_v28, %v10133_v48  ;;  %v4732_v58 = vpop.f32.mrb[13].mxu0  ;;  %7819 = vrot.lane.b32.xlu0 %v10347_v43, %s10707_s18  ;;  %v7990_v38 = vrot.slane %v7989_v5, 4  ;;  %v7960_v12 = vrot.slane %v7958_v7, 5  ;;  %v6839_v6 = vld [vmem:[#allocation4 + $0x28] sm:$0xf] }
 0x26a   : > { %v4831_v53 = vmul.f32 %v12713_v28, %v4732_v58  ;;  %v10134_v14 = vpop.f32.mrb[14].mxu0  ;;  %v7955_v4 = vor.u32 %v7954_v15, %v7951_v56  ;;  %v7968_v30 = vshll.u32 %v7881_v1, 16  ;;  %v7964_v37 = vrot.slane %v7962_v41, 4  ;;  %v6840_v16 = vld [vmem:[#allocation4 + $0x2c] sm:$0x1] }
 0x26b   : > { %v7985_v9 = vsel %vm10896_vm12, %v7980_v25, %v7984_v40  ;;  %v12724_v33 = vadd.f32 %v12721_v18, %v4833_v17  ;;  %v4834_v59 = vmul.f32 %v12713_v28, %v10134_v14  ;;  %v4735_v44 = vpop.f32.mrb[15].mxu0  ;;  %v7995_v3 = vsel %vm10896_vm12, %v7990_v38, %v7994_v22  ;;  %v7392_v55 = vld [vmem:[#allocation4 + $0x48] sm:$0xe]  ;;  %v7393_v48 = vld [vmem:[#allocation4 + $0x4c] sm:$0xf] }
 0x26c   : > { %v12730_v61 = vadd.f32 %v12721_v18, %v4831_v53  ;;  %v4832_v21 = vmul.f32 %v12713_v28, %v4735_v44  ;;  %6277 = vrot.lane.b32.xlu1 %v9778_v52, %s10699_s19  ;;  %v9904_v63 = vcombine.low %v7985_v9, %v7995_v3  ;;  %v7956_v24 = vrot.slane %v7955_v4, 4  ;;  %v7394_v15 = vld [vmem:[#allocation4 + $0x50] sm:$0x1]  ;;  %v8434_v41 = vld [vmem:[#allocation4 + $0x4c] sm:$0xf] }
 0x26d   : > { %v9708_v27 = vmul.f32 -1.442695, %v12724_v33  ;;  %v12736_v42 = vadd.f32 %v12721_v18, %v4834_v59  ;;  %v7965_v36 = vor.u32 %v7964_v37, %v7960_v12  ;;  %v7970_v51 = vrot.slane %v7968_v30, 5  ;;  %v8433_v30 = vld [vmem:[#allocation4 + $0x48] sm:$0xe] }
 0x26e   : > { %v9706_v54 = vmul.f32 -1.442695, %v12730_v61  ;;  %v12740_v29 = vadd.f32 %v12721_v18, %v4832_v21  ;;  %8360 = vrot.lane.b32.xlu0 %v9904_v63, %s10710_s29  ;;  %v7961_v32 = vsel %vm10896_vm12, %v7956_v24, %v7960_v12  ;;  %v5910_v0 = vshrl.u32 %v5798_v23, 16  ;;  %v8435_v24 = vld [vmem:[#allocation4 + $0x50] sm:$0x1] }
 0x26f   : > { %10566 = vpow2.f32 %v9708_v27  ;;  %v9709_v2 = vmul.f32 -1.442695, %v12736_v42  ;;  %v7966_v60 = vrot.slane %v7965_v36, 4  ;;  %v5913_v50 = vshll.u32 %v5798_v23, 16 }
 0x270   : > { %10568 = vpow2.f32 %v9706_v54  ;;  %v9707_v46 = vmul.f32 -1.442695, %v12740_v29  ;;  %v5912_v31 = vrot.slane %v5910_v0, 4  ;;  %v5919_v40 = vshll.u32 %v5799_v10, 16 }
 0x271   : > { %10570 = vpow2.f32 %v9709_v2  ;;  %v7971_v39 = vsel %vm10896_vm12, %v7966_v60, %v7970_v51  ;;  %v5915_v49 = vrot.slane %v5913_v50, 5  ;;  %v5923_v57 = vshrl.u32 %v5799_v10, 16 }
 0x272   : > { %10572 = vpow2.f32 %v9707_v46  ;;  %v9903_v34 = vcombine.low %v7961_v32, %v7971_v39  ;;  %6775 = vrot.lane.b32.xlu0 %v10348_v20, %s10702_s22  ;;  %v5921_v45 = vrot.slane %v5919_v40, 5  ;;  %v5929_v43 = vshll.u32 %v5800_v62, 16  ;;  %v6350_v62 = vld [vmem:[#allocation4 + $0x40] sm:$0xf] }
 0x273   : > { %v5916_v5 = vor.u32 %v5915_v49, %v5912_v31  ;;  %v5925_v22 = vrot.slane %v5923_v57, 4  ;;  %v6929_v1 = vshrl.u32 %v6838_v35, 16  ;;  %v6932_v7 = vshll.u32 %v6838_v35, 16  ;;  %v6353_v35 = vld [vmem:[#allocation4 + $0x4c] sm:$0xf] }
 0x274   : > { %8358 = vrot.lane.b32.xlu1 %v9903_v34, %s10710_s29  ;;  %v6938_v52 = vshll.u32 %v6839_v6, 16  ;;  %v6942_v25 = vshrl.u32 %v6839_v6, 16  ;;  %v6948_v56 = vshll.u32 %v6840_v16, 16  ;;  %v5931_v53 = vrot.slane %v5929_v43, 5  ;;  %v6349_v49 = vld [vmem:[#allocation4 + $0x3c] sm:$0xe] }
 0x275   : > { %v5917_v17 = vrot.slane %v5916_v5, 4  ;;  %v5926_v58 = vor.u32 %v5925_v22, %v5921_v45  ;;  %v6931_v38 = vrot.slane %v6929_v1, 4  ;;  %v6934_v12 = vrot.slane %v6932_v7, 5  ;;  %v6351_v57 = vld [vmem:[#allocation4 + $0x44] sm:$0x1] }
 0x276   : > { %v6940_v14 = vrot.slane %v6938_v52, 5  ;;  %v6944_v9 = vrot.slane %v6942_v25, 4  ;;  %v6950_v4 = vrot.slane %v6948_v56, 5  ;;  %v9859_v3 = vrot.slane %v7392_v55, 9  ;;  %v6352_v6 = vld [vmem:[#allocation4 + $0x48] sm:$0xe] }
 0x277   : > { %v5927_v59 = vrot.slane %v5926_v58, 4  ;;  %v6935_v44 = vor.u32 %v6934_v12, %v6931_v38  ;;  %v7510_v37 = vrot.slane %v7393_v48, 5  ;;  %v5922_v23 = vsel %vm10896_vm12, %v5917_v17, %v5921_v45  ;;  %v6354_v55 = vld [vmem:[#allocation4 + $0x50] sm:$0x1]  ;;  %v8431_v5 = vld [vmem:[#allocation4 + $0x40] sm:$0xf] }
 0x278   : > { %v6945_v21 = vor.u32 %v6944_v9, %v6940_v14  ;;  %v7513_v63 = vrot.slane %v7394_v15, 5  ;;  %v8547_v27 = vrot.slane %v8434_v41, 5  ;;  %v9922_v32 = vrot.slane %v8433_v30, 9  ;;  %v8432_v25 = vld [vmem:[#allocation4 + $0x44] sm:$0x1] }
 0x279   : > { %v10567_v36 = vpop.eup %10566  ;;  %v5932_v51 = vsel %vm10896_vm12, %v5927_v59, %v5931_v53  ;;  %v6936_v10 = vrot.slane %v6935_v44, 4  ;;  %v7512_v54 = vrot.slane %v7510_v37, 4  ;;  %v7511_v31 = vsel %vm10819_vm9, %v9859_v3, %v7510_v37  ;;  %v6847_v58 = vld [vmem:[#allocation4 + $0x48] sm:$0xf]  ;;  %v6848_v44 = vld [vmem:[#allocation4 + $0x4c] sm:$0xf] }
 0x27a   : > { %v10569_v0 = vpop.eup %10568  ;;  %v4999_v2 = vadd.f32 1.0, %v10567_v36  ;;  %v9777_v60 = vcombine.low %v5922_v23, %v5932_v51  ;;  %v6946_v50 = vrot.slane %v6945_v21, 4  ;;  %v8549_v39 = vrot.slane %v8547_v27, 4  ;;  %v7390_v51 = vld [vmem:[#allocation4 + $0x40] sm:$0xf] }
 0x27b   : > { %v10571_v46 = vpop.eup %10570  ;;  %v4997_v20 = vadd.f32 1.0, %v10569_v0  ;;  %v7514_v40 = vsel %vm10819_vm9, %v7512_v54, %v7513_v63  ;;  %v6941_v45 = vsel %vm10896_vm12, %v6936_v10, %v6940_v14  ;;  %v8550_v7 = vrot.slane %v8435_v24, 5  ;;  %v8430_v14 = vld [vmem:[#allocation4 + $0x3c] sm:$0xe] }
 0x27c   : > { %v10573_v16 = vpop.eup %10572  ;;  %10574 = vrcp.f32 %v4999_v2  ;;  %v5000_v34 = vadd.f32 1.0, %v10571_v46  ;;  %6275 = vrot.lane.b32.xlu1 %v9777_v60, %s10699_s19  ;;  %v6951_v43 = vsel %vm10896_vm12, %v6946_v50, %v6950_v4  ;;  %v9875_v48 = vcombine.low %v7511_v31, %v7514_v40  ;;  %v7391_v50 = vld [vmem:[#allocation4 + $0x44] sm:$0x1] }
 0x27d   : > { %10576 = vrcp.f32 %v4997_v20  ;;  %v4998_v22 = vadd.f32 1.0, %v10573_v16  ;;  %v9840_v1 = vcombine.low %v6941_v45, %v6951_v43  ;;  %v6467_v52 = vrot.slane %v6350_v62, 5  ;;  %v7389_v62 = vld [vmem:[#allocation4 + $0x3c] sm:$0xe] }
 0x27e   : > { %10578 = vrcp.f32 %v5000_v34  ;;  %v8548_v56 = vsel %vm10819_vm9, %v9922_v32, %v8547_v27  ;;  %v8551_v15 = vsel %vm10819_vm9, %v8549_v39, %v8550_v7  ;;  %v6474_v17 = vrot.slane %v6353_v35, 5  ;;  %v517_v39 = vld [vmem:[#allocation4 + $0x90] sm:$0x1] }
 0x27f   : > { %10580 = vrcp.f32 %v4998_v22  ;;  %7316 = vrot.lane.b32.xlu0 %v9840_v1, %s10704_s24  ;;  %v9795_v38 = vrot.slane %v6349_v49, 9  ;;  %v6469_v12 = vrot.slane %v6467_v52, 4  ;;  %v6470_v41 = vrot.slane %v6351_v57, 5 }
 0x280   : > { %7643 = vrot.lane.b32.xlu1 %v9875_v48, %s10708_s27  ;;  %v9796_v53 = vrot.slane %v6352_v6, 9  ;;  %v9938_v9 = vcombine.low %v8548_v56, %v8551_v15  ;;  %v6476_v4 = vrot.slane %v6474_v17, 4  ;;  %v6477_v30 = vrot.slane %v6354_v55, 5  ;;  %v12790_v6 = vld [vmem:[#allocation4 + $0x50] sm:$0x1] }
 0x281   : > { %v8540_v59 = vrot.slane %v8431_v5, 5  ;;  %v6468_v3 = vsel %vm10819_vm9, %v9795_v38, %v6467_v52  ;;  %v6471_v37 = vsel %vm10819_vm9, %v6469_v12, %v6470_v41  ;;  %v8543_v23 = vrot.slane %v8432_v25, 5 }
 0x282   : > { %v7001_v21 = vshrl.u32 %v6847_v58, 16  ;;  %v9811_v63 = vcombine.low %v6468_v3, %v6471_v37  ;;  %v6478_v24 = vsel %vm10819_vm9, %v6476_v4, %v6477_v30  ;;  %v7004_v36 = vshll.u32 %v6847_v58, 16  ;;  %v514_v4 = vld [vmem:[#allocation4 + $0x84] sm:$0x1] }
 0x283   : > { %8685 = vrot.lane.b32.xlu0 %v9938_v9, %s10709_s28  ;;  %v8542_v27 = vrot.slane %v8540_v59, 4  ;;  %v6475_v10 = vsel %vm10819_vm9, %v9796_v53, %v6474_v17  ;;  %v9921_v54 = vrot.slane %v8430_v14, 9  ;;  %v7010_v32 = vshll.u32 %v6848_v44, 16  ;;  %v5581_v53 = vld [vmem:[#allocation4 + $0x60] sm:$0xf] }
 0x284   : > { %6600 = vrot.lane.b32.xlu1 %v9811_v63, %s10705_s25  ;;  %v9812_v0 = vcombine.low %v6475_v10, %v6478_v24  ;;  %v7014_v60 = vshrl.u32 %v6848_v44, 16  ;;  %v12784_v20 = vrot.slane %v7001_v21, 4  ;;  %v7503_v40 = vrot.slane %v7390_v51, 5  ;;  %v5574_v44 = vld [vmem:[#allocation4 + $0x54] sm:$0xf] }
 0x285   : > { %v8544_v2 = vsel %vm10819_vm9, %v8542_v27, %v8543_v23  ;;  %v8541_v46 = vsel %vm10819_vm9, %v9921_v54, %v8540_v59  ;;  %v12786_v31 = vrot.slane %v7010_v32, 5  ;;  %v12792_v16 = vrot.slane %v7004_v36, 5  ;;  %v572_v23 = vld [vmem:[#allocation4 + $0x98] sm:$0x1]  ;;  %v5585_v24 = vld [vmem:[#allocation4 + $0x68] sm:$0x1] }
 0x286   : > { %v10575_v35 = vpop.eup %10574  ;;  %v7016_v34 = vrot.slane %v7014_v60, 4  ;;  %v9858_v45 = vrot.slane %v7389_v62, 9  ;;  %v9937_v5 = vcombine.low %v8541_v46, %v8544_v2  ;;  %v7505_v22 = vrot.slane %v7503_v40, 4  ;;  %v569_v51 = vld [vmem:[#allocation4 + $0x8c] sm:$0x1] }
 0x287   : > { %v10577_v49 = vpop.eup %10576  ;;  %v5095_v57 = vmul.f32 %v10575_v35, %v12724_v33  ;;  %6602 = vrot.lane.b32.xlu0 %v9812_v0, %s10705_s25  ;;  %v7506_v1 = vrot.slane %v7391_v50, 5  ;;  %v518_v25 = vsel %vm12352_vm8, 0, %v517_v39  ;;  %v7020_v17 = vshll.u32 %v12790_v6, 16  ;;  %v5807_v0 = vld [vmem:[#allocation4 + $0x48] sm:$0xf] }
 0x288   : > { %v10579_v43 = vpop.eup %10578  ;;  %v5093_v55 = vmul.f32 %v10577_v49, %v12730_v61  ;;  %v7017_v33 = vor.u32 %v7016_v34, %v12786_v31  ;;  %519 = vst [vmem:[#allocation4 + $0x90] sm:$0x1] %v518_v25  ;;  %v7504_v12 = vsel %vm10819_vm9, %v9858_v45, %v7503_v40  ;;  %v515_v62 = vsel %vm12352_vm8, 0, %v514_v4  ;;  %v5808_v46 = vld [vmem:[#allocation4 + $0x4c] sm:$0xf] }
 0x289   : > { %v10581_v7 = vpop.eup %10580  ;;  %v10038_v48 = vpack.c.bf16 %v5095_v57, %v5095_v57  ;;  %v5096_v52 = vmul.f32 %v10579_v43, %v12736_v42  ;;  %v7507_v61 = vsel %vm10819_vm9, %v7505_v22, %v7506_v1  ;;  %v7007_v42 = vor.u32 %v12792_v16, %v12784_v20  ;;  %516 = vst [vmem:[#allocation4 + $0x84] sm:$0x1] %v515_v62  ;;  %v5578_v57 = vld [vmem:[#allocation4 + $0x5c] sm:$0x1]  ;;  %v7889_v16 = vld [vmem:[#allocation4 + $0x4c] sm:$0xf] }
 0x28a   : > { %v10036_v56 = vpack.c.bf16 %v5093_v55, %v5093_v55  ;;  %v5094_v15 = vmul.f32 %v10581_v7, %v12740_v29  ;;  %v12808_v9 = vrot.slane %v7017_v33, 4  ;;  %v9874_v37 = vcombine.low %v7504_v12, %v7507_v61 }
 0x28b   : > { %v5329_v58 = vshrl.u32 %v10038_v48, 16  ;;  %v10039_v38 = vpack.c.bf16 %v5096_v52, %v5096_v52  ;;  %8683 = vrot.lane.b32.xlu0 %v9937_v5, %s10709_s28  ;;  %v5332_v41 = vshll.u32 %v10038_v48, 16  ;;  %v573_v35 = vsel %vm12364_vm0, 0, %v572_v23  ;;  %v7888_v52 = vld [vmem:[#allocation4 + $0x48] sm:$0xf] }
 0x28c   : > { %v5312_v14 = vshrl.u32 %v10036_v56, 16  ;;  %v10037_v29 = vpack.c.bf16 %v5094_v15, %v5094_v15  ;;  %v5315_v59 = vshll.u32 %v10036_v56, 16  ;;  %574 = vst [vmem:[#allocation4 + $0x98] sm:$0x1] %v573_v35  ;;  %v570_v34 = vsel %vm12364_vm0, 0, %v569_v51 }
 0x28d   : > { %v5331_v30 = vrot.slane %v5329_v58, 7  ;;  %v5337_v3 = vshrl.u32 %v10039_v38, 16  ;;  %v5340_v63 = vshll.u32 %v10039_v38, 16  ;;  %571 = vst [vmem:[#allocation4 + $0x8c] sm:$0x1] %v570_v34  ;;  %v5982_v5 = vshrl.u32 %v5807_v0, 16 }
 0x28e   : > { %v5314_v21 = vrot.slane %v5312_v14, 7  ;;  %v5320_v27 = vshrl.u32 %v10037_v29, 16  ;;  %v5323_v36 = vshll.u32 %v10037_v29, 16  ;;  %v5985_v7 = vshll.u32 %v5807_v0, 16  ;;  %v5809_v15 = vld [vmem:[#allocation4 + $0x50] sm:$0x1] }
 0x28f   : > { %v5334_v10 = vor.u32 %v5332_v41, %v5331_v30  ;;  %v5335_v54 = vrot.slane %v5331_v30, 4  ;;  %v5339_v32 = vrot.slane %v5337_v3, 7  ;;  %7641 = vrot.lane.b32.xlu0 %v9874_v37, %s10708_s27  ;;  %v5991_v48 = vshll.u32 %v5808_v46, 16  ;;  %v7890_v51 = vld [vmem:[#allocation4 + $0x50] sm:$0x1] }
 0x290   : > { %v5317_v2 = vor.u32 %v5315_v59, %v5314_v21  ;;  %v5318_v60 = vrot.slane %v5314_v21, 4  ;;  %v5322_v50 = vrot.slane %v5320_v27, 7  ;;  %v5984_v61 = vrot.slane %v5982_v5, 4 }
 0x291   : > { %v5582_v40 = vsel %vm12489_vm1, %v5334_v10, %v5581_v53  ;;  %v5342_v39 = vor.u32 %v5340_v63, %v5339_v32  ;;  %v5344_v49 = vrot.slane %v5339_v32, 4  ;;  %v5995_v58 = vshrl.u32 %v5808_v46, 16  ;;  %v7885_v32 = vld [vmem:[#allocation4 + $0x3c] sm:$0xf] }
 0x292   : > { %5583 = vst [vmem:[#allocation4 + $0x60] sm:$0xf] %v5582_v40  ;;  %v5575_v45 = vsel %vm12489_vm1, %v5317_v2, %v5574_v44  ;;  %v5325_v43 = vor.u32 %v5323_v36, %v5322_v50  ;;  %v5327_v55 = vrot.slane %v5322_v50, 4  ;;  %v7022_v41 = vrot.slane %v7020_v17, 5  ;;  %v12861_v50 = vpop.permute.xlu0 %6269 }
 0x293   : > { %5576 = vst [vmem:[#allocation4 + $0x54] sm:$0xf] %v5575_v45  ;;  %v5343_v22 = vsel %vm10999_vm15, %v5335_v54, %v5342_v39  ;;  %v5586_v1 = vsel %vm12352_vm8, %v5344_v49, %v5585_v24  ;;  %v10137_v56 = vpop.f32.mrb[16].mxu0  ;;  %v5987_v53 = vrot.slane %v5985_v7, 5  ;;  %v5993_v14 = vrot.slane %v5991_v48, 5 }
 0x294   : > { %5584 = vst.msk [vmem:[#allocation4 + $0x64] sm:$0xf] %vm13953_vm2, %v5343_v22  ;;  %5587 = vst [vmem:[#allocation4 + $0x68] sm:$0x1] %v5586_v1  ;;  %v5326_v33 = vsel %vm10999_vm15, %v5318_v60, %v5325_v43  ;;  %v5579_v25 = vsel %vm12352_vm8, %v5327_v55, %v5578_v57  ;;  %v4837_v38 = vmul.f32 %v12713_v28, %v10137_v56  ;;  %v4748_v12 = vpop.f32.mrb[17].mxu0  ;;  %v7008_v30 = vrot.slane %v7007_v42, 4 }
 0x295   : > { %5577 = vst.msk [vmem:[#allocation4 + $0x58] sm:$0xf] %vm13954_vm5, %v5326_v33  ;;  %5580 = vst [vmem:[#allocation4 + $0x5c] sm:$0x1] %v5579_v25  ;;  %v4835_v29 = vmul.f32 %v12713_v28, %v4748_v12  ;;  %v10138_v4 = vpop.f32.mrb[18].mxu0  ;;  %v5997_v59 = vrot.slane %v5995_v58, 4  ;;  %v7023_v6 = vsel %vm10896_vm12, %v12808_v9, %v7022_v41  ;;  %v5988_v20 = vor.u32 %v5987_v53, %v5984_v61 }
 0x296   : > { %v8021_v44 = vshrl.u32 %v7888_v52, 16  ;;  %v12839_v3 = vadd.f32 %v12721_v18, %v4837_v38  ;;  %v4838_v37 = vmul.f32 %v12713_v28, %v10138_v4  ;;  %v4751_v23 = vpop.f32.mrb[19].mxu0  ;;  %v6001_v17 = vshll.u32 %v5809_v15, 16  ;;  %v7887_v22 = vld [vmem:[#allocation4 + $0x44] sm:$0x1]  ;;  %v12871_v38 = vpop.permute.xlu1 %7841 }
 0x297   : > { %v12846_v21 = vadd.f32 %v12721_v18, %v4835_v29  ;;  %v4836_v63 = vmul.f32 %v12713_v28, %v4751_v23  ;;  %v8024_v42 = vshll.u32 %v7888_v52, 16  ;;  %v5998_v36 = vor.u32 %v5997_v59, %v5993_v14  ;;  %v5804_v7 = vld [vmem:[#allocation4 + $0x3c] sm:$0xf]  ;;  %v12873_v12 = vpop.permute.xlu0 %6590  ;;  %v5805_v29 = vld [vmem:[#allocation4 + $0x40] sm:$0xf] }
 0x298   : > { %v9712_v24 = vmul.f32 -1.442695, %v12839_v3  ;;  %v12851_v27 = vadd.f32 %v12721_v18, %v4838_v37  ;;  %v8023_v10 = vrot.slane %v8021_v44, 4  ;;  %v7013_v28 = vsel %vm10896_vm12, %v7008_v30, %v12786_v31  ;;  %v5806_v23 = vld [vmem:[#allocation4 + $0x44] sm:$0x1] }
 0x299   : > { %v9710_v54 = vmul.f32 -1.442695, %v12846_v21  ;;  %v12855_v9 = vadd.f32 %v12721_v18, %v4836_v63  ;;  %v9843_v2 = vcombine.low %v7013_v28, %v7023_v6  ;;  %v5989_v46 = vrot.slane %v5988_v20, 4  ;;  %v7886_v18 = vld [vmem:[#allocation4 + $0x40] sm:$0xf] }
 0x29a   : > { %10582 = vpow2.f32 %v9712_v24  ;;  %v9713_v62 = vmul.f32 -1.442695, %v12851_v27  ;;  %v6003_v40 = vrot.slane %v6001_v17, 5  ;;  %v5999_v31 = vrot.slane %v5998_v36, 4 }
 0x29b   : > { %v10349_v0 = vld [vmem:[#allocation4 + $0x60] sm:$0xff]   ;;  %10584 = vpow2.f32 %v9710_v54  ;;  %v9711_v35 = vmul.f32 -1.442695, %v12855_v9  ;;  %v8026_v39 = vrot.slane %v8024_v42, 5  ;;  %v8030_v49 = vshll.u32 %v7889_v16, 16 }
 0x29c   : > { %v10351_v60 = vld [vmem:[#allocation4 + $0x60] sm:$0xff]   ;;  %10586 = vpow2.f32 %v9713_v62  ;;  %6781 = vrot.lane.b32.xlu1 %v10349_v0, %s10702_s22  ;;  %v5994_v57 = vsel %vm10896_vm12, %v5989_v46, %v5993_v14  ;;  %v8034_v34 = vshrl.u32 %v7889_v16, 16  ;;  %v8040_v45 = vshll.u32 %v7890_v51, 16  ;;  %v10350_v30 = vld [vmem:[#allocation4 + $0x54] sm:$0xff]  }
 0x29d   : > { %7823 = vrot.lane.b32.xlu0 %v10351_v60, %s10707_s18  ;;  %10588 = vpow2.f32 %v9711_v35  ;;  %v6004_v43 = vsel %vm10896_vm12, %v5999_v31, %v6003_v40  ;;  %v8027_v55 = vor.u32 %v8026_v39, %v8023_v10  ;;  %v8032_v5 = vrot.slane %v8030_v49, 5  ;;  %v12882_v31 = vpop.permute.xlu1 %6769 }
 0x29e   : > { %v7997_v1 = vshrl.u32 %v7885_v32, 16  ;;  %v9780_v48 = vcombine.low %v5994_v57, %v6004_v43  ;;  %v8036_v52 = vrot.slane %v8034_v34, 4  ;;  %v8042_v33 = vrot.slane %v8040_v45, 5  ;;  %v6844_v45 = vld [vmem:[#allocation4 + $0x3c] sm:$0xf] }
 0x29f   : > { %v8000_v25 = vshll.u32 %v7885_v32, 16  ;;  %v8028_v56 = vrot.slane %v8027_v55, 4  ;;  %v8006_v61 = vshll.u32 %v7886_v18, 16  ;;  %v8010_v58 = vshrl.u32 %v7886_v18, 16  ;;  %v12880_v18 = vpop.permute.xlu0 %7811 }
 0x2a0   : > { %7322 = vrot.lane.b32.xlu1 %v9843_v2, %s10704_s24  ;;  %v7999_v15 = vrot.slane %v7997_v1, 4  ;;  %v8037_v41 = vor.u32 %v8036_v52, %v8032_v5  ;;  %v8016_v14 = vshll.u32 %v7887_v22, 16  ;;  %v5958_v4 = vshrl.u32 %v5804_v7, 16  ;;  %v6845_v22 = vld [vmem:[#allocation4 + $0x40] sm:$0xf] }
 0x2a1   : > { %v8002_v53 = vrot.slane %v8000_v25, 5  ;;  %v8033_v59 = vsel %vm10896_vm12, %v8028_v56, %v8032_v5  ;;  %v8008_v44 = vrot.slane %v8006_v61, 5  ;;  %v8012_v37 = vrot.slane %v8010_v58, 4  ;;  %v6846_v1 = vld [vmem:[#allocation4 + $0x44] sm:$0x1] }
 0x2a2   : > { %v5961_v6 = vshll.u32 %v5804_v7, 16  ;;  %v8038_v17 = vrot.slane %v8037_v41, 4  ;;  %v8018_v20 = vrot.slane %v8016_v14, 5  ;;  %v5960_v16 = vrot.slane %v5958_v4, 4  ;;  %v7398_v25 = vld [vmem:[#allocation4 + $0x60] sm:$0xe]  ;;  %v12894_v14 = vpop.permute.xlu1 %7635 }
 0x2a3   : > { %v8003_v63 = vor.u32 %v8002_v53, %v7999_v15  ;;  %v8013_v24 = vor.u32 %v8012_v37, %v8008_v44  ;;  %v5967_v51 = vshll.u32 %v5805_v29, 16  ;;  %v5971_v10 = vshrl.u32 %v5805_v29, 16  ;;  %v7399_v56 = vld [vmem:[#allocation4 + $0x64] sm:$0xf]  ;;  %v10352_v15 = vld [vmem:[#allocation4 + $0x54] sm:$0xff]   ;;  %v12892_v53 = vpop.permute.xlu0 %6767 }
 0x2a4   : > { %v10583_v42 = vpop.eup %10582  ;;  %7821 = vrot.lane.b32.xlu1 %v10350_v30, %s10707_s18  ;;  %v5963_v36 = vrot.slane %v5961_v6, 5  ;;  %v8043_v32 = vsel %vm10896_vm12, %v8038_v17, %v8042_v33  ;;  %v5977_v0 = vshll.u32 %v5806_v23, 16  ;;  %v6980_v58 = vshll.u32 %v6844_v45, 16  ;;  %v7400_v41 = vld [vmem:[#allocation4 + $0x68] sm:$0x1] }
 0x2a5   : > { %v10585_v54 = vpop.eup %10584  ;;  %v5003_v28 = vadd.f32 1.0, %v10583_v42  ;;  %v8004_v62 = vrot.slane %v8003_v63, 4  ;;  %v9906_v35 = vcombine.low %v8033_v59, %v8043_v32  ;;  %v8014_v46 = vrot.slane %v8013_v24, 4  ;;  %v8440_v63 = vld [vmem:[#allocation4 + $0x64] sm:$0xf] }
 0x2a6   : > { %v10587_v2 = vpop.eup %10586  ;;  %v5001_v60 = vadd.f32 1.0, %v10585_v54  ;;  %v5964_v40 = vor.u32 %v5963_v36, %v5960_v16  ;;  %v5969_v34 = vrot.slane %v5967_v51, 5  ;;  %v5973_v52 = vrot.slane %v5971_v10, 4  ;;  %v8441_v36 = vld [vmem:[#allocation4 + $0x68] sm:$0x1] }
 0x2a7   : > { %v10589_v39 = vpop.eup %10588  ;;  %10590 = vrcp.f32 %v5003_v28  ;;  %v5004_v49 = vadd.f32 1.0, %v10587_v2  ;;  %v8009_v57 = vsel %vm10896_vm12, %v8004_v62, %v8008_v44  ;;  %8364 = vrot.lane.b32.xlu0 %v9906_v35, %s10710_s29  ;;  %v8019_v55 = vsel %vm10896_vm12, %v8014_v46, %v8018_v20  ;;  %v8439_v44 = vld [vmem:[#allocation4 + $0x60] sm:$0xe]  ;;  %v12900_v32 = vpop.permute.xlu0 %8677  ;;  %v6355_v46 = vld [vmem:[#allocation4 + $0x54] sm:$0xe] }
 0x2a8   : > { %10592 = vrcp.f32 %v5001_v60  ;;  %v5002_v43 = vadd.f32 1.0, %v10589_v39  ;;  %6281 = vrot.lane.b32.xlu1 %v9780_v48, %s10699_s19  ;;  %v5965_v5 = vrot.slane %v5964_v40, 4  ;;  %v9905_v7 = vcombine.low %v8009_v57, %v8019_v55  ;;  %v12902_v62 = vpop.permute.xlu1 %6592  ;;  %v6356_v40 = vld [vmem:[#allocation4 + $0x58] sm:$0xf] }
 0x2a9   : > { %10594 = vrcp.f32 %v5004_v49  ;;  %v5979_v33 = vrot.slane %v5977_v0, 5  ;;  %v6977_v48 = vshrl.u32 %v6844_v45, 16  ;;  %v5974_v29 = vor.u32 %v5973_v52, %v5969_v34  ;;  %v6357_v45 = vld [vmem:[#allocation4 + $0x5c] sm:$0x1] }
 0x2aa   : > { %10596 = vrcp.f32 %v5002_v43  ;;  %v5970_v61 = vsel %vm10896_vm12, %v5965_v5, %v5969_v34  ;;  %v6986_v4 = vshll.u32 %v6845_v22, 16  ;;  %v6990_v30 = vshrl.u32 %v6845_v22, 16 }
 0x2ab   : > { %v6996_v59 = vshll.u32 %v6846_v1, 16  ;;  %6779 = vrot.lane.b32.xlu0 %v10352_v15, %s10702_s22  ;;  %v6979_v37 = vrot.slane %v6977_v48, 4  ;;  %v6982_v23 = vrot.slane %v6980_v58, 5  ;;  %v9861_v6 = vrot.slane %v7398_v25, 9 }
 0x2ac   : > { %8362 = vrot.lane.b32.xlu1 %v9905_v7, %s10710_s29  ;;  %v7524_v17 = vrot.slane %v7399_v56, 5  ;;  %v5975_v20 = vrot.slane %v5974_v29, 4  ;;  %v6988_v16 = vrot.slane %v6986_v4, 5  ;;  %v6992_v42 = vrot.slane %v6990_v30, 4  ;;  %v12914_v15 = vpop.permute.xlu1 %6773  ;;  %v12924_v4 = vld [vmem:[%s13881_s7] sm:$0x3] }
 0x2ad   : > { %v6998_v24 = vrot.slane %v6996_v59, 5  ;;  %v6983_v51 = vor.u32 %v6982_v23, %v6979_v37  ;;  %v7527_v28 = vrot.slane %v7400_v41, 5  ;;  %v9924_v60 = vrot.slane %v8439_v44, 9 }
 0x2ae   : > { %v7525_v10 = vsel %vm10819_vm9, %v9861_v6, %v7524_v17  ;;  %v7526_v54 = vrot.slane %v7524_v17, 4  ;;  %v5980_v0 = vsel %vm10896_vm12, %v5975_v20, %v5979_v33  ;;  %v6993_v2 = vor.u32 %v6992_v42, %v6988_v16 }
 0x2af   : > { %v8561_v35 = vrot.slane %v8440_v63, 5  ;;  %v9779_v39 = vcombine.low %v5970_v61, %v5980_v0  ;;  %v6984_v49 = vrot.slane %v6983_v51, 4  ;;  %v8564_v34 = vrot.slane %v8441_v36, 5 }
 0x2b0   : > { %v7528_v57 = vsel %vm10819_vm9, %v7526_v54, %v7527_v28  ;;  %v6994_v55 = vrot.slane %v6993_v2, 4  ;;  %v9797_v25 = vrot.slane %v6355_v46, 9  ;;  %v6481_v56 = vrot.slane %v6356_v40, 5  ;;  %v12938_v51 = vpop.permute.xlu1 %7314  ;;  %v6360_v2 = vld [vmem:[#allocation4 + $0x68] sm:$0x1] }
 0x2b1   : > { %v10591_v43 = vpop.eup %10590  ;;  %v9877_v5 = vcombine.low %v7525_v10, %v7528_v57  ;;  %v8562_v22 = vsel %vm10819_vm9, %v9924_v60, %v8561_v35  ;;  %v8563_v1 = vrot.slane %v8561_v35, 4  ;;  %6279 = vrot.lane.b32.xlu1 %v9779_v39, %s10699_s19  ;;  %v6989_v33 = vsel %vm10896_vm12, %v6984_v49, %v6988_v16  ;;  %v5595_v10 = vld [vmem:[#allocation4 + $0x78] sm:$0xf]  ;;  %v5588_v35 = vld [vmem:[#allocation4 + $0x6c] sm:$0xf]  ;;  %v10354_v49 = vld [vmem:[#allocation4] sm:$0xff]  }
 0x2b2   : > { %v10593_v7 = vpop.eup %10592  ;;  %v5099_v52 = vmul.f32 %v10591_v43, %v12839_v3  ;;  %v6999_v58 = vsel %vm10896_vm12, %v6994_v55, %v6998_v24  ;;  %v6484_v29 = vrot.slane %v6357_v45, 5  ;;  %v6358_v3 = vld [vmem:[#allocation4 + $0x60] sm:$0xe]  ;;  %vm13955_vm10 = vcmask 1041408   ;;  %v6359_v24 = vld [vmem:[#allocation4 + $0x64] sm:$0xf] }
 0x2b3   : > { %v10595_v61 = vpop.eup %10594  ;;  %v5097_v48 = vmul.f32 %v10593_v7, %v12846_v21  ;;  %v8565_v41 = vsel %vm10819_vm9, %v8563_v1, %v8564_v34  ;;  %v9842_v37 = vcombine.low %v6989_v33, %v6999_v58  ;;  %10263 = vmatprep.subr.msk.bf16.mxu1 %vm13955_vm10, %v12924_v4  ;;  %v12929_v21 = vpop.permute.xlu0 %6594  ;;  %v6482_v63 = vsel %vm10819_vm9, %v9797_v25, %v6481_v56  ;;  %vm13956_vm13 = vmmov %vm13955_vm10  ;;  %v10359_v57 = vld [vmem:[#allocation4 + $0x18] sm:$0xff]   ;;  %v10360_v34 = vld [vmem:[#allocation4 + $0xc] sm:$0xff]  }
 0x2b4   : > { %v10597_v30 = vpop.eup %10596  ;;  %v10042_v59 = vpack.c.bf16 %v5099_v52, %v5099_v52  ;;  %v5100_v44 = vmul.f32 %v10595_v61, %v12851_v27  ;;  %v9940_v23 = vcombine.low %v8562_v22, %v8565_v41  ;;  %v6483_v20 = vrot.slane %v6481_v56, 4  ;;  %10262 = vmatprep.subr.msk.bf16.mxu0 %vm13956_vm13, %v12924_v4  ;;  %v10366_v45 = vld [vmem:[#allocation4 + $0x30] sm:$0xff]   ;;  %v10370_v43 = vld [vmem:[#allocation4 + $0x24] sm:$0xff]   ;;  %v12946_v41 = vpop.permute.xlu1 %7813  ;;  %vm13960_vm5 = vmmov %vm13955_vm10 }
 0x2b5   : > { %v10040_v6 = vpack.c.bf16 %v5097_v48, %v5097_v48  ;;  %v5098_v17 = vmul.f32 %v10597_v30, %v12855_v9  ;;  %7320 = vrot.lane.b32.xlu0 %v9842_v37, %s10704_s24  ;;  %7647 = vrot.lane.b32.xlu1 %v9877_v5, %s10708_s27  ;;  %v9798_v36 = vrot.slane %v6358_v3, 9  ;;  %v10375_v55 = vld [vmem:[#allocation4 + $0x48] sm:$0xff]   ;;  %v10377_v5 = vld [vmem:[#allocation4 + $0x3c] sm:$0xff]   ;;  %v6488_v33 = vrot.slane %v6359_v24, 5  ;;  %v5592_v37 = vld [vmem:[#allocation4 + $0x74] sm:$0x1] }
 0x2b6   : > { %v5363_v16 = vshrl.u32 %v10042_v59, 16  ;;  %v5366_v42 = vshll.u32 %v10042_v59, 16  ;;  %v10043_v27 = vpack.c.bf16 %v5100_v44, %v5100_v44  ;;  %v6485_v0 = vsel %vm10819_vm9, %v6483_v20, %v6484_v29  ;;  %v10381_v22 = vld [vmem:[#allocation4 + $0x60] sm:$0xff]   ;;  %v10382_v29 = vld [vmem:[#allocation4 + $0x54] sm:$0xff]  }
 0x2b7   : > { %v5346_v9 = vshrl.u32 %v10040_v6, 16  ;;  %v5349_v54 = vshll.u32 %v10040_v6, 16  ;;  %v10041_v28 = vpack.c.bf16 %v5098_v17, %v5098_v17  ;;  %v9813_v39 = vcombine.low %v6482_v63, %v6485_v0  ;;  %v12944_v58 = vpop.permute.xlu0 %7633  ;;  %v5599_v59 = vld [vmem:[#allocation4 + $0x80] sm:$0x1] }
 0x2b8   : > { %v5365_v60 = vrot.slane %v5363_v16, 7  ;;  %v5371_v46 = vshrl.u32 %v10043_v27, 16  ;;  %v5374_v40 = vshll.u32 %v10043_v27, 16  ;;  %v6491_v48 = vrot.slane %v6360_v2, 5  ;;  %v8436_v16 = vld [vmem:[#allocation4 + $0x54] sm:$0xe] }
 0x2b9   : > { %v5348_v1 = vrot.slane %v5346_v9, 7  ;;  %v5354_v7 = vshrl.u32 %v10041_v28, 16  ;;  %v5357_v52 = vshll.u32 %v10041_v28, 16  ;;  %8689 = vrot.lane.b32.xlu0 %v9940_v23, %s10709_s28  ;;  %6604 = vrot.lane.b32.xlu1 %v9813_v39, %s10705_s25  ;;  %v6489_v6 = vsel %vm10819_vm9, %v9798_v36, %v6488_v33  ;;  %v6853_v28 = vld [vmem:[#allocation4 + $0x60] sm:$0xf] }
 0x2ba   : > { %v5368_v25 = vor.u32 %v5366_v42, %v5365_v60  ;;  %v5369_v56 = vrot.slane %v5365_v60, 4  ;;  %v5373_v61 = vrot.slane %v5371_v46, 7  ;;  %v6490_v20 = vrot.slane %v6488_v33, 4  ;;  %v8437_v42 = vld [vmem:[#allocation4 + $0x58] sm:$0xf] }
 0x2bb   : > { %v5351_v3 = vor.u32 %v5349_v54, %v5348_v1  ;;  %v5352_v30 = vrot.slane %v5348_v1, 4  ;;  %v5356_v44 = vrot.slane %v5354_v7, 7  ;;  %vm13894_vm14 = vcmask 64512   ;;  %v8438_v54 = vld [vmem:[#allocation4 + $0x5c] sm:$0x1]  ;;  %v12978_v1 = vpop.permute.xlu0 %7815 }
 0x2bc   : > { %v5596_v17 = vsel %vm12489_vm1, %v5368_v25, %v5595_v10  ;;  %v5376_v23 = vor.u32 %v5374_v40, %v5373_v61  ;;  %v5378_v63 = vrot.slane %v5373_v61, 4  ;;  %v6492_v0 = vsel %vm10819_vm9, %v6490_v20, %v6491_v48  ;;  %5773 = vst.msk [vmem:[#allocation5] sm:$0xff] %vm13894_vm14, %v10354_v49  ;;  %v6854_v2 = vld [vmem:[#allocation4 + $0x64] sm:$0xf]  ;;  %v6855_v60 = vld [vmem:[#allocation4 + $0x68] sm:$0x1] }
 0x2bd   : > { %5597 = vst [vmem:[#allocation4 + $0x78] sm:$0xf] %v5596_v17  ;;  %v5589_v27 = vsel %vm12489_vm1, %v5351_v3, %v5588_v35  ;;  %v5359_v24 = vor.u32 %v5357_v52, %v5356_v44  ;;  %v5361_v9 = vrot.slane %v5356_v44, 4  ;;  %vm13895_vm7 = vcmask 130112   ;;  %5775 = vst.msk [vmem:[#allocation5 + $0x10] sm:$0xff] %vm13894_vm14, %v10359_v57  ;;  %v6274_v35 = vpop.permute.xlu1 %6273 }
 0x2be   : > { %5590 = vst [vmem:[#allocation4 + $0x6c] sm:$0xf] %v5589_v27  ;;  %v5377_v36 = vsel %vm10999_vm15, %v5369_v56, %v5376_v23  ;;  %v5600_v10 = vsel %vm12352_vm8, %v5378_v63, %v5599_v59  ;;  %5774 = vst.msk [vmem:[#allocation5 + $0x8] sm:$0xff] %vm13894_vm14, %v10360_v34  ;;  %v9814_v39 = vcombine.low %v6489_v6, %v6492_v0  ;;  %v9923_v49 = vrot.slane %v8436_v16, 9  ;;  %v7395_v57 = vld [vmem:[#allocation4 + $0x54] sm:$0xe] }
 0x2bf   : > { %5777 = vst.msk [vmem:[#allocation5 + $0x20] sm:$0xff] %vm13894_vm14, %v10366_v45  ;;  %5776 = vst.msk [vmem:[#allocation5 + $0x18] sm:$0xff] %vm13894_vm14, %v10370_v43  ;;  %v5360_v46 = vsel %vm10999_vm15, %v5352_v30, %v5359_v24  ;;  %v5593_v40 = vsel %vm12352_vm8, %v5361_v9, %v5592_v37  ;;  %v8554_v34 = vrot.slane %v8437_v42, 5  ;;  %v8557_v45 = vrot.slane %v8438_v54, 5  ;;  %v7397_v33 = vld [vmem:[#allocation4 + $0x5c] sm:$0x1] }
 0x2c0   : > { %5779 = vst.msk [vmem:[#allocation5 + $0x30] sm:$0xff] %vm13894_vm14, %v10375_v55  ;;  %5778 = vst.msk [vmem:[#allocation5 + $0x28] sm:$0xff] %vm13894_vm14, %v10377_v5  ;;  %v7049_v43 = vshrl.u32 %v6853_v28, 16  ;;  %v7052_v55 = vshll.u32 %v6853_v28, 16  ;;  %v7396_v5 = vld [vmem:[#allocation4 + $0x58] sm:$0xf]  ;;  %6606 = vrot.lane.b32.xlu0 %v9814_v39, %s10705_s25 }
 0x2c1   : > { %5781 = vst.msk [vmem:[#allocation5 + $0x40] sm:$0xff] %vm13894_vm14, %v10381_v22  ;;  %5780 = vst.msk [vmem:[#allocation5 + $0x38] sm:$0xff] %vm13894_vm14, %v10382_v29  ;;  %v523_v22 = vld [vmem:[#allocation4 + $0xa8] sm:$0x1]  ;;  %v7058_v7 = vshll.u32 %v6854_v2, 16  ;;  %v7062_v52 = vshrl.u32 %v6854_v2, 16  ;;  %v8555_v25 = vsel %vm10819_vm9, %v9923_v49, %v8554_v34 }
 0x2c2   : > { %5598 = vst.msk [vmem:[#allocation4 + $0x7c] sm:$0xf] %vm13957_vm6, %v5377_v36  ;;  %5601 = vst [vmem:[#allocation4 + $0x80] sm:$0x1] %v5600_v10  ;;  %vm6638_vm3 = vcmask 195712   ;;  %v8556_v56 = vrot.slane %v8554_v34, 4 }
 0x2c3   : > { %6318 = vst.msk [vmem:[#allocation5] sm:$0xff] %vm13895_vm7, %v12861_v50  ;;  %6320 = vst.msk [vmem:[#allocation5 + $0x10] sm:$0xff] %vm13895_vm7, %v6274_v35  ;;  %v7068_v50 = vshll.u32 %v6855_v60, 16  ;;  %v7051_v61 = vrot.slane %v7049_v43, 4  ;;  %v7054_v48 = vrot.slane %v7052_v55, 5  ;;  %v7060_v3 = vrot.slane %v7058_v7, 5  ;;  %v13001_v60 = vpop.permute.xlu0 %8356 }
 0x2c4   : > { %5591 = vst.msk [vmem:[#allocation4 + $0x70] sm:$0xf] %vm13958_vm4, %v5360_v46  ;;  %5594 = vst [vmem:[#allocation4 + $0x74] sm:$0x1] %v5593_v40  ;;  %v520_v29 = vld [vmem:[#allocation4 + $0x9c] sm:$0x1]  ;;  %v8558_v6 = vsel %vm10819_vm9, %v8556_v56, %v8557_v45 }
 0x2c5   : > { %6639 = vst.msk [vmem:[#allocation5] sm:$0xff] %vm6638_vm3, %v12873_v12  ;;  %6641 = vst.msk [vmem:[#allocation5 + $0x10] sm:$0xff] %vm6638_vm3, %v12929_v21  ;;  %v7064_v30 = vrot.slane %v7062_v52, 4  ;;  %v7070_v59 = vrot.slane %v7068_v50, 5  ;;  %v9860_v44 = vrot.slane %v7395_v57, 9  ;;  %v7055_v17 = vor.u32 %v7054_v48, %v7051_v61  ;;  %v10655_v49 = vld [vmem:[%s10826_s16 + $0x60] sm:$0xff] }
 0x2c6   : > { %v578_v37 = vld [vmem:[#allocation4 + $0xb0] sm:$0x1]  ;;  %v7517_v23 = vrot.slane %v7396_v5, 5  ;;  %v7520_v63 = vrot.slane %v7397_v33, 5  ;;  %v9939_v16 = vcombine.low %v8555_v25, %v8558_v6  ;;  %v524_v12 = vsel %vm12352_vm8, 0, %v523_v22  ;;  %vm13963_vm6 = vmmov %vm13958_vm4 }
 0x2c7   : > { %v10141_v20 = vpop.f32.mrb[20].mxu0  ;;  %v7065_v42 = vor.u32 %v7064_v30, %v7060_v3  ;;  %v521_v21 = vsel %vm12352_vm8, 0, %v520_v29  ;;  %v575_v27 = vld [vmem:[#allocation4 + $0xa4] sm:$0x1]  ;;  %v12996_v24 = vld [vmem:[%s13879_s5] ss:$0 sm:$0xff] }
 0x2c8   : > { %v4841_v9 = vmul.f32 %v12996_v24, %v10141_v20  ;;  %v4764_v54 = vpop.f32.mrb[21].mxu0  ;;  %v7056_v36 = vrot.slane %v7055_v17, 4  ;;  %v7518_v10 = vsel %vm10819_vm9, %v9860_v44, %v7517_v23  ;;  %v7519_v0 = vrot.slane %v7517_v23, 4  ;;  %525 = vst [vmem:[#allocation4 + $0xa8] sm:$0x1] %v524_v12  ;;  %8687 = vrot.lane.b32.xlu0 %v9939_v16, %s10709_s28  ;;  %v10656_v57 = vld [vmem:[%s10826_s16 + $0x68] sm:$0xff]  ;;  %v6772_v12 = vpop.permute.xlu0 %6771 }
 0x2c9   : > { %v10353_v28 = vld [vmem:[#allocation4 + $0x78] sm:$0xff]   ;;  %522 = vst [vmem:[#allocation4 + $0x9c] sm:$0x1] %v521_v21  ;;  %v5813_v2 = vld [vmem:[#allocation4 + $0x60] sm:$0xf]  ;;  %v4839_v35 = vmul.f32 %v12996_v24, %v4764_v54  ;;  %v10142_v46 = vpop.f32.mrb[22].mxu0  ;;  %v8773_v34 = vpack.c.bf16 %v10656_v57, %v10655_v49  ;;  %v6272_v49 = vpop.permute.xlu1 %6271 }
 0x2ca   : > { %v7066_v40 = vrot.slane %v7065_v42, 4  ;;  %v579_v39 = vsel %vm12364_vm0, 0, %v578_v37  ;;  %v13010_v45 = vld [vmem:[%s12395_s23] ss:$0 sm:$0xff]  ;;  %v4842_v55 = vmul.f32 %v12996_v24, %v10142_v46  ;;  %v4767_v5 = vpop.f32.mrb[23].mxu0  ;;  %6785 = vrot.lane.b32.xlu1 %v10353_v28, %s10702_s22  ;;  %v7061_v22 = vsel %vm10896_vm12, %v7056_v36, %v7060_v3  ;;  %v10383_v44 = vld [vmem:[#allocation4 + $0x78] sm:$0xff]  }
 0x2cb   : > { %v13013_v43 = vadd.f32 %v13010_v45, %v4841_v9  ;;  %v7521_v7 = vsel %vm10819_vm9, %v7519_v0, %v7520_v63  ;;  %580 = vst [vmem:[#allocation4 + $0xb0] sm:$0x1] %v579_v39  ;;  %v13022_v52 = vadd.f32 %v13010_v45, %v4839_v35  ;;  %v4840_v50 = vmul.f32 %v12996_v24, %v4767_v5  ;;  %v5814_v56 = vld [vmem:[#allocation4 + $0x64] sm:$0xf]  ;;  %v5815_v30 = vld [vmem:[#allocation4 + $0x68] sm:$0x1] }
 0x2cc   : > { %v7071_v33 = vsel %vm10896_vm12, %v7066_v40, %v7070_v59  ;;  %v9876_v25 = vcombine.low %v7518_v10, %v7521_v7  ;;  %vm13959_vm11 = vcmask 31744   ;;  %v13030_v48 = vadd.f32 %v13010_v45, %v4842_v55  ;;  %v7894_v23 = vld [vmem:[#allocation4 + $0x60] sm:$0xf]  ;;  %v7895_v42 = vld [vmem:[#allocation4 + $0x64] sm:$0xf]  ;;  %5783 = vst.msk [vmem:[#allocation5 + $0x50] sm:$0xff] %vm13894_vm14, %v10383_v44 }
 0x2cd   : > { %10165 = vmatprep.mubr.msk.bf16.mxu1 %vm13959_vm11, %v8773_v34  ;;  %v9716_v61 = vmul.f32 -1.442695, %v13013_v43  ;;  %v9845_v29 = vcombine.low %v7061_v22, %v7071_v33  ;;  %v576_v3 = vsel %vm12364_vm0, 0, %v575_v27  ;;  %v9714_v37 = vmul.f32 -1.442695, %v13022_v52  ;;  %v10356_v27 = vld [vmem:[#allocation4 + $0x78] sm:$0xff]   ;;  %vm13961_vm10 = vmmov %vm13959_vm11 }
 0x2ce   : > { %v13036_v6 = vadd.f32 %v13010_v45, %v4840_v50  ;;  %7645 = vrot.lane.b32.xlu0 %v9876_v25, %s10708_s27  ;;  %577 = vst [vmem:[#allocation4 + $0xa4] sm:$0x1] %v576_v3  ;;  %v6030_v59 = vshrl.u32 %v5813_v2, 16  ;;  %v6033_v17 = vshll.u32 %v5813_v2, 16  ;;  %v9717_v63 = vmul.f32 -1.442695, %v13030_v48  ;;  %v13067_v25 = vpop.permute.xlu0 %7312  ;;  %vm13962_vm13 = vmmov %vm13961_vm10 }
 0x2cf   : > { %10598 = vpow2.f32 %v9716_v61  ;;  %7326 = vrot.lane.b32.xlu1 %v9845_v29, %s10704_s24  ;;  %v6039_v20 = vshll.u32 %v5814_v56, 16  ;;  %v6043_v16 = vshrl.u32 %v5814_v56, 16  ;;  %v7896_v9 = vld [vmem:[#allocation4 + $0x68] sm:$0x1]  ;;  %v13044_v54 = vld [vmem:[%s10826_s16 + $0x70] sm:$0xff]  ;;  %v13047_v28 = vld [vmem:[%s10826_s16 + $0x78] sm:$0xff] }
 0x2d0   : > { %10600 = vpow2.f32 %v9714_v37  ;;  %v9715_v21 = vmul.f32 -1.442695, %v13036_v6  ;;  %v8774_v36 = vpack.c.bf16 %v13047_v28, %v13044_v54  ;;  %v13052_v10 = vld [vmem:[%s10826_s16 + $0x80] sm:$0xff]  ;;  %v13055_v0 = vld [vmem:[%s10826_s16 + $0x88] sm:$0xff]  ;;  %v6032_v46 = vrot.slane %v6030_v59, 4  ;;  %6319 = vst.msk [vmem:[#allocation5 + $0x8] sm:$0xff] %vm13895_vm7, %v6272_v49  ;;  %vm13964_vm11 = vmmov %vm13961_vm10 }
 0x2d1   : > { %v8775_v2 = vpack.c.bf16 %v13055_v0, %v13052_v10  ;;  %10602 = vpow2.f32 %v9717_v63  ;;  %v10355_v35 = vld [vmem:[#allocation4 + $0x6c] sm:$0xff]   ;;  %v6035_v40 = vrot.slane %v6033_v17, 5  ;;  %v6041_v39 = vrot.slane %v6039_v20, 5  ;;  %v7891_v33 = vld [vmem:[#allocation4 + $0x54] sm:$0xf]  ;;  %6640 = vst.msk [vmem:[#allocation5 + $0x8] sm:$0xff] %vm6638_vm3, %v12902_v62  ;;  %v13072_v17 = vpop.permute.xlu1 %7639 }
 0x2d2   : > { %v10384_v57 = vld [vmem:[#allocation4 + $0x6c] sm:$0xff]   ;;  %10604 = vpow2.f32 %v9715_v21  ;;  %7827 = vrot.lane.b32.xlu0 %v10356_v27, %s10707_s18  ;;  %v6045_v34 = vrot.slane %v6043_v16, 4  ;;  %v6049_v55 = vshll.u32 %v5815_v30, 16  ;;  %vm6815_vm2 = vcmask 261312   ;;  %v7892_v30 = vld [vmem:[#allocation4 + $0x58] sm:$0xf] }
 0x2d3   : > { %7825 = vrot.lane.b32.xlu1 %v10355_v35, %s10707_s18  ;;  %v6036_v5 = vor.u32 %v6035_v40, %v6032_v46  ;;  %6816 = vst.msk [vmem:[#allocation5] sm:$0xff] %vm6815_vm2, %v12892_v53  ;;  %v8069_v22 = vshrl.u32 %v7894_v23, 16  ;;  %v8072_v7 = vshll.u32 %v7894_v23, 16  ;;  %v8078_v50 = vshll.u32 %v7895_v42, 16  ;;  %6818 = vst.msk [vmem:[#allocation5 + $0x10] sm:$0xff] %vm6815_vm2, %v6772_v12  ;;  %v10364_v54 = vld [vmem:[%s13880_s6] sm:$0xff]  }
 0x2d4   : > { %5782 = vst.msk [vmem:[#allocation5 + $0x48] sm:$0xff] %vm13894_vm14, %v10384_v57  ;;  %v6046_v56 = vor.u32 %v6045_v34, %v6041_v39  ;;  %v6051_v61 = vrot.slane %v6049_v55, 5  ;;  %v8082_v29 = vshrl.u32 %v7895_v42, 16  ;;  %v8088_v3 = vshll.u32 %v7896_v9, 16  ;;  %v7893_v42 = vld [vmem:[#allocation4 + $0x5c] sm:$0x1]  ;;  %v13076_v9 = vpop.permute.xlu0 %8681 }
 0x2d5   : > { %6817 = vst.msk [vmem:[#allocation5 + $0x8] sm:$0xff] %vm6815_vm2, %v12882_v31  ;;  %v6037_v53 = vrot.slane %v6036_v5, 4  ;;  %v8071_v44 = vrot.slane %v8069_v22, 4  ;;  %v8074_v37 = vrot.slane %v8072_v7, 5  ;;  %v8080_v59 = vrot.slane %v8078_v50, 5  ;;  %v13080_v22 = vpop.permute.xlu1 %6596 }
 0x2d6   : > { %v6047_v23 = vrot.slane %v6046_v56, 4  ;;  %v8084_v62 = vrot.slane %v8082_v29, 4  ;;  %v8090_v63 = vrot.slane %v8088_v3, 5  ;;  %v8045_v20 = vshrl.u32 %v7891_v33, 16 }
 0x2d7   : > { %v6042_v16 = vsel %vm10896_vm12, %v6037_v53, %v6041_v39  ;;  %v8075_v12 = vor.u32 %v8074_v37, %v8071_v44  ;;  %v8048_v21 = vshll.u32 %v7891_v33, 16  ;;  %v8054_v27 = vshll.u32 %v7892_v30, 16  ;;  %v5810_v44 = vld [vmem:[#allocation4 + $0x54] sm:$0xf] }
 0x2d8   : > { %v6052_v31 = vsel %vm10896_vm12, %v6047_v23, %v6051_v61  ;;  %v8085_v35 = vor.u32 %v8084_v62, %v8080_v59  ;;  %v8047_v46 = vrot.slane %v8045_v20, 4  ;;  %v8058_v40 = vshrl.u32 %v7892_v30, 16  ;;  %v13087_v37 = vpop.permute.xlu0 %6598 }
 0x2d9   : > { %v10599_v49 = vpop.eup %10598  ;;  %v9782_v57 = vcombine.low %v6042_v16, %v6052_v31  ;;  %v8076_v34 = vrot.slane %v8075_v12, 4  ;;  %v8050_v55 = vrot.slane %v8048_v21, 5  ;;  %v8056_v5 = vrot.slane %v8054_v27, 5  ;;  %v5811_v12 = vld [vmem:[#allocation4 + $0x58] sm:$0xf] }
 0x2da   : > { %v10601_v39 = vpop.eup %10600  ;;  %v5007_v7 = vadd.f32 1.0, %v10599_v49  ;;  %v8086_v50 = vrot.slane %v8085_v35, 4  ;;  %v8060_v33 = vrot.slane %v8058_v40, 4  ;;  %v8064_v56 = vshll.u32 %v7893_v42, 16  ;;  %v5812_v27 = vld [vmem:[#allocation4 + $0x5c] sm:$0x1] }
 0x2db   : > { %v10603_v29 = vpop.eup %10602  ;;  %v5005_v3 = vadd.f32 1.0, %v10601_v39  ;;  %6285 = vrot.lane.b32.xlu1 %v9782_v57, %s10699_s19  ;;  %v8081_v61 = vsel %vm10896_vm12, %v8076_v34, %v8080_v59  ;;  %v8051_v30 = vor.u32 %v8050_v55, %v8047_v46  ;;  %v8833_v53 = vsel %vm13960_vm5, %v12924_v4, 0  ;;  %v6850_v31 = vld [vmem:[#allocation4 + $0x54] sm:$0xf]  ;;  %v13091_v4 = vpop.permute.xlu1 %6777  ;;  %v6851_v49 = vld [vmem:[#allocation4 + $0x58] sm:$0xf]  ;;  %vm13965_vm5 = vmmov %vm13961_vm10 }
 0x2dc   : > { %v10605_v23 = vpop.eup %10604  ;;  %10606 = vrcp.f32 %v5007_v7  ;;  %v5008_v62 = vadd.f32 1.0, %v10603_v29  ;;  %v8091_v20 = vsel %vm10896_vm12, %v8086_v50, %v8090_v63  ;;  %v8061_v16 = vor.u32 %v8060_v33, %v8056_v5  ;;  %10228 = vmatpush3.bf16.msra.mxu1 %v8833_v53  ;;  %10152 = vmatpush3.bf16.msra.mxu0 %v8833_v53  ;;  %v10357_v57 = vld [vmem:[#allocation4 + $0x6c] sm:$0xff]   ;;  %v6852_v39 = vld [vmem:[#allocation4 + $0x5c] sm:$0x1]  ;;  %v13100_v7 = vpop.permute.xlu0 %8679 }
 0x2dd   : > { %10608 = vrcp.f32 %v5005_v3  ;;  %v5006_v42 = vadd.f32 1.0, %v10605_v23  ;;  %v9908_v59 = vcombine.low %v8081_v61, %v8091_v20  ;;  %v8052_v21 = vrot.slane %v8051_v30, 4  ;;  %v7404_v3 = vld [vmem:[#allocation4 + $0x78] sm:$0xe]  ;;  %v7405_v30 = vld [vmem:[#allocation4 + $0x7c] sm:$0xf]  ;;  %10185 = vmatprep.subr.bf16.mxu1 %v10364_v54 }
 0x2de   : > { %10610 = vrcp.f32 %v5008_v62  ;;  %v8062_v35 = vrot.slane %v8061_v16, 4  ;;  %v8066_v46 = vrot.slane %v8064_v56, 5  ;;  %v6006_v40 = vshrl.u32 %v5810_v44, 16 }
 0x2df   : > { %10612 = vrcp.f32 %v5006_v42  ;;  %8368 = vrot.lane.b32.xlu0 %v9908_v59, %s10710_s29  ;;  %v8057_v63 = vsel %vm10896_vm12, %v8052_v21, %v8056_v5  ;;  %v6009_v34 = vshll.u32 %v5810_v44, 16  ;;  %v6015_v55 = vshll.u32 %v5811_v12, 16  ;;  %10166 = vmatmul.mubr.msk.bf16.vlgmr.msra.gmra.mrb[0].mxu1 %vm13961_vm10, %v8774_v36  ;;  %v13111_v53 = vpop.permute.xlu1 %7318  ;;  %v10365_v44 = vld [vmem:[%s13880_s6 + $0x8] sm:$0xff]   ;;  %v13118_v59 = vld [vmem:[#allocation4 + $0x78] sm:$0xe]  ;;  %vm13966_vm10 = vmmov %vm13965_vm5 }
 0x2e0   : > { %v8067_v50 = vsel %vm10896_vm12, %v8062_v35, %v8066_v46  ;;  %v6008_v33 = vrot.slane %v6006_v40, 4  ;;  %v6019_v56 = vshrl.u32 %v5811_v12, 16  ;;  %v6025_v29 = vshll.u32 %v5812_v27, 16  ;;  %10169 = vmatprep.mubr.msk.bf16.mxu1 %vm13962_vm13, %v8775_v2  ;;  %v7406_v2 = vld [vmem:[#allocation4 + $0x80] sm:$0x1]  ;;  %v13120_v21 = vpop.permute.xlu0 %7637  ;;  %10186 = vmatpush3.bf16.msra.mxu1 %v10364_v54 }
 0x2e1   : > { %v9907_v28 = vcombine.low %v8057_v63, %v8067_v50  ;;  %v6011_v36 = vrot.slane %v6009_v34, 5  ;;  %v6017_v5 = vrot.slane %v6015_v55, 5  ;;  %v7025_v61 = vshrl.u32 %v6850_v31, 16  ;;  %10187 = vmatprep.subr.bf16.mxu1 %v10365_v44 }
 0x2e2   : > { %v6021_v23 = vrot.slane %v6019_v56, 4  ;;  %v6027_v62 = vrot.slane %v6025_v29, 5  ;;  %v7028_v10 = vshll.u32 %v6850_v31, 16  ;;  %v7034_v0 = vshll.u32 %v6851_v49, 16 }
 0x2e3   : > { %8366 = vrot.lane.b32.xlu1 %v9907_v28, %s10710_s29  ;;  %6783 = vrot.lane.b32.xlu0 %v10357_v57, %s10702_s22  ;;  %v6012_v20 = vor.u32 %v6011_v36, %v6008_v33  ;;  %v7027_v16 = vrot.slane %v7025_v61, 4  ;;  %v7038_v12 = vshrl.u32 %v6851_v49, 16  ;;  %v7044_v42 = vshll.u32 %v6852_v39, 16  ;;  %v13122_v50 = vpop.permute.xlu1 %7817  ;;  %v10367_v49 = vld [vmem:[%s13880_s6 + $0x10] sm:$0xff]  }
 0x2e4   : > { %v6022_v27 = vor.u32 %v6021_v23, %v6017_v5  ;;  %v7030_v35 = vrot.slane %v7028_v10, 5  ;;  %v7036_v46 = vrot.slane %v7034_v0, 5  ;;  %v9863_v40 = vrot.slane %v7404_v3, 9  ;;  %10188 = vmatpush3.bf16.msra.mxu1 %v10365_v44 }
 0x2e5   : > { %v6013_v31 = vrot.slane %v6012_v20, 4  ;;  %v7040_v63 = vrot.slane %v7038_v12, 4  ;;  %v7046_v34 = vrot.slane %v7044_v42, 5  ;;  %v7538_v55 = vrot.slane %v7405_v30, 5  ;;  %v13133_v30 = vpop.permute.xlu0 %7819  ;;  %10189 = vmatprep.subr.bf16.mxu1 %v10367_v49 }
 0x2e6   : > { %v10607_v57 = vpop.eup %10606  ;;  %v6023_v39 = vrot.slane %v6022_v27, 4  ;;  %v7031_v33 = vor.u32 %v7030_v35, %v7027_v16  ;;  %v7541_v56 = vrot.slane %v7406_v2, 5  ;;  %v9926_v29 = vrot.slane %v13118_v59, 9  ;;  %v10369_v35 = vld [vmem:[%s13880_s6 + $0x18] sm:$0xff]  }
 0x2e7   : > { %v10609_v28 = vpop.eup %10608  ;;  %v5103_v3 = vmul.f32 %v10607_v57, %v13013_v43  ;;  %v6018_v54 = vsel %vm10896_vm12, %v6013_v31, %v6017_v5  ;;  %v7041_v36 = vor.u32 %v7040_v63, %v7036_v46  ;;  %v7539_v61 = vsel %vm10819_vm9, %v9863_v40, %v7538_v55  ;;  %v6278_v27 = vpop.permute.xlu1 %6277  ;;  %v8446_v31 = vld [vmem:[#allocation4 + $0x7c] sm:$0xf]  ;;  %v13147_v63 = vld [vmem:[#allocation4 + $0x80] sm:$0x1] }
 0x2e8   : > { %v10611_v23 = vpop.eup %10610  ;;  %v5101_v10 = vmul.f32 %v10609_v28, %v13022_v52  ;;  %v6028_v0 = vsel %vm10896_vm12, %v6023_v39, %v6027_v62  ;;  %v7032_v2 = vrot.slane %v7031_v33, 4  ;;  %v7540_v20 = vrot.slane %v7538_v55, 4  ;;  %6322 = vst.msk [vmem:[#allocation5 + $0x20] sm:$0xff] %vm13895_vm7, %v6278_v27  ;;  %10190 = vmatpush3.bf16.msra.mxu1 %v10367_v49  ;;  %v6361_v27 = vld [vmem:[#allocation4 + $0x6c] sm:$0xe] }
 0x2e9   : > { %v10613_v16 = vpop.eup %10612  ;;  %v10046_v43 = vpack.c.bf16 %v5103_v3, %v5103_v3  ;;  %v5104_v12 = vmul.f32 %v10611_v23, %v13030_v48  ;;  %v9781_v5 = vcombine.low %v6018_v54, %v6028_v0  ;;  %v7042_v42 = vrot.slane %v7041_v36, 4  ;;  %6643 = vst.msk [vmem:[#allocation5 + $0x20] sm:$0xff] %vm6638_vm3, %v13087_v37  ;;  %v5602_v36 = vld [vmem:[#allocation4 + $0x84] sm:$0xf]  ;;  %10191 = vmatprep.subr.bf16.mxu1 %v10369_v35 }
 0x2ea   : > { %v10044_v40 = vpack.c.bf16 %v5101_v10, %v5101_v10  ;;  %v5102_v52 = vmul.f32 %v10613_v16, %v13036_v6  ;;  %v7037_v62 = vsel %vm10896_vm12, %v7032_v2, %v7036_v46  ;;  %v7542_v44 = vsel %vm10819_vm9, %v7540_v20, %v7541_v56  ;;  %v13155_v6 = vpop.permute.xlu0 %8360  ;;  %v5609_v46 = vld [vmem:[#allocation4 + $0x90] sm:$0xf]  ;;  %v5613_v20 = vld [vmem:[#allocation4 + $0x98] sm:$0x1] }
 0x2eb   : > { %v5397_v48 = vshrl.u32 %v10046_v43, 16  ;;  %v5400_v55 = vshll.u32 %v10046_v43, 16  ;;  %v10047_v57 = vpack.c.bf16 %v5104_v12, %v5104_v12  ;;  %6283 = vrot.lane.b32.xlu1 %v9781_v5, %s10699_s19  ;;  %v7047_v39 = vsel %vm10896_vm12, %v7042_v42, %v7046_v34  ;;  %v13157_v2 = vpop.permute.xlu1 %8358 }
 0x2ec   : > { %v5380_v33 = vshrl.u32 %v10044_v40, 16  ;;  %v5383_v56 = vshll.u32 %v10044_v40, 16  ;;  %v10045_v28 = vpack.c.bf16 %v5102_v52, %v5102_v52  ;;  %v9844_v3 = vcombine.low %v7037_v62, %v7047_v39  ;;  %10192 = vmatpush3.bf16.msra.mxu1 %v10369_v35  ;;  %v6366_v35 = vld [vmem:[#allocation4 + $0x80] sm:$0x1] }
 0x2ed   : > { %v5399_v54 = vrot.slane %v5397_v48, 7  ;;  %v5405_v23 = vshrl.u32 %v10047_v57, 16  ;;  %v5408_v10 = vshll.u32 %v10047_v57, 16  ;;  %v9879_v0 = vcombine.low %v7539_v61, %v7542_v44  ;;  %v5606_v44 = vld [vmem:[#allocation4 + $0x8c] sm:$0x1] }
 0x2ee   : > { %v5382_v34 = vrot.slane %v5380_v33, 7  ;;  %v5388_v16 = vshrl.u32 %v10045_v28, 16  ;;  %v5391_v37 = vshll.u32 %v10045_v28, 16  ;;  %7324 = vrot.lane.b32.xlu0 %v9844_v3, %s10704_s24  ;;  %v8575_v43 = vrot.slane %v8446_v31, 5  ;;  %v6776_v40 = vpop.permute.xlu0 %6775  ;;  %v6362_v57 = vld [vmem:[#allocation4 + $0x70] sm:$0xf] }
 0x2ef   : > { %v5402_v12 = vor.u32 %v5400_v55, %v5399_v54  ;;  %v5403_v5 = vrot.slane %v5399_v54, 4  ;;  %v5407_v42 = vrot.slane %v5405_v23, 7  ;;  %7651 = vrot.lane.b32.xlu1 %v9879_v0, %s10708_s27  ;;  %v8578_v49 = vrot.slane %v13147_v63, 5  ;;  %6820 = vst.msk [vmem:[#allocation5 + $0x20] sm:$0xff] %vm6815_vm2, %v6776_v40  ;;  %v6363_v33 = vld [vmem:[#allocation4 + $0x74] sm:$0x1]  ;;  %v6276_v28 = vpop.permute.xlu1 %6275 }
 0x2f0   : > { %v5385_v61 = vor.u32 %v5383_v56, %v5382_v34  ;;  %v5386_v52 = vrot.slane %v5382_v34, 4  ;;  %v5390_v62 = vrot.slane %v5388_v16, 7  ;;  %v8576_v48 = vsel %vm10819_vm9, %v9926_v29, %v8575_v43  ;;  %v6364_v56 = vld [vmem:[#allocation4 + $0x78] sm:$0xe]  ;;  %v6365_v23 = vld [vmem:[#allocation4 + $0x7c] sm:$0xf] }
 0x2f1   : > { %v5610_v31 = vsel %vm12489_vm1, %v5402_v12, %v5609_v46  ;;  %v5410_v55 = vor.u32 %v5408_v10, %v5407_v42  ;;  %v5412_v63 = vrot.slane %v5407_v42, 4  ;;  %v8577_v39 = vrot.slane %v8575_v43, 4  ;;  %6321 = vst.msk [vmem:[#allocation5 + $0x18] sm:$0xff] %vm13895_vm7, %v6276_v28  ;;  %v8442_v16 = vld [vmem:[#allocation4 + $0x6c] sm:$0xe]  ;;  %v10663_v40 = vld [vmem:[%s10826_s16 + $0x98] sm:$0xff] }
 0x2f2   : > { %5611 = vst [vmem:[#allocation4 + $0x90] sm:$0xf] %v5610_v31  ;;  %v5603_v59 = vsel %vm12489_vm1, %v5385_v61, %v5602_v36  ;;  %v5393_v3 = vor.u32 %v5391_v37, %v5390_v62  ;;  %v5395_v54 = vrot.slane %v5390_v62, 4  ;;  %v9799_v29 = vrot.slane %v6361_v27, 9  ;;  %v8443_v36 = vld [vmem:[#allocation4 + $0x70] sm:$0xf] }
 0x2f3   : > { %5604 = vst [vmem:[#allocation4 + $0x84] sm:$0xf] %v5603_v59  ;;  %v5411_v46 = vsel %vm10999_vm15, %v5403_v5, %v5410_v55  ;;  %v5614_v10 = vsel %vm12352_vm8, %v5412_v63, %v5613_v20  ;;  %v8579_v0 = vsel %vm10819_vm9, %v8577_v39, %v8578_v49  ;;  %v6495_v34 = vrot.slane %v6362_v57, 5  ;;  %6642 = vst.msk [vmem:[#allocation5 + $0x18] sm:$0xff] %vm6638_vm3, %v13080_v22  ;;  %v8444_v5 = vld [vmem:[#allocation4 + $0x74] sm:$0x1] }
 0x2f4   : > { %5612 = vst.msk [vmem:[#allocation4 + $0x94] sm:$0xf] %vm13963_vm6, %v5411_v46  ;;  %5615 = vst [vmem:[#allocation4 + $0x98] sm:$0x1] %v5614_v10  ;;  %v5394_v37 = vsel %vm10999_vm15, %v5386_v52, %v5393_v3  ;;  %v5607_v20 = vsel %vm12352_vm8, %v5395_v54, %v5606_v44  ;;  %v9942_v43 = vcombine.low %v8576_v48, %v8579_v0  ;;  %v6498_v12 = vrot.slane %v6363_v33, 5  ;;  %v10662_v27 = vld [vmem:[%s10826_s16 + $0x90] sm:$0xff] }
 0x2f5   : > { %v6859_v42 = vld [vmem:[#allocation4 + $0x78] sm:$0xf]  ;;  %6819 = vst.msk [vmem:[#allocation5 + $0x18] sm:$0xff] %vm6815_vm2, %v12914_v15  ;;  %5608 = vst [vmem:[#allocation4 + $0x8c] sm:$0x1] %v5607_v20  ;;  %v6496_v22 = vsel %vm10819_vm9, %v9799_v29, %v6495_v34  ;;  %v6497_v49 = vrot.slane %v6495_v34, 4  ;;  %v8776_v61 = vpack.c.bf16 %v10663_v40, %v10662_v27 }
 0x2f6   : > { %5605 = vst.msk [vmem:[#allocation4 + $0x88] sm:$0xf] %vm13958_vm4, %v5394_v37  ;;  %v9800_v52 = vrot.slane %v6364_v56, 9  ;;  %8693 = vrot.lane.b32.xlu0 %v9942_v43, %s10709_s28  ;;  %v6502_v62 = vrot.slane %v6365_v23, 5  ;;  %v6505_v44 = vrot.slane %v6366_v35, 5  ;;  %v9925_v48 = vrot.slane %v8442_v16, 9  ;;  %v7317_v43 = vpop.permute.xlu0 %7316 }
 0x2f7   : > { %v8568_v57 = vrot.slane %v8443_v36, 5  ;;  %v6860_v15 = vld [vmem:[#allocation4 + $0x7c] sm:$0xf]  ;;  %v6499_v31 = vsel %vm10819_vm9, %v6497_v49, %v6498_v12  ;;  %10170 = vmatmul.mubr.msk.bf16.gmra.mrb[4].mxu1 %vm13964_vm11, %v8776_v61  ;;  %v8571_v55 = vrot.slane %v8444_v5, 5  ;;  %v10664_v63 = vld [vmem:[%s10826_s16 + $0xa0] sm:$0xff]  ;;  %v10665_v39 = vld [vmem:[%s10826_s16 + $0xa8] sm:$0xff] }
 0x2f8   : > { %v8777_v33 = vpack.c.bf16 %v10665_v39, %v10664_v63  ;;  %v6861_v28 = vld [vmem:[#allocation4 + $0x80] sm:$0x1]  ;;  %v7097_v59 = vshrl.u32 %v6859_v42, 16  ;;  %v9815_v56 = vcombine.low %v6496_v22, %v6499_v31  ;;  %v6503_v54 = vsel %vm10819_vm9, %v9800_v52, %v6502_v62  ;;  %v526_v35 = vld [vmem:[#allocation4 + $0xb4] sm:$0x1] }
 0x2f9   : > { %v529_v3 = vld [vmem:[#allocation4 + $0xc0] sm:$0x1]  ;;  %v6504_v29 = vrot.slane %v6502_v62, 4  ;;  %v13202_v23 = vsel %vm10819_vm9, %v9925_v48, %v8568_v57  ;;  %v584_v46 = vld [vmem:[#allocation4 + $0xc8] sm:$0x1]  ;;  %v8570_v0 = vrot.slane %v8568_v57, 4 }
 0x2fa   : > { %v7401_v10 = vld [vmem:[#allocation4 + $0x6c] sm:$0xe]  ;;  %10173 = vmatprep.mubr.msk.bf16.mxu1 %vm13965_vm5, %v8777_v33  ;;  %v7099_v34 = vrot.slane %v7097_v59, 4  ;;  %v7100_v16 = vshll.u32 %v6859_v42, 16  ;;  %v7106_v36 = vshll.u32 %v6860_v15, 16  ;;  %6608 = vrot.lane.b32.xlu1 %v9815_v56, %s10705_s25  ;;  %v7110_v5 = vshrl.u32 %v6860_v15, 16 }
 0x2fb   : > { %v7402_v37 = vld [vmem:[#allocation4 + $0x70] sm:$0xf]  ;;  %v13205_v20 = vld [vmem:[#allocation4 + $0x74] sm:$0x1]  ;;  %v6506_v12 = vsel %vm10819_vm9, %v6504_v29, %v6505_v44  ;;  %v7116_v22 = vshll.u32 %v6861_v28, 16  ;;  %v530_v49 = vsel %vm12352_vm8, 0, %v529_v3  ;;  %v8572_v42 = vsel %vm10819_vm9, %v8570_v0, %v8571_v55 }
 0x2fc   : > { %v9816_v27 = vcombine.low %v6503_v54, %v6506_v12  ;;  %v7102_v40 = vrot.slane %v7100_v16, 5  ;;  %v13214_v61 = vrot.slane %v7106_v36, 5  ;;  %531 = vst [vmem:[#allocation4 + $0xc0] sm:$0x1] %v530_v49  ;;  %v581_v52 = vld [vmem:[#allocation4 + $0xbc] sm:$0x1]  ;;  %v9941_v48 = vcombine.low %v13202_v23, %v8572_v42 }
 0x2fd   : > { %v10358_v62 = vld [vmem:[#allocation4 + $0x90] sm:$0xff]   ;;  %v7112_v57 = vrot.slane %v7110_v5, 4  ;;  %v7118_v31 = vrot.slane %v7116_v22, 5  ;;  %v10666_v44 = vld [vmem:[%s10826_s16 + $0xb0] sm:$0xff]  ;;  %v10667_v15 = vld [vmem:[%s10826_s16 + $0xb8] sm:$0xff]  ;;  %v527_v33 = vsel %vm12352_vm8, 0, %v526_v35 }
 0x2fe   : > { %v8778_v63 = vpack.c.bf16 %v10667_v15, %v10666_v44  ;;  %6610 = vrot.lane.b32.xlu0 %v9816_v27, %s10705_s25  ;;  %v7103_v39 = vor.u32 %v7102_v40, %v7099_v34  ;;  %v585_v55 = vsel %vm12364_vm0, 0, %v584_v46  ;;  %v9862_v28 = vrot.slane %v7401_v10, 9  ;;  %v10385_v59 = vld [vmem:[#allocation4 + $0x90] sm:$0xff]   ;;  %v10145_v3 = vpop.f32.mrb[24].mxu0  ;;  %6789 = vrot.lane.b32.xlu1 %v10358_v62, %s10702_s22  ;;  %528 = vst [vmem:[#allocation4 + $0xb4] sm:$0x1] %v527_v33  ;;  %v13231_v46 = vpop.permute.xlu0 %8685 }
 0x2ff   : > { %v7113_v56 = vor.u32 %v7112_v57, %v13214_v61  ;;  %586 = vst [vmem:[#allocation4 + $0xc8] sm:$0x1] %v585_v55  ;;  %v7531_v54 = vrot.slane %v7402_v37, 5  ;;  %v7534_v29 = vrot.slane %v13205_v20, 5  ;;  %v582_v23 = vsel %vm12364_vm0, 0, %v581_v52  ;;  %v4780_v0 = vpop.f32.mrb[25].mxu0  ;;  %v13298_v44 = vpop.permute.xlu1 %7643 }
 0x300   : > { %v4845_v35 = vmul.f32 %v12996_v24, %v10145_v3  ;;  %v7104_v34 = vrot.slane %v7103_v39, 4  ;;  %10174 = vmatmul.mubr.msk.bf16.gmra.mrb[8].mxu1 %vm13966_vm10, %v8778_v63  ;;  %583 = vst [vmem:[#allocation4 + $0xbc] sm:$0x1] %v582_v23  ;;  %vm7360_vm13 = vcmask 326912   ;;  %vm7681_vm6 = vcmask 392512   ;;  %5785 = vst.msk [vmem:[#allocation5 + $0x60] sm:$0xff] %vm13894_vm14, %v10385_v59 }
 0x301   : > { %v4843_v10 = vmul.f32 %v12996_v24, %v4780_v0  ;;  %v10146_v16 = vpop.f32.mrb[26].mxu0  ;;  %v7114_v36 = vrot.slane %v7113_v56, 4  ;;  %v7532_v37 = vsel %vm10819_vm9, %v9862_v28, %v7531_v54  ;;  %v7533_v20 = vrot.slane %v7531_v54, 4  ;;  %7361 = vst.msk [vmem:[#allocation5] sm:$0xff] %vm7360_vm13, %v13067_v25  ;;  %7362 = vst.msk [vmem:[#allocation5 + $0x8] sm:$0xff] %vm7360_vm13, %v12938_v51  ;;  %v10386_v12 = vld [vmem:[#allocation4 + $0x84] sm:$0xff]  }
 0x302   : > { %7364 = vst.msk [vmem:[#allocation5 + $0x18] sm:$0xff] %vm7360_vm13, %v13111_v53  ;;  %7363 = vst.msk [vmem:[#allocation5 + $0x10] sm:$0xff] %vm7360_vm13, %v7317_v43  ;;  %v13245_v5 = vadd.f32 %v13010_v45, %v4845_v35  ;;  %v4846_v22 = vmul.f32 %v12996_v24, %v10146_v16  ;;  %v4783_v49 = vpop.f32.mrb[27].mxu0  ;;  %8691 = vrot.lane.b32.xlu0 %v9941_v48, %s10709_s28  ;;  %v7109_v25 = vsel %vm10896_vm12, %v7104_v34, %v13214_v61  ;;  %vm13896_vm4 = vcmask 458112   ;;  %v10668_v40 = vld [vmem:[%s10826_s16 + $0xc0] sm:$0xff]  ;;  %v10669_v61 = vld [vmem:[%s10826_s16 + $0xc8] sm:$0xff]  ;;  %v13300_v15 = vpop.permute.xlu0 %6602 }
 0x303   : > { %7682 = vst.msk [vmem:[#allocation5] sm:$0xff] %vm7681_vm6, %v12944_v58  ;;  %7683 = vst.msk [vmem:[#allocation5 + $0x8] sm:$0xff] %vm7681_vm6, %v12894_v14  ;;  %v13261_v51 = vadd.f32 %v13010_v45, %v4843_v10  ;;  %v4844_v53 = vmul.f32 %v12996_v24, %v4783_v49  ;;  %v7119_v43 = vsel %vm10896_vm12, %v7114_v36, %v7118_v31  ;;  %vm8404_vm11 = vcmask 523712   ;;  %v10670_v62 = vld [vmem:[%s10826_s16 + $0xd0] sm:$0xff]  ;;  %v10671_v48 = vld [vmem:[%s10826_s16 + $0xd8] sm:$0xff] }
 0x304   : > { %7685 = vst.msk [vmem:[#allocation5 + $0x18] sm:$0xff] %vm7681_vm6, %v13072_v17  ;;  %7684 = vst.msk [vmem:[#allocation5 + $0x10] sm:$0xff] %vm7681_vm6, %v13120_v21  ;;  %v7535_v58 = vsel %vm10819_vm9, %v7533_v20, %v7534_v29  ;;  %v9720_v14 = vmul.f32 -1.442695, %v13245_v5  ;;  %v13279_v24 = vadd.f32 %v13010_v45, %v4846_v22  ;;  %v9847_v17 = vcombine.low %v7109_v25, %v7119_v43  ;;  %v5819_v21 = vld [vmem:[#allocation4 + $0x78] sm:$0xf]  ;;  %v13313_v22 = vpop.permute.xlu1 %6600 }
 0x305   : > { %7860 = vst.msk [vmem:[#allocation5] sm:$0xff] %vm13896_vm4, %v12880_v18  ;;  %7861 = vst.msk [vmem:[#allocation5 + $0x8] sm:$0xff] %vm13896_vm4, %v12946_v41  ;;  %v9878_v18 = vcombine.low %v7532_v37, %v7535_v58  ;;  %v5820_v41 = vld [vmem:[#allocation4 + $0x7c] sm:$0xf]  ;;  %v13283_v27 = vadd.f32 %v13010_v45, %v4844_v53  ;;  %vm8725_vm5 = vcmask 589312   ;;  %v8779_v52 = vpack.c.bf16 %v10669_v61, %v10668_v40 }
 0x306   : > { %7863 = vst.msk [vmem:[#allocation5 + $0x18] sm:$0xff] %vm13896_vm4, %v13122_v50  ;;  %7862 = vst.msk [vmem:[#allocation5 + $0x10] sm:$0xff] %vm13896_vm4, %v12978_v1  ;;  %v9718_v50 = vmul.f32 -1.442695, %v13261_v51  ;;  %v5821_v1 = vld [vmem:[#allocation4 + $0x80] sm:$0x1]  ;;  %10614 = vpow2.f32 %v9720_v14  ;;  %7330 = vrot.lane.b32.xlu1 %v9847_v17, %s10704_s24  ;;  %v8780_v45 = vpack.c.bf16 %v10671_v48, %v10670_v62  ;;  %v13315_v49 = vpop.permute.xlu0 %8683 }
 0x307   : > { %5784 = vst.msk [vmem:[#allocation5 + $0x58] sm:$0xff] %vm13894_vm14, %v10386_v12  ;;  %v9721_v42 = vmul.f32 -1.442695, %v13279_v24  ;;  %7649 = vrot.lane.b32.xlu0 %v9878_v18, %s10708_s27  ;;  %v7900_v57 = vld [vmem:[#allocation4 + $0x78] sm:$0xf]  ;;  %v6078_v63 = vshrl.u32 %v5819_v21, 16  ;;  %10177 = vmatprep.mubr.msk.bf16.mxu1 %vm13966_vm10, %v8779_v52  ;;  %vm13967_vm14 = vmmov %vm13966_vm10 }
 0x308   : > { %8405 = vst.msk [vmem:[#allocation5] sm:$0xff] %vm8404_vm11, %v13001_v60  ;;  %v7901_v31 = vld [vmem:[#allocation4 + $0x7c] sm:$0xf]  ;;  %8406 = vst.msk [vmem:[#allocation5 + $0x8] sm:$0xff] %vm8404_vm11, %v13157_v2  ;;  %10616 = vpow2.f32 %v9718_v50  ;;  %v9719_v60 = vmul.f32 -1.442695, %v13283_v27  ;;  %10178 = vmatmul.mubr.msk.bf16.gmra.mrb[12].mxu1 %vm13967_vm14, %v8780_v45 }
 0x309   : > { %8407 = vst.msk [vmem:[#allocation5 + $0x10] sm:$0xff] %vm8404_vm11, %v13155_v6  ;;  %v6081_v39 = vshll.u32 %v5819_v21, 16  ;;  %v7902_v33 = vld [vmem:[#allocation4 + $0x80] sm:$0x1]  ;;  %10618 = vpow2.f32 %v9721_v42  ;;  %v10361_v6 = vld [vmem:[#allocation4 + $0x84] sm:$0xff]   ;;  %v10362_v2 = vld [vmem:[#allocation4 + $0x90] sm:$0xff]  }
 0x30a   : > { %8726 = vst.msk [vmem:[#allocation5] sm:$0xff] %vm8725_vm5, %v12900_v32  ;;  %8727 = vst.msk [vmem:[#allocation5 + $0x8] sm:$0xff] %vm8725_vm5, %v13100_v7  ;;  %v6087_v55 = vshll.u32 %v5820_v41, 16  ;;  %v6091_v28 = vshrl.u32 %v5820_v41, 16  ;;  %v6097_v59 = vshll.u32 %v5821_v1, 16  ;;  %10620 = vpow2.f32 %v9719_v60  ;;  %7829 = vrot.lane.b32.xlu1 %v10361_v6, %s10707_s18 }
 0x30b   : > { %8728 = vst.msk [vmem:[#allocation5 + $0x10] sm:$0xff] %vm8725_vm5, %v13076_v9  ;;  %v6080_v3 = vrot.slane %v6078_v63, 4  ;;  %v6083_v32 = vrot.slane %v6081_v39, 5  ;;  %v8117_v56 = vshrl.u32 %v7900_v57, 16  ;;  %v7897_v54 = vld [vmem:[#allocation4 + $0x6c] sm:$0xf]  ;;  %7831 = vrot.lane.b32.xlu0 %v10362_v2, %s10707_s18  ;;  %vm13968_vm14 = vmmov %vm13966_vm10 }
 0x30c   : > { %v6089_v9 = vrot.slane %v6087_v55, 5  ;;  %v6093_v7 = vrot.slane %v6091_v28, 4  ;;  %v6099_v29 = vrot.slane %v6097_v59, 5  ;;  %v8120_v23 = vshll.u32 %v7900_v57, 16  ;;  %v7898_v20 = vld [vmem:[#allocation4 + $0x70] sm:$0xf] }
 0x30d   : > { %v6084_v35 = vor.u32 %v6083_v32, %v6080_v3  ;;  %v8119_v0 = vrot.slane %v8117_v56, 4  ;;  %v8126_v34 = vshll.u32 %v7901_v31, 16  ;;  %v8130_v10 = vshrl.u32 %v7901_v31, 16  ;;  %v7899_v58 = vld [vmem:[#allocation4 + $0x74] sm:$0x1]  ;;  %v13325_v3 = vpop.permute.xlu0 %7641 }
 0x30e   : > { %v6094_v16 = vor.u32 %v6093_v7, %v6089_v9  ;;  %v8122_v36 = vrot.slane %v8120_v23, 5  ;;  %v8136_v37 = vshll.u32 %v7902_v33, 16  ;;  %v8093_v12 = vshrl.u32 %v7897_v54, 16  ;;  %v13323_v59 = vpop.permute.xlu1 %6781  ;;  %v5816_v7 = vld [vmem:[#allocation4 + $0x6c] sm:$0xf] }
 0x30f   : > { %v6085_v25 = vrot.slane %v6084_v35, 4  ;;  %v8128_v53 = vrot.slane %v8126_v34, 5  ;;  %v8132_v43 = vrot.slane %v8130_v10, 4  ;;  %v8096_v14 = vshll.u32 %v7897_v54, 16  ;;  %v5818_v34 = vld [vmem:[#allocation4 + $0x74] sm:$0x1] }
 0x310   : > { %v6095_v17 = vrot.slane %v6094_v16, 4  ;;  %v8123_v18 = vor.u32 %v8122_v36, %v8119_v0  ;;  %v8138_v21 = vrot.slane %v8136_v37, 5  ;;  %v8095_v41 = vrot.slane %v8093_v12, 4  ;;  %v10615_v61 = vpop.eup %10614  ;;  %v5817_v0 = vld [vmem:[#allocation4 + $0x70] sm:$0xf]  ;;  %v10672_v36 = vld [vmem:[%s10826_s16 + $0xe0] sm:$0xff] }
 0x311   : > { %v6090_v50 = vsel %vm10896_vm12, %v6085_v25, %v6089_v9  ;;  %v8133_v1 = vor.u32 %v8132_v43, %v8128_v53  ;;  %v8098_v42 = vrot.slane %v8096_v14, 5  ;;  %v8102_v40 = vshll.u32 %v7898_v20, 16  ;;  %v10673_v37 = vld [vmem:[%s10826_s16 + $0xe8] sm:$0xff]  ;;  %v6856_v12 = vld [vmem:[#allocation4 + $0x6c] sm:$0xf] }
 0x312   : > { %v6100_v52 = vsel %vm10896_vm12, %v6095_v17, %v6099_v29  ;;  %v8124_v62 = vrot.slane %v8123_v18, 4  ;;  %v8106_v48 = vshrl.u32 %v7898_v20, 16  ;;  %v8112_v45 = vshll.u32 %v7899_v58, 16  ;;  %v10617_v57 = vpop.eup %10616  ;;  %v6857_v58 = vld [vmem:[#allocation4 + $0x70] sm:$0xf]  ;;  %v13335_v14 = vpop.permute.xlu1 %7322 }
 0x313   : > { %v5011_v31 = vadd.f32 1.0, %v10615_v61  ;;  %v9784_v60 = vcombine.low %v6090_v50, %v6100_v52  ;;  %v8134_v63 = vrot.slane %v8133_v1, 4  ;;  %v8099_v39 = vor.u32 %v8098_v42, %v8095_v41  ;;  %v10619_v33 = vpop.eup %10618  ;;  %v10674_v41 = vld [vmem:[%s10826_s16 + $0xf0] sm:$0xff]  ;;  %v10675_v50 = vld [vmem:[%s10826_s16 + $0xf8] sm:$0xff] }
 0x314   : > { %v5009_v6 = vadd.f32 1.0, %v10617_v57  ;;  %v8129_v2 = vsel %vm10896_vm12, %v8124_v62, %v8128_v53  ;;  %v8104_v55 = vrot.slane %v8102_v40, 5  ;;  %v8108_v28 = vrot.slane %v8106_v48, 4  ;;  %v10621_v32 = vpop.eup %10620  ;;  %v8742_v42 = vld [vmem:[#allocation5] sm:$0xff]  ;;  %v6858_v40 = vld [vmem:[#allocation4 + $0x74] sm:$0x1]  ;;  %v13342_v57 = vpop.permute.xlu0 %7823 }
 0x315   : > { %10622 = vrcp.f32 %v5011_v31  ;;  %v5012_v56 = vadd.f32 1.0, %v10619_v33  ;;  %6289 = vrot.lane.b32.xlu1 %v9784_v60, %s10699_s19  ;;  %v8139_v54 = vsel %vm10896_vm12, %v8134_v63, %v8138_v21  ;;  %v8100_v9 = vrot.slane %v8099_v39, 4  ;;  %v10363_v52 = vld [vmem:[#allocation4 + $0x84] sm:$0xff]  }
 0x316   : > { %10624 = vrcp.f32 %v5009_v6  ;;  %v5010_v29 = vadd.f32 1.0, %v10621_v32  ;;  %v9910_v23 = vcombine.low %v8129_v2, %v8139_v54  ;;  %v8109_v35 = vor.u32 %v8108_v28, %v8104_v55  ;;  %v7411_v28 = vld [vmem:[#allocation4 + $0x94] sm:$0xf]  ;;  %v13347_v32 = vpop.permute.xlu1 %7821 }
 0x317   : > { %10626 = vrcp.f32 %v5012_v56  ;;  %v8105_v10 = vsel %vm10896_vm12, %v8100_v9, %v8104_v55  ;;  %v8114_v16 = vrot.slane %v8112_v45, 5  ;;  %v8781_v20 = vpack.c.bf16 %v10673_v37, %v10672_v36  ;;  %v7410_v45 = vld [vmem:[#allocation4 + $0x90] sm:$0xe] }
 0x318   : > { %10628 = vrcp.f32 %v5010_v29  ;;  %8372 = vrot.lane.b32.xlu0 %v9910_v23, %s10710_s29  ;;  %v8110_v25 = vrot.slane %v8109_v35, 4  ;;  %v6054_v53 = vshrl.u32 %v5816_v7, 16  ;;  %v6057_v43 = vshll.u32 %v5816_v7, 16  ;;  %v7412_v7 = vld [vmem:[#allocation4 + $0x98] sm:$0x1] }
 0x319   : > { %10181 = vmatprep.mubr.msk.bf16.mxu1 %vm13968_vm14, %v8781_v20  ;;  %v6063_v17 = vshll.u32 %v5817_v0, 16  ;;  %v6067_v18 = vshrl.u32 %v5817_v0, 16  ;;  %v6073_v21 = vshll.u32 %v5818_v34, 16  ;;  %v8782_v1 = vpack.c.bf16 %v10675_v50, %v10674_v41 }
 0x31a   : > { %v8115_v61 = vsel %vm10896_vm12, %v8110_v25, %v8114_v16  ;;  %v6056_v62 = vrot.slane %v6054_v53, 4  ;;  %v6059_v48 = vrot.slane %v6057_v43, 5  ;;  %vm9023_vm10 = vcmask 588800  }
 0x31b   : > { %v9909_v31 = vcombine.low %v8105_v10, %v8115_v61  ;;  %v6065_v60 = vrot.slane %v6063_v17, 5  ;;  %v6069_v63 = vrot.slane %v6067_v18, 4  ;;  %v6075_v39 = vrot.slane %v6073_v21, 5  ;;  %10182 = vmatmul.mubr.msk.bf16.gmra.mrb[16].mxu1 %vm13968_vm14, %v8782_v1  ;;  %v6282_v17 = vpop.permute.xlu1 %6281  ;;  %v13353_v18 = vpop.permute.xlu0 %8364 }
 0x31c   : > { %6787 = vrot.lane.b32.xlu0 %v10363_v52, %s10702_s22  ;;  %v6060_v33 = vor.u32 %v6059_v48, %v6056_v62  ;;  %10195 = vmatprep.mubr.msk.bf16.mxu1 %vm9023_vm10, %v8742_v42  ;;  %v7073_v6 = vshrl.u32 %v6856_v12, 16  ;;  %v7076_v2 = vshll.u32 %v6856_v12, 16  ;;  %v7082_v55 = vshll.u32 %v6857_v58, 16  ;;  %6324 = vst.msk [vmem:[#allocation5 + $0x30] sm:$0xff] %vm13895_vm7, %v6282_v17  ;;  %v6367_v17 = vld [vmem:[#allocation4 + $0x84] sm:$0xe] }
 0x31d   : > { %8370 = vrot.lane.b32.xlu1 %v9909_v31, %s10710_s29  ;;  %v6070_v56 = vor.u32 %v6069_v63, %v6065_v60  ;;  %v7086_v54 = vshrl.u32 %v6857_v58, 16  ;;  %v7092_v9 = vshll.u32 %v6858_v40, 16  ;;  %v9865_v29 = vrot.slane %v7410_v45, 9  ;;  %6645 = vst.msk [vmem:[#allocation5 + $0x30] sm:$0xff] %vm6638_vm3, %v13300_v15 }
 0x31e   : > { %v6061_v23 = vrot.slane %v6060_v33, 4  ;;  %v7075_v35 = vrot.slane %v7073_v6, 4  ;;  %v7078_v0 = vrot.slane %v7076_v2, 5  ;;  %v7084_v34 = vrot.slane %v7082_v55, 5  ;;  %v5623_v2 = vld [vmem:[#allocation4 + $0xa8] sm:$0xf] }
 0x31f   : > { %v10623_v10 = vpop.eup %10622  ;;  %v6071_v16 = vrot.slane %v6070_v56, 4  ;;  %v7088_v36 = vrot.slane %v7086_v54, 4  ;;  %v7094_v37 = vrot.slane %v7092_v9, 5  ;;  %v7552_v20 = vrot.slane %v7411_v28, 5  ;;  %v8363_v6 = vpop.permute.xlu1 %8362  ;;  %v5616_v54 = vld [vmem:[#allocation4 + $0x9c] sm:$0xf] }
 0x320   : > { %v10625_v12 = vpop.eup %10624  ;;  %v5107_v25 = vmul.f32 %v10623_v10, %v13245_v5  ;;  %v6066_v53 = vsel %vm10896_vm12, %v6061_v23, %v6065_v60  ;;  %v7079_v43 = vor.u32 %v7078_v0, %v7075_v35  ;;  %v7555_v58 = vrot.slane %v7412_v7, 5  ;;  %8408 = vst.msk [vmem:[#allocation5 + $0x18] sm:$0xff] %vm8404_vm11, %v8363_v6  ;;  %v8451_v23 = vld [vmem:[#allocation4 + $0x90] sm:$0xe]  ;;  %v5627_v0 = vld [vmem:[#allocation4 + $0xb0] sm:$0x1] }
 0x321   : > { %v10627_v21 = vpop.eup %10626  ;;  %v5105_v41 = vmul.f32 %v10625_v12, %v13261_v51  ;;  %v6076_v50 = vsel %vm10896_vm12, %v6071_v16, %v6075_v39  ;;  %v7089_v1 = vor.u32 %v7088_v36, %v7084_v34  ;;  %v7553_v42 = vsel %vm10819_vm9, %v9865_v29, %v7552_v20  ;;  %8729 = vst.msk [vmem:[#allocation5 + $0x18] sm:$0xff] %vm8725_vm5, %v13315_v49  ;;  %v8452_v36 = vld [vmem:[#allocation4 + $0x94] sm:$0xf] }
 0x322   : > { %v10629_v5 = vpop.eup %10628  ;;  %v10050_v40 = vpack.c.bf16 %v5107_v25, %v5107_v25  ;;  %v5108_v61 = vmul.f32 %v10627_v21, %v13279_v24  ;;  %v9783_v52 = vcombine.low %v6066_v53, %v6076_v50  ;;  %v7080_v62 = vrot.slane %v7079_v43, 4  ;;  %v6780_v24 = vpop.permute.xlu0 %6779  ;;  %v5620_v25 = vld [vmem:[#allocation4 + $0xa4] sm:$0x1]  ;;  %v8453_v43 = vld [vmem:[#allocation4 + $0x98] sm:$0x1] }
 0x323   : > { %v10048_v48 = vpack.c.bf16 %v5105_v41, %v5105_v41  ;;  %v5106_v51 = vmul.f32 %v10629_v5, %v13283_v27  ;;  %v7090_v45 = vrot.slane %v7089_v1, 4  ;;  %v7554_v31 = vrot.slane %v7552_v20, 4  ;;  %6822 = vst.msk [vmem:[#allocation5 + $0x30] sm:$0xff] %vm6815_vm2, %v6780_v24  ;;  %v6368_v1 = vld [vmem:[#allocation4 + $0x88] sm:$0xf] }
 0x324   : > { %v5431_v60 = vshrl.u32 %v10050_v40, 16  ;;  %v5434_v63 = vshll.u32 %v10050_v40, 16  ;;  %v10051_v39 = vpack.c.bf16 %v5108_v61, %v5108_v61  ;;  %6287 = vrot.lane.b32.xlu1 %v9783_v52, %s10699_s19  ;;  %v7085_v33 = vsel %vm10896_vm12, %v7080_v62, %v7084_v34  ;;  %v6369_v52 = vld [vmem:[#allocation4 + $0x8c] sm:$0x1]  ;;  %v6370_v62 = vld [vmem:[#allocation4 + $0x90] sm:$0xe] }
 0x325   : > { %v5414_v55 = vshrl.u32 %v10048_v48, 16  ;;  %v5417_v28 = vshll.u32 %v10048_v48, 16  ;;  %v10049_v56 = vpack.c.bf16 %v5106_v51, %v5106_v51  ;;  %v7095_v15 = vsel %vm10896_vm12, %v7090_v45, %v7094_v37  ;;  %v6280_v48 = vpop.permute.xlu1 %6279 }
 0x326   : > { %v5433_v27 = vrot.slane %v5431_v60, 7  ;;  %v5439_v9 = vshrl.u32 %v10051_v39, 16  ;;  %v5442_v7 = vshll.u32 %v10051_v39, 16  ;;  %v9846_v29 = vcombine.low %v7085_v33, %v7095_v15  ;;  %v6371_v60 = vld [vmem:[#allocation4 + $0x94] sm:$0xf]  ;;  %6323 = vst.msk [vmem:[#allocation5 + $0x28] sm:$0xff] %vm13895_vm7, %v6280_v48 }
 0x327   : > { %v5416_v35 = vrot.slane %v5414_v55, 7  ;;  %v5422_v34 = vshrl.u32 %v10049_v56, 16  ;;  %v5425_v10 = vshll.u32 %v10049_v56, 16  ;;  %v7556_v16 = vsel %vm10819_vm9, %v7554_v31, %v7555_v58  ;;  %v8449_v55 = vld [vmem:[#allocation4 + $0x88] sm:$0xf]  ;;  %6644 = vst.msk [vmem:[#allocation5 + $0x28] sm:$0xff] %vm6638_vm3, %v13313_v22 }
 0x328   : > { %v5436_v37 = vor.u32 %v5434_v63, %v5433_v27  ;;  %v5437_v20 = vrot.slane %v5433_v27, 4  ;;  %v5441_v12 = vrot.slane %v5439_v9, 7  ;;  %7328 = vrot.lane.b32.xlu0 %v9846_v29, %s10704_s24  ;;  %v9881_v53 = vcombine.low %v7553_v42, %v7556_v16  ;;  %v6372_v63 = vld [vmem:[#allocation4 + $0x98] sm:$0x1]  ;;  %v6865_v9 = vld [vmem:[#allocation4 + $0x90] sm:$0xf] }
 0x329   : > { %v5419_v21 = vor.u32 %v5417_v28, %v5416_v35  ;;  %v5420_v41 = vrot.slane %v5416_v35, 4  ;;  %v5424_v49 = vrot.slane %v5422_v34, 7  ;;  %v9928_v50 = vrot.slane %v8451_v23, 9  ;;  %6821 = vst.msk [vmem:[#allocation5 + $0x28] sm:$0xff] %vm6815_vm2, %v13091_v4  ;;  %v6866_v35 = vld [vmem:[#allocation4 + $0x94] sm:$0xf] }
 0x32a   : > { %v5624_v5 = vsel %vm12489_vm1, %v5436_v37, %v5623_v2  ;;  %v5444_v40 = vor.u32 %v5442_v7, %v5441_v12  ;;  %v5446_v58 = vrot.slane %v5441_v12, 4  ;;  %7655 = vrot.lane.b32.xlu1 %v9881_v53, %s10708_s27  ;;  %v8589_v61 = vrot.slane %v8452_v36, 5  ;;  %v8448_v2 = vld [vmem:[#allocation4 + $0x84] sm:$0xe]  ;;  %7366 = vst.msk [vmem:[#allocation5 + $0x28] sm:$0xff] %vm7360_vm13, %v13335_v14 }
 0x32b   : > { %5625 = vst [vmem:[#allocation4 + $0xa8] sm:$0xf] %v5624_v5  ;;  %v5617_v42 = vsel %vm12489_vm1, %v5419_v21, %v5616_v54  ;;  %v5427_v51 = vor.u32 %v5425_v10, %v5424_v49  ;;  %v5429_v45 = vrot.slane %v5424_v49, 4  ;;  %v8592_v31 = vrot.slane %v8453_v43, 5  ;;  %v8450_v54 = vld [vmem:[#allocation4 + $0x8c] sm:$0x1] }
 0x32c   : > { %5618 = vst [vmem:[#allocation4 + $0x9c] sm:$0xf] %v5617_v42  ;;  %v5445_v39 = vsel %vm10999_vm15, %v5437_v20, %v5444_v40  ;;  %v5628_v33 = vsel %vm12352_vm8, %v5446_v58, %v5627_v0  ;;  %v8590_v6 = vsel %vm10819_vm9, %v9928_v50, %v8589_v61  ;;  %v8591_v24 = vrot.slane %v8589_v61, 4  ;;  %v7321_v0 = vpop.permute.xlu0 %7320  ;;  %v6867_v36 = vld [vmem:[#allocation4 + $0x98] sm:$0x1]  ;;  %7687 = vst.msk [vmem:[#allocation5 + $0x28] sm:$0xff] %vm7681_vm6, %v13298_v44 }
 0x32d   : > { %vm13969_vm14 = vcmask 60416   ;;  %5629 = vst [vmem:[#allocation4 + $0xb0] sm:$0x1] %v5628_v33  ;;  %v5428_v28 = vsel %vm10999_vm15, %v5420_v41, %v5427_v51  ;;  %v5621_v56 = vsel %vm12352_vm8, %v5429_v45, %v5620_v25  ;;  %v9801_v15 = vrot.slane %v6367_v17, 9  ;;  %v7407_v37 = vld [vmem:[#allocation4 + $0x84] sm:$0xe] }
 0x32e   : > { %5626 = vst.msk [vmem:[#allocation4 + $0xac] sm:$0xf] %vm13969_vm14, %v5445_v39  ;;  %v6509_v27 = vrot.slane %v6368_v1, 5  ;;  %vm13970_vm7 = vmmov %vm13969_vm14  ;;  %v8593_v22 = vsel %vm10819_vm9, %v8591_v24, %v8592_v31  ;;  %v6512_v7 = vrot.slane %v6369_v52, 5  ;;  %v9802_v29 = vrot.slane %v6370_v62, 9 }
 0x32f   : > { %5619 = vst.msk [vmem:[#allocation4 + $0xa0] sm:$0xf] %vm13970_vm7, %v5428_v28  ;;  %5622 = vst [vmem:[#allocation4 + $0xa4] sm:$0x1] %v5621_v56  ;;  %v6516_v23 = vrot.slane %v6371_v60, 5  ;;  %v9944_v34 = vcombine.low %v8590_v6, %v8593_v22  ;;  %v6519_v4 = vrot.slane %v6372_v63, 5 }
 0x330   : > { %v6510_v10 = vsel %vm10819_vm9, %v9801_v15, %v6509_v27  ;;  %v6511_v16 = vrot.slane %v6509_v27, 4  ;;  %7365 = vst.msk [vmem:[#allocation5 + $0x20] sm:$0xff] %vm7360_vm13, %v7321_v0  ;;  %v9927_v25 = vrot.slane %v8448_v2, 9  ;;  %v8582_v14 = vrot.slane %v8449_v55, 5  ;;  %v7408_v53 = vld [vmem:[#allocation4 + $0x88] sm:$0xf]  ;;  %v13439_v55 = vpop.permute.xlu0 %8689 }
 0x331   : > { %v6517_v20 = vsel %vm10819_vm9, %v9802_v29, %v6516_v23  ;;  %v6518_v12 = vrot.slane %v6516_v23, 4  ;;  %7865 = vst.msk [vmem:[#allocation5 + $0x28] sm:$0xff] %vm13896_vm4, %v13347_v32  ;;  %8697 = vrot.lane.b32.xlu0 %v9944_v34, %s10709_s28  ;;  %v8585_v43 = vrot.slane %v8450_v54, 5  ;;  %v7145_v17 = vshrl.u32 %v6865_v9, 16  ;;  %v7409_v41 = vld [vmem:[#allocation4 + $0x8c] sm:$0x1] }
 0x332   : > { %7686 = vst.msk [vmem:[#allocation5 + $0x20] sm:$0xff] %vm7681_vm6, %v13325_v3  ;;  %v6513_v44 = vsel %vm10819_vm9, %v6511_v16, %v6512_v7  ;;  %v7148_v21 = vshll.u32 %v6865_v9, 16  ;;  %v8583_v32 = vsel %vm10819_vm9, %v9927_v25, %v8582_v14  ;;  %v8584_v3 = vrot.slane %v8582_v14, 4  ;;  %v10371_v48 = vld [vmem:[%s13880_s6 + $0x20] ss:$0 sps:$4 sm:$0xff]   ;;  %v10149_v42 = vpop.f32.mrb[28].mxu0 }
 0x333   : > { %7864 = vst.msk [vmem:[#allocation5 + $0x20] sm:$0xff] %vm13896_vm4, %v13133_v30  ;;  %v9817_v49 = vcombine.low %v6510_v10, %v6513_v44  ;;  %v6520_v50 = vsel %vm10819_vm9, %v6518_v12, %v6519_v4  ;;  %v7147_v5 = vrot.slane %v7145_v17, 4  ;;  %v7154_v58 = vshll.u32 %v6866_v35, 16  ;;  %v10676_v63 = vld [vmem:[%s13879_s5] ss:$0 sm:$0xff]  ;;  %v4796_v33 = vpop.f32.mrb[29].mxu0 }
 0x334   : > { %8409 = vst.msk [vmem:[#allocation5 + $0x20] sm:$0xff] %vm8404_vm11, %v13353_v18  ;;  %v9818_v1 = vcombine.low %v6517_v20, %v6520_v50  ;;  %v7150_v40 = vrot.slane %v7148_v21, 5  ;;  %v8586_v30 = vsel %vm10819_vm9, %v8584_v3, %v8585_v43  ;;  %v7158_v61 = vshrl.u32 %v6866_v35, 16  ;;  %v13433_v18 = vpop.permute.xlu1 %7647  ;;  %v10150_v56 = vpop.f32.mrb[30].mxu0  ;;  %v10677_v9 = vld [vmem:[%s12395_s23] ss:$0 sm:$0xff] }
 0x335   : > { %8730 = vst.msk [vmem:[#allocation5 + $0x20] sm:$0xff] %vm8725_vm5, %v13231_v46  ;;  %6612 = vrot.lane.b32.xlu1 %v9817_v49, %s10705_s25  ;;  %v7164_v52 = vshll.u32 %v6867_v36, 16  ;;  %v9864_v62 = vrot.slane %v7407_v37, 9  ;;  %v10368_v51 = vld [vmem:[#allocation4 + $0xa8] sm:$0xff]   ;;  %v9943_v45 = vcombine.low %v8583_v32, %v8586_v30  ;;  %v7156_v31 = vrot.slane %v7154_v58, 5  ;;  %v4799_v29 = vpop.f32.mrb[31].mxu0 }
 0x336   : > { %6614 = vrot.lane.b32.xlu0 %v9818_v1, %s10705_s25  ;;  %v7151_v46 = vor.u32 %v7150_v40, %v7147_v5  ;;  %v7545_v60 = vrot.slane %v7408_v53, 5  ;;  %v4849_v39 = vmul.f32 %v10676_v63, %v10149_v42  ;;  %v7160_v6 = vrot.slane %v7158_v61, 4  ;;  %v10387_v35 = vld [vmem:[#allocation4 + $0xa8] sm:$0xff]   ;;  %v8743_v12 = vld [vmem:[#allocation5 + $0x8] sm:$0xff]  ;;  %v5825_v25 = vld [vmem:[#allocation4 + $0x90] sm:$0xf]  ;;  %v13472_v61 = vpop.permute.xlu0 %6606 }
 0x337   : > { %v7166_v24 = vrot.slane %v7164_v52, 5  ;;  %v7548_v2 = vrot.slane %v7409_v41, 5  ;;  %v4847_v28 = vmul.f32 %v10676_v63, %v4796_v33  ;;  %v4850_v7 = vmul.f32 %v10676_v63, %v10150_v56  ;;  %v10678_v17 = vld [vmem:[%s10826_s16] sm:$0xff]  ;;  %v10679_v21 = vld [vmem:[%s10826_s16 + $0x8] sm:$0xff]  ;;  %v10388_v50 = vld [vmem:[#allocation4 + $0x9c] sm:$0xff]  }
 0x338   : > { %v7152_v15 = vrot.slane %v7151_v46, 4  ;;  %v7546_v27 = vsel %vm10819_vm9, %v9864_v62, %v7545_v60  ;;  %v7547_v54 = vrot.slane %v7545_v60, 4  ;;  %v13444_v22 = vadd.f32 %v10677_v9, %v4849_v39  ;;  %v13458_v14 = vpop.permute.xlu1 %6604  ;;  %v5826_v49 = vld [vmem:[#allocation4 + $0x94] sm:$0xf]  ;;  %v10680_v1 = vld [vmem:[%s10826_s16 + $0x10] sm:$0xff]  ;;  %v10681_v5 = vld [vmem:[%s10826_s16 + $0x18] sm:$0xff] }
 0x339   : > { %6793 = vrot.lane.b32.xlu1 %v10368_v51, %s10702_s22  ;;  %v7161_v23 = vor.u32 %v7160_v6, %v7156_v31  ;;  %vm9072_vm7 = vcmask 1043456   ;;  %v13447_v0 = vadd.f32 %v10677_v9, %v4847_v28  ;;  %v4848_v34 = vmul.f32 %v10676_v63, %v4799_v29  ;;  %v5827_v58 = vld [vmem:[#allocation4 + $0x98] sm:$0x1]  ;;  %v7906_v30 = vld [vmem:[#allocation4 + $0x90] sm:$0xf]  ;;  %v8744_v42 = vld [vmem:[#allocation5 + $0x10] sm:$0xff] }
 0x33a   : > { %8695 = vrot.lane.b32.xlu0 %v9943_v45, %s10709_s28  ;;  %v7157_v10 = vsel %vm10896_vm12, %v7152_v15, %v7156_v31  ;;  %v7549_v16 = vsel %vm10819_vm9, %v7547_v54, %v7548_v2  ;;  %v9724_v4 = vmul.f32 -1.442695, %v13444_v22  ;;  %v13455_v36 = vadd.f32 %v10677_v9, %v4850_v7  ;;  %10264 = vmatprep.subr.msk.bf16.mxu1 %vm9072_vm7, %v10371_v48  ;;  %v7907_v31 = vld [vmem:[#allocation4 + $0x94] sm:$0xf]  ;;  %v10373_v60 = vld [vmem:[#allocation4 + $0xa8] sm:$0xff]   ;;  %v10372_v54 = vld [vmem:[#allocation4 + $0x9c] sm:$0xff]  }
 0x33b   : > { %v7162_v37 = vrot.slane %v7161_v23, 4  ;;  %v9880_v20 = vcombine.low %v7546_v27, %v7549_v16  ;;  %vm13971_vm14 = vcmask 64512   ;;  %v9722_v53 = vmul.f32 -1.442695, %v13447_v0  ;;  %v7908_v33 = vld [vmem:[#allocation4 + $0x98] sm:$0x1] }
 0x33c   : > { %5787 = vst.msk [vmem:[#allocation5 + $0x70] sm:$0xff] %vm13971_vm14, %v10387_v35  ;;  %v13462_v44 = vadd.f32 %v10677_v9, %v4848_v34  ;;  %v9074_v43 = vsel %vm9072_vm7, %v10371_v48, 0  ;;  %v8767_v41 = vpack.c.bf16 %v10679_v21, %v10678_v17  ;;  %10630 = vpow2.f32 %v9724_v4  ;;  %5786 = vst.msk [vmem:[#allocation5 + $0x68] sm:$0xff] %vm13971_vm14, %v10388_v50  ;;  %v7903_v15 = vld [vmem:[#allocation4 + $0x84] sm:$0xf]  ;;  %v13482_v27 = vpop.permute.xlu1 %6785 }
 0x33d   : > { %v9725_v32 = vmul.f32 -1.442695, %v13455_v36  ;;  %v7167_v3 = vsel %vm10896_vm12, %v7162_v37, %v7166_v24  ;;  %10194 = vmatpush3.bf16.msra.mxu1 %v9074_v43  ;;  %v8768_v40 = vpack.c.bf16 %v10681_v5, %v10680_v1  ;;  %10632 = vpow2.f32 %v9722_v53  ;;  %v7904_v4 = vld [vmem:[#allocation4 + $0x88] sm:$0xf]  ;;  %v13485_v37 = vpop.permute.xlu0 %8687  ;;  %v6872_v47 = vld [vmem:[#allocation4 + $0xac] sm:$0xf] }
 0x33e   : > { %v9723_v52 = vmul.f32 -1.442695, %v13462_v44  ;;  %v9849_v62 = vcombine.low %v7157_v10, %v7167_v3  ;;  %7653 = vrot.lane.b32.xlu0 %v9880_v20, %s10708_s27  ;;  %vm13972_vm7 = vcmask 31744   ;;  %v6126_v48 = vshrl.u32 %v5825_v25, 16 }
 0x33f   : > { %10153 = vmatprep.mubr.msk.bf16.mxu0 %vm13972_vm7, %v8767_v41  ;;  %10634 = vpow2.f32 %v9725_v32  ;;  %vm13973_vm4 = vmmov %vm13972_vm7  ;;  %v6129_v51 = vshll.u32 %v5825_v25, 16  ;;  %v6135_v45 = vshll.u32 %v5826_v49, 16  ;;  %v6139_v46 = vshrl.u32 %v5826_v49, 16  ;;  %v8745_v49 = vld [vmem:[#allocation5 + $0x18] sm:$0xff] }
 0x340   : > { %10154 = vmatmul.mubr.msk.bf16.vlgmr.msra.gmra.mrb[32].mxu0 %vm13973_vm4, %v8768_v40  ;;  %10636 = vpow2.f32 %v9723_v52  ;;  %7334 = vrot.lane.b32.xlu1 %v9849_v62, %s10704_s24  ;;  %v6128_v63 = vrot.slane %v6126_v48, 4  ;;  %v6145_v39 = vshll.u32 %v5827_v58, 16  ;;  %v8165_v6 = vshrl.u32 %v7906_v30, 16  ;;  %v8746_v40 = vld [vmem:[#allocation5 + $0x20] sm:$0xff] }
 0x341   : > { %10196 = vmatmul.mubr.msk.bf16.vlgmr.msra.gmra.mrb[20].mxu1 %vm9023_vm10, %v8743_v12  ;;  %v6131_v24 = vrot.slane %v6129_v51, 5  ;;  %v6137_v2 = vrot.slane %v6135_v45, 5  ;;  %v6141_v28 = vrot.slane %v6139_v46, 4  ;;  %v8168_v56 = vshll.u32 %v7906_v30, 16  ;;  %v13488_v50 = vpop.permute.xlu1 %7326 }
 0x342   : > { %10199 = vmatprep.mubr.msk.bf16.mxu1 %vm9023_vm10, %v8744_v42  ;;  %7835 = vrot.lane.b32.xlu0 %v10373_v60, %s10707_s18  ;;  %v6147_v9 = vrot.slane %v6145_v39, 5  ;;  %v8167_v7 = vrot.slane %v8165_v6, 4  ;;  %v8174_v29 = vshll.u32 %v7907_v31, 16  ;;  %v8178_v23 = vshrl.u32 %v7907_v31, 16  ;;  %v7905_v31 = vld [vmem:[#allocation4 + $0x8c] sm:$0x1] }
 0x343   : > { %v6132_v35 = vor.u32 %v6131_v24, %v6128_v63  ;;  %v6142_v34 = vor.u32 %v6141_v28, %v6137_v2  ;;  %v8170_v10 = vrot.slane %v8168_v56, 5  ;;  %v8184_v16 = vshll.u32 %v7908_v33, 16  ;;  %v13498_v28 = vpop.permute.xlu0 %7645 }
 0x344   : > { %7833 = vrot.lane.b32.xlu1 %v10372_v54, %s10707_s18  ;;  %v8176_v20 = vrot.slane %v8174_v29, 5  ;;  %v8180_v12 = vrot.slane %v8178_v23, 4  ;;  %v8141_v25 = vshrl.u32 %v7903_v15, 16  ;;  %v8144_v53 = vshll.u32 %v7903_v15, 16 }
 0x345   : > { %v6133_v43 = vrot.slane %v6132_v35, 4  ;;  %v6143_v17 = vrot.slane %v6142_v34, 4  ;;  %v8171_v21 = vor.u32 %v8170_v10, %v8167_v7  ;;  %v8186_v41 = vrot.slane %v8184_v16, 5  ;;  %v5823_v7 = vld [vmem:[#allocation4 + $0x88] sm:$0xf]  ;;  %v13503_v10 = vpop.permute.xlu1 %7825 }
 0x346   : > { %v8181_v32 = vor.u32 %v8180_v12, %v8176_v20  ;;  %v8143_v3 = vrot.slane %v8141_v25, 4  ;;  %v8146_v1 = vrot.slane %v8144_v53, 5  ;;  %v8150_v5 = vshll.u32 %v7904_v4, 16  ;;  %v10631_v58 = vpop.eup %10630  ;;  %v5824_v34 = vld [vmem:[#allocation4 + $0x8c] sm:$0x1] }
 0x347   : > { %v6138_v30 = vsel %vm10896_vm12, %v6133_v43, %v6137_v2  ;;  %v6148_v52 = vsel %vm10896_vm12, %v6143_v17, %v6147_v9  ;;  %v8172_v62 = vrot.slane %v8171_v21, 4  ;;  %v8154_v48 = vshrl.u32 %v7904_v4, 16  ;;  %v10633_v42 = vpop.eup %10632  ;;  %v5822_v2 = vld [vmem:[#allocation4 + $0x84] sm:$0xf]  ;;  %v6863_v25 = vld [vmem:[#allocation4 + $0x88] sm:$0xf] }
 0x348   : > { %v5015_v51 = vadd.f32 1.0, %v10631_v58  ;;  %v9786_v45 = vcombine.low %v6138_v30, %v6148_v52  ;;  %v8182_v46 = vrot.slane %v8181_v32, 4  ;;  %v8147_v60 = vor.u32 %v8146_v1, %v8143_v3  ;;  %v6862_v12 = vld [vmem:[#allocation4 + $0x84] sm:$0xf]  ;;  %v6864_v21 = vld [vmem:[#allocation4 + $0x8c] sm:$0x1] }
 0x349   : > { %10200 = vmatmul.mubr.msk.bf16.gmra.mrb[24].mxu1 %vm9023_vm10, %v8745_v49  ;;  %v10635_v63 = vpop.eup %10634  ;;  %v5013_v39 = vadd.f32 1.0, %v10633_v42  ;;  %v8177_v33 = vsel %vm10896_vm12, %v8172_v62, %v8176_v20  ;;  %v8152_v6 = vrot.slane %v8150_v5, 5  ;;  %v8156_v24 = vrot.slane %v8154_v48, 4  ;;  %v10374_v49 = vld [vmem:[#allocation4 + $0x9c] sm:$0xff]   ;;  %v7416_v52 = vld [vmem:[#allocation4 + $0xa8] sm:$0xe]  ;;  %v13508_v62 = vpop.permute.xlu0 %7827 }
 0x34a   : > { %10203 = vmatprep.mubr.msk.bf16.mxu1 %vm9023_vm10, %v8746_v40  ;;  %v10637_v56 = vpop.eup %10636  ;;  %10638 = vrcp.f32 %v5015_v51  ;;  %v5016_v15 = vadd.f32 1.0, %v10635_v63  ;;  %6293 = vrot.lane.b32.xlu1 %v9786_v45, %s10699_s19  ;;  %v8187_v54 = vsel %vm10896_vm12, %v8182_v46, %v8186_v41  ;;  %v8148_v9 = vrot.slane %v8147_v60, 4  ;;  %v7417_v46 = vld [vmem:[#allocation4 + $0xac] sm:$0xf] }
 0x34b   : > { %10640 = vrcp.f32 %v5013_v39  ;;  %v5014_v29 = vadd.f32 1.0, %v10637_v56  ;;  %v9912_v23 = vcombine.low %v8177_v33, %v8187_v54  ;;  %v8157_v35 = vor.u32 %v8156_v24, %v8152_v6  ;;  %v7418_v33 = vld [vmem:[#allocation4 + $0xb0] sm:$0x1] }
 0x34c   : > { %10642 = vrcp.f32 %v5016_v15  ;;  %v8153_v16 = vsel %vm10896_vm12, %v8148_v9, %v8152_v6  ;;  %v8160_v4 = vshll.u32 %v7905_v31, 16  ;;  %v6102_v20 = vshrl.u32 %v5822_v2, 16 }
 0x34d   : > { %10644 = vrcp.f32 %v5014_v29  ;;  %8376 = vrot.lane.b32.xlu0 %v9912_v23, %s10710_s29  ;;  %v8158_v53 = vrot.slane %v8157_v35, 4  ;;  %v6105_v43 = vshll.u32 %v5822_v2, 16  ;;  %v6111_v17 = vshll.u32 %v5823_v7, 16  ;;  %v6286_v6 = vpop.permute.xlu1 %6285 }
 0x34e   : > { %v8162_v41 = vrot.slane %v8160_v4, 5  ;;  %v6104_v32 = vrot.slane %v6102_v20, 4  ;;  %v6115_v3 = vshrl.u32 %v5823_v7, 16  ;;  %v6121_v1 = vshll.u32 %v5824_v34, 16 }
 0x34f   : > { %v6107_v5 = vrot.slane %v6105_v43, 5  ;;  %v6113_v40 = vrot.slane %v6111_v17, 5  ;;  %v7121_v58 = vshrl.u32 %v6862_v12, 16  ;;  %v7124_v30 = vshll.u32 %v6862_v12, 16 }
 0x350   : > { %v8163_v48 = vsel %vm10896_vm12, %v8158_v53, %v8162_v41  ;;  %v6117_v42 = vrot.slane %v6115_v3, 4  ;;  %v6123_v51 = vrot.slane %v6121_v1, 5  ;;  %v7130_v45 = vshll.u32 %v6863_v25, 16 }
 0x351   : > { %v9911_v31 = vcombine.low %v8153_v16, %v8163_v48  ;;  %6791 = vrot.lane.b32.xlu0 %v10374_v49, %s10702_s22  ;;  %v6108_v60 = vor.u32 %v6107_v5, %v6104_v32  ;;  %v7123_v63 = vrot.slane %v7121_v58, 4  ;;  %v7126_v39 = vrot.slane %v7124_v30, 5  ;;  %v13522_v17 = vpop.permute.xlu0 %8368 }
 0x352   : > { %v6118_v24 = vor.u32 %v6117_v42, %v6113_v40  ;;  %v7132_v2 = vrot.slane %v7130_v45, 5  ;;  %v7134_v56 = vshrl.u32 %v6863_v25, 16  ;;  %v7140_v15 = vshll.u32 %v6864_v21, 16 }
 0x353   : > { %vm13974_vm4 = vcmask 130112   ;;  %8374 = vrot.lane.b32.xlu1 %v9911_v31, %s10710_s29  ;;  %v6109_v54 = vrot.slane %v6108_v60, 4  ;;  %v7127_v9 = vor.u32 %v7126_v39, %v7123_v63  ;;  %v9867_v7 = vrot.slane %v7416_v52, 9  ;;  %v5637_v60 = vld [vmem:[#allocation4 + $0xc0] sm:$0xf] }
 0x354   : > { %6326 = vst.msk [vmem:[#allocation5 + $0x40] sm:$0xff] %vm13974_vm4, %v6286_v6  ;;  %v7566_v29 = vrot.slane %v7417_v46, 5  ;;  %v10639_v23 = vpop.eup %10638  ;;  %v6119_v35 = vrot.slane %v6118_v24, 4  ;;  %v7136_v34 = vrot.slane %v7134_v56, 4  ;;  %v7142_v16 = vrot.slane %v7140_v15, 5 }
 0x355   : > { %6647 = vst.msk [vmem:[#allocation5 + $0x40] sm:$0xff] %vm6638_vm3, %v13472_v61  ;;  %v7569_v4 = vrot.slane %v7418_v33, 5  ;;  %v10641_v20 = vpop.eup %10640  ;;  %v5111_v12 = vmul.f32 %v10639_v23, %v13444_v22  ;;  %v6114_v25 = vsel %vm10896_vm12, %v6109_v54, %v6113_v40  ;;  %v7128_v53 = vrot.slane %v7127_v9, 4  ;;  %v8457_v46 = vld [vmem:[#allocation4 + $0xa8] sm:$0xe]  ;;  %v8367_v31 = vpop.permute.xlu1 %8366 }
 0x356   : > { %v7567_v43 = vsel %vm10819_vm9, %v9867_v7, %v7566_v29  ;;  %v10643_v21 = vpop.eup %10642  ;;  %v5109_v61 = vmul.f32 %v10641_v20, %v13447_v0  ;;  %v6124_v41 = vsel %vm10896_vm12, %v6119_v35, %v6123_v51  ;;  %v7137_v49 = vor.u32 %v7136_v34, %v7132_v2  ;;  %v8458_v6 = vld [vmem:[#allocation4 + $0xac] sm:$0xf]  ;;  %8410 = vst.msk [vmem:[#allocation5 + $0x28] sm:$0xff] %vm8404_vm11, %v8367_v31  ;;  %v8459_v9 = vld [vmem:[#allocation4 + $0xb0] sm:$0x1] }
 0x357   : > { %v7568_v32 = vrot.slane %v7566_v29, 4  ;;  %v10645_v3 = vpop.eup %10644  ;;  %v10054_v1 = vpack.c.bf16 %v5111_v12, %v5111_v12  ;;  %v5112_v22 = vmul.f32 %v10643_v21, %v13455_v36  ;;  %v9785_v5 = vcombine.low %v6114_v25, %v6124_v41  ;;  %v6784_v36 = vpop.permute.xlu0 %6783  ;;  %8731 = vst.msk [vmem:[#allocation5 + $0x28] sm:$0xff] %vm8725_vm5, %v13485_v37  ;;  %v5641_v29 = vld [vmem:[#allocation4 + $0xc8] sm:$0x1]  ;;  %v5634_v12 = vld [vmem:[#allocation4 + $0xbc] sm:$0x1] }
 0x358   : > { %v7133_v40 = vsel %vm10896_vm12, %v7128_v53, %v7132_v2  ;;  %v10052_v58 = vpack.c.bf16 %v5109_v61, %v5109_v61  ;;  %v5110_v30 = vmul.f32 %v10645_v3, %v13462_v44  ;;  %v7138_v52 = vrot.slane %v7137_v49, 4  ;;  %6824 = vst.msk [vmem:[#allocation5 + $0x40] sm:$0xff] %vm6815_vm2, %v6784_v36  ;;  %v5630_v2 = vld [vmem:[#allocation4 + $0xb4] sm:$0xf]  ;;  %v6373_v53 = vld [vmem:[#allocation4 + $0x9c] sm:$0xe] }
 0x359   : > { %v7570_v0 = vsel %vm10819_vm9, %v7568_v32, %v7569_v4  ;;  %v5465_v48 = vshrl.u32 %v10054_v1, 16  ;;  %v5468_v42 = vshll.u32 %v10054_v1, 16  ;;  %v10055_v51 = vpack.c.bf16 %v5112_v22, %v5112_v22  ;;  %6291 = vrot.lane.b32.xlu1 %v9785_v5, %s10699_s19  ;;  %v6374_v37 = vld [vmem:[#allocation4 + $0xa0] sm:$0xf]  ;;  %v6375_v22 = vld [vmem:[#allocation4 + $0xa4] sm:$0x1] }
 0x35a   : > { %v9883_v45 = vcombine.low %v7567_v43, %v7570_v0  ;;  %v5448_v63 = vshrl.u32 %v10052_v58, 16  ;;  %v5451_v39 = vshll.u32 %v10052_v58, 16  ;;  %v10053_v33 = vpack.c.bf16 %v5110_v30, %v5110_v30  ;;  %v6376_v5 = vld [vmem:[#allocation4 + $0xa8] sm:$0xe]  ;;  %v6377_v0 = vld [vmem:[#allocation4 + $0xac] sm:$0xf] }
 0x35b   : > { %v7143_v44 = vsel %vm10896_vm12, %v7138_v52, %v7142_v16  ;;  %v5467_v24 = vrot.slane %v5465_v48, 7  ;;  %v5473_v56 = vshrl.u32 %v10055_v51, 16  ;;  %v5476_v15 = vshll.u32 %v10055_v51, 16  ;;  %v6378_v48 = vld [vmem:[#allocation4 + $0xb0] sm:$0x1] }
 0x35c   : > { %v9848_v54 = vcombine.low %v7133_v40, %v7143_v44  ;;  %v5450_v7 = vrot.slane %v5448_v63, 7  ;;  %v5456_v23 = vshrl.u32 %v10053_v33, 16  ;;  %v5459_v35 = vshll.u32 %v10053_v33, 16  ;;  %v8454_v31 = vld [vmem:[#allocation4 + $0x9c] sm:$0xe] }
 0x35d   : > { %v9930_v34 = vrot.slane %v8457_v46, 9  ;;  %v5470_v16 = vor.u32 %v5468_v42, %v5467_v24  ;;  %v5471_v4 = vrot.slane %v5467_v24, 4  ;;  %v5475_v20 = vrot.slane %v5473_v56, 7  ;;  %7659 = vrot.lane.b32.xlu1 %v9883_v45, %s10708_s27  ;;  %v8455_v36 = vld [vmem:[#allocation4 + $0xa0] sm:$0xf] }
 0x35e   : > { %7332 = vrot.lane.b32.xlu0 %v9848_v54, %s10704_s24  ;;  %v8603_v25 = vrot.slane %v8458_v6, 5  ;;  %v5453_v43 = vor.u32 %v5451_v39, %v5450_v7  ;;  %v5454_v21 = vrot.slane %v5450_v7, 4  ;;  %v5458_v61 = vrot.slane %v5456_v23, 7  ;;  %v8456_v44 = vld [vmem:[#allocation4 + $0xa4] sm:$0x1] }
 0x35f   : > { %v8606_v41 = vrot.slane %v8459_v9, 5  ;;  %v5638_v49 = vsel %vm12489_vm1, %v5470_v16, %v5637_v60  ;;  %v5478_v32 = vor.u32 %v5476_v15, %v5475_v20  ;;  %v5480_v3 = vrot.slane %v5475_v20, 4  ;;  %v6284_v60 = vpop.permute.xlu1 %6283  ;;  %v6871_v6 = vld [vmem:[#allocation4 + $0xa8] sm:$0xf]  ;;  %v8747_v24 = vld [vmem:[#allocation5 + $0x28] sm:$0xff] }
 0x360   : > { %v8604_v1 = vsel %vm10819_vm9, %v9930_v34, %v8603_v25  ;;  %5639 = vst [vmem:[#allocation4 + $0xc0] sm:$0xf] %v5638_v49  ;;  %v5631_v40 = vsel %vm12489_vm1, %v5453_v43, %v5630_v2  ;;  %v5461_v58 = vor.u32 %v5459_v35, %v5458_v61  ;;  %v5463_v30 = vrot.slane %v5458_v61, 4  ;;  %vm13976_vm1 = vmmov %vm13974_vm4  ;;  %10204 = vmatmul.mubr.msk.bf16.gmra.mrb[28].mxu1 %vm9023_vm10, %v8747_v24  ;;  %v6873_v23 = vld [vmem:[#allocation4 + $0xb0] sm:$0x1]  ;;  %v7325_v35 = vpop.permute.xlu0 %7324 }
 0x361   : > { %v8605_v52 = vrot.slane %v8603_v25, 4  ;;  %5632 = vst [vmem:[#allocation4 + $0xb4] sm:$0xf] %v5631_v40  ;;  %v5479_v42 = vsel %vm10999_vm15, %v5471_v4, %v5478_v32  ;;  %v5642_v51 = vsel %vm12352_vm8, %v5480_v3, %v5641_v29  ;;  %v9803_v45 = vrot.slane %v6373_v53, 9  ;;  %6325 = vst.msk [vmem:[#allocation5 + $0x38] sm:$0xff] %vm13976_vm1, %v6284_v60 }
 0x362   : > { %v6523_v46 = vrot.slane %v6374_v37, 5  ;;  %vm13975_vm7 = vcmask 60416   ;;  %5643 = vst [vmem:[#allocation4 + $0xc8] sm:$0x1] %v5642_v51  ;;  %v5462_v19 = vsel %vm10999_vm15, %v5454_v21, %v5461_v58  ;;  %v5635_v63 = vsel %vm12352_vm8, %v5463_v30, %v5634_v12  ;;  %6646 = vst.msk [vmem:[#allocation5 + $0x38] sm:$0xff] %vm6638_vm3, %v13458_v14  ;;  %v10682_v51 = vld [vmem:[%s10826_s16 + $0x20] sm:$0xff] }
 0x363   : > { %5640 = vst.msk [vmem:[#allocation4 + $0xc4] sm:$0xf] %vm13975_vm7, %v5479_v42  ;;  %v8607_v39 = vsel %vm10819_vm9, %v8605_v52, %v8606_v41  ;;  %v6526_v33 = vrot.slane %v6375_v22, 5  ;;  %vm13977_vm14 = vmmov %vm13975_vm7  ;;  %v9804_v15 = vrot.slane %v6376_v5, 9  ;;  %v6530_v54 = vrot.slane %v6377_v0, 5 }
 0x364   : > { %5633 = vst.msk [vmem:[#allocation4 + $0xb8] sm:$0xf] %vm13977_vm14, %v5462_v19  ;;  %5636 = vst [vmem:[#allocation4 + $0xbc] sm:$0x1] %v5635_v63  ;;  %v9946_v2 = vcombine.low %v8604_v1, %v8607_v39  ;;  %v6524_v26 = vsel %vm10819_vm9, %v9803_v45, %v6523_v46  ;;  %v6525_v56 = vrot.slane %v6523_v46, 4  ;;  %v6533_v9 = vrot.slane %v6378_v48, 5  ;;  %v13595_v48 = vpop.permute.xlu1 %7651 }
 0x365   : > { %v9929_v7 = vrot.slane %v8454_v31, 9  ;;  %v8596_v29 = vrot.slane %v8455_v36, 5  ;;  %6823 = vst.msk [vmem:[#allocation5 + $0x38] sm:$0xff] %vm6815_vm2, %v13323_v59  ;;  %v8599_v16 = vrot.slane %v8456_v44, 5  ;;  %v7193_v4 = vshrl.u32 %v6871_v6, 16  ;;  %v10683_v45 = vld [vmem:[%s10826_s16 + $0x28] sm:$0xff] }
 0x366   : > { %8701 = vrot.lane.b32.xlu0 %v9946_v2, %s10709_s28  ;;  %v6527_v34 = vsel %vm10819_vm9, %v6525_v56, %v6526_v33  ;;  %v7196_v20 = vshll.u32 %v6871_v6, 16  ;;  %v7413_v14 = vld [vmem:[#allocation4 + $0x9c] sm:$0xe]  ;;  %7368 = vst.msk [vmem:[#allocation5 + $0x38] sm:$0xff] %vm7360_vm13, %v13488_v50  ;;  %7367 = vst.msk [vmem:[#allocation5 + $0x30] sm:$0xff] %vm7360_vm13, %v7325_v35  ;;  %v6531_v25 = vsel %vm10819_vm9, %v9804_v15, %v6530_v54  ;;  %v6532_v59 = vrot.slane %v6530_v54, 4 }
 0x367   : > { %v9819_v12 = vcombine.low %v6524_v26, %v6527_v34  ;;  %v8597_v53 = vsel %vm10819_vm9, %v9929_v7, %v8596_v29  ;;  %v7414_v43 = vld [vmem:[#allocation4 + $0xa0] sm:$0xf]  ;;  %v7415_v21 = vld [vmem:[#allocation4 + $0xa4] sm:$0x1]  ;;  %7689 = vst.msk [vmem:[#allocation5 + $0x38] sm:$0xff] %vm7681_vm6, %v13433_v18  ;;  %7688 = vst.msk [vmem:[#allocation5 + $0x30] sm:$0xff] %vm7681_vm6, %v13498_v28  ;;  %v8769_v46 = vpack.c.bf16 %v10683_v45, %v10682_v51 }
 0x368   : > { %v8598_v61 = vrot.slane %v8596_v29, 4  ;;  %v7195_v50 = vrot.slane %v7193_v4, 4  ;;  %v7198_v41 = vrot.slane %v7196_v20, 5  ;;  %v7202_v37 = vshll.u32 %v6872_v47, 16  ;;  %v5831_v49 = vld [vmem:[#allocation4 + $0xa8] sm:$0xf]  ;;  %v13608_v56 = vpop.permute.xlu0 %8693 }
 0x369   : > { %vm13978_vm15 = vcmask 458112   ;;  %6616 = vrot.lane.b32.xlu1 %v9819_v12, %s10705_s25  ;;  %v6534_v32 = vsel %vm10819_vm9, %v6532_v59, %v6533_v9  ;;  %v7206_v18 = vshrl.u32 %v6872_v47, 16  ;;  %v7212_v3 = vshll.u32 %v6873_v23, 16  ;;  %v5832_v28 = vld [vmem:[#allocation4 + $0xac] sm:$0xf]  ;;  %v10684_v31 = vld [vmem:[%s10826_s16 + $0x30] sm:$0xff] }
 0x36a   : > { %7867 = vst.msk [vmem:[#allocation5 + $0x38] sm:$0xff] %vm13978_vm15, %v13503_v10  ;;  %vm13979_vm8 = vmmov %vm13978_vm15  ;;  %v9866_v1 = vrot.slane %v7413_v14, 9  ;;  %v9820_v22 = vcombine.low %v6531_v25, %v6534_v32  ;;  %v8600_v10 = vsel %vm10819_vm9, %v8598_v61, %v8599_v16  ;;  %v7204_v5 = vrot.slane %v7202_v37, 5  ;;  %v10376_v40 = vld [vmem:[#allocation4 + $0xc0] sm:$0xff]   ;;  %v5833_v19 = vld [vmem:[#allocation4 + $0xb0] sm:$0x1] }
 0x36b   : > { %7866 = vst.msk [vmem:[#allocation5 + $0x30] sm:$0xff] %vm13979_vm8, %v13342_v57  ;;  %v7199_v57 = vor.u32 %v7198_v41, %v7195_v50  ;;  %v9945_v58 = vcombine.low %v8597_v53, %v8600_v10  ;;  %v7208_v30 = vrot.slane %v7206_v18, 4  ;;  %v7214_v52 = vrot.slane %v7212_v3, 5  ;;  %v10685_v36 = vld [vmem:[%s10826_s16 + $0x38] sm:$0xff]  ;;  %v7912_v26 = vld [vmem:[#allocation4 + $0xa8] sm:$0xf] }
 0x36c   : > { %8411 = vst.msk [vmem:[#allocation5 + $0x30] sm:$0xff] %vm8404_vm11, %v13522_v17  ;;  %v7559_v0 = vrot.slane %v7414_v43, 5  ;;  %6618 = vrot.lane.b32.xlu0 %v9820_v22, %s10705_s25  ;;  %v7562_v42 = vrot.slane %v7415_v21, 5  ;;  %v8770_v60 = vpack.c.bf16 %v10685_v36, %v10684_v31  ;;  %v6174_v33 = vshrl.u32 %v5831_v49, 16  ;;  %v10389_v15 = vld [vmem:[#allocation4 + $0xb4] sm:$0xff]   ;;  %v13617_v53 = vpop.permute.xlu1 %6608 }
 0x36d   : > { %8732 = vst.msk [vmem:[#allocation5 + $0x30] sm:$0xff] %vm8725_vm5, %v13439_v55  ;;  %v7200_v17 = vrot.slane %v7199_v57, 4  ;;  %6797 = vrot.lane.b32.xlu1 %v10376_v40, %s10702_s22  ;;  %v7209_v55 = vor.u32 %v7208_v30, %v7204_v5  ;;  %vm13980_vm4 = vcmask 31744   ;;  %v6177_v6 = vshll.u32 %v5831_v49, 16  ;;  %v7913_v29 = vld [vmem:[#allocation4 + $0xac] sm:$0xf] }
 0x36e   : > { %v7560_v63 = vsel %vm10819_vm9, %v9866_v1, %v7559_v0  ;;  %v7561_v39 = vrot.slane %v7559_v0, 4  ;;  %10157 = vmatprep.mubr.msk.bf16.mxu0 %vm13980_vm4, %v8769_v46  ;;  %v6183_v24 = vshll.u32 %v5832_v28, 16  ;;  %v6187_v2 = vshrl.u32 %v5832_v28, 16  ;;  %vm13981_vm7 = vmmov %vm13980_vm4  ;;  %v7914_v4 = vld [vmem:[#allocation4 + $0xb0] sm:$0x1] }
 0x36f   : > { %v7205_v44 = vsel %vm10896_vm12, %v7200_v17, %v7204_v5  ;;  %v7210_v47 = vrot.slane %v7209_v55, 4  ;;  %10158 = vmatmul.mubr.msk.bf16.gmra.mrb[36].mxu0 %vm13981_vm7, %v8770_v60  ;;  %v6176_v9 = vrot.slane %v6174_v33, 4  ;;  %v6193_v7 = vshll.u32 %v5833_v19, 16  ;;  %v7909_v59 = vld [vmem:[#allocation4 + $0x9c] sm:$0xf]  ;;  %v10378_v17 = vld [vmem:[#allocation4 + $0xb4] sm:$0xff]   ;;  %vm13985_vm4 = vmmov %vm13979_vm8 }
 0x370   : > { %v7563_v54 = vsel %vm10819_vm9, %v7561_v39, %v7562_v42  ;;  %8699 = vrot.lane.b32.xlu0 %v9945_v58, %s10709_s28  ;;  %v6179_v35 = vrot.slane %v6177_v6, 5  ;;  %v6185_v34 = vrot.slane %v6183_v24, 5  ;;  %v6189_v16 = vrot.slane %v6187_v2, 4  ;;  %v7910_v3 = vld [vmem:[#allocation4 + $0xa0] sm:$0xf]  ;;  %v13622_v5 = vpop.permute.xlu0 %6610  ;;  %v13628_v39 = vpop.permute.xlu1 %6789 }
 0x371   : > { %v9882_v23 = vcombine.low %v7560_v63, %v7563_v54  ;;  %vm13982_vm1 = vcmask 64512   ;;  %v7215_v20 = vsel %vm10896_vm12, %v7210_v47, %v7214_v52  ;;  %v6195_v14 = vrot.slane %v6193_v7, 5  ;;  %v7911_v10 = vld [vmem:[#allocation4 + $0xa4] sm:$0x1]  ;;  %v5828_v0 = vld [vmem:[#allocation4 + $0x9c] sm:$0xf] }
 0x372   : > { %5788 = vst.msk [vmem:[#allocation5 + $0x78] sm:$0xff] %vm13982_vm1, %v10389_v15  ;;  %v8213_v12 = vshrl.u32 %v7912_v26, 16  ;;  %v8216_v25 = vshll.u32 %v7912_v26, 16  ;;  %v9851_v21 = vcombine.low %v7205_v44, %v7215_v20  ;;  %v6180_v61 = vor.u32 %v6179_v35, %v6176_v9  ;;  %v10379_v42 = vld [vmem:[#allocation4 + $0xc0] sm:$0xff]   ;;  %v6868_v35 = vld [vmem:[#allocation4 + $0x9c] sm:$0xf]  ;;  %vm13986_vm1 = vmmov %vm13981_vm7 }
 0x373   : > { %v6190_v50 = vor.u32 %v6189_v16, %v6185_v34  ;;  %v8222_v41 = vshll.u32 %v7913_v29, 16  ;;  %v8226_v32 = vshrl.u32 %v7913_v29, 16  ;;  %v8232_v18 = vshll.u32 %v7914_v4, 16  ;;  %v5829_v63 = vld [vmem:[#allocation4 + $0xa0] sm:$0xf] }
 0x374   : > { %v8748_v43 = vld [vmem:[#allocation5 + $0x30] sm:$0xff]  ;;  %v8215_v37 = vrot.slane %v8213_v12, 4  ;;  %v8218_v49 = vrot.slane %v8216_v25, 5  ;;  %7338 = vrot.lane.b32.xlu1 %v9851_v21, %s10704_s24  ;;  %7657 = vrot.lane.b32.xlu0 %v9882_v23, %s10708_s27  ;;  %v6181_v1 = vrot.slane %v6180_v61, 4  ;;  %v8189_v57 = vshrl.u32 %v7909_v59, 16 }
 0x375   : > { %10207 = vmatprep.mubr.msk.bf16.mxu1 %vm9023_vm10, %v8748_v43  ;;  %v6191_v28 = vrot.slane %v6190_v50, 4  ;;  %v8224_v22 = vrot.slane %v8222_v41, 5  ;;  %v8228_v58 = vrot.slane %v8226_v32, 4  ;;  %v8234_v30 = vrot.slane %v8232_v18, 5  ;;  %v5830_v47 = vld [vmem:[#allocation4 + $0xa4] sm:$0x1] }
 0x376   : > { %v8219_v40 = vor.u32 %v8218_v49, %v8215_v37  ;;  %v8192_v52 = vshll.u32 %v7909_v59, 16  ;;  %v6186_v51 = vsel %vm10896_vm12, %v6181_v1, %v6185_v34  ;;  %v8191_v46 = vrot.slane %v8189_v57, 4  ;;  %v13634_v34 = vpop.permute.xlu0 %8691  ;;  %v6869_v12 = vld [vmem:[#allocation4 + $0xa0] sm:$0xf]  ;;  %v6870_v61 = vld [vmem:[#allocation4 + $0xa4] sm:$0x1] }
 0x377   : > { %v6196_v45 = vsel %vm10896_vm12, %v6191_v28, %v6195_v14  ;;  %v8198_v31 = vshll.u32 %v7910_v3, 16  ;;  %v8229_v19 = vor.u32 %v8228_v58, %v8224_v22  ;;  %v8202_v44 = vshrl.u32 %v7910_v3, 16  ;;  %v7422_v32 = vld [vmem:[#allocation4 + $0xc0] sm:$0xe]  ;;  %v7423_v18 = vld [vmem:[#allocation4 + $0xc4] sm:$0xf] }
 0x378   : > { %v9788_v36 = vcombine.low %v6186_v51, %v6196_v45  ;;  %v8220_v60 = vrot.slane %v8219_v40, 4  ;;  %v8194_v55 = vrot.slane %v8192_v52, 5  ;;  %7837 = vrot.lane.b32.xlu1 %v10378_v17, %s10707_s18  ;;  %7839 = vrot.lane.b32.xlu0 %v10379_v42, %s10707_s18  ;;  %v8208_v6 = vshll.u32 %v7911_v10, 16  ;;  %v13641_v3 = vpop.permute.xlu1 %7330  ;;  %v7424_v57 = vld [vmem:[#allocation4 + $0xc8] sm:$0x1]  ;;  %v10380_v42 = vld [vmem:[#allocation4 + $0xb4] sm:$0xff]  }
 0x379   : > { %v8200_v33 = vrot.slane %v8198_v31, 5  ;;  %v6150_v24 = vshrl.u32 %v5828_v0, 16  ;;  %v8230_v26 = vrot.slane %v8229_v19, 4  ;;  %v6153_v54 = vshll.u32 %v5828_v0, 16  ;;  %v8460_v0 = vld [vmem:[#allocation4 + $0xb4] sm:$0xe] }
 0x37a   : > { %v8225_v2 = vsel %vm10896_vm12, %v8220_v60, %v8224_v22  ;;  %v8195_v15 = vor.u32 %v8194_v55, %v8191_v46  ;;  %v8204_v9 = vrot.slane %v8202_v44, 4  ;;  %v8210_v7 = vrot.slane %v8208_v6, 5  ;;  %v8461_v31 = vld [vmem:[#allocation4 + $0xb8] sm:$0xf]  ;;  %v6379_v44 = vld [vmem:[#allocation4 + $0xb4] sm:$0xe] }
 0x37b   : > { %v6152_v29 = vrot.slane %v6150_v24, 4  ;;  %v6159_v23 = vshll.u32 %v5829_v63, 16  ;;  %v8235_v16 = vsel %vm10896_vm12, %v8230_v26, %v8234_v30  ;;  %v6155_v20 = vrot.slane %v6153_v54, 5 }
 0x37c   : > { %v8196_v4 = vrot.slane %v8195_v15, 4  ;;  %v6163_v14 = vshrl.u32 %v5829_v63, 16  ;;  %6297 = vrot.lane.b32.xlu1 %v9788_v36, %s10699_s19  ;;  %v9914_v25 = vcombine.low %v8225_v2, %v8235_v16  ;;  %v8205_v59 = vor.u32 %v8204_v9, %v8200_v33  ;;  %v13646_v36 = vpop.permute.xlu0 %7649  ;;  %v6380_v15 = vld [vmem:[#allocation4 + $0xb8] sm:$0xf] }
 0x37d   : > { %v6161_v43 = vrot.slane %v6159_v23, 5  ;;  %v6169_v21 = vshll.u32 %v5830_v47, 16  ;;  %v6156_v41 = vor.u32 %v6155_v20, %v6152_v29  ;;  %v7169_v49 = vshrl.u32 %v6868_v35, 16  ;;  %v6381_v29 = vld [vmem:[#allocation4 + $0xbc] sm:$0x1] }
 0x37e   : > { %v8201_v50 = vsel %vm10896_vm12, %v8196_v4, %v8200_v33  ;;  %v6165_v37 = vrot.slane %v6163_v14, 4  ;;  %8380 = vrot.lane.b32.xlu0 %v9914_v25, %s10710_s29  ;;  %v8206_v1 = vrot.slane %v8205_v59, 4  ;;  %v7172_v22 = vshll.u32 %v6868_v35, 16  ;;  %v8462_v33 = vld [vmem:[#allocation4 + $0xbc] sm:$0x1]  ;;  %v13654_v35 = vpop.permute.xlu1 %7829 }
 0x37f   : > { %v6171_v28 = vrot.slane %v6169_v21, 5  ;;  %v7178_v10 = vshll.u32 %v6869_v12, 16  ;;  %v6157_v40 = vrot.slane %v6156_v41, 4  ;;  %v7171_v30 = vrot.slane %v7169_v49, 4  ;;  %v7419_v23 = vld [vmem:[#allocation4 + $0xb4] sm:$0xe] }
 0x380   : > { %v6166_v58 = vor.u32 %v6165_v37, %v6161_v43  ;;  %v7182_v52 = vshrl.u32 %v6869_v12, 16  ;;  %v8211_v17 = vsel %vm10896_vm12, %v8206_v1, %v8210_v7  ;;  %v7174_v51 = vrot.slane %v7172_v22, 5  ;;  %v7420_v21 = vld [vmem:[#allocation4 + $0xb8] sm:$0xf]  ;;  %v7421_v49 = vld [vmem:[#allocation4 + $0xbc] sm:$0x1] }
 0x381   : > { %v7180_v45 = vrot.slane %v7178_v10, 5  ;;  %v7188_v46 = vshll.u32 %v6870_v61, 16  ;;  %v9913_v60 = vcombine.low %v8201_v50, %v8211_v17  ;;  %v6162_v19 = vsel %vm10896_vm12, %v6157_v40, %v6161_v43 }
 0x382   : > { %v6167_v55 = vrot.slane %v6166_v58, 4  ;;  %v7184_v63 = vrot.slane %v7182_v52, 4  ;;  %6795 = vrot.lane.b32.xlu0 %v10380_v42, %s10702_s22  ;;  %v7175_v6 = vor.u32 %v7174_v51, %v7171_v30  ;;  %v9869_v2 = vrot.slane %v7422_v32, 9  ;;  %v6877_v32 = vld [vmem:[#allocation4 + $0xc0] sm:$0xf]  ;;  %s9991_s22 = sshll.u32 %s13997_s10, 4 }
 0x383   : > { %v7190_v24 = vrot.slane %v7188_v46, 5  ;;  %v7580_v26 = vrot.slane %v7423_v18, 5  ;;  %8378 = vrot.lane.b32.xlu1 %v9913_v60, %s10710_s29  ;;  %v7583_v9 = vrot.slane %v7424_v57, 5  ;;  %v9931_v7 = vrot.slane %v8460_v0, 9  ;;  %v13662_v18 = vpop.permute.xlu0 %7831  ;;  %v6878_v57 = vld [vmem:[#allocation4 + $0xc4] sm:$0xf]  ;;  %s13857_s23 = scalar_lea.vmem %s13883_s9, %s9991_s22 }
 0x384   : > { %v6172_v47 = vsel %vm10896_vm12, %v6167_v55, %v6171_v28  ;;  %v7185_v54 = vor.u32 %v7184_v63, %v7180_v45  ;;  %v7176_v4 = vrot.slane %v7175_v6, 4  ;;  %v8610_v25 = vrot.slane %v8461_v31, 5  ;;  %v6879_v51 = vld [vmem:[#allocation4 + $0xc8] sm:$0x1]  ;;  %v7918_v63 = vld [vmem:[#allocation4 + $0xc0] sm:$0xf] }
 0x385   : > { %v9787_v16 = vcombine.low %v6162_v19, %v6172_v47  ;;  %v7581_v20 = vsel %vm10819_vm9, %v9869_v2, %v7580_v26  ;;  %v7582_v14 = vrot.slane %v7580_v26, 4  ;;  %v8613_v59 = vrot.slane %v8462_v33, 5  ;;  %v7919_v33 = vld [vmem:[#allocation4 + $0xc4] sm:$0xf] }
 0x386   : > { %v7186_v12 = vrot.slane %v7185_v54, 4  ;;  %v9805_v43 = vrot.slane %v6379_v44, 9  ;;  %v7181_v61 = vsel %vm10896_vm12, %v7176_v4, %v7180_v45  ;;  %v6537_v41 = vrot.slane %v6380_v15, 5 }
 0x387   : > { %v7584_v50 = vsel %vm10819_vm9, %v7582_v14, %v7583_v9  ;;  %v6540_v37 = vrot.slane %v6381_v29, 5  ;;  %6295 = vrot.lane.b32.xlu1 %v9787_v16, %s10699_s19  ;;  %v8611_v22 = vsel %vm10819_vm9, %v9931_v7, %v8610_v25  ;;  %v8612_v10 = vrot.slane %v8610_v25, 4  ;;  %v6290_v46 = vpop.permute.xlu1 %6289  ;;  %v7920_v9 = vld [vmem:[#allocation4 + $0xc8] sm:$0x1] }
 0x388   : > { %v7191_v1 = vsel %vm10896_vm12, %v7186_v12, %v7190_v24  ;;  %v9885_v28 = vcombine.low %v7581_v20, %v7584_v50  ;;  %v6538_v58 = vsel %vm10819_vm9, %v9805_v43, %v6537_v41  ;;  %v6539_v30 = vrot.slane %v6537_v41, 4  ;;  %v7915_v20 = vld [vmem:[#allocation4 + $0xb4] sm:$0xf] }
 0x389   : > { %v9850_v40 = vcombine.low %v7181_v61, %v7191_v1  ;;  %v9868_v52 = vrot.slane %v7419_v23, 9  ;;  %v8614_v0 = vsel %vm10819_vm9, %v8612_v10, %v8613_v59  ;;  %v7573_v17 = vrot.slane %v7420_v21, 5  ;;  %v7916_v59 = vld [vmem:[#allocation4 + $0xb8] sm:$0xf] }
 0x38a   : > { %v7576_v42 = vrot.slane %v7421_v49, 5  ;;  %v7241_v45 = vshrl.u32 %v6877_v32, 16  ;;  %v9947_v31 = vcombine.low %v8611_v22, %v8614_v0  ;;  %v6541_v60 = vsel %vm10819_vm9, %v6539_v30, %v6540_v37  ;;  %v13682_v7 = vpop.permute.xlu0 %8372 }
 0x38b   : > { %7336 = vrot.lane.b32.xlu0 %v9850_v40, %s10704_s24  ;;  %v7244_v19 = vshll.u32 %v6877_v32, 16  ;;  %v7250_v55 = vshll.u32 %v6878_v57, 16  ;;  %vm13983_vm14 = vcmask 130112   ;;  %7663 = vrot.lane.b32.xlu1 %v9885_v28, %s10708_s27  ;;  %v9821_v44 = vcombine.low %v6538_v58, %v6541_v60  ;;  %v7917_v32 = vld [vmem:[#allocation4 + $0xbc] sm:$0x1] }
 0x38c   : > { %6328 = vst.msk [vmem:[#allocation5 + $0x50] sm:$0xff] %vm13983_vm14, %v6290_v46  ;;  %v7574_v6 = vsel %vm10819_vm9, %v9868_v52, %v7573_v17  ;;  %v7575_v24 = vrot.slane %v7573_v17, 4  ;;  %v7243_v2 = vrot.slane %v7241_v45, 4  ;;  %v7254_v47 = vshrl.u32 %v6878_v57, 16  ;;  %v6874_v58 = vld [vmem:[#allocation4 + $0xb4] sm:$0xf]  ;;  %vm13984_vm15 = vmmov %vm13983_vm14 }
 0x38d   : > { %6649 = vst.msk [vmem:[#allocation5 + $0x50] sm:$0xff] %vm6638_vm3, %v13622_v5  ;;  %v7246_v26 = vrot.slane %v7244_v19, 5  ;;  %v7252_v15 = vrot.slane %v7250_v55, 5  ;;  %v7260_v54 = vshll.u32 %v6879_v51, 16  ;;  %v8261_v23 = vshrl.u32 %v7918_v63, 16 }
 0x38e   : > { %v7577_v29 = vsel %vm10819_vm9, %v7575_v24, %v7576_v42  ;;  %v8264_v16 = vshll.u32 %v7918_v63, 16  ;;  %v8270_v4 = vshll.u32 %v7919_v33, 16  ;;  %v7256_v25 = vrot.slane %v7254_v47, 4  ;;  %v6788_v28 = vpop.permute.xlu0 %6787  ;;  %v6875_v63 = vld [vmem:[#allocation4 + $0xb8] sm:$0xf] }
 0x38f   : > { %8703 = vrot.lane.b32.xlu0 %v9947_v31, %s10709_s28  ;;  %v9884_v14 = vcombine.low %v7574_v6, %v7577_v29  ;;  %v7247_v12 = vor.u32 %v7246_v26, %v7243_v2  ;;  %v7262_v5 = vrot.slane %v7260_v54, 5  ;;  %6620 = vrot.lane.b32.xlu1 %v9821_v44, %s10705_s25  ;;  %v8263_v43 = vrot.slane %v8261_v23, 4  ;;  %v8371_v30 = vpop.permute.xlu1 %8370  ;;  %6826 = vst.msk [vmem:[#allocation5 + $0x50] sm:$0xff] %vm6815_vm2, %v6788_v28  ;;  %v6876_v26 = vld [vmem:[#allocation4 + $0xbc] sm:$0x1] }
 0x390   : > { %v8266_v21 = vrot.slane %v8264_v16, 5  ;;  %v8272_v61 = vrot.slane %v8270_v4, 5  ;;  %v8274_v50 = vshrl.u32 %v7919_v33, 16  ;;  %v7257_v37 = vor.u32 %v7256_v25, %v7252_v15  ;;  %8412 = vst.msk [vmem:[#allocation5 + $0x38] sm:$0xff] %vm8404_vm11, %v8371_v30  ;;  %v5834_v29 = vld [vmem:[#allocation4 + $0xb4] sm:$0xf] }
 0x391   : > { %v7248_v41 = vrot.slane %v7247_v12, 4  ;;  %v8280_v49 = vshll.u32 %v7920_v9, 16  ;;  %v8237_v1 = vshrl.u32 %v7915_v20, 16  ;;  %v8240_v57 = vshll.u32 %v7915_v20, 16  ;;  %8733 = vst.msk [vmem:[#allocation5 + $0x38] sm:$0xff] %vm8725_vm5, %v13634_v34 }
 0x392   : > { %v8267_v22 = vor.u32 %v8266_v21, %v8263_v43  ;;  %v8276_v10 = vrot.slane %v8274_v50, 4  ;;  %v8246_v40 = vshll.u32 %v7916_v59, 16  ;;  %v7258_v0 = vrot.slane %v7257_v37, 4  ;;  %v5836_v50 = vld [vmem:[#allocation4 + $0xbc] sm:$0x1] }
 0x393   : > { %7661 = vrot.lane.b32.xlu0 %v9884_v14, %s10708_s27  ;;  %v7253_v52 = vsel %vm10896_vm12, %v7248_v41, %v7252_v15  ;;  %v8282_v17 = vrot.slane %v8280_v49, 5  ;;  %v8239_v42 = vrot.slane %v8237_v1, 4  ;;  %v8242_v46 = vrot.slane %v8240_v57, 5 }
 0x394   : > { %v8268_v51 = vrot.slane %v8267_v22, 4  ;;  %v8277_v45 = vor.u32 %v8276_v10, %v8272_v61  ;;  %v8248_v31 = vrot.slane %v8246_v40, 5  ;;  %v7263_v60 = vsel %vm10896_vm12, %v7258_v0, %v7262_v5  ;;  %v5835_v5 = vld [vmem:[#allocation4 + $0xb8] sm:$0xf] }
 0x395   : > { %v8250_v19 = vshrl.u32 %v7916_v59, 16  ;;  %v8256_v55 = vshll.u32 %v7917_v32, 16  ;;  %v7217_v33 = vshrl.u32 %v6874_v58, 16  ;;  %v9853_v44 = vcombine.low %v7253_v52, %v7263_v60 }
 0x396   : > { %v8273_v6 = vsel %vm10896_vm12, %v8268_v51, %v8272_v61  ;;  %v8278_v24 = vrot.slane %v8277_v45, 4  ;;  %v8243_v2 = vor.u32 %v8242_v46, %v8239_v42  ;;  %v7220_v9 = vshll.u32 %v6874_v58, 16  ;;  %v6288_v59 = vpop.permute.xlu1 %6287 }
 0x397   : > { %v8252_v15 = vrot.slane %v8250_v19, 4  ;;  %v8258_v47 = vrot.slane %v8256_v55, 5  ;;  %v7219_v54 = vrot.slane %v7217_v33, 4  ;;  %7342 = vrot.lane.b32.xlu1 %v9853_v44, %s10704_s24  ;;  %v7226_v16 = vshll.u32 %v6875_v63, 16  ;;  %6327 = vst.msk [vmem:[#allocation5 + $0x48] sm:$0xff] %vm13984_vm15, %v6288_v59  ;;  %v10686_v19 = vld [vmem:[%s10826_s16 + $0x40] sm:$0xff] }
 0x398   : > { %v8283_v34 = vsel %vm10896_vm12, %v8278_v24, %v8282_v17  ;;  %v8244_v23 = vrot.slane %v8243_v2, 4  ;;  %v7230_v4 = vshrl.u32 %v6875_v63, 16  ;;  %v7222_v12 = vrot.slane %v7220_v9, 5  ;;  %6648 = vst.msk [vmem:[#allocation5 + $0x48] sm:$0xff] %vm6638_vm3, %v13617_v53  ;;  %v8749_v28 = vld [vmem:[#allocation5 + $0x38] sm:$0xff] }
 0x399   : > { %v9916_v20 = vcombine.low %v8273_v6, %v8283_v34  ;;  %v8253_v14 = vor.u32 %v8252_v15, %v8248_v31  ;;  %v7236_v25 = vshll.u32 %v6876_v26, 16  ;;  %v7228_v21 = vrot.slane %v7226_v16, 5  ;;  %6825 = vst.msk [vmem:[#allocation5 + $0x48] sm:$0xff] %vm6815_vm2, %v13482_v27  ;;  %10208 = vmatmul.mubr.msk.bf16.gmra.mrb[0].mxu1 %vm9023_vm10, %v8749_v28  ;;  %v8464_v17 = vld [vmem:[#allocation4 + $0xc4] sm:$0xf]  ;;  %v10687_v55 = vld [vmem:[%s10826_s16 + $0x48] sm:$0xff] }
 0x39a   : > { %v8249_v43 = vsel %vm10896_vm12, %v8244_v23, %v8248_v31  ;;  %v7232_v61 = vrot.slane %v7230_v4, 4  ;;  %v6198_v41 = vshrl.u32 %v5834_v29, 16  ;;  %v7223_v49 = vor.u32 %v7222_v12, %v7219_v54  ;;  %7370 = vst.msk [vmem:[#allocation5 + $0x48] sm:$0xff] %vm7360_vm13, %v13641_v3  ;;  %v7329_v53 = vpop.permute.xlu0 %7328  ;;  %v8463_v27 = vld [vmem:[#allocation4 + $0xc0] sm:$0xe]  ;;  %v10688_v54 = vld [vmem:[%s10826_s16 + $0x50] sm:$0xff] }
 0x39b   : > { %8384 = vrot.lane.b32.xlu0 %v9916_v20, %s10710_s29  ;;  %v8254_v37 = vrot.slane %v8253_v14, 4  ;;  %v7238_v32 = vrot.slane %v7236_v25, 5  ;;  %v6201_v1 = vshll.u32 %v5834_v29, 16  ;;  %v6207_v57 = vshll.u32 %v5835_v5, 16  ;;  %7369 = vst.msk [vmem:[#allocation5 + $0x40] sm:$0xff] %vm7360_vm13, %v7329_v53 }
 0x39c   : > { %v7233_v22 = vor.u32 %v7232_v61, %v7228_v21  ;;  %v6200_v10 = vrot.slane %v6198_v41, 4  ;;  %v6211_v40 = vshrl.u32 %v5835_v5, 16  ;;  %v7224_v30 = vrot.slane %v7223_v49, 4  ;;  %7691 = vst.msk [vmem:[#allocation5 + $0x48] sm:$0xff] %vm7681_vm6, %v13595_v48  ;;  %v8465_v33 = vld [vmem:[#allocation4 + $0xc8] sm:$0x1]  ;;  %v13744_v14 = vpop.permute.xlu1 %7655 }
 0x39d   : > { %v8259_v58 = vsel %vm10896_vm12, %v8254_v37, %v8258_v47  ;;  %v6203_v52 = vrot.slane %v6201_v1, 5  ;;  %v6217_v0 = vshll.u32 %v5836_v50, 16  ;;  %v6209_v45 = vrot.slane %v6207_v57, 5  ;;  %v587_v3 = vld [vmem:[#allocation4 + $0xd4] sm:$0x1]  ;;  %7690 = vst.msk [vmem:[#allocation5 + $0x40] sm:$0xff] %vm7681_vm6, %v13646_v36 }
 0x39e   : > { %v9915_v42 = vcombine.low %v8249_v43, %v8259_v58  ;;  %v7234_v51 = vrot.slane %v7233_v22, 4  ;;  %v6213_v46 = vrot.slane %v6211_v40, 4  ;;  %v7229_v31 = vsel %vm10896_vm12, %v7224_v30, %v7228_v21  ;;  %7869 = vst.msk [vmem:[#allocation5 + $0x48] sm:$0xff] %vm13979_vm8, %v13654_v35  ;;  %v7921_v2 = vld [vmem:[#allocation4 + $0xcc] sm:$0xf]  ;;  %v10689_v35 = vld [vmem:[%s10826_s16 + $0x58] sm:$0xff] }
 0x39f   : > { %v6204_v60 = vor.u32 %v6203_v52, %v6200_v10  ;;  %v8771_v63 = vpack.c.bf16 %v10687_v55, %v10686_v19  ;;  %v6219_v6 = vrot.slane %v6217_v0, 5  ;;  %v8617_v24 = vrot.slane %v8464_v17, 5  ;;  %v7922_v26 = vld [vmem:[#allocation4 + $0xd0] sm:$0xf]  ;;  %7868 = vst.msk [vmem:[#allocation5 + $0x40] sm:$0xff] %vm13985_vm4, %v13508_v62 }
 0x3a0   : > { %8382 = vrot.lane.b32.xlu1 %v9915_v42, %s10710_s29  ;;  %v7239_v48 = vsel %vm10896_vm12, %v7234_v51, %v7238_v32  ;;  %v6214_v44 = vor.u32 %v6213_v46, %v6209_v45  ;;  %v9932_v36 = vrot.slane %v8463_v27, 9  ;;  %v8772_v9 = vpack.c.bf16 %v10689_v35, %v10688_v54  ;;  %8413 = vst.msk [vmem:[#allocation5 + $0x40] sm:$0xff] %vm8404_vm11, %v13682_v7  ;;  %v8467_v5 = vld [vmem:[#allocation4 + $0xd0] sm:$0xf]  ;;  %v8466_v32 = vld [vmem:[#allocation4 + $0xcc] sm:$0xe] }
 0x3a1   : > { %v9852_v15 = vcombine.low %v7229_v31, %v7239_v48  ;;  %v6205_v47 = vrot.slane %v6204_v60, 4  ;;  %10161 = vmatprep.mubr.msk.bf16.mxu0 %vm13981_vm7, %v8771_v63  ;;  %v8619_v34 = vrot.slane %v8617_v24, 4  ;;  %v8620_v23 = vrot.slane %v8465_v33, 5  ;;  %8734 = vst.msk [vmem:[#allocation5 + $0x40] sm:$0xff] %vm8725_vm5, %v13608_v56  ;;  %vm13993_vm7 = vmmov %vm13985_vm4 }
 0x3a2   : > { %v6215_v29 = vrot.slane %v6214_v44, 4  ;;  %v588_v16 = vsel %vm12364_vm0, 0, %v587_v3  ;;  %v8618_v62 = vsel %vm10819_vm9, %v9932_v36, %v8617_v24  ;;  %10162 = vmatmul.mubr.msk.bf16.gmra.mrb[40].mxu0 %vm13986_vm1, %v8772_v9  ;;  %v8285_v4 = vshrl.u32 %v7921_v2, 16  ;;  %vm13987_vm0 = vmmov %vm13983_vm14 }
 0x3a3   : > { %7340 = vrot.lane.b32.xlu0 %v9852_v15, %s10704_s24  ;;  %589 = vst [vmem:[#allocation4 + $0xd4] sm:$0x1] %v588_v16  ;;  %v8288_v20 = vshll.u32 %v7921_v2, 16  ;;  %v8294_v7 = vshll.u32 %v7922_v26, 16  ;;  %v6210_v8 = vsel %vm10896_vm12, %v6205_v47, %v6209_v45  ;;  %v8621_v56 = vsel %vm10819_vm9, %v8619_v34, %v8620_v23  ;;  %v8698_v37 = vpop.permute.xlu0 %8697  ;;  %vm13990_vm14 = vmmov %vm13985_vm4 }
 0x3a4   : > { %v6220_v12 = vsel %vm10896_vm12, %v6215_v29, %v6219_v6  ;;  %v8298_v25 = vshrl.u32 %v7922_v26, 16  ;;  %v9948_v43 = vcombine.low %v8618_v62, %v8621_v56  ;;  %v8287_v21 = vrot.slane %v8285_v4, 4  ;;  %vm13991_vm15 = vmmov %vm13987_vm0 }
 0x3a5   : > { %v9789_v59 = vcombine.low %v6210_v8, %v6220_v12  ;;  %v8290_v61 = vrot.slane %v8288_v20, 5  ;;  %v8296_v50 = vrot.slane %v8294_v7, 5  ;;  %v8624_v1 = vrot.slane %v8467_v5, 5  ;;  %vm13992_vm8 = vmmov %vm13987_vm0 }
 0x3a6   : > { %v8300_v41 = vrot.slane %v8298_v25, 4  ;;  %v9933_v30 = vrot.slane %v8466_v32, 9  ;;  %vm13994_vm1 = vmmov %vm13985_vm4 }
 0x3a7   : > { %6299 = vrot.lane.b32.xlu1 %v9789_v59, %s10699_s19  ;;  %8705 = vrot.lane.b32.xlu0 %v9948_v43, %s10709_s28  ;;  %v8291_v49 = vor.u32 %v8290_v61, %v8287_v21  ;;  %v6613_v10 = vpop.permute.xlu1 %6612  ;;  %v8626_v53 = vrot.slane %v8624_v1, 4 }
 0x3a8   : > { %v8301_v28 = vor.u32 %v8300_v41, %v8296_v50  ;;  %v8750_v57 = vld [vmem:[#allocation5 + $0x40] sm:$0xff]  ;;  %v6615_v52 = vpop.permute.xlu0 %6614  ;;  %v8625_v31 = vsel %vm10819_vm9, %v9933_v30, %v8624_v1  ;;  %v13812_v1 = vld [vmem:[%s13882_s8] ss:$0 sm:$0xff] }
 0x3a9   : > { %v8292_v22 = vrot.slane %v8291_v49, 4  ;;  %10211 = vmatprep.mubr.msk.bf16.mxu1 %vm9023_vm10, %v8750_v57 }
 0x3aa   : > { %v7923_v40 = vld [vmem:[#allocation4 + $0xd4] sm:$0x1]  ;;  %v8302_v0 = vrot.slane %v8301_v28, 4 }
 0x3ab   : > { %v8468_v58 = vld [vmem:[#allocation4 + $0xd4] sm:$0x1]  ;;  %v8304_v17 = vshll.u32 %v7923_v40, 16  ;;  %v8297_v51 = vsel %vm10896_vm12, %v8292_v22, %v8296_v50  ;;  %v6794_v46 = vpop.permute.xlu1 %6793 }
 0x3ac   : > { %v8627_v42 = vrot.slane %v8468_v58, 5  ;;  %v8696_v19 = vpop.permute.xlu0 %8695 }
 0x3ad   : > { %v8306_v45 = vrot.slane %v8304_v17, 5 }
 0x3ae   : > { %v8628_v60 = vsel %vm10819_vm9, %v8626_v53, %v8627_v42  ;;  %vm13988_vm9 = vmmov %vm13987_vm0 }
 0x3af   : > { %v8307_v27 = vsel %vm10896_vm12, %v8302_v0, %v8306_v45  ;;  %v9949_v63 = vcombine.low %v8625_v31, %v8628_v60  ;;  %vm13989_vm12 = vmmov %vm13985_vm4 }
 0x3b0   : > { %v9917_v55 = vcombine.low %v8297_v51, %v8307_v27  ;;  %v7654_v3 = vpop.permute.xlu0 %7653 }
 0x3b2   : > { %8386 = vrot.lane.b32.xlu1 %v9917_v55, %s10710_s29  ;;  %v7335_v33 = vpop.permute.xlu1 %7334 }
 0x3b4   : > { %v7836_v44 = vpop.permute.xlu0 %7835 }
 0x3b6   : > { %8707 = vrot.lane.b32.xlu1 %v9949_v63, %s10709_s28  ;;  %v7834_v48 = vpop.permute.xlu1 %7833 }
 0x3bc   : > { %v6294_v6 = vpop.permute.xlu1 %6293 }
 0x3bd   : > { %6330 = vst.msk [vmem:[#allocation5 + $0x60] sm:$0xff] %vm13987_vm0, %v6294_v6 }
 0x3be   : > { %6651 = vst.msk [vmem:[#allocation5 + $0x60] sm:$0xff] %vm6638_vm3, %v6615_v52 }
 0x3bf   : > { %v8377_v11 = vpop.permute.xlu0 %8376 }
 0x3c3   : > { %v6792_v24 = vpop.permute.xlu0 %6791 }
 0x3c4   : > { %6828 = vst.msk [vmem:[#allocation5 + $0x60] sm:$0xff] %vm6815_vm2, %v6792_v24 }
 0x3c5   : > { %v8375_v13 = vpop.permute.xlu1 %8374 }
 0x3c6   : > { %8414 = vst.msk [vmem:[#allocation5 + $0x48] sm:$0xff] %vm8404_vm11, %v8375_v13 }
 0x3c7   : > { %8735 = vst.msk [vmem:[#allocation5 + $0x48] sm:$0xff] %vm8725_vm5, %v8696_v19 }
 0x3cb   : > { %v6292_v2 = vpop.permute.xlu1 %6291 }
 0x3cc   : > { %6329 = vst.msk [vmem:[#allocation5 + $0x58] sm:$0xff] %vm13988_vm9, %v6292_v2  ;;  %vm13995_vm9 = vmmov %vm13994_vm1 }
 0x3cd   : > { %6650 = vst.msk [vmem:[#allocation5 + $0x58] sm:$0xff] %vm6638_vm3, %v6613_v10 }
 0x3ce   : > { %6827 = vst.msk [vmem:[#allocation5 + $0x58] sm:$0xff] %vm6815_vm2, %v13628_v39  ;;  %v8751_v26 = vld [vmem:[#allocation5 + $0x48] sm:$0xff] }
 0x3cf   : > { %7372 = vst.msk [vmem:[#allocation5 + $0x58] sm:$0xff] %vm7360_vm13, %v7335_v33  ;;  %10212 = vmatmul.mubr.msk.bf16.gmra.mrb[4].mxu1 %vm9023_vm10, %v8751_v26  ;;  %v7660_v39 = vpop.permute.xlu1 %7659 }
 0x3d0   : > { %v7333_v15 = vpop.permute.xlu0 %7332  ;;  %7693 = vst.msk [vmem:[#allocation5 + $0x58] sm:$0xff] %vm7681_vm6, %v13744_v14 }
 0x3d1   : > { %7371 = vst.msk [vmem:[#allocation5 + $0x50] sm:$0xff] %vm7360_vm13, %v7333_v15 }
 0x3d2   : > { %7692 = vst.msk [vmem:[#allocation5 + $0x50] sm:$0xff] %vm7681_vm6, %v7654_v3 }
 0x3d3   : > { %7871 = vst.msk [vmem:[#allocation5 + $0x58] sm:$0xff] %vm13989_vm12, %v7834_v48 }
 0x3d4   : > { %7870 = vst.msk [vmem:[#allocation5 + $0x50] sm:$0xff] %vm13990_vm14, %v13662_v18 }
 0x3d5   : > { %8415 = vst.msk [vmem:[#allocation5 + $0x50] sm:$0xff] %vm8404_vm11, %v8377_v11 }
 0x3d6   : > { %8736 = vst.msk [vmem:[#allocation5 + $0x50] sm:$0xff] %vm8725_vm5, %v8698_v37 }
 0x3d8   : > { %v8702_v47 = vpop.permute.xlu0 %8701 }
 0x3db   : > { %v6617_v36 = vpop.permute.xlu1 %6616 }
 0x3dd   : > { %v8752_v54 = vld [vmem:[#allocation5 + $0x50] sm:$0xff] }
 0x3de   : > { %10215 = vmatprep.mubr.msk.bf16.mxu1 %vm9023_vm10, %v8752_v54  ;;  %v6619_v35 = vpop.permute.xlu0 %6618 }
 0x3df   : > { %v13786_v9 = vpop.permute.xlu1 %6797 }
 0x3e2   : > { %v8700_v29 = vpop.permute.xlu0 %8699 }
 0x3e6   : > { %v7339_v34 = vpop.permute.xlu1 %7338  ;;  %v7658_v23 = vpop.permute.xlu0 %7657 }
 0x3ea   : > { %v7838_v16 = vpop.permute.xlu1 %7837  ;;  %v7840_v62 = vpop.permute.xlu0 %7839 }
 0x3ee   : > { %v6298_v4 = vpop.permute.xlu1 %6297 }
 0x3ef   : > { %6332 = vst.msk [vmem:[#allocation5 + $0x70] sm:$0xff] %vm13991_vm15, %v6298_v4 }
 0x3f0   : > { %6653 = vst.msk [vmem:[#allocation5 + $0x70] sm:$0xff] %vm6638_vm3, %v6619_v35  ;;  %v8381_v18 = vpop.permute.xlu0 %8380 }
 0x3f4   : > { %v6796_v20 = vpop.permute.xlu0 %6795 }
 0x3f5   : > { %v8379_v7 = vpop.permute.xlu1 %8378  ;;  %6830 = vst.msk [vmem:[#allocation5 + $0x70] sm:$0xff] %vm6815_vm2, %v6796_v20 }
 0x3f6   : > { %8416 = vst.msk [vmem:[#allocation5 + $0x58] sm:$0xff] %vm8404_vm11, %v8379_v7 }
 0x3f7   : > { %8737 = vst.msk [vmem:[#allocation5 + $0x58] sm:$0xff] %vm8725_vm5, %v8700_v29 }
 0x3f9   : > { %v6296_v14 = vpop.permute.xlu1 %6295 }
 0x3fa   : > { %6331 = vst.msk [vmem:[#allocation5 + $0x68] sm:$0xff] %vm13992_vm8, %v6296_v14 }
 0x3fb   : > { %6652 = vst.msk [vmem:[#allocation5 + $0x68] sm:$0xff] %vm6638_vm3, %v6617_v36 }
 0x3fc   : > { %6829 = vst.msk [vmem:[#allocation5 + $0x68] sm:$0xff] %vm6815_vm2, %v6794_v46 }
 0x3fd   : > { %v7337_v8 = vpop.permute.xlu0 %7336  ;;  %7374 = vst.msk [vmem:[#allocation5 + $0x68] sm:$0xff] %vm7360_vm13, %v7339_v34  ;;  %v7664_v56 = vpop.permute.xlu1 %7663 }
 0x3fe   : > { %7373 = vst.msk [vmem:[#allocation5 + $0x60] sm:$0xff] %vm7360_vm13, %v7337_v8  ;;  %v8753_v12 = vld [vmem:[#allocation5 + $0x58] sm:$0xff] }
 0x3ff   : > { %7694 = vst.msk [vmem:[#allocation5 + $0x60] sm:$0xff] %vm7681_vm6, %v7658_v23  ;;  %7695 = vst.msk [vmem:[#allocation5 + $0x68] sm:$0xff] %vm7681_vm6, %v7660_v39  ;;  %10216 = vmatmul.mubr.msk.bf16.gmra.mrb[8].mxu1 %vm9023_vm10, %v8753_v12 }
 0x400   : > { %7872 = vst.msk [vmem:[#allocation5 + $0x60] sm:$0xff] %vm13985_vm4, %v7836_v44 }
 0x401   : > { %7873 = vst.msk [vmem:[#allocation5 + $0x68] sm:$0xff] %vm13993_vm7, %v7838_v16  ;;  %v8704_v25 = vpop.permute.xlu0 %8703  ;;  %v6621_v5 = vpop.permute.xlu1 %6620 }
 0x402   : > { %8417 = vst.msk [vmem:[#allocation5 + $0x60] sm:$0xff] %vm8404_vm11, %v8381_v18 }
 0x403   : > { %8738 = vst.msk [vmem:[#allocation5 + $0x60] sm:$0xff] %vm8725_vm5, %v8702_v47 }
 0x405   : > { %v7662_v59 = vpop.permute.xlu0 %7661 }
 0x409   : > { %v7343_v21 = vpop.permute.xlu1 %7342 }
 0x40a   : > { %v8754_v43 = vld [vmem:[#allocation5 + $0x60] sm:$0xff] }
 0x40b   : > { %10219 = vmatprep.mubr.msk.bf16.mxu1 %vm9023_vm10, %v8754_v43 }
 0x40d   : > { %v8385_v61 = vpop.permute.xlu0 %8384 }
 0x412   : > { %v8383_v50 = vpop.permute.xlu1 %8382 }
 0x413   : > { %8418 = vst.msk [vmem:[#allocation5 + $0x68] sm:$0xff] %vm8404_vm11, %v8383_v50  ;;  %v10155_v41 = vpop.f32.mrb[32].mxu0 }
 0x414   : > { %8739 = vst.msk [vmem:[#allocation5 + $0x68] sm:$0xff] %vm8725_vm5, %v8704_v25  ;;  %v10197_v49 = vpop.f32.mrb[20].mxu1  ;;  %v8869_v28 = vpop.f32.mrb[33].mxu0 }
 0x415   : > { %v7341_v37 = vpop.permute.xlu0 %7340  ;;  %v9119_v32 = vadd.f32 %v10197_v49, %v10155_v41  ;;  %v9110_v22 = vpop.f32.mrb[21].mxu1 }
 0x416   : > { %7375 = vst.msk [vmem:[#allocation5 + $0x70] sm:$0xff] %vm7360_vm13, %v7341_v37  ;;  %v9111_v10 = vadd.f32 %v9110_v22, %v8869_v28  ;;  %v10156_v57 = vpop.f32.mrb[34].mxu0  ;;  %v10198_v40 = vpop.f32.mrb[22].mxu1 }
 0x417   : > { %7696 = vst.msk [vmem:[#allocation5 + $0x70] sm:$0xff] %vm7681_vm6, %v7662_v59  ;;  %v9122_v58 = vadd.f32 %v10198_v40, %v10156_v57  ;;  %v8872_v30 = vpop.f32.mrb[35].mxu0  ;;  %v9113_v52 = vpop.f32.mrb[23].mxu1  ;;  %v9246_v55 = vadd.f32 %v13812_v1, %v9119_v32 }
 0x418   : > { %7874 = vst.msk [vmem:[#allocation5 + $0x70] sm:$0xff] %vm13994_vm1, %v7840_v62  ;;  %v9244_v53 = vadd.f32 %v13812_v1, %v9111_v10  ;;  %v9114_v42 = vadd.f32 %v9113_v52, %v8872_v30 }
 0x419   : > { %v6300_v0 = vpop.permute.xlu1 %6299  ;;  %8419 = vst.msk [vmem:[#allocation5 + $0x70] sm:$0xff] %vm8404_vm11, %v8385_v61  ;;  %v8706_v17 = vpop.permute.xlu0 %8705  ;;  %v9247_v33 = vadd.f32 %v13812_v1, %v9122_v58 }
 0x41a   : > { %6333 = vst.msk [vmem:[#allocation5 + $0x78] sm:$0xff] %vm13987_vm0, %v6300_v0  ;;  %9276 = vxpose.xlu0.b32.start [1/16] (narrow) %v9244_v53, 8  ;;  %v9245_v45 = vadd.f32 %v13812_v1, %v9114_v42 }
 0x41b   : > { %8740 = vst.msk [vmem:[#allocation5 + $0x70] sm:$0xff] %vm8725_vm5, %v8706_v17  ;;  %v8755_v51 = vld [vmem:[#allocation5 + $0x68] sm:$0xff] }
 0x41c   : > { %6654 = vst.msk [vmem:[#allocation5 + $0x78] sm:$0xff] %vm6638_vm3, %v6621_v5  ;;  %10220 = vmatmul.mubr.msk.bf16.gmra.mrb[12].mxu1 %vm9023_vm10, %v8755_v51  ;;  %v10201_v46 = vpop.f32.mrb[24].mxu1 }
 0x41d   : > { %6831 = vst.msk [vmem:[#allocation5 + $0x78] sm:$0xff] %vm6815_vm2, %v13786_v9  ;;  %v9126_v27 = vpop.f32.mrb[25].mxu1 }
 0x41e   : > { %7376 = vst.msk [vmem:[#allocation5 + $0x78] sm:$0xff] %vm7360_vm13, %v7343_v21  ;;  %9277 = vxpose.xlu0.b32.cont [2/16] (narrow) %v9245_v45, 8  ;;  %v10202_v31 = vpop.f32.mrb[26].mxu1 }
 0x41f   : > { %7697 = vst.msk [vmem:[#allocation5 + $0x78] sm:$0xff] %vm7681_vm6, %v7664_v56  ;;  %v9129_v60 = vpop.f32.mrb[27].mxu1 }
 0x420   : > { %7875 = vst.msk [vmem:[#allocation5 + $0x78] sm:$0xff] %vm13995_vm9, %v12871_v38 }
 0x422   : > { %v8756_v19 = vld [vmem:[#allocation5 + $0x70] sm:$0xff]  ;;  %9278 = vxpose.xlu0.b32.cont [3/16] (narrow) %v9246_v55, 8 }
 0x423   : > { %10223 = vmatprep.mubr.msk.bf16.mxu1 %vm9023_vm10, %v8756_v19 }
 0x424   : > { %v8387_v63 = vpop.permute.xlu1 %8386 }
 0x425   : > { %8420 = vst.msk [vmem:[#allocation5 + $0x78] sm:$0xff] %vm8404_vm11, %v8387_v63 }
 0x426   : > { %9279 = vxpose.xlu0.b32.cont [4/16] (narrow) %v9247_v33, 8 }
 0x428   : > { %v8708_v3 = vpop.permute.xlu1 %8707 }
 0x429   : > { %8741 = vst.msk [vmem:[#allocation5 + $0x78] sm:$0xff] %vm8725_vm5, %v8708_v3 }
 0x430   : > { %v8757_v48 = vld [vmem:[#allocation5 + $0x78] sm:$0xff] }
 0x431   : > { %10224 = vmatmul.mubr.msk.bf16.gmra.mrb[16].mxu1 %vm9023_vm10, %v8757_v48 }
 0x433   : > { %v10205_v38 = vpop.f32.mrb[28].mxu1 }
 0x434   : > { %v9142_v44 = vpop.f32.mrb[29].mxu1 }
 0x435   : > { %v10206_v6 = vpop.f32.mrb[30].mxu1 }
 0x436   : > { %v9145_v11 = vpop.f32.mrb[31].mxu1 }
 0x442   : > { %v10159_v24 = vpop.f32.mrb[36].mxu0 }
 0x443   : > { %v9135_v13 = vadd.f32 %v10201_v46, %v10159_v24  ;;  %v8885_v2 = vpop.f32.mrb[37].mxu0 }
 0x444   : > { %v9127_v26 = vadd.f32 %v9126_v27, %v8885_v2  ;;  %v10160_v15 = vpop.f32.mrb[38].mxu0 }
 0x445   : > { %v9138_v39 = vadd.f32 %v10202_v31, %v10160_v15  ;;  %v8888_v47 = vpop.f32.mrb[39].mxu0  ;;  %v9250_v9 = vadd.f32 %v13812_v1, %v9135_v13 }
 0x446   : > { %v9248_v36 = vadd.f32 %v13812_v1, %v9127_v26  ;;  %v9130_v54 = vadd.f32 %v9129_v60, %v8888_v47 }
 0x447   : > { %v9251_v29 = vadd.f32 %v13812_v1, %v9138_v39 }
 0x448   : > { %9280 = vxpose.xlu0.b32.cont [5/16] (narrow) %v9248_v36, 8  ;;  %v9249_v35 = vadd.f32 %v13812_v1, %v9130_v54 }
 0x44c   : > { %9281 = vxpose.xlu0.b32.cont [6/16] (narrow) %v9249_v35, 8 }
 0x450   : > { %9282 = vxpose.xlu0.b32.cont [7/16] (narrow) %v9250_v9, 8 }
 0x454   : > { %9283 = vxpose.xlu0.b32.cont [8/16] (narrow) %v9251_v29, 8 }
 0x46c   : > { %v10209_v34 = vpop.f32.mrb[0].mxu1 }
 0x46d   : > { %v9158_v23 = vpop.f32.mrb[1].mxu1  ;;  %v9258_v50 = vadd.f32 %v10209_v34, %v13812_v1 }
 0x46e   : > { %v10210_v16 = vpop.f32.mrb[2].mxu1  ;;  %v9256_v21 = vadd.f32 %v13812_v1, %v9158_v23 }
 0x46f   : > { %v9161_v62 = vpop.f32.mrb[3].mxu1  ;;  %v9259_v41 = vadd.f32 %v10210_v16, %v13812_v1 }
 0x470   : > { %v9257_v61 = vadd.f32 %v13812_v1, %v9161_v62 }
 0x475   : > { %v10163_v4 = vpop.f32.mrb[40].mxu0 }
 0x476   : > { %v9151_v18 = vadd.f32 %v10205_v38, %v10163_v4  ;;  %v8901_v20 = vpop.f32.mrb[41].mxu0 }
 0x477   : > { %v9143_v7 = vadd.f32 %v9142_v44, %v8901_v20  ;;  %v10164_v14 = vpop.f32.mrb[42].mxu0 }
 0x478   : > { %v9154_v8 = vadd.f32 %v10206_v6, %v10164_v14  ;;  %v8904_v12 = vpop.f32.mrb[43].mxu0  ;;  %v9254_v59 = vadd.f32 %v13812_v1, %v9151_v18 }
 0x479   : > { %v9252_v56 = vadd.f32 %v13812_v1, %v9143_v7  ;;  %v9146_v25 = vadd.f32 %v9145_v11, %v8904_v12 }
 0x47a   : > { %v9255_v43 = vadd.f32 %v13812_v1, %v9154_v8 }
 0x47b   : > { %9284 = vxpose.xlu0.b32.cont [9/16] (narrow) %v9252_v56, 8  ;;  %v9253_v5 = vadd.f32 %v13812_v1, %v9146_v25 }
 0x47f   : > { %9285 = vxpose.xlu0.b32.cont [10/16] (narrow) %v9253_v5, 8 }
 0x483   : > { %9286 = vxpose.xlu0.b32.cont [11/16] (narrow) %v9254_v59, 8 }
 0x487   : > { %9287 = vxpose.xlu0.b32.cont [12/16] (narrow) %v9255_v43, 8 }
 0x48b   : > { %9288 = vxpose.xlu0.b32.cont [13/16] (narrow) %v9256_v21, 8 }
 0x48f   : > { %9289 = vxpose.xlu0.b32.cont [14/16] (narrow) %v9257_v61, 8 }
 0x493   : > { %9290 = vxpose.xlu0.b32.cont [15/16] (narrow) %v9258_v50, 8 }
 0x497   : > { %9291 = vxpose.xlu0.b32.end [16/16] (narrow) %v9259_v41, 8 }
 0x4a2   : > { %v10213_v37 = vpop.f32.mrb[4].mxu1 }
 0x4a3   : > { %v9174_v49 = vpop.f32.mrb[5].mxu1  ;;  %v9262_v57 = vadd.f32 %v10213_v37, %v13812_v1 }
 0x4a4   : > { %v9260_v32 = vadd.f32 %v13812_v1, %v9174_v49  ;;  %v10214_v28 = vpop.f32.mrb[6].mxu1 }
 0x4a5   : > { %v9177_v22 = vpop.f32.mrb[7].mxu1  ;;  %v9263_v40 = vadd.f32 %v10214_v28, %v13812_v1 }
 0x4a6   : > { %9308 = vxpose.xlu1.b32.start [1/16] (narrow) %v9260_v32, 8  ;;  %v9261_v10 = vadd.f32 %v13812_v1, %v9177_v22 }
 0x4aa   : > { %9309 = vxpose.xlu1.b32.cont [2/16] (narrow) %v9261_v10, 8 }
 0x4ae   : > { %9310 = vxpose.xlu1.b32.cont [3/16] (narrow) %v9262_v57, 8 }
 0x4b2   : > { %9311 = vxpose.xlu1.b32.cont [4/16] (narrow) %v9263_v40, 8 }
 0x4d2   : > { %v10217_v58 = vpop.f32.mrb[8].mxu1 }
 0x4d3   : > { %v9190_v30 = vpop.f32.mrb[9].mxu1  ;;  %v9266_v51 = vadd.f32 %v10217_v58, %v13812_v1 }
 0x4d4   : > { %v9264_v52 = vadd.f32 %v13812_v1, %v9190_v30  ;;  %v10218_v0 = vpop.f32.mrb[10].mxu1 }
 0x4d5   : > { %v9193_v17 = vpop.f32.mrb[11].mxu1  ;;  %v9267_v45 = vadd.f32 %v10218_v0, %v13812_v1 }
 0x4d6   : > { %9312 = vxpose.xlu1.b32.cont [5/16] (narrow) %v9264_v52, 8  ;;  %v9265_v53 = vadd.f32 %v13812_v1, %v9193_v17 }
 0x4da   : > { %9313 = vxpose.xlu1.b32.cont [6/16] (narrow) %v9265_v53, 8 }
 0x4db   : > { %v9292_v42 = vpop.trf.xlu0 }
 0x4dc   : > { %9340 = vst [vmem:[%s13857_s23] sm:$0xff] %v9292_v42 }
 0x4de   : > { %9314 = vxpose.xlu1.b32.cont [7/16] (narrow) %v9266_v51, 8 }
 0x4e2   : > { %9315 = vxpose.xlu1.b32.cont [8/16] (narrow) %v9267_v45, 8 }
 0x4ef   : > { %v10221_v46 = vpop.f32.mrb[12].mxu1 }
 0x4f0   : > { %v9206_v27 = vpop.f32.mrb[13].mxu1  ;;  %v9270_v63 = vadd.f32 %v10221_v46, %v13812_v1 }
 0x4f1   : > { %v9268_v31 = vadd.f32 %v13812_v1, %v9206_v27  ;;  %v10222_v60 = vpop.f32.mrb[14].mxu1 }
 0x4f2   : > { %v9209_v19 = vpop.f32.mrb[15].mxu1  ;;  %v9271_v33 = vadd.f32 %v10222_v60, %v13812_v1 }
 0x4f3   : > { %9316 = vxpose.xlu1.b32.cont [9/16] (narrow) %v9268_v31, 8  ;;  %v9269_v55 = vadd.f32 %v13812_v1, %v9209_v19 }
 0x4f7   : > { %9317 = vxpose.xlu1.b32.cont [10/16] (narrow) %v9269_v55, 8 }
 0x4fb   : > { %9318 = vxpose.xlu1.b32.cont [11/16] (narrow) %v9270_v63, 8 }
 0x4ff   : > { %9319 = vxpose.xlu1.b32.cont [12/16] (narrow) %v9271_v33, 8 }
 0x504   : > { %v10225_v3 = vpop.f32.mrb[16].mxu1 }
 0x505   : > { %v9222_v48 = vpop.f32.mrb[17].mxu1  ;;  %v9274_v24 = vadd.f32 %v10225_v3, %v13812_v1 }
 0x506   : > { %v9272_v38 = vadd.f32 %v13812_v1, %v9222_v48  ;;  %v10226_v44 = vpop.f32.mrb[18].mxu1 }
 0x507   : > { %v9225_v6 = vpop.f32.mrb[19].mxu1  ;;  %v9275_v13 = vadd.f32 %v10226_v44, %v13812_v1 }
 0x508   : > { %9320 = vxpose.xlu1.b32.cont [13/16] (narrow) %v9272_v38, 8  ;;  %v9273_v11 = vadd.f32 %v13812_v1, %v9225_v6 }
 0x50c   : > { %9321 = vxpose.xlu1.b32.cont [14/16] (narrow) %v9273_v11, 8 }
 0x510   : > { %9322 = vxpose.xlu1.b32.cont [15/16] (narrow) %v9274_v24, 8 }
 0x514   : > { %9323 = vxpose.xlu1.b32.end [16/16] (narrow) %v9275_v13, 8 }
 0x558   : > { %v9324_v2 = vpop.trf.xlu1 }
 0x559   : > { %9341 = vst [vmem:[%s13857_s23 + $0x8] sm:$0xff] %v9324_v2 }
 0x55a PF: > { %s19_s30 = sadd.s32 1, %s10696_s30  }
 0x55b   : > { %p16_p4 = scmp.ge.s32.totalorder %s19_s30, 4  }
 0x55d   :  { %18 = sbr.rel (!%p16_p4) target bundleno = 1 (0x1), region = 95 }

</bundles_post_ra>
